<compile_context>
chip_gen: v7x
topology: tpu7x:2x2x1
jax: 0.10.0
libtpu: 0.0.40
codegen_flags: <defaults>
</compile_context>

<pallas_src>
import functools

import jax
import jax.numpy as jnp
from jax.experimental import pallas as pl
from jax.experimental.pallas import tpu as pltpu


# ----------------------------------------------------------------------------
# Fused kernel
# ----------------------------------------------------------------------------
def _rdb4c_kernel(x_ref, w1_ref, b1_ref, w2_ref, b2_ref, w3_ref, b3_ref,
                  w4_ref, b4_ref, o_ref, fpad_ref, *,
                  H, W, TH, nc, gc, neg_slope, res_scale, matmul_dtype):
    """One (batch, row-tile) step of the fused residual dense block.

    fpad_ref: VMEM scratch (TH+8, W+2, nc+3*gc) holding the zero-padded,
    halo-extended concat feature map [x | x1 | x2 | x3].  fpad row i maps to
    image row (r0 - 4 + i), fpad col j maps to image col (j - 1).
    """
    C1 = nc
    C2 = nc + gc
    C3 = nc + 2 * gc
    C4 = nc + 3 * gc

    t = pl.program_id(1)
    r0 = t * TH                            # first image row owned by this tile

    # ---- stage the input window: image rows [r0-4, r0+TH+4), cols padded ----
    fpad_ref[...] = jnp.zeros(fpad_ref.shape, fpad_ref.dtype)
    start = pl.multiple_of(r0, TH)         # window start in the +-4 padded rows
    xw = x_ref[0, pl.ds(start, TH + 8), :, :]            # (TH+8, W+2, nc)
    fpad_ref[:, :, 0:nc] = xw.astype(fpad_ref.dtype)

    def conv_stage(w_ref, b_ref, row_off, m, cin):
        """3x3 conv producing fpad rows [row_off, row_off+m), channels [0,cin)."""
        taps = []
        for ky in range(3):
            for kx in range(3):
                taps.append(
                    fpad_ref[row_off - 1 + ky: row_off - 1 + ky + m,
                             kx: kx + W, 0:cin])
        patch = jnp.concatenate(taps, axis=-1)            # (m, W, 9*cin)
        patch = patch.reshape(m * W, 9 * cin).astype(matmul_dtype)
        acc = jnp.dot(patch, w_ref[...].astype(matmul_dtype),
                      preferred_element_type=jnp.float32)
        return acc + b_ref[...].astype(jnp.float32)       # (m*W, cout)

    def write_hidden(acc, row_off, m, c_lo, c_hi):
        cout = c_hi - c_lo
        v = jnp.where(acc >= 0.0, acc, neg_slope * acc)   # LeakyReLU(0.2)
        v = v.reshape(m, W, cout)
        # Rows outside the image must be ZERO in the concat buffer (they are
        # the zero-padding ring / halo overshoot seen by the next conv).
        row = jax.lax.broadcasted_iota(jnp.int32, (m, 1, 1), 0)
        img_row = r0 - (4 - row_off) + row
        v = jnp.where((img_row >= 0) & (img_row < H), v, 0.0)
        fpad_ref[row_off: row_off + m, 1: W + 1, c_lo: c_hi] = \
            v.astype(fpad_ref.dtype)

    # conv1..conv3 (+ LeakyReLU) -> written into the concat scratch
    write_hidden(conv_stage(w1_ref, b1_ref, 1, TH + 6, C1), 1, TH + 6, C1, C2)
    write_hidden(conv_stage(w2_ref, b2_ref, 2, TH + 4, C2), 2, TH + 4, C2, C3)
    write_hidden(conv_stage(w3_ref, b3_ref, 3, TH + 2, C3), 3, TH + 2, C3, C4)

    # conv4 (no activation); out = conv4 * 0.2 + x
    acc4 = conv_stage(w4_ref, b4_ref, 4, TH, C4)          # (TH*W, nc)
    x_res = fpad_ref[4: 4 + TH, 1: W + 1, 0:nc].astype(jnp.float32)
    out = acc4.reshape(TH, W, nc) * res_scale + x_res
    o_ref[0] = out.astype(o_ref.dtype)


# ----------------------------------------------------------------------------
# Wrapper
# ----------------------------------------------------------------------------
def rdb4c_forward(x_nchw, params, *, tile_h=8, matmul_dtype=jnp.float32):
    """x_nchw: (N, nc, H, W) like the PyTorch module; returns (N, nc, H, W).

    Set matmul_dtype=jnp.bfloat16 on v6e/v7x for 2x MXU rate (f32 accumulate
    is kept via preferred_element_type).
    """
    N, nc, H, W = x_nchw.shape
    (w1, b1), (w2, b2), (w3, b3), (w4, b4) = params
    gc = w1.shape[-1]
    C4 = nc + 3 * gc

    th = tile_h if (tile_h <= H and H % tile_h == 0) else H
    rt = H // th

    x = jnp.transpose(x_nchw, (0, 2, 3, 1))               # NCHW -> NHWC
    # One small pad of the nc-channel input: +-4 halo rows (4 chained 3x3
    # convs) and +-1 cols ("same" conv padding).  Intermediates never get a
    # padded HBM copy -- their padding lives in the VMEM scratch.
    xp = jnp.pad(x, ((0, 0), (4, 4), (1, 1), (0, 0)))

    # Dense 2-D weight slabs (9*Cin, Cout) matching the (ky, kx, ci) im2col
    # order; biases as (1, Cout).
    wf = [w.reshape(-1, w.shape[-1]) for w in (w1, w2, w3, w4)]
    bf = [b.reshape(1, -1) for b in (b1, b2, b3, b4)]

    flops = 2 * N * H * W * 9 * (nc * gc + (nc + gc) * gc
                                 + (nc + 2 * gc) * gc + (nc + 3 * gc) * nc)
    bytes_accessed = 4 * (xp.size + N * H * W * nc
                          + sum(w.size for w in wf) + sum(b.size for b in bf))

    const2 = lambda n, t: (0, 0)
    out_nhwc = pl.pallas_call(
        functools.partial(_rdb4c_kernel, H=H, W=W, TH=th, nc=nc, gc=gc,
                          neg_slope=0.2, res_scale=0.2,
                          matmul_dtype=matmul_dtype),
        out_shape=jax.ShapeDtypeStruct((N, H, W, nc), x.dtype),
        grid=(N, rt),
        in_specs=[
            # whole padded image of batch n; constant over the row-tile axis
            # so it is DMA'd once per batch element, row window sliced
            # in-kernel with pl.ds.
            pl.BlockSpec((1, H + 8, W + 2, nc), lambda n, t: (n, 0, 0, 0)),
            pl.BlockSpec((9 * nc, gc), const2),
            pl.BlockSpec((1, gc), const2),
            pl.BlockSpec((9 * (nc + gc), gc), const2),
            pl.BlockSpec((1, gc), const2),
            pl.BlockSpec((9 * (nc + 2 * gc), gc), const2),
            pl.BlockSpec((1, gc), const2),
            pl.BlockSpec((9 * (nc + 3 * gc), nc), const2),
            pl.BlockSpec((1, nc), const2),
        ],
        out_specs=pl.BlockSpec((1, th, W, nc), lambda n, t: (n, t, 0, 0)),
        scratch_shapes=[pltpu.VMEM((th + 8, W + 2, C4), jnp.float32)],
        compiler_params=pltpu.CompilerParams(
            dimension_semantics=("parallel", "parallel")),
        cost_estimate=pl.CostEstimate(flops=flops, transcendentals=0,
                                      bytes_accessed=bytes_accessed),
    )(xp, wf[0], bf[0], wf[1], bf[1], wf[2], bf[2], wf[3], bf[3])

    return jnp.transpose(out_nhwc, (0, 3, 1, 2))           # NHWC -> NCHW


# ----------------------------------------------------------------------------
# Params (synthetic) + pure-JAX reference for the correctness check
# ----------------------------------------------------------------------------
def init_rdb4c_params(key, nc=4, gc=32, dtype=jnp.float32):
    """Weight layout: HWIO (3,3,Cin,Cout), bias (Cout,)."""
    specs = [(nc, gc), (nc + gc, gc), (nc + 2 * gc, gc), (nc + 3 * gc, nc)]
    params = []
    for i, (cin, cout) in enumerate(specs):
        kw, kb = jax.random.split(jax.random.fold_in(key, i))
        w = 0.05 * jax.random.normal(kw, (3, 3, cin, cout), dtype)
        b = 0.05 * jax.random.normal(kb, (cout,), dtype)
        params.append((w, b))
    return params


def _conv_ref(x_nhwc, w, b):
    out = jax.lax.conv_general_dilated(
        x_nhwc, w, window_strides=(1, 1), padding="SAME",
        dimension_numbers=("NHWC", "HWIO", "NHWC"))
    return out + b[None, None, None, :]


def rdb4c_ref(x_nchw, params):
    x = jnp.transpose(x_nchw, (0, 2, 3, 1))
    (w1, b1), (w2, b2), (w3, b3), (w4, b4) = params
    lrelu = lambda v: jnp.where(v >= 0, v, 0.2 * v)
    x1 = lrelu(_conv_ref(x, w1, b1))
    x2 = lrelu(_conv_ref(jnp.concatenate([x, x1], -1), w2, b2))
    x3 = lrelu(_conv_ref(jnp.concatenate([x, x1, x2], -1), w3, b3))
    x4 = _conv_ref(jnp.concatenate([x, x1, x2, x3], -1), w4, b4)
    return jnp.transpose(x4 * 0.2 + x, (0, 3, 1, 2))


if __name__ == "__main__":
    key = jax.random.PRNGKey(0)
    kx, kp = jax.random.split(key)

    N, nc, H, W = 2, 4, 16, 16
    gc = 32
    x = jax.random.normal(kx, (N, nc, H, W), jnp.float32)   # NCHW like PyTorch
    params = init_rdb4c_params(kp, nc=nc, gc=gc)

    out = jax.jit(rdb4c_forward)(x, params)
    out = jax.block_until_ready(out)

    ref = rdb4c_ref(x, params)
    assert out.shape == (N, nc, H, W)
    assert jnp.allclose(out, ref, atol=1e-4, rtol=1e-4), "mismatch vs reference"

    print("KERNEL_OK")
</pallas_src>

<mosaic_0001>
module attributes {stable_mosaic.version = 11 : i64} {
  func.func @_rdb4c_kernel(%arg0: i32, %arg1: i32, %arg2: memref<1x24x18x4xf32, #tpu.memory_space<vmem>>, %arg3: memref<36x32xf32, #tpu.memory_space<vmem>>, %arg4: memref<1x32xf32, #tpu.memory_space<vmem>>, %arg5: memref<324x32xf32, #tpu.memory_space<vmem>>, %arg6: memref<1x32xf32, #tpu.memory_space<vmem>>, %arg7: memref<612x32xf32, #tpu.memory_space<vmem>>, %arg8: memref<1x32xf32, #tpu.memory_space<vmem>>, %arg9: memref<900x4xf32, #tpu.memory_space<vmem>>, %arg10: memref<1x4xf32, #tpu.memory_space<vmem>>, %arg11: memref<1x8x16x4xf32, #tpu.memory_space<vmem>>, %arg12: memref<16x18x100xf32, #tpu.memory_space<vmem>>) attributes {dimension_semantics = [#tpu.dimension_semantics<parallel>, #tpu.dimension_semantics<parallel>], iteration_bounds = array<i64: 2, 2>, scalar_prefetch = 0 : i64, scratch_operands = 1 : i64, tpu.core_type = #tpu.core_type<tc>, window_params = [{transform_indices = @transform_0, window_bounds = array<i64: 1, 24, 18, 4>}, {pipeline_mode = #tpu.pipeline_mode<synchronous>, transform_indices = @transform_1, window_bounds = array<i64: 36, 32>}, {pipeline_mode = #tpu.pipeline_mode<synchronous>, transform_indices = @transform_2, window_bounds = array<i64: 1, 32>}, {pipeline_mode = #tpu.pipeline_mode<synchronous>, transform_indices = @transform_3, window_bounds = array<i64: 324, 32>}, {pipeline_mode = #tpu.pipeline_mode<synchronous>, transform_indices = @transform_4, window_bounds = array<i64: 1, 32>}, {pipeline_mode = #tpu.pipeline_mode<synchronous>, transform_indices = @transform_5, window_bounds = array<i64: 612, 32>}, {pipeline_mode = #tpu.pipeline_mode<synchronous>, transform_indices = @transform_6, window_bounds = array<i64: 1, 32>}, {pipeline_mode = #tpu.pipeline_mode<synchronous>, transform_indices = @transform_7, window_bounds = array<i64: 900, 4>}, {pipeline_mode = #tpu.pipeline_mode<synchronous>, transform_indices = @transform_8, window_bounds = array<i64: 1, 4>}, {transform_indices = @transform_9, window_bounds = array<i64: 1, 8, 16, 4>}]} {
    %c8_i32 = arith.constant 8 : i32
    %0 = arith.muli %arg1, %c8_i32 : i32
    %cst = arith.constant 0.000000e+00 : f32
    %1 = vector.broadcast %cst : f32 to vector<16x18x100xf32>
    %c0 = arith.constant 0 : index
    %c0_0 = arith.constant 0 : index
    %c0_1 = arith.constant 0 : index
    %2 = vector.load %arg12[%c0, %c0_0, %c0_1] : memref<16x18x100xf32, #tpu.memory_space<vmem>>, vector<16x18x100xf32>
    tpu.vector_store %arg12[%c0, %c0_0, %c0_1], %1 {strides = array<i32>} : memref<16x18x100xf32, #tpu.memory_space<vmem>>, vector<16x18x100xf32>,
    %3 = tpu.assume_multiple %0, 8 : i32
    %c0_2 = arith.constant 0 : index
    %4 = arith.index_cast %3 : i32 to index
    %c0_3 = arith.constant 0 : index
    %c0_4 = arith.constant 0 : index
    %5 = vector.load %arg2[%c0_2, %4, %c0_3, %c0_4] : memref<1x24x18x4xf32, #tpu.memory_space<vmem>>, vector<1x16x18x4xf32>
    %6 = vector.shape_cast %5 : vector<1x16x18x4xf32> to vector<16x18x4xf32>
    %c0_5 = arith.constant 0 : index
    %c0_6 = arith.constant 0 : index
    %c0_7 = arith.constant 0 : index
    %7 = vector.load %arg12[%c0_5, %c0_6, %c0_7] : memref<16x18x100xf32, #tpu.memory_space<vmem>>, vector<16x18x4xf32>
    tpu.vector_store %arg12[%c0_5, %c0_6, %c0_7], %6 {strides = array<i32>} : memref<16x18x100xf32, #tpu.memory_space<vmem>>, vector<16x18x4xf32>,
    %c0_8 = arith.constant 0 : index
    %c0_9 = arith.constant 0 : index
    %c0_10 = arith.constant 0 : index
    %8 = vector.load %arg12[%c0_8, %c0_9, %c0_10] : memref<16x18x100xf32, #tpu.memory_space<vmem>>, vector<14x16x4xf32>
    %c0_11 = arith.constant 0 : index
    %c1 = arith.constant 1 : index
    %c0_12 = arith.constant 0 : index
    %9 = vector.load %arg12[%c0_11, %c1, %c0_12] : memref<16x18x100xf32, #tpu.memory_space<vmem>>, vector<14x16x4xf32>
    %c0_13 = arith.constant 0 : index
    %c2 = arith.constant 2 : index
    %c0_14 = arith.constant 0 : index
    %10 = vector.load %arg12[%c0_13, %c2, %c0_14] : memref<16x18x100xf32, #tpu.memory_space<vmem>>, vector<14x16x4xf32>
    %c1_15 = arith.constant 1 : index
    %c0_16 = arith.constant 0 : index
    %c0_17 = arith.constant 0 : index
    %11 = vector.load %arg12[%c1_15, %c0_16, %c0_17] : memref<16x18x100xf32, #tpu.memory_space<vmem>>, vector<14x16x4xf32>
    %c1_18 = arith.constant 1 : index
    %c1_19 = arith.constant 1 : index
    %c0_20 = arith.constant 0 : index
    %12 = vector.load %arg12[%c1_18, %c1_19, %c0_20] : memref<16x18x100xf32, #tpu.memory_space<vmem>>, vector<14x16x4xf32>
    %c1_21 = arith.constant 1 : index
    %c2_22 = arith.constant 2 : index
    %c0_23 = arith.constant 0 : index
    %13 = vector.load %arg12[%c1_21, %c2_22, %c0_23] : memref<16x18x100xf32, #tpu.memory_space<vmem>>, vector<14x16x4xf32>
    %c2_24 = arith.constant 2 : index
    %c0_25 = arith.constant 0 : index
    %c0_26 = arith.constant 0 : index
    %14 = vector.load %arg12[%c2_24, %c0_25, %c0_26] : memref<16x18x100xf32, #tpu.memory_space<vmem>>, vector<14x16x4xf32>
    %c2_27 = arith.constant 2 : index
    %c1_28 = arith.constant 1 : index
    %c0_29 = arith.constant 0 : index
    %15 = vector.load %arg12[%c2_27, %c1_28, %c0_29] : memref<16x18x100xf32, #tpu.memory_space<vmem>>, vector<14x16x4xf32>
    %c2_30 = arith.constant 2 : index
    %c2_31 = arith.constant 2 : index
    %c0_32 = arith.constant 0 : index
    %16 = vector.load %arg12[%c2_30, %c2_31, %c0_32] : memref<16x18x100xf32, #tpu.memory_space<vmem>>, vector<14x16x4xf32>
    %17 = tpu.concatenate %8, %9, %10, %11, %12, %13, %14, %15, %16 in 2 : vector<14x16x4xf32>, vector<14x16x4xf32>, vector<14x16x4xf32>, vector<14x16x4xf32>, vector<14x16x4xf32>, vector<14x16x4xf32>, vector<14x16x4xf32>, vector<14x16x4xf32>, vector<14x16x4xf32> -> vector<14x16x36xf32>
    %18 = vector.shape_cast %17 : vector<14x16x36xf32> to vector<224x36xf32>
    %c0_33 = arith.constant 0 : index
    %c0_34 = arith.constant 0 : index
    %19 = vector.load %arg3[%c0_33, %c0_34] : memref<36x32xf32, #tpu.memory_space<vmem>>, vector<36x32xf32>
    %cst_35 = arith.constant dense<0.000000e+00> : vector<224x32xf32>
    %20 = tpu.matmul %18, %19, %cst_35 {dimension_numbers = #tpu.dot_dimension_numbers<[1], [0], [0], [1], [0, 0, 1, 1], [], []>} : vector<224x36xf32>, vector<36x32xf32>, vector<224x32xf32> -> vector<224x32xf32>
    %c0_36 = arith.constant 0 : index
    %c0_37 = arith.constant 0 : index
    %21 = vector.load %arg4[%c0_36, %c0_37] : memref<1x32xf32, #tpu.memory_space<vmem>>, vector<1x32xf32>
    %22 = vector.broadcast %21 : vector<1x32xf32> to vector<224x32xf32>
    %23 = arith.addf %20, %22 : vector<224x32xf32>
    %cst_38 = arith.constant 0.000000e+00 : f32
    %24 = vector.broadcast %cst_38 : f32 to vector<224x32xf32>
    %25 = arith.cmpf oge, %23, %24 : vector<224x32xf32>
    %cst_39 = arith.constant 2.000000e-01 : f32
    %26 = vector.broadcast %cst_39 : f32 to vector<224x32xf32>
    %27 = arith.mulf %26, %23 : vector<224x32xf32>
    %28 = arith.select %25, %23, %27 : vector<224x32xi1>, vector<224x32xf32>
    %29 = vector.shape_cast %28 : vector<224x32xf32> to vector<14x16x32xf32>
    %30 = tpu.iota {dimensions = array<i32: 0>} : vector<14x1x1xi32>
    %c3_i32 = arith.constant 3 : i32
    %31 = arith.subi %0, %c3_i32 : i32
    %32 = vector.broadcast %31 : i32 to vector<14x1x1xi32>
    %33 = arith.addi %32, %30 : vector<14x1x1xi32>
    %c0_i32 = arith.constant 0 : i32
    %34 = vector.broadcast %c0_i32 : i32 to vector<14x1x1xi32>
    %35 = arith.cmpi sge, %33, %34 : vector<14x1x1xi32>
    %c16_i32 = arith.constant 16 : i32
    %36 = vector.broadcast %c16_i32 : i32 to vector<14x1x1xi32>
    %37 = arith.cmpi slt, %33, %36 : vector<14x1x1xi32>
    %38 = arith.andi %35, %37 : vector<14x1x1xi1>
    %cst_40 = arith.constant 0.000000e+00 : f32
    %39 = vector.shape_cast %38 : vector<14x1x1xi1> to vector<14x1x1xi1>
    %40 = vector.broadcast %39 : vector<14x1x1xi1> to vector<14x16x32xi1>
    %41 = vector.broadcast %cst_40 : f32 to vector<14x16x32xf32>
    %42 = arith.select %40, %29, %41 : vector<14x16x32xi1>, vector<14x16x32xf32>
    %c1_41 = arith.constant 1 : index
    %c1_42 = arith.constant 1 : index
    %c4 = arith.constant 4 : index
    %43 = vector.load %arg12[%c1_41, %c1_42, %c4] : memref<16x18x100xf32, #tpu.memory_space<vmem>>, vector<14x16x32xf32>
    tpu.vector_store %arg12[%c1_41, %c1_42, %c4], %42 {strides = array<i32>} : memref<16x18x100xf32, #tpu.memory_space<vmem>>, vector<14x16x32xf32>,
    %c1_43 = arith.constant 1 : index
    %c0_44 = arith.constant 0 : index
    %c0_45 = arith.constant 0 : index
    %44 = vector.load %arg12[%c1_43, %c0_44, %c0_45] : memref<16x18x100xf32, #tpu.memory_space<vmem>>, vector<12x16x36xf32>
    %c1_46 = arith.constant 1 : index
    %c1_47 = arith.constant 1 : index
    %c0_48 = arith.constant 0 : index
    %45 = vector.load %arg12[%c1_46, %c1_47, %c0_48] : memref<16x18x100xf32, #tpu.memory_space<vmem>>, vector<12x16x36xf32>
    %c1_49 = arith.constant 1 : index
    %c2_50 = arith.constant 2 : index
    %c0_51 = arith.constant 0 : index
    %46 = vector.load %arg12[%c1_49, %c2_50, %c0_51] : memref<16x18x100xf32, #tpu.memory_space<vmem>>, vector<12x16x36xf32>
    %c2_52 = arith.constant 2 : index
    %c0_53 = arith.constant 0 : index
    %c0_54 = arith.constant 0 : index
    %47 = vector.load %arg12[%c2_52, %c0_53, %c0_54] : memref<16x18x100xf32, #tpu.memory_space<vmem>>, vector<12x16x36xf32>
    %c2_55 = arith.constant 2 : index
    %c1_56 = arith.constant 1 : index
    %c0_57 = arith.constant 0 : index
    %48 = vector.load %arg12[%c2_55, %c1_56, %c0_57] : memref<16x18x100xf32, #tpu.memory_space<vmem>>, vector<12x16x36xf32>
    %c2_58 = arith.constant 2 : index
    %c2_59 = arith.constant 2 : index
    %c0_60 = arith.constant 0 : index
    %49 = vector.load %arg12[%c2_58, %c2_59, %c0_60] : memref<16x18x100xf32, #tpu.memory_space<vmem>>, vector<12x16x36xf32>
    %c3 = arith.constant 3 : index
    %c0_61 = arith.constant 0 : index
    %c0_62 = arith.constant 0 : index
    %50 = vector.load %arg12[%c3, %c0_61, %c0_62] : memref<16x18x100xf32, #tpu.memory_space<vmem>>, vector<12x16x36xf32>
    %c3_63 = arith.constant 3 : index
    %c1_64 = arith.constant 1 : index
    %c0_65 = arith.constant 0 : index
    %51 = vector.load %arg12[%c3_63, %c1_64, %c0_65] : memref<16x18x100xf32, #tpu.memory_space<vmem>>, vector<12x16x36xf32>
    %c3_66 = arith.constant 3 : index
    %c2_67 = arith.constant 2 : index
    %c0_68 = arith.constant 0 : index
    %52 = vector.load %arg12[%c3_66, %c2_67, %c0_68] : memref<16x18x100xf32, #tpu.memory_space<vmem>>, vector<12x16x36xf32>
    %53 = tpu.concatenate %44, %45, %46, %47, %48, %49, %50, %51, %52 in 2 : vector<12x16x36xf32>, vector<12x16x36xf32>, vector<12x16x36xf32>, vector<12x16x36xf32>, vector<12x16x36xf32>, vector<12x16x36xf32>, vector<12x16x36xf32>, vector<12x16x36xf32>, vector<12x16x36xf32> -> vector<12x16x324xf32>
    %54 = vector.shape_cast %53 : vector<12x16x324xf32> to vector<192x324xf32>
    %c0_69 = arith.constant 0 : index
    %c0_70 = arith.constant 0 : index
    %55 = vector.load %arg5[%c0_69, %c0_70] : memref<324x32xf32, #tpu.memory_space<vmem>>, vector<324x32xf32>
    %cst_71 = arith.constant dense<0.000000e+00> : vector<192x32xf32>
    %56 = tpu.matmul %54, %55, %cst_71 {dimension_numbers = #tpu.dot_dimension_numbers<[1], [0], [0], [1], [0, 0, 1, 1], [], []>} : vector<192x324xf32>, vector<324x32xf32>, vector<192x32xf32> -> vector<192x32xf32>
    %c0_72 = arith.constant 0 : index
    %c0_73 = arith.constant 0 : index
    %57 = vector.load %arg6[%c0_72, %c0_73] : memref<1x32xf32, #tpu.memory_space<vmem>>, vector<1x32xf32>
    %58 = vector.broadcast %57 : vector<1x32xf32> to vector<192x32xf32>
    %59 = arith.addf %56, %58 : vector<192x32xf32>
    %cst_74 = arith.constant 0.000000e+00 : f32
    %60 = vector.broadcast %cst_74 : f32 to vector<192x32xf32>
    %61 = arith.cmpf oge, %59, %60 : vector<192x32xf32>
    %cst_75 = arith.constant 2.000000e-01 : f32
    %62 = vector.broadcast %cst_75 : f32 to vector<192x32xf32>
    %63 = arith.mulf %62, %59 : vector<192x32xf32>
    %64 = arith.select %61, %59, %63 : vector<192x32xi1>, vector<192x32xf32>
    %65 = vector.shape_cast %64 : vector<192x32xf32> to vector<12x16x32xf32>
    %66 = tpu.iota {dimensions = array<i32: 0>} : vector<12x1x1xi32>
    %c2_i32 = arith.constant 2 : i32
    %67 = arith.subi %0, %c2_i32 : i32
    %68 = vector.broadcast %67 : i32 to vector<12x1x1xi32>
    %69 = arith.addi %68, %66 : vector<12x1x1xi32>
    %c0_i32_76 = arith.constant 0 : i32
    %70 = vector.broadcast %c0_i32_76 : i32 to vector<12x1x1xi32>
    %71 = arith.cmpi sge, %69, %70 : vector<12x1x1xi32>
    %c16_i32_77 = arith.constant 16 : i32
    %72 = vector.broadcast %c16_i32_77 : i32 to vector<12x1x1xi32>
    %73 = arith.cmpi slt, %69, %72 : vector<12x1x1xi32>
    %74 = arith.andi %71, %73 : vector<12x1x1xi1>
    %cst_78 = arith.constant 0.000000e+00 : f32
    %75 = vector.shape_cast %74 : vector<12x1x1xi1> to vector<12x1x1xi1>
    %76 = vector.broadcast %75 : vector<12x1x1xi1> to vector<12x16x32xi1>
    %77 = vector.broadcast %cst_78 : f32 to vector<12x16x32xf32>
    %78 = arith.select %76, %65, %77 : vector<12x16x32xi1>, vector<12x16x32xf32>
    %c2_79 = arith.constant 2 : index
    %c1_80 = arith.constant 1 : index
    %c36 = arith.constant 36 : index
    %79 = vector.load %arg12[%c2_79, %c1_80, %c36] : memref<16x18x100xf32, #tpu.memory_space<vmem>>, vector<12x16x32xf32>
    tpu.vector_store %arg12[%c2_79, %c1_80, %c36], %78 {strides = array<i32>} : memref<16x18x100xf32, #tpu.memory_space<vmem>>, vector<12x16x32xf32>,
    %c2_81 = arith.constant 2 : index
    %c0_82 = arith.constant 0 : index
    %c0_83 = arith.constant 0 : index
    %80 = vector.load %arg12[%c2_81, %c0_82, %c0_83] : memref<16x18x100xf32, #tpu.memory_space<vmem>>, vector<10x16x68xf32>
    %c2_84 = arith.constant 2 : index
    %c1_85 = arith.constant 1 : index
    %c0_86 = arith.constant 0 : index
    %81 = vector.load %arg12[%c2_84, %c1_85, %c0_86] : memref<16x18x100xf32, #tpu.memory_space<vmem>>, vector<10x16x68xf32>
    %c2_87 = arith.constant 2 : index
    %c2_88 = arith.constant 2 : index
    %c0_89 = arith.constant 0 : index
    %82 = vector.load %arg12[%c2_87, %c2_88, %c0_89] : memref<16x18x100xf32, #tpu.memory_space<vmem>>, vector<10x16x68xf32>
    %c3_90 = arith.constant 3 : index
    %c0_91 = arith.constant 0 : index
    %c0_92 = arith.constant 0 : index
    %83 = vector.load %arg12[%c3_90, %c0_91, %c0_92] : memref<16x18x100xf32, #tpu.memory_space<vmem>>, vector<10x16x68xf32>
    %c3_93 = arith.constant 3 : index
    %c1_94 = arith.constant 1 : index
    %c0_95 = arith.constant 0 : index
    %84 = vector.load %arg12[%c3_93, %c1_94, %c0_95] : memref<16x18x100xf32, #tpu.memory_space<vmem>>, vector<10x16x68xf32>
    %c3_96 = arith.constant 3 : index
    %c2_97 = arith.constant 2 : index
    %c0_98 = arith.constant 0 : index
    %85 = vector.load %arg12[%c3_96, %c2_97, %c0_98] : memref<16x18x100xf32, #tpu.memory_space<vmem>>, vector<10x16x68xf32>
    %c4_99 = arith.constant 4 : index
    %c0_100 = arith.constant 0 : index
    %c0_101 = arith.constant 0 : index
    %86 = vector.load %arg12[%c4_99, %c0_100, %c0_101] : memref<16x18x100xf32, #tpu.memory_space<vmem>>, vector<10x16x68xf32>
    %c4_102 = arith.constant 4 : index
    %c1_103 = arith.constant 1 : index
    %c0_104 = arith.constant 0 : index
    %87 = vector.load %arg12[%c4_102, %c1_103, %c0_104] : memref<16x18x100xf32, #tpu.memory_space<vmem>>, vector<10x16x68xf32>
    %c4_105 = arith.constant 4 : index
    %c2_106 = arith.constant 2 : index
    %c0_107 = arith.constant 0 : index
    %88 = vector.load %arg12[%c4_105, %c2_106, %c0_107] : memref<16x18x100xf32, #tpu.memory_space<vmem>>, vector<10x16x68xf32>
    %89 = tpu.concatenate %80, %81, %82, %83, %84, %85, %86, %87, %88 in 2 : vector<10x16x68xf32>, vector<10x16x68xf32>, vector<10x16x68xf32>, vector<10x16x68xf32>, vector<10x16x68xf32>, vector<10x16x68xf32>, vector<10x16x68xf32>, vector<10x16x68xf32>, vector<10x16x68xf32> -> vector<10x16x612xf32>
    %90 = vector.shape_cast %89 : vector<10x16x612xf32> to vector<160x612xf32>
    %c0_108 = arith.constant 0 : index
    %c0_109 = arith.constant 0 : index
    %91 = vector.load %arg7[%c0_108, %c0_109] : memref<612x32xf32, #tpu.memory_space<vmem>>, vector<612x32xf32>
    %cst_110 = arith.constant dense<0.000000e+00> : vector<160x32xf32>
    %92 = tpu.matmul %90, %91, %cst_110 {dimension_numbers = #tpu.dot_dimension_numbers<[1], [0], [0], [1], [0, 0, 1, 1], [], []>} : vector<160x612xf32>, vector<612x32xf32>, vector<160x32xf32> -> vector<160x32xf32>
    %c0_111 = arith.constant 0 : index
    %c0_112 = arith.constant 0 : index
    %93 = vector.load %arg8[%c0_111, %c0_112] : memref<1x32xf32, #tpu.memory_space<vmem>>, vector<1x32xf32>
    %94 = vector.broadcast %93 : vector<1x32xf32> to vector<160x32xf32>
    %95 = arith.addf %92, %94 : vector<160x32xf32>
    %cst_113 = arith.constant 0.000000e+00 : f32
    %96 = vector.broadcast %cst_113 : f32 to vector<160x32xf32>
    %97 = arith.cmpf oge, %95, %96 : vector<160x32xf32>
    %cst_114 = arith.constant 2.000000e-01 : f32
    %98 = vector.broadcast %cst_114 : f32 to vector<160x32xf32>
    %99 = arith.mulf %98, %95 : vector<160x32xf32>
    %100 = arith.select %97, %95, %99 : vector<160x32xi1>, vector<160x32xf32>
    %101 = vector.shape_cast %100 : vector<160x32xf32> to vector<10x16x32xf32>
    %102 = tpu.iota {dimensions = array<i32: 0>} : vector<10x1x1xi32>
    %c1_i32 = arith.constant 1 : i32
    %103 = arith.subi %0, %c1_i32 : i32
    %104 = vector.broadcast %103 : i32 to vector<10x1x1xi32>
    %105 = arith.addi %104, %102 : vector<10x1x1xi32>
    %c0_i32_115 = arith.constant 0 : i32
    %106 = vector.broadcast %c0_i32_115 : i32 to vector<10x1x1xi32>
    %107 = arith.cmpi sge, %105, %106 : vector<10x1x1xi32>
    %c16_i32_116 = arith.constant 16 : i32
    %108 = vector.broadcast %c16_i32_116 : i32 to vector<10x1x1xi32>
    %109 = arith.cmpi slt, %105, %108 : vector<10x1x1xi32>
    %110 = arith.andi %107, %109 : vector<10x1x1xi1>
    %cst_117 = arith.constant 0.000000e+00 : f32
    %111 = vector.shape_cast %110 : vector<10x1x1xi1> to vector<10x1x1xi1>
    %112 = vector.broadcast %111 : vector<10x1x1xi1> to vector<10x16x32xi1>
    %113 = vector.broadcast %cst_117 : f32 to vector<10x16x32xf32>
    %114 = arith.select %112, %101, %113 : vector<10x16x32xi1>, vector<10x16x32xf32>
    %c3_118 = arith.constant 3 : index
    %c1_119 = arith.constant 1 : index
    %c68 = arith.constant 68 : index
    %115 = vector.load %arg12[%c3_118, %c1_119, %c68] : memref<16x18x100xf32, #tpu.memory_space<vmem>>, vector<10x16x32xf32>
    tpu.vector_store %arg12[%c3_118, %c1_119, %c68], %114 {strides = array<i32>} : memref<16x18x100xf32, #tpu.memory_space<vmem>>, vector<10x16x32xf32>,
    %c3_120 = arith.constant 3 : index
    %c0_121 = arith.constant 0 : index
    %c0_122 = arith.constant 0 : index
    %116 = vector.load %arg12[%c3_120, %c0_121, %c0_122] : memref<16x18x100xf32, #tpu.memory_space<vmem>>, vector<8x16x100xf32>
    %c3_123 = arith.constant 3 : index
    %c1_124 = arith.constant 1 : index
    %c0_125 = arith.constant 0 : index
    %117 = vector.load %arg12[%c3_123, %c1_124, %c0_125] : memref<16x18x100xf32, #tpu.memory_space<vmem>>, vector<8x16x100xf32>
    %c3_126 = arith.constant 3 : index
    %c2_127 = arith.constant 2 : index
    %c0_128 = arith.constant 0 : index
    %118 = vector.load %arg12[%c3_126, %c2_127, %c0_128] : memref<16x18x100xf32, #tpu.memory_space<vmem>>, vector<8x16x100xf32>
    %c4_129 = arith.constant 4 : index
    %c0_130 = arith.constant 0 : index
    %c0_131 = arith.constant 0 : index
    %119 = vector.load %arg12[%c4_129, %c0_130, %c0_131] : memref<16x18x100xf32, #tpu.memory_space<vmem>>, vector<8x16x100xf32>
    %c4_132 = arith.constant 4 : index
    %c1_133 = arith.constant 1 : index
    %c0_134 = arith.constant 0 : index
    %120 = vector.load %arg12[%c4_132, %c1_133, %c0_134] : memref<16x18x100xf32, #tpu.memory_space<vmem>>, vector<8x16x100xf32>
    %c4_135 = arith.constant 4 : index
    %c2_136 = arith.constant 2 : index
    %c0_137 = arith.constant 0 : index
    %121 = vector.load %arg12[%c4_135, %c2_136, %c0_137] : memref<16x18x100xf32, #tpu.memory_space<vmem>>, vector<8x16x100xf32>
    %c5 = arith.constant 5 : index
    %c0_138 = arith.constant 0 : index
    %c0_139 = arith.constant 0 : index
    %122 = vector.load %arg12[%c5, %c0_138, %c0_139] : memref<16x18x100xf32, #tpu.memory_space<vmem>>, vector<8x16x100xf32>
    %c5_140 = arith.constant 5 : index
    %c1_141 = arith.constant 1 : index
    %c0_142 = arith.constant 0 : index
    %123 = vector.load %arg12[%c5_140, %c1_141, %c0_142] : memref<16x18x100xf32, #tpu.memory_space<vmem>>, vector<8x16x100xf32>
    %c5_143 = arith.constant 5 : index
    %c2_144 = arith.constant 2 : index
    %c0_145 = arith.constant 0 : index
    %124 = vector.load %arg12[%c5_143, %c2_144, %c0_145] : memref<16x18x100xf32, #tpu.memory_space<vmem>>, vector<8x16x100xf32>
    %125 = tpu.concatenate %116, %117, %118, %119, %120, %121, %122, %123, %124 in 2 : vector<8x16x100xf32>, vector<8x16x100xf32>, vector<8x16x100xf32>, vector<8x16x100xf32>, vector<8x16x100xf32>, vector<8x16x100xf32>, vector<8x16x100xf32>, vector<8x16x100xf32>, vector<8x16x100xf32> -> vector<8x16x900xf32>
    %126 = vector.shape_cast %125 : vector<8x16x900xf32> to vector<128x900xf32>
    %c0_146 = arith.constant 0 : index
    %c0_147 = arith.constant 0 : index
    %127 = vector.load %arg9[%c0_146, %c0_147] : memref<900x4xf32, #tpu.memory_space<vmem>>, vector<900x4xf32>
    %cst_148 = arith.constant dense<0.000000e+00> : vector<128x4xf32>
    %128 = tpu.matmul %126, %127, %cst_148 {dimension_numbers = #tpu.dot_dimension_numbers<[1], [0], [0], [1], [0, 0, 1, 1], [], []>} : vector<128x900xf32>, vector<900x4xf32>, vector<128x4xf32> -> vector<128x4xf32>
    %c0_149 = arith.constant 0 : index
    %c0_150 = arith.constant 0 : index
    %129 = vector.load %arg10[%c0_149, %c0_150] : memref<1x4xf32, #tpu.memory_space<vmem>>, vector<1x4xf32>
    %130 = vector.broadcast %129 : vector<1x4xf32> to vector<128x4xf32>
    %131 = arith.addf %128, %130 : vector<128x4xf32>
    %c4_151 = arith.constant 4 : index
    %c1_152 = arith.constant 1 : index
    %c0_153 = arith.constant 0 : index
    %132 = vector.load %arg12[%c4_151, %c1_152, %c0_153] : memref<16x18x100xf32, #tpu.memory_space<vmem>>, vector<8x16x4xf32>
    %133 = vector.shape_cast %131 : vector<128x4xf32> to vector<8x16x4xf32>
    %cst_154 = arith.constant 2.000000e-01 : f32
    %134 = vector.broadcast %cst_154 : f32 to vector<8x16x4xf32>
    %135 = arith.mulf %133, %134 : vector<8x16x4xf32>
    %136 = arith.addf %135, %132 : vector<8x16x4xf32>
    %c0_155 = arith.constant 0 : index
    %c0_156 = arith.constant 0 : index
    %c0_157 = arith.constant 0 : index
    %c0_158 = arith.constant 0 : index
    %137 = vector.load %arg11[%c0_155, %c0_156, %c0_157, %c0_158] : memref<1x8x16x4xf32, #tpu.memory_space<vmem>>, vector<1x8x16x4xf32>
    %138 = vector.shape_cast %137 : vector<1x8x16x4xf32> to vector<8x16x4xf32>
    %139 = vector.shape_cast %136 : vector<8x16x4xf32> to vector<1x8x16x4xf32>
    tpu.vector_store %arg11[%c0_155, %c0_156, %c0_157, %c0_158], %139 {strides = array<i32>} : memref<1x8x16x4xf32, #tpu.memory_space<vmem>>, vector<1x8x16x4xf32>,
    return
  }
  func.func @transform_0(%arg0: i32, %arg1: i32) -> (i32, i32, i32, i32) {
    %c0_i32 = arith.constant 0 : i32
    %c0_i32_0 = arith.constant 0 : i32
    %c0_i32_1 = arith.constant 0 : i32
    %c0_i32_2 = arith.constant 0 : i32
    return %arg0, %c0_i32, %c0_i32_0, %c0_i32_1 : i32, i32, i32, i32
  }
  func.func @transform_1(%arg0: i32, %arg1: i32) -> (i32, i32) {
    %c0_i32 = arith.constant 0 : i32
    %c0_i32_0 = arith.constant 0 : i32
    %c0_i32_1 = arith.constant 0 : i32
    return %c0_i32, %c0_i32_0 : i32, i32
  }
  func.func @transform_2(%arg0: i32, %arg1: i32) -> (i32, i32) {
    %c0_i32 = arith.constant 0 : i32
    %c0_i32_0 = arith.constant 0 : i32
    %c0_i32_1 = arith.constant 0 : i32
    return %c0_i32, %c0_i32_0 : i32, i32
  }
  func.func @transform_3(%arg0: i32, %arg1: i32) -> (i32, i32) {
    %c0_i32 = arith.constant 0 : i32
    %c0_i32_0 = arith.constant 0 : i32
    %c0_i32_1 = arith.constant 0 : i32
    return %c0_i32, %c0_i32_0 : i32, i32
  }
  func.func @transform_4(%arg0: i32, %arg1: i32) -> (i32, i32) {
    %c0_i32 = arith.constant 0 : i32
    %c0_i32_0 = arith.constant 0 : i32
    %c0_i32_1 = arith.constant 0 : i32
    return %c0_i32, %c0_i32_0 : i32, i32
  }
  func.func @transform_5(%arg0: i32, %arg1: i32) -> (i32, i32) {
    %c0_i32 = arith.constant 0 : i32
    %c0_i32_0 = arith.constant 0 : i32
    %c0_i32_1 = arith.constant 0 : i32
    return %c0_i32, %c0_i32_0 : i32, i32
  }
  func.func @transform_6(%arg0: i32, %arg1: i32) -> (i32, i32) {
    %c0_i32 = arith.constant 0 : i32
    %c0_i32_0 = arith.constant 0 : i32
    %c0_i32_1 = arith.constant 0 : i32
    return %c0_i32, %c0_i32_0 : i32, i32
  }
  func.func @transform_7(%arg0: i32, %arg1: i32) -> (i32, i32) {
    %c0_i32 = arith.constant 0 : i32
    %c0_i32_0 = arith.constant 0 : i32
    %c0_i32_1 = arith.constant 0 : i32
    return %c0_i32, %c0_i32_0 : i32, i32
  }
  func.func @transform_8(%arg0: i32, %arg1: i32) -> (i32, i32) {
    %c0_i32 = arith.constant 0 : i32
    %c0_i32_0 = arith.constant 0 : i32
    %c0_i32_1 = arith.constant 0 : i32
    return %c0_i32, %c0_i32_0 : i32, i32
  }
  func.func @transform_9(%arg0: i32, %arg1: i32) -> (i32, i32, i32, i32) {
    %c0_i32 = arith.constant 0 : i32
    %c0_i32_0 = arith.constant 0 : i32
    %c0_i32_1 = arith.constant 0 : i32
    return %arg0, %arg1, %c0_i32, %c0_i32_0 : i32, i32, i32, i32
  }
}

</mosaic_0001>

<bundles_post_ra>
// kernel: rdb4c_forward.1
= control target key start
LH: loop header
LB: loop body
LE: loop exit
PB: predicated region body
PF: predicated region fallthrough
CT: control target
= control target key end

     0   :  { %s10147_s30 = smov 0   ;;  %s10149_s10 = smov 0   ;;  %s14883_s0 = inlined_call_operand.vmem [shape: f32[2,24,18,4], index: 0, kind: input, shape index: {}]   ;;  %s14884_s1 = inlined_call_operand.vmem [shape: f32[36,32], index: 1, kind: input, shape index: {}]   ;;  %s14885_s2 = inlined_call_operand.vmem [shape: f32[1,32], index: 2, kind: input, shape index: {}]   ;;  %s14886_s3 = inlined_call_operand.vmem [shape: f32[324,32], index: 3, kind: input, shape index: {}]   ;;  %s14887_s4 = inlined_call_operand.vmem [shape: f32[1,32], index: 4, kind: input, shape index: {}]   ;;  %s14888_s5 = inlined_call_operand.vmem [shape: f32[612,32], index: 5, kind: input, shape index: {}]   ;;  %s14889_s6 = inlined_call_operand.vmem [shape: f32[1,32], index: 6, kind: input, shape index: {}]   ;;  %s14890_s7 = inlined_call_operand.vmem [shape: f32[900,4], index: 7, kind: input, shape index: {}]   ;;  %s14891_s8 = inlined_call_operand.vmem [shape: f32[1,4], index: 8, kind: input, shape index: {}]   ;;  %s14892_s9 = inlined_call_operand.vmem [shape: f32[2,16,16,4], index: 9, kind: output, shape index: {}]  }
   0x1   :  { %s10151_s11 = smov 0   ;;  %s10153_s12 = smov 0  }
   0x2   :  { %s10155_s13 = smov 0  }
   0x3 LB: > { %s28_s14 = sadd.s32 1, %s10063_s11  ;;  %s31_s15 = sadd.s32 1, %s10067_s12  ;;  %s10071_s13 = sphi %s10155_s13, %s19_s13   ;;  %s10067_s12 = sphi %s10153_s12, %s15193_s12   ;;  %s10063_s11 = sphi %s10151_s11, %s15192_s11   ;;  %s10059_s10 = sphi %s10149_s10, %s15191_s10   ;;  %s10055_s30 = sphi %s10147_s30, %s15190_s30  }
   0x4   : > { %p29_p0 = scmp.ge.s32.totalorder %s28_s14, 2  ;;  %p8035_p1 = scmp.ge.s32.totalorder %s10071_s13, 1 }
   0x5   : > { %p301_p2 = scmp.lt.s32.totalorder %s10071_s13, 5 }
   0x6   : > { %s15195_s14 = smov (%p29_p0, %s28_s14), 0  ;;  %s15197_s15 = smov (!%p29_p0, %s31_s15), %s10067_s12 }
   0x7   : > { %p302_p3 = pnand %p8035_p1, %p301_p2  ;;  %p33_p4 = scmp.ge.s32.totalorder %s15197_s15, 2 }
   0x9   : > { %s15199_s15 = smov (%p33_p4, %s15197_s15), 0  ;;  %305 = sbr.rel (%p302_p3) target bundleno = 2490 (0x9ba), region = 56 }
  0x10   : > { %p342_p5 = scmp.lt.s32.totalorder %s10059_s10, 1  ;;  %vm14893_vm0 = vcmask 818176   ;;  %vm362_vm1 = vcmask 812032   ;;  %v14912_v0 = vmov 0.0   ;;  %s8042_s16 = smul.u32 192, %s10055_s30  ;;  %vm459_vm2 = vcmask 31744  }
  0x11   : > { %360 = vst.msk [vmem:[#allocation2] sm:$0xff] %vm14893_vm0, %v14912_v0  ;;  %361 = vst.msk [vmem:[#allocation2 + $0x8] sm:$0xff] %vm14893_vm0, %v14912_v0  ;;  %vm462_vm3 = vcmask 25600   ;;  %s14902_s22 = smov 8   ;;  %s10075_s23 = smov 4   ;;  %v1890_v33 = vld [vmem:[%s14884_s1] sm:$0xff] }
  0x12   : > { %364 = vst.msk [vmem:[#allocation2 + $0x18] sm:$0xff] %vm14893_vm0, %v14912_v0  ;;  %365 = vst.msk [vmem:[#allocation2 + $0x20] sm:$0xff] %vm14893_vm0, %v14912_v0  ;;  %s15201_s10 = smov (!%p342_p5, %s10059_s10), 1  ;;  %s10076_s24 = smov 12   ;;  %v1891_v34 = vld [vmem:[%s14884_s1 + $0x8] sm:$0xff]  ;;  %v1892_v36 = vld [vmem:[%s14884_s1 + $0x10] sm:$0xff] }
  0x13   : > { %367 = vst.msk [vmem:[#allocation2 + $0x30] sm:$0xff] %vm14893_vm0, %v14912_v0  ;;  %368 = vst.msk [vmem:[#allocation2 + $0x38] sm:$0xff] %vm14893_vm0, %v14912_v0  ;;  %s9035_s17 = smul.u32 576, %s15201_s10  ;;  %s10077_s25 = smov 16   ;;  %v8645_v35 = vpack.c.bf16 %v1891_v34, %v1890_v33  ;;  %v1893_v37 = vld [vmem:[%s14884_s1 + $0x18] sm:$0xff]  ;;  %vm14894_vm4 = vcmask 1043456  }
  0x14   : > { %370 = vst.msk [vmem:[#allocation2 + $0x48] sm:$0xff] %vm14893_vm0, %v14912_v0  ;;  %371 = vst.msk [vmem:[#allocation2 + $0x50] sm:$0xff] %vm14893_vm0, %v14912_v0  ;;  %s10078_s26 = smov 20   ;;  %s14900_s29 = smov 24   ;;  %v8649_v40 = vpack.c.bf16 %v1893_v37, %v1892_v36  ;;  %v1894_v41 = vld [vmem:[%s14884_s1 + $0x20] sm:$0xf] }
  0x15   : > { %373 = vst.msk [vmem:[#allocation2 + $0x60] sm:$0xff] %vm14893_vm0, %v14912_v0  ;;  %374 = vst.msk [vmem:[#allocation2 + $0x68] sm:$0xff] %vm14893_vm0, %v14912_v0  ;;  %s346_s20 = scalar_lea.vmem %s14883_s0, %s9035_s17  ;;  %8646 = vmatprep.subr.bf16.mxu0 %v8645_v35  ;;  %s10080_s28 = smov 28   ;;  %vm1687_vm5 = vcmask 64512   ;;  %vm1716_vm6 = vcmask 97280   ;;  %vm1745_vm7 = vcmask 130048  }
  0x16   : > { %376 = vst.msk [vmem:[#allocation2 + $0x78] sm:$0xff] %vm14893_vm0, %v14912_v0  ;;  %377 = vst.msk [vmem:[#allocation2 + $0x80] sm:$0xff] %vm14893_vm0, %v14912_v0  ;;  %s10288_s21 = scalar_lea.vmem %s346_s20, %s8042_s16  ;;  %8648 = vmatpush3.bf16.msra.mxu0 %v8645_v35  ;;  %s14935_s18 = smov 32   ;;  %vm14899_vm8 = vcmask 162816   ;;  %vm14898_vm9 = vcmask 195584   ;;  %vm14897_vm10 = vcmask 228352  }
  0x17   : > { %379 = vst.msk [vmem:[#allocation2 + $0x90] sm:$0xff] %vm14893_vm0, %v14912_v0  ;;  %380 = vst.msk [vmem:[#allocation2 + $0x98] sm:$0xff] %vm14893_vm0, %v14912_v0  ;;  %v411_v1 = vld [vmem:[%s10288_s21] sm:$0xff]  ;;  %v412_v2 = vld [vmem:[%s10288_s21 + $0x8] sm:$0xff]  ;;  %8650 = vmatprep.subr.bf16.mxu0 %v8649_v40  ;;  %vm14896_vm11 = vcmask 261120   ;;  %vm14895_vm12 = vcmask 293888  }
  0x18   : > { %382 = vst.msk [vmem:[#allocation2 + $0xa8] sm:$0xff] %vm14893_vm0, %v14912_v0  ;;  %383 = vst.msk [vmem:[#allocation2 + $0xb0] sm:$0xff] %vm14893_vm0, %v14912_v0  ;;  %v413_v3 = vld [vmem:[%s10288_s21 + $0x10] sm:$0x3]  ;;  %v415_v4 = vld [vmem:[%s10288_s21 + $0x20] sm:$0xff]  ;;  %s14908_s17 = smov 108  }
  0x19   : > { %385 = vst.msk [vmem:[#allocation2 + $0xc0] sm:$0xff] %vm14893_vm0, %v14912_v0  ;;  %386 = vst.msk [vmem:[#allocation2 + $0xc8] sm:$0xff] %vm14893_vm0, %v14912_v0  ;;  %v414_v5 = vld [vmem:[%s10288_s21 + $0x18] sm:$0xff]  ;;  %v416_v6 = vld [vmem:[%s10288_s21 + $0x28] sm:$0x3]  ;;  %s14904_s20 = smov 52  }
  0x1a   : > { %388 = vst.msk [vmem:[#allocation2 + $0xd8] sm:$0xff] %vm14893_vm0, %v14912_v0  ;;  %389 = vst.msk [vmem:[#allocation2 + $0xe0] sm:$0xff] %vm14893_vm0, %v14912_v0  ;;  %v417_v7 = vld [vmem:[%s10288_s21 + $0x30] sm:$0xff]  ;;  %v418_v8 = vld [vmem:[%s10288_s21 + $0x38] sm:$0xff]  ;;  %8652 = vmatpush3.bf16.msra.mxu0 %v8649_v40  ;;  %s14921_s16 = smov 72   ;;  %s14991_s27 = smov 108  }
  0x1b   : > { %391 = vst.msk [vmem:[#allocation2 + $0xf0] sm:$0xff] %vm14893_vm0, %v14912_v0  ;;  %392 = vst.msk [vmem:[#allocation2 + $0xf8] sm:$0xff] %vm14893_vm0, %v14912_v0  ;;  %v419_v9 = vld [vmem:[%s10288_s21 + $0x40] sm:$0x3]  ;;  %v420_v10 = vld [vmem:[%s10288_s21 + $0x48] sm:$0xff]  ;;  %8491 = vmatprep.subr.msk.mxu0 %vm14894_vm4, %v1894_v41  ;;  %s15170_s19 = smov 32  }
  0x1c   : > { %394 = vst.msk [vmem:[#allocation2 + $0x108] sm:$0xff] %vm14893_vm0, %v14912_v0  ;;  %395 = vst.msk [vmem:[#allocation2 + $0x110] sm:$0xff] %vm14893_vm0, %v14912_v0  ;;  %v421_v11 = vld [vmem:[%s10288_s21 + $0x50] sm:$0xff]  ;;  %v422_v12 = vld [vmem:[%s10288_s21 + $0x58] sm:$0x3] }
  0x1d   : > { %397 = vst.msk [vmem:[#allocation2 + $0x120] sm:$0xff] %vm14893_vm0, %v14912_v0  ;;  %398 = vst.msk [vmem:[#allocation2 + $0x128] sm:$0xff] %vm14893_vm0, %v14912_v0  ;;  %v424_v13 = vld [vmem:[%s10288_s21 + $0x68] sm:$0xff]  ;;  %v423_v14 = vld [vmem:[%s10288_s21 + $0x60] sm:$0xff] }
  0x1e   : > { %400 = vst.msk [vmem:[#allocation2 + $0x138] sm:$0xff] %vm14893_vm0, %v14912_v0  ;;  %401 = vst.msk [vmem:[#allocation2 + $0x140] sm:$0xff] %vm14893_vm0, %v14912_v0  ;;  %v425_v15 = vld [vmem:[%s10288_s21 + $0x70] sm:$0x3]  ;;  %v427_v16 = vld [vmem:[%s10288_s21 + $0x80] sm:$0xff]  ;;  %8492 = vmatpush3.msk.msra.mxu0 %vm14894_vm4, %v1894_v41 }
  0x1f   : > { %403 = vst.msk [vmem:[#allocation2 + $0x150] sm:$0xff] %vm14893_vm0, %v14912_v0  ;;  %404 = vst.msk [vmem:[#allocation2 + $0x158] sm:$0xff] %vm14893_vm0, %v14912_v0  ;;  %v426_v17 = vld [vmem:[%s10288_s21 + $0x78] sm:$0xff]  ;;  %v428_v18 = vld [vmem:[%s10288_s21 + $0x88] sm:$0x3] }
  0x20   : > { %406 = vst.msk [vmem:[#allocation2 + $0x168] sm:$0xff] %vm14893_vm0, %v14912_v0  ;;  %407 = vst.msk [vmem:[#allocation2 + $0x170] sm:$0xff] %vm14893_vm0, %v14912_v0  ;;  %v430_v26 = vld [vmem:[%s10288_s21 + $0x98] sm:$0xff]  ;;  %v429_v27 = vld [vmem:[%s10288_s21 + $0x90] sm:$0xff] }
  0x21   : > { %363 = vst.msk [vmem:[#allocation2 + $0x10] sm:$0x3] %vm362_vm1, %v14912_v0  ;;  %366 = vst.msk [vmem:[#allocation2 + $0x28] sm:$0x3] %vm362_vm1, %v14912_v0  ;;  %v431_v30 = vld [vmem:[%s10288_s21 + $0xa0] sm:$0x3] }
  0x22   : > { %369 = vst.msk [vmem:[#allocation2 + $0x40] sm:$0x3] %vm362_vm1, %v14912_v0  ;;  %372 = vst.msk [vmem:[#allocation2 + $0x58] sm:$0x3] %vm362_vm1, %v14912_v0  ;;  %v433_v44 = vld [vmem:[%s10288_s21 + $0xb0] sm:$0xff]  ;;  %v432_v45 = vld [vmem:[%s10288_s21 + $0xa8] sm:$0xff] }
  0x23   : > { %375 = vst.msk [vmem:[#allocation2 + $0x70] sm:$0x3] %vm362_vm1, %v14912_v0  ;;  %378 = vst.msk [vmem:[#allocation2 + $0x88] sm:$0x3] %vm362_vm1, %v14912_v0  ;;  %v434_v47 = vld [vmem:[%s10288_s21 + $0xb8] sm:$0x3] }
  0x24   : > { %381 = vst.msk [vmem:[#allocation2 + $0xa0] sm:$0x3] %vm362_vm1, %v14912_v0  ;;  %384 = vst.msk [vmem:[#allocation2 + $0xb8] sm:$0x3] %vm362_vm1, %v14912_v0  ;;  %v436_v53 = vld [vmem:[%s10288_s21 + $0xc8] sm:$0xff]  ;;  %v435_v54 = vld [vmem:[%s10288_s21 + $0xc0] sm:$0xff] }
  0x25   : > { %387 = vst.msk [vmem:[#allocation2 + $0xd0] sm:$0x3] %vm362_vm1, %v14912_v0  ;;  %390 = vst.msk [vmem:[#allocation2 + $0xe8] sm:$0x3] %vm362_vm1, %v14912_v0  ;;  %v437_v56 = vld [vmem:[%s10288_s21 + $0xd0] sm:$0x3] }
  0x26   : > { %393 = vst.msk [vmem:[#allocation2 + $0x100] sm:$0x3] %vm362_vm1, %v14912_v0  ;;  %396 = vst.msk [vmem:[#allocation2 + $0x118] sm:$0x3] %vm362_vm1, %v14912_v0  ;;  %v439_v63 = vld [vmem:[%s10288_s21 + $0xe0] sm:$0xff] }
  0x27   : > { %399 = vst.msk [vmem:[#allocation2 + $0x130] sm:$0x3] %vm362_vm1, %v14912_v0  ;;  %402 = vst.msk [vmem:[#allocation2 + $0x148] sm:$0x3] %vm362_vm1, %v14912_v0 }
  0x28   : > { %405 = vst.msk [vmem:[#allocation2 + $0x160] sm:$0x3] %vm362_vm1, %v14912_v0  ;;  %408 = vst.msk [vmem:[#allocation2 + $0x178] sm:$0x3] %vm362_vm1, %v14912_v0 }
  0x29   : > { %460 = vst.msk [vmem:[#allocation2] sm:$0xff] %vm459_vm2, %v411_v1  ;;  %461 = vst.msk [vmem:[#allocation2 + $0x8] sm:$0xff] %vm459_vm2, %v412_v2  ;;  %v438_v1 = vld [vmem:[%s10288_s21 + $0xd8] sm:$0xff]  ;;  %v440_v2 = vld [vmem:[%s10288_s21 + $0xe8] sm:$0x3] }
  0x2a   : > { %463 = vst.msk [vmem:[#allocation2 + $0x10] sm:$0x3] %vm462_vm3, %v413_v3  ;;  %466 = vst.msk [vmem:[#allocation2 + $0x28] sm:$0x3] %vm462_vm3, %v416_v6 }
  0x2b   : > { %465 = vst.msk [vmem:[#allocation2 + $0x20] sm:$0xff] %vm459_vm2, %v415_v4  ;;  %464 = vst.msk [vmem:[#allocation2 + $0x18] sm:$0xff] %vm459_vm2, %v414_v5 }
  0x2c   : > { %467 = vst.msk [vmem:[#allocation2 + $0x30] sm:$0xff] %vm459_vm2, %v417_v7  ;;  %468 = vst.msk [vmem:[#allocation2 + $0x38] sm:$0xff] %vm459_vm2, %v418_v8 }
  0x2d   : > { %469 = vst.msk [vmem:[#allocation2 + $0x40] sm:$0x3] %vm462_vm3, %v419_v9  ;;  %472 = vst.msk [vmem:[#allocation2 + $0x58] sm:$0x3] %vm462_vm3, %v422_v12 }
  0x2e   : > { %470 = vst.msk [vmem:[#allocation2 + $0x48] sm:$0xff] %vm459_vm2, %v420_v10  ;;  %471 = vst.msk [vmem:[#allocation2 + $0x50] sm:$0xff] %vm459_vm2, %v421_v11 }
  0x2f   : > { %474 = vst.msk [vmem:[#allocation2 + $0x68] sm:$0xff] %vm459_vm2, %v424_v13  ;;  %473 = vst.msk [vmem:[#allocation2 + $0x60] sm:$0xff] %vm459_vm2, %v423_v14 }
  0x30   : > { %475 = vst.msk [vmem:[#allocation2 + $0x70] sm:$0x3] %vm462_vm3, %v425_v15  ;;  %478 = vst.msk [vmem:[#allocation2 + $0x88] sm:$0x3] %vm462_vm3, %v428_v18  ;;  %v565_v19 = vld [vmem:[#allocation2 + $0x2] sm:$0xff] }
  0x31   : > { %477 = vst.msk [vmem:[#allocation2 + $0x80] sm:$0xff] %vm459_vm2, %v427_v16  ;;  %476 = vst.msk [vmem:[#allocation2 + $0x78] sm:$0xff] %vm459_vm2, %v426_v17  ;;  %v537_v20 = vld [vmem:[#allocation2 + $0x1] sm:$0xff]  ;;  %903 = vrot.lane.b32.xlu1 %v565_v19, %s14902_s22  ;;  %v566_v21 = vld [vmem:[#allocation2 + $0xa] sm:$0xff] }
  0x32   : > { %791 = vrot.lane.b32.xlu0 %v537_v20, %s10075_s23  ;;  %v538_v22 = vld [vmem:[#allocation2 + $0x9] sm:$0xff]  ;;  %v10330_v23 = vld [vmem:[#allocation2 + $0x20] sm:$0xff]  ;;  %v10332_v24 = vld [vmem:[#allocation2 + $0x18] sm:$0xff]  ;;  %480 = vst.msk [vmem:[#allocation2 + $0x98] sm:$0xff] %vm459_vm2, %v430_v26 }
  0x33   : > { %v539_v25 = vld [vmem:[#allocation2 + $0x19] sm:$0xff]  ;;  %479 = vst.msk [vmem:[#allocation2 + $0x90] sm:$0xff] %vm459_vm2, %v429_v27  ;;  %v623_v29 = vld [vmem:[#allocation2 + $0x21] sm:$0xff]  ;;  %v10350_v31 = vld [vmem:[#allocation2 + $0x30] sm:$0xff] }
  0x34   : > { %v650_v28 = vld [vmem:[#allocation2 + $0x1a] sm:$0xff]  ;;  %481 = vst.msk [vmem:[#allocation2 + $0xa0] sm:$0x3] %vm462_vm3, %v431_v30  ;;  %v651_v32 = vld [vmem:[#allocation2 + $0x22] sm:$0xff]  ;;  %v707_v38 = vld [vmem:[#allocation2 + $0x31] sm:$0xff] }
  0x35   : > { %905 = vrot.lane.b32.xlu1 %v566_v21, %s14902_s22  ;;  %v10370_v39 = vld [vmem:[#allocation2 + $0x38] sm:$0xff]  ;;  %483 = vst.msk [vmem:[#allocation2 + $0xb0] sm:$0xff] %vm459_vm2, %v433_v44  ;;  %482 = vst.msk [vmem:[#allocation2 + $0xa8] sm:$0xff] %vm459_vm2, %v432_v45  ;;  %v10397_v48 = vld [vmem:[#allocation2 + $0x48] sm:$0xff] }
  0x36   : > { %793 = vrot.lane.b32.xlu0 %v538_v22, %s10075_s23  ;;  %v735_v42 = vld [vmem:[#allocation2 + $0x32] sm:$0xff]  ;;  %v736_v46 = vld [vmem:[#allocation2 + $0x3a] sm:$0xff]  ;;  %484 = vst.msk [vmem:[#allocation2 + $0xb8] sm:$0x3] %vm462_vm3, %v434_v47  ;;  %v709_v49 = vld [vmem:[#allocation2 + $0x49] sm:$0xff] }
  0x37   : > { %v708_v43 = vld [vmem:[#allocation2 + $0x39] sm:$0xff]  ;;  %v10405_v50 = vld [vmem:[#allocation2 + $0x50] sm:$0xff]  ;;  %486 = vst.msk [vmem:[#allocation2 + $0xc8] sm:$0xff] %vm459_vm2, %v436_v53  ;;  %485 = vst.msk [vmem:[#allocation2 + $0xc0] sm:$0xff] %vm459_vm2, %v435_v54 }
  0x38   : > { %v737_v51 = vld [vmem:[#allocation2 + $0x4a] sm:$0xff]  ;;  %v655_v55 = vld [vmem:[#allocation2 + $0x52] sm:$0xff]  ;;  %v10426_v58 = vld [vmem:[#allocation2 + $0x60] sm:$0xff]  ;;  %487 = vst.msk [vmem:[#allocation2 + $0xd0] sm:$0x3] %vm462_vm3, %v437_v56 }
  0x39   : > { %1017 = vrot.lane.b32.xlu1 %v10330_v23, %s10076_s24  ;;  %v710_v52 = vld [vmem:[#allocation2 + $0x51] sm:$0xff]  ;;  %v10424_v57 = vld [vmem:[#allocation2 + $0x68] sm:$0xff]  ;;  %489 = vst.msk [vmem:[#allocation2 + $0xe0] sm:$0xff] %vm459_vm2, %v439_v63  ;;  %488 = vst.msk [vmem:[#allocation2 + $0xd8] sm:$0xff] %vm459_vm2, %v438_v1 }
  0x3a   : > { %1015 = vrot.lane.b32.xlu0 %v10332_v24, %s10076_s24  ;;  %v712_v59 = vld [vmem:[#allocation2 + $0x69] sm:$0xff]  ;;  %v711_v60 = vld [vmem:[#allocation2 + $0x61] sm:$0xff]  ;;  %v10456_v4 = vld [vmem:[#allocation2 + $0x78] sm:$0xff]  ;;  %490 = vst.msk [vmem:[#allocation2 + $0xe8] sm:$0x3] %vm462_vm3, %v440_v2 }
  0x3b   : > { %v739_v61 = vld [vmem:[#allocation2 + $0x62] sm:$0xff]  ;;  %v740_v62 = vld [vmem:[#allocation2 + $0x6a] sm:$0xff]  ;;  %v10465_v8 = vld [vmem:[#allocation2 + $0x79] sm:$0xff] }
  0x3c   : > { %v10454_v3 = vld [vmem:[#allocation2 + $0x80] sm:$0xff]  ;;  %v441_v26 = vld [vmem:[%s10288_s21 + $0xf0] sm:$0xff]  ;;  %v510_v44 = vld [vmem:[#allocation2 + $0x8] sm:$0xff] }
  0x3d   : > { %795 = vrot.lane.b32.xlu1 %v539_v25, %s10075_s23  ;;  %v10463_v7 = vld [vmem:[#allocation2 + $0x81] sm:$0xff]  ;;  %491 = vst.msk [vmem:[#allocation2 + $0xf0] sm:$0xff] %vm459_vm2, %v441_v26  ;;  %v10520_v33 = vld [vmem:[#allocation2 + $0x90] sm:$0xff] }
  0x3e   : > { %1127 = vrot.lane.b32.xlu0 %v539_v25, %s10077_s25  ;;  %v10475_v11 = vld [vmem:[#allocation2 + $0x7a] sm:$0xff]  ;;  %v10482_v14 = vld [vmem:[#allocation2 + $0x82] sm:$0xff]  ;;  %v10531_v40 = vld [vmem:[#allocation2 + $0x91] sm:$0xff] }
  0x3f   : > { %v442_v25 = vld [vmem:[%s10288_s21 + $0xf8] sm:$0xff]  ;;  %v443_v30 = vld [vmem:[%s10288_s21 + $0x100] sm:$0x3] }
  0x40   : > { %492 = vst.msk [vmem:[#allocation2 + $0xf8] sm:$0xff] %vm459_vm2, %v442_v25 }
  0x41   : > { %1239 = vrot.lane.b32.xlu1 %v650_v28, %s10078_s26  ;;  %493 = vst.msk [vmem:[#allocation2 + $0x100] sm:$0x3] %vm462_vm3, %v443_v30 }
  0x42   : > { %1129 = vrot.lane.b32.xlu0 %v623_v29, %s10077_s25 }
  0x45   : > { %907 = vrot.lane.b32.xlu1 %v650_v28, %s14902_s22 }
  0x46   : > { %797 = vrot.lane.b32.xlu0 %v623_v29, %s10075_s23  ;;  %v509_v29 = vld [vmem:[#allocation2] sm:$0xff] }
  0x49   : > { %1351 = vrot.lane.b32.xlu1 %v10350_v31, %s14900_s29 }
  0x4a   : > { %1241 = vrot.lane.b32.xlu0 %v651_v32, %s10078_s26 }
  0x4d   : > { %1019 = vrot.lane.b32.xlu1 %v10350_v31, %s10076_s24 }
  0x4e   : > { %909 = vrot.lane.b32.xlu0 %v651_v32, %s14902_s22  ;;  %v10518_v32 = vld [vmem:[#allocation2 + $0x98] sm:$0xff] }
  0x51   : > { %1463 = vrot.lane.b32.xlu1 %v707_v38, %s10080_s28 }
  0x52   : > { %1353 = vrot.lane.b32.xlu0 %v10370_v39, %s14900_s29 }
  0x55   : > { %1131 = vrot.lane.b32.xlu1 %v707_v38, %s10077_s25 }
  0x56   : > { %1021 = vrot.lane.b32.xlu0 %v10370_v39, %s10076_s24 }
  0x59   : > { %1575 = vrot.lane.b32.xlu1 %v735_v42, %s14935_s18 }
  0x5a   : > { %1465 = vrot.lane.b32.xlu0 %v708_v43, %s10080_s28 }
  0x5d   : > { %1133 = vrot.lane.b32.xlu1 %v708_v43, %s10077_s25 }
  0x5e   : > { %799 = vrot.lane.b32.xlu0 %v707_v38, %s10075_s23  ;;  %v10529_v38 = vld [vmem:[#allocation2 + $0x99] sm:$0xff] }
  0x61   : > { %1577 = vrot.lane.b32.xlu1 %v736_v46, %s14935_s18 }
  0x62   : > { %1243 = vrot.lane.b32.xlu0 %v735_v42, %s10078_s26 }
  0x65   : > { %911 = vrot.lane.b32.xlu1 %v735_v42, %s14902_s22 }
  0x66   : > { %801 = vrot.lane.b32.xlu0 %v708_v43, %s10075_s23 }
  0x69   : > { %1355 = vrot.lane.b32.xlu1 %v10397_v48, %s14900_s29 }
  0x6a   : > { %1245 = vrot.lane.b32.xlu0 %v736_v46, %s10078_s26 }
  0x6d   : > { %1023 = vrot.lane.b32.xlu1 %v10397_v48, %s10076_s24 }
  0x6e   : > { %913 = vrot.lane.b32.xlu0 %v736_v46, %s14902_s22 }
  0x71   : > { %1467 = vrot.lane.b32.xlu1 %v709_v49, %s10080_s28 }
  0x72   : > { %1357 = vrot.lane.b32.xlu0 %v10405_v50, %s14900_s29 }
  0x75   : > { %1135 = vrot.lane.b32.xlu1 %v709_v49, %s10077_s25 }
  0x76   : > { %1025 = vrot.lane.b32.xlu0 %v10405_v50, %s10076_s24 }
  0x79   : > { %1579 = vrot.lane.b32.xlu1 %v737_v51, %s14935_s18 }
  0x7a   : > { %1469 = vrot.lane.b32.xlu0 %v710_v52, %s10080_s28 }
  0x7d   : > { %1247 = vrot.lane.b32.xlu1 %v737_v51, %s10078_s26 }
  0x7e   : > { %1137 = vrot.lane.b32.xlu0 %v710_v52, %s10077_s25 }
  0x81   : > { %1249 = vrot.lane.b32.xlu1 %v655_v55, %s10078_s26 }
  0x82   : > { %1581 = vrot.lane.b32.xlu0 %v655_v55, %s14935_s18 }
  0x85   : > { %1361 = vrot.lane.b32.xlu1 %v10424_v57, %s14900_s29 }
  0x86   : > { %1359 = vrot.lane.b32.xlu0 %v10426_v58, %s14900_s29 }
  0x89   : > { %1473 = vrot.lane.b32.xlu1 %v712_v59, %s10080_s28 }
  0x8a   : > { %1471 = vrot.lane.b32.xlu0 %v711_v60, %s10080_s28 }
  0x8d   : > { %803 = vrot.lane.b32.xlu1 %v709_v49, %s10075_s23  ;;  %v10545_v49 = vld [vmem:[#allocation2 + $0x92] sm:$0xff] }
  0x8e   : > { %1583 = vrot.lane.b32.xlu0 %v739_v61, %s14935_s18 }
  0x91   : > { %805 = vrot.lane.b32.xlu1 %v710_v52, %s10075_s23 }
  0x92   : > { %1585 = vrot.lane.b32.xlu0 %v740_v62, %s14935_s18 }
  0x95   : > { %917 = vrot.lane.b32.xlu1 %v655_v55, %s14902_s22 }
  0x96   : > { %915 = vrot.lane.b32.xlu0 %v737_v51, %s14902_s22 }
  0x99   : > { %1029 = vrot.lane.b32.xlu1 %v10424_v57, %s10076_s24 }
  0x9a   : > { %1027 = vrot.lane.b32.xlu0 %v10426_v58, %s10076_s24 }
  0x9d   : > { %1141 = vrot.lane.b32.xlu1 %v712_v59, %s10077_s25 }
  0x9e   : > { %1139 = vrot.lane.b32.xlu0 %v711_v60, %s10077_s25 }
  0xa1   : > { %1253 = vrot.lane.b32.xlu1 %v740_v62, %s10078_s26 }
  0xa2   : > { %1251 = vrot.lane.b32.xlu0 %v739_v61, %s10078_s26 }
  0xa3   : > { %v904_v5 = vpop.permute.xlu1 %903 }
  0xa4   : > { %v792_v6 = vpop.permute.xlu0 %791 }
  0xa5   : > { %1365 = vrot.lane.b32.xlu1 %v10454_v3, %s14900_s29  ;;  %v1659_v34 = vsel %vm459_vm2, %v509_v29, %v792_v6 }
  0xa6   : > { %1363 = vrot.lane.b32.xlu0 %v10456_v4, %s14900_s29  ;;  %v1688_v37 = vsel %vm1687_vm5, %v1659_v34, %v904_v5  ;;  %v10618_v34 = vld [vmem:[#allocation2 + $0xb1] sm:$0xff] }
  0xa7   : > { %v10467_v9 = vpop.permute.xlu1 %905 }
  0xa8   : > { %v10469_v10 = vpop.permute.xlu0 %793 }
  0xa9   : > { %1477 = vrot.lane.b32.xlu1 %v10463_v7, %s10080_s28  ;;  %v1660_v51 = vsel %vm459_vm2, %v510_v44, %v10469_v10  ;;  %v10632_v44 = vld [vmem:[#allocation2 + $0xaa] sm:$0xff] }
  0xaa   : > { %1475 = vrot.lane.b32.xlu0 %v10465_v8, %s10080_s28  ;;  %v1689_v56 = vsel %vm1687_vm5, %v1660_v51, %v10467_v9 }
  0xab   : > { %v10477_v12 = vpop.permute.xlu1 %1017 }
  0xac   : > { %v1016_v13 = vpop.permute.xlu0 %1015 }
  0xad   : > { %807 = vrot.lane.b32.xlu1 %v711_v60, %s10075_s23  ;;  %v1717_v41 = vsel %vm1716_vm6, %v1688_v37, %v1016_v13  ;;  %v1718_v60 = vsel %vm1716_vm6, %v1689_v56, %v10477_v12 }
  0xae   : > { %1587 = vrot.lane.b32.xlu0 %v10475_v11, %s14935_s18 }
  0xaf   : > { %v10484_v15 = vpop.permute.xlu1 %795 }
  0xb0   : > { %v1128_v16 = vpop.permute.xlu0 %1127  ;;  %v1661_v29 = vsel %vm459_vm2, %v10332_v24, %v10484_v15 }
  0xb1   : > { %809 = vrot.lane.b32.xlu1 %v712_v59, %s10075_s23  ;;  %v1746_v45 = vsel %vm1745_vm7, %v1717_v41, %v1128_v16  ;;  %v10558_v59 = vld [vmem:[#allocation2 + $0x9a] sm:$0xff] }
  0xb2   : > { %1589 = vrot.lane.b32.xlu0 %v10482_v14, %s14935_s18 }
  0xb3   : > { %v1240_v17 = vpop.permute.xlu1 %1239 }
  0xb4   : > { %v10489_v18 = vpop.permute.xlu0 %1129  ;;  %v1775_v46 = vsel %vm14899_vm8, %v1746_v45, %v1240_v17 }
  0xb5   : > { %921 = vrot.lane.b32.xlu1 %v740_v62, %s14902_s22  ;;  %v1747_v63 = vsel %vm1745_vm7, %v1718_v60, %v10489_v18  ;;  %v446_v18 = vld [vmem:[%s10288_s21 + $0x118] sm:$0x3] }
  0xb6   : > { %919 = vrot.lane.b32.xlu0 %v739_v61, %s14902_s22  ;;  %496 = vst.msk [vmem:[#allocation2 + $0x118] sm:$0x3] %vm462_vm3, %v446_v18 }
  0xb7   : > { %v10493_v19 = vpop.permute.xlu1 %907 }
  0xb8   : > { %v10495_v20 = vpop.permute.xlu0 %797  ;;  %v1690_v30 = vsel %vm1687_vm5, %v1661_v29, %v10493_v19 }
  0xb9   : > { %1033 = vrot.lane.b32.xlu1 %v10454_v3, %s10076_s24 }
  0xba   : > { %1031 = vrot.lane.b32.xlu0 %v10456_v4, %s10076_s24 }
  0xbb   : > { %v1352_v21 = vpop.permute.xlu1 %1351 }
  0xbc   : > { %v1242_v22 = vpop.permute.xlu0 %1241  ;;  %v1804_v47 = vsel %vm14898_vm9, %v1775_v46, %v1352_v21  ;;  %v10604_v21 = vld [vmem:[#allocation2 + $0xb0] sm:$0xff] }
  0xbd   : > { %1145 = vrot.lane.b32.xlu1 %v10463_v7, %s10077_s25  ;;  %v1776_v1 = vsel %vm14899_vm8, %v1747_v63, %v1242_v22  ;;  %v10606_v22 = vld [vmem:[#allocation2 + $0xa8] sm:$0xff] }
  0xbe   : > { %1143 = vrot.lane.b32.xlu0 %v10465_v8, %s10077_s25 }
  0xbf   : > { %v10509_v27 = vpop.permute.xlu1 %1019 }
  0xc0   : > { %v10511_v28 = vpop.permute.xlu0 %909 }
  0xc1   : > { %1257 = vrot.lane.b32.xlu1 %v10482_v14, %s10078_s26 }
  0xc2   : > { %1255 = vrot.lane.b32.xlu0 %v10475_v11, %s10078_s26 }
  0xc3   : > { %v1464_v35 = vpop.permute.xlu1 %1463 }
  0xc4   : > { %v1354_v36 = vpop.permute.xlu0 %1353  ;;  %v1833_v52 = vsel %vm14897_vm10, %v1804_v47, %v1464_v35  ;;  %v10620_v35 = vld [vmem:[#allocation2 + $0xa9] sm:$0xff] }
  0xc5   : > { %1369 = vrot.lane.b32.xlu1 %v10518_v32, %s14900_s29  ;;  %v1805_v2 = vsel %vm14898_vm9, %v1776_v1, %v1354_v36  ;;  %v1719_v36 = vsel %vm1716_vm6, %v1690_v30, %v10509_v27 }
  0xc6   : > { %1367 = vrot.lane.b32.xlu0 %v10520_v33, %s14900_s29 }
  0xc7   : > { %v10534_v42 = vpop.permute.xlu1 %1131 }
  0xc8   : > { %v10536_v43 = vpop.permute.xlu0 %1021  ;;  %v1748_v24 = vsel %vm1745_vm7, %v1719_v36, %v10534_v42  ;;  %v1662_v42 = vsel %vm459_vm2, %v10330_v23, %v10495_v20 }
  0xc9   : > { %1481 = vrot.lane.b32.xlu1 %v10529_v38, %s10080_s28  ;;  %v1691_v51 = vsel %vm1687_vm5, %v1662_v42, %v10511_v28 }
  0xca   : > { %1479 = vrot.lane.b32.xlu0 %v10531_v40, %s10080_s28 }
  0xcb   : > { %v1576_v53 = vpop.permute.xlu1 %1575 }
  0xcc   : > { %v1466_v54 = vpop.permute.xlu0 %1465  ;;  %v1862_v55 = vsel %vm14896_vm11, %v1833_v52, %v1576_v53  ;;  %v10646_v52 = vld [vmem:[#allocation2 + $0xb2] sm:$0xff]  ;;  %v1720_v53 = vsel %vm1716_vm6, %v1691_v51, %v10536_v43 }
  0xcd   : > { %811 = vrot.lane.b32.xlu1 %v10465_v8, %s10075_s23  ;;  %8493 = vmatprep.mubr.msk.f32.mxu0 %vm14895_vm12, %v1862_v55  ;;  %v1834_v5 = vsel %vm14897_vm10, %v1805_v2, %v1466_v54 }
  0xce   : > { %1591 = vrot.lane.b32.xlu0 %v10545_v49, %s14935_s18 }
  0xcf   : > { %v10562_v61 = vpop.permute.xlu1 %1133 }
  0xd0   : > { %v10564_v62 = vpop.permute.xlu0 %799  ;;  %v1749_v23 = vsel %vm1745_vm7, %v1720_v53, %v10562_v61 }
  0xd1   : > { %813 = vrot.lane.b32.xlu1 %v10463_v7, %s10075_s23  ;;  %v1663_v63 = vsel %vm459_vm2, %v10350_v31, %v10564_v62  ;;  %v448_v62 = vld [vmem:[%s10288_s21 + $0x128] sm:$0xff] }
  0xd2   : > { %1593 = vrot.lane.b32.xlu0 %v10558_v59, %s14935_s18  ;;  %498 = vst.msk [vmem:[#allocation2 + $0x128] sm:$0xff] %vm459_vm2, %v448_v62  ;;  %v10775_v62 = vld [vmem:[#allocation2 + $0xd8] sm:$0xff] }
  0xd3   : > { %v1578_v6 = vpop.permute.xlu1 %1577 }
  0xd4   : > { %v1244_v8 = vpop.permute.xlu0 %1243  ;;  %v1863_v9 = vsel %vm14896_vm11, %v1834_v5, %v1578_v6 }
  0xd5   : > { %925 = vrot.lane.b32.xlu1 %v10482_v14, %s14902_s22  ;;  %8494 = vmatmul.mubr.msk.f32.vlgmr.msra.gmra.mrb[0].mxu0 %vm14895_vm12, %v1863_v9  ;;  %v444_v14 = vld [vmem:[%s10288_s21 + $0x108] sm:$0xff]  ;;  %v1777_v15 = vsel %vm14899_vm8, %v1748_v24, %v1244_v8  ;;  %v447_v8 = vld [vmem:[%s10288_s21 + $0x120] sm:$0xff] }
  0xd6   : > { %923 = vrot.lane.b32.xlu0 %v10475_v11, %s14902_s22  ;;  %v445_v11 = vld [vmem:[%s10288_s21 + $0x110] sm:$0xff]  ;;  %494 = vst.msk [vmem:[#allocation2 + $0x108] sm:$0xff] %vm459_vm2, %v444_v14  ;;  %497 = vst.msk [vmem:[#allocation2 + $0x120] sm:$0xff] %vm459_vm2, %v447_v8  ;;  %v10717_v24 = vld [vmem:[#allocation2 + $0xc1] sm:$0xff] }
  0xd7   : > { %v10581_v7 = vpop.permute.xlu1 %911  ;;  %495 = vst.msk [vmem:[#allocation2 + $0x110] sm:$0xff] %vm459_vm2, %v445_v11 }
  0xd8   : > { %v10583_v10 = vpop.permute.xlu0 %801 }
  0xd9   : > { %1037 = vrot.lane.b32.xlu1 %v10518_v32, %s10076_s24  ;;  %v1664_v6 = vsel %vm459_vm2, %v10370_v39, %v10583_v10 }
  0xda   : > { %1035 = vrot.lane.b32.xlu0 %v10520_v33, %s10076_s24 }
  0xdb   : > { %v1356_v12 = vpop.permute.xlu1 %1355 }
  0xdc   : > { %v1246_v13 = vpop.permute.xlu0 %1245  ;;  %v1806_v19 = vsel %vm14898_vm9, %v1777_v15, %v1356_v12 }
  0xdd   : > { %1149 = vrot.lane.b32.xlu1 %v10529_v38, %s10077_s25  ;;  %v1778_v20 = vsel %vm14899_vm8, %v1749_v23, %v1246_v13 }
  0xde   : > { %1147 = vrot.lane.b32.xlu0 %v10531_v40, %s10077_s25 }
  0xdf   : > { %v1024_v16 = vpop.permute.xlu1 %1023 }
  0xe0   : > { %v10597_v17 = vpop.permute.xlu0 %913 }
  0xe1   : > { %1261 = vrot.lane.b32.xlu1 %v10558_v59, %s10078_s26  ;;  %v1693_v9 = vsel %vm1687_vm5, %v1664_v6, %v10597_v17  ;;  %v449_v17 = vld [vmem:[%s10288_s21 + $0x130] sm:$0x3] }
  0xe2   : > { %1259 = vrot.lane.b32.xlu0 %v10545_v49, %s10078_s26  ;;  %499 = vst.msk [vmem:[#allocation2 + $0x130] sm:$0x3] %vm462_vm3, %v449_v17 }
  0xe3   : > { %v1468_v25 = vpop.permute.xlu1 %1467 }
  0xe4   : > { %v1358_v26 = vpop.permute.xlu0 %1357  ;;  %v1835_v45 = vsel %vm14897_vm10, %v1806_v19, %v1468_v25  ;;  %v10703_v25 = vld [vmem:[#allocation2 + $0xc8] sm:$0xff] }
  0xe5   : > { %1373 = vrot.lane.b32.xlu1 %v10604_v21, %s14900_s29  ;;  %v1807_v28 = vsel %vm14898_vm9, %v1778_v20, %v1358_v26  ;;  %v10705_v26 = vld [vmem:[#allocation2 + $0xc0] sm:$0xff] }
  0xe6   : > { %1371 = vrot.lane.b32.xlu0 %v10606_v22, %s14900_s29 }
  0xe7   : > { %v1136_v37 = vpop.permute.xlu1 %1135 }
  0xe8   : > { %v1026_v41 = vpop.permute.xlu0 %1025 }
  0xe9   : > { %1485 = vrot.lane.b32.xlu1 %v10618_v34, %s10080_s28  ;;  %v1722_v39 = vsel %vm1716_vm6, %v1693_v9, %v1026_v41  ;;  %v10715_v41 = vld [vmem:[#allocation2 + $0xc9] sm:$0xff] }
  0xea   : > { %1483 = vrot.lane.b32.xlu0 %v10620_v35, %s10080_s28 }
  0xeb   : > { %v1580_v27 = vpop.permute.xlu1 %1579 }
  0xec   : > { %v1470_v46 = vpop.permute.xlu0 %1469  ;;  %v1864_v47 = vsel %vm14896_vm11, %v1835_v45, %v1580_v27  ;;  %v10723_v45 = vld [vmem:[#allocation2 + $0xc2] sm:$0xff] }
  0xed   : > { %815 = vrot.lane.b32.xlu1 %v10531_v40, %s10075_s23  ;;  %8496 = vmatprep.mubr.msk.f32.mxu0 %vm14895_vm12, %v1864_v47  ;;  %v1836_v40 = vsel %vm14897_vm10, %v1807_v28, %v1470_v46  ;;  %v10729_v47 = vld [vmem:[#allocation2 + $0xca] sm:$0xff] }
  0xee   : > { %1595 = vrot.lane.b32.xlu0 %v10632_v44, %s14935_s18 }
  0xef   : > { %v1248_v54 = vpop.permute.xlu1 %1247 }
  0xf0   : > { %v1138_v55 = vpop.permute.xlu0 %1137 }
  0xf1   : > { %817 = vrot.lane.b32.xlu1 %v10529_v38, %s10075_s23  ;;  %v1751_v11 = vsel %vm1745_vm7, %v1722_v39, %v1138_v55 }
  0xf2   : > { %1597 = vrot.lane.b32.xlu0 %v10646_v52, %s14935_s18 }
  0xf3   : > { %v1250_v56 = vpop.permute.xlu1 %1249 }
  0xf4   : > { %v1582_v60 = vpop.permute.xlu0 %1581 }
  0xf5   : > { %v1865_v43 = vsel %vm14896_vm11, %v1836_v40, %v1582_v60  ;;  %929 = vrot.lane.b32.xlu1 %v10558_v59, %s14902_s22  ;;  %v1692_v59 = vsel %vm1687_vm5, %v1663_v63, %v10581_v7  ;;  %v450_v60 = vld [vmem:[%s10288_s21 + $0x138] sm:$0xff] }
  0xf6   : > { %927 = vrot.lane.b32.xlu0 %v10545_v49, %s14902_s22  ;;  %8497 = vmatmul.mubr.msk.f32.gmra.mrb[2].mxu0 %vm14895_vm12, %v1865_v43  ;;  %v1721_v49 = vsel %vm1716_vm6, %v1692_v59, %v1024_v16  ;;  %v1780_v16 = vsel %vm14899_vm8, %v1751_v11, %v1250_v56  ;;  %500 = vst.msk [vmem:[#allocation2 + $0x138] sm:$0xff] %vm459_vm2, %v450_v60 }
  0xf7   : > { %v1362_v38 = vpop.permute.xlu1 %1361  ;;  %v1750_v5 = vsel %vm1745_vm7, %v1721_v49, %v1136_v37 }
  0xf8   : > { %v1360_v61 = vpop.permute.xlu0 %1359  ;;  %v1779_v31 = vsel %vm14899_vm8, %v1750_v5, %v1248_v54  ;;  %v1809_v18 = vsel %vm14898_vm9, %v1780_v16, %v1362_v38  ;;  %v452_v5 = vld [vmem:[%s10288_s21 + $0x148] sm:$0x3] }
  0xf9   : > { %1041 = vrot.lane.b32.xlu1 %v10604_v21, %s10076_s24  ;;  %v1808_v7 = vsel %vm14898_vm9, %v1779_v31, %v1360_v61  ;;  %v10773_v31 = vld [vmem:[#allocation2 + $0xe0] sm:$0xff]  ;;  %502 = vst.msk [vmem:[#allocation2 + $0x148] sm:$0x3] %vm462_vm3, %v452_v5 }
  0xfa   : > { %1039 = vrot.lane.b32.xlu0 %v10606_v22, %s10076_s24 }
  0xfb   : > { %v1474_v1 = vpop.permute.xlu1 %1473 }
  0xfc   : > { %v1472_v2 = vpop.permute.xlu0 %1471  ;;  %v1838_v29 = vsel %vm14897_vm10, %v1809_v18, %v1474_v1  ;;  %v10799_v18 = vld [vmem:[#allocation2 + $0xe2] sm:$0xff] }
  0xfd   : > { %1153 = vrot.lane.b32.xlu1 %v10618_v34, %s10077_s25  ;;  %v1837_v10 = vsel %vm14897_vm10, %v1808_v7, %v1472_v2 }
  0xfe   : > { %1151 = vrot.lane.b32.xlu0 %v10620_v35, %s10077_s25 }
  0xff   : > { %v804_v12 = vpop.permute.xlu1 %803 }
 0x100   : > { %v1584_v13 = vpop.permute.xlu0 %1583  ;;  %v1665_v23 = vsel %vm459_vm2, %v10397_v48, %v804_v12  ;;  %v451_v48 = vld [vmem:[%s10288_s21 + $0x140] sm:$0xff] }
 0x101   : > { %v1866_v14 = vsel %vm14896_vm11, %v1837_v10, %v1584_v13  ;;  %1265 = vrot.lane.b32.xlu1 %v10646_v52, %s10078_s26  ;;  %501 = vst.msk [vmem:[#allocation2 + $0x140] sm:$0xff] %vm459_vm2, %v451_v48  ;;  %v10785_v10 = vld [vmem:[#allocation2 + $0xe1] sm:$0xff]  ;;  %v10787_v12 = vld [vmem:[#allocation2 + $0xd9] sm:$0xff]  ;;  %v10845_v48 = vld [vmem:[#allocation2 + $0xf0] sm:$0xff] }
 0x102   : > { %1263 = vrot.lane.b32.xlu0 %v10632_v44, %s10078_s26  ;;  %8499 = vmatprep.mubr.msk.f32.mxu0 %vm14895_vm12, %v1866_v14  ;;  %v10793_v14 = vld [vmem:[#allocation2 + $0xda] sm:$0xff] }
 0x103   : > { %v806_v30 = vpop.permute.xlu1 %805 }
 0x104   : > { %v1586_v36 = vpop.permute.xlu0 %1585  ;;  %v1666_v40 = vsel %vm459_vm2, %v10405_v50, %v806_v30 }
 0x105   : > { %v1867_v37 = vsel %vm14896_vm11, %v1838_v29, %v1586_v36  ;;  %1377 = vrot.lane.b32.xlu1 %v10703_v25, %s14900_s29 }
 0x106   : > { %1375 = vrot.lane.b32.xlu0 %v10705_v26, %s14900_s29  ;;  %8500 = vmatmul.mubr.msk.f32.gmra.mrb[4].mxu0 %vm14895_vm12, %v1867_v37 }
 0x107   : > { %v918_v15 = vpop.permute.xlu1 %917 }
 0x108   : > { %v916_v19 = vpop.permute.xlu0 %915  ;;  %v1695_v43 = vsel %vm1687_vm5, %v1666_v40, %v918_v15 }
 0x109   : > { %1489 = vrot.lane.b32.xlu1 %v10715_v41, %s10080_s28 }
 0x10a   : > { %1487 = vrot.lane.b32.xlu0 %v10717_v24, %s10080_s28 }
 0x10b   : > { %v1030_v27 = vpop.permute.xlu1 %1029 }
 0x10c   : > { %v1028_v46 = vpop.permute.xlu0 %1027  ;;  %v1724_v50 = vsel %vm1716_vm6, %v1695_v43, %v1030_v27 }
 0x10d   : > { %819 = vrot.lane.b32.xlu1 %v10620_v35, %s10075_s23 }
 0x10e   : > { %1599 = vrot.lane.b32.xlu0 %v10723_v45, %s14935_s18 }
 0x10f   : > { %v1142_v42 = vpop.permute.xlu1 %1141 }
 0x110   : > { %v1140_v51 = vpop.permute.xlu0 %1139  ;;  %v1753_v49 = vsel %vm1745_vm7, %v1724_v50, %v1142_v42 }
 0x111   : > { %821 = vrot.lane.b32.xlu1 %v10618_v34, %s10075_s23  ;;  %v1694_v34 = vsel %vm1687_vm5, %v1665_v23, %v916_v19 }
 0x112   : > { %1601 = vrot.lane.b32.xlu0 %v10729_v47, %s14935_s18 }
 0x113   : > { %v1254_v53 = vpop.permute.xlu1 %1253 }
 0x114   : > { %v1252_v54 = vpop.permute.xlu0 %1251  ;;  %v1782_v2 = vsel %vm14899_vm8, %v1753_v49, %v1254_v53  ;;  %v453_v53 = vld [vmem:[%s10288_s21 + $0x150] sm:$0xff] }
 0x115   : > { %933 = vrot.lane.b32.xlu1 %v10646_v52, %s14902_s22  ;;  %v1723_v52 = vsel %vm1716_vm6, %v1694_v34, %v1028_v46  ;;  %503 = vst.msk [vmem:[#allocation2 + $0x150] sm:$0xff] %vm459_vm2, %v453_v53 }
 0x116   : > { %931 = vrot.lane.b32.xlu0 %v10632_v44, %s14902_s22  ;;  %v1752_v44 = vsel %vm1745_vm7, %v1723_v52, %v1140_v51 }
 0x117   : > { %v1366_v35 = vpop.permute.xlu1 %1365  ;;  %v1781_v56 = vsel %vm14899_vm8, %v1752_v44, %v1252_v54  ;;  %v455_v44 = vld [vmem:[%s10288_s21 + $0x160] sm:$0x3] }
 0x118   : > { %v1364_v55 = vpop.permute.xlu0 %1363  ;;  %v1811_v6 = vsel %vm14898_vm9, %v1782_v2, %v1366_v35  ;;  %505 = vst.msk [vmem:[#allocation2 + $0x160] sm:$0x3] %vm462_vm3, %v455_v44 }
 0x119   : > { %1045 = vrot.lane.b32.xlu1 %v10703_v25, %s10076_s24  ;;  %v1810_v38 = vsel %vm14898_vm9, %v1781_v56, %v1364_v55  ;;  %v10843_v56 = vld [vmem:[#allocation2 + $0xf8] sm:$0xff] }
 0x11a   : > { %1043 = vrot.lane.b32.xlu0 %v10705_v26, %s10076_s24 }
 0x11b   : > { %v1478_v20 = vpop.permute.xlu1 %1477 }
 0x11c   : > { %v1476_v28 = vpop.permute.xlu0 %1475  ;;  %v1840_v8 = vsel %vm14897_vm10, %v1811_v6, %v1478_v20  ;;  %v10869_v6 = vld [vmem:[#allocation2 + $0xfa] sm:$0xff] }
 0x11d   : > { %1157 = vrot.lane.b32.xlu1 %v10715_v41, %s10077_s25  ;;  %v1839_v61 = vsel %vm14897_vm10, %v1810_v38, %v1476_v28 }
 0x11e   : > { %1155 = vrot.lane.b32.xlu0 %v10717_v24, %s10077_s25 }
 0x11f   : > { %v808_v63 = vpop.permute.xlu1 %807 }
 0x120   : > { %v1588_v59 = vpop.permute.xlu0 %1587  ;;  %v1667_v19 = vsel %vm459_vm2, %v10426_v58, %v808_v63  ;;  %v454_v58 = vld [vmem:[%s10288_s21 + $0x158] sm:$0xff] }
 0x121   : > { %v1868_v1 = vsel %vm14896_vm11, %v1839_v61, %v1588_v59  ;;  %1269 = vrot.lane.b32.xlu1 %v10729_v47, %s10078_s26  ;;  %504 = vst.msk [vmem:[#allocation2 + $0x158] sm:$0xff] %vm459_vm2, %v454_v58  ;;  %v10855_v61 = vld [vmem:[#allocation2 + $0xf9] sm:$0xff]  ;;  %v10857_v63 = vld [vmem:[#allocation2 + $0xf1] sm:$0xff]  ;;  %v10915_v58 = vld [vmem:[#allocation2 + $0x108] sm:$0xff] }
 0x122   : > { %1267 = vrot.lane.b32.xlu0 %v10723_v45, %s10078_s26  ;;  %8502 = vmatprep.mubr.msk.f32.mxu0 %vm14895_vm12, %v1868_v1  ;;  %v10863_v1 = vld [vmem:[#allocation2 + $0xf2] sm:$0xff] }
 0x123   : > { %v810_v9 = vpop.permute.xlu1 %809 }
 0x124   : > { %v1590_v7 = vpop.permute.xlu0 %1589  ;;  %v1668_v42 = vsel %vm459_vm2, %v10424_v57, %v810_v9 }
 0x125   : > { %v1869_v39 = vsel %vm14896_vm11, %v1840_v8, %v1590_v7  ;;  %1381 = vrot.lane.b32.xlu1 %v10773_v31, %s14900_s29 }
 0x126   : > { %1379 = vrot.lane.b32.xlu0 %v10775_v62, %s14900_s29  ;;  %8503 = vmatmul.mubr.msk.f32.gmra.mrb[6].mxu0 %vm14895_vm12, %v1869_v39 }
 0x127   : > { %v922_v13 = vpop.permute.xlu1 %921 }
 0x128   : > { %v920_v11 = vpop.permute.xlu0 %919  ;;  %v1697_v54 = vsel %vm1687_vm5, %v1668_v42, %v922_v13 }
 0x129   : > { %1493 = vrot.lane.b32.xlu1 %v10785_v10, %s10080_s28 }
 0x12a   : > { %1491 = vrot.lane.b32.xlu0 %v10787_v12, %s10080_s28 }
 0x12b   : > { %v1034_v16 = vpop.permute.xlu1 %1033 }
 0x12c   : > { %v1032_v17 = vpop.permute.xlu0 %1031  ;;  %v1726_v57 = vsel %vm1716_vm6, %v1697_v54, %v1034_v16 }
 0x12d   : > { %823 = vrot.lane.b32.xlu1 %v10717_v24, %s10075_s23 }
 0x12e   : > { %1603 = vrot.lane.b32.xlu0 %v10793_v14, %s14935_s18 }
 0x12f   : > { %v1146_v29 = vpop.permute.xlu1 %1145 }
 0x130   : > { %v1144_v30 = vpop.permute.xlu0 %1143  ;;  %v1755_v52 = vsel %vm1745_vm7, %v1726_v57, %v1146_v29 }
 0x131   : > { %825 = vrot.lane.b32.xlu1 %v10715_v41, %s10075_s23  ;;  %v1696_v41 = vsel %vm1687_vm5, %v1667_v19, %v920_v11 }
 0x132   : > { %1605 = vrot.lane.b32.xlu0 %v10799_v18, %s14935_s18  ;;  %v1725_v27 = vsel %vm1716_vm6, %v1696_v41, %v1032_v17 }
 0x133   : > { %v1258_v36 = vpop.permute.xlu1 %1257 }
 0x134   : > { %v1256_v37 = vpop.permute.xlu0 %1255  ;;  %v1784_v28 = vsel %vm14899_vm8, %v1755_v52, %v1258_v36  ;;  %v456_v36 = vld [vmem:[%s10288_s21 + $0x168] sm:$0xff] }
 0x135   : > { %937 = vrot.lane.b32.xlu1 %v10729_v47, %s14902_s22  ;;  %506 = vst.msk [vmem:[#allocation2 + $0x168] sm:$0xff] %vm459_vm2, %v456_v36 }
 0x136   : > { %935 = vrot.lane.b32.xlu0 %v10723_v45, %s14902_s22  ;;  %v1754_v45 = vsel %vm1745_vm7, %v1725_v27, %v1144_v30 }
 0x137   : > { %v1370_v24 = vpop.permute.xlu1 %1369  ;;  %v1783_v51 = vsel %vm14899_vm8, %v1754_v45, %v1256_v37  ;;  %v458_v45 = vld [vmem:[%s10288_s21 + $0x178] sm:$0x3] }
 0x138   : > { %v1368_v15 = vpop.permute.xlu0 %1367  ;;  %v1813_v40 = vsel %vm14898_vm9, %v1784_v28, %v1370_v24  ;;  %508 = vst.msk [vmem:[#allocation2 + $0x178] sm:$0x3] %vm462_vm3, %v458_v45 }
 0x139   : > { %1049 = vrot.lane.b32.xlu1 %v10773_v31, %s10076_s24  ;;  %v1812_v35 = vsel %vm14898_vm9, %v1783_v51, %v1368_v15  ;;  %v10913_v51 = vld [vmem:[#allocation2 + $0x110] sm:$0xff] }
 0x13a   : > { %1047 = vrot.lane.b32.xlu0 %v10775_v62, %s10076_s24 }
 0x13b   : > { %v1482_v46 = vpop.permute.xlu1 %1481 }
 0x13c   : > { %v1480_v47 = vpop.permute.xlu0 %1479  ;;  %v1842_v60 = vsel %vm14897_vm10, %v1813_v40, %v1482_v46  ;;  %v754_v40 = vld [vmem:[#allocation2 + $0x112] sm:$0xff] }
 0x13d   : > { %1161 = vrot.lane.b32.xlu1 %v10785_v10, %s10077_s25  ;;  %v1841_v55 = vsel %vm14897_vm10, %v1812_v35, %v1480_v47 }
 0x13e   : > { %1159 = vrot.lane.b32.xlu0 %v10787_v12, %s10077_s25 }
 0x13f   : > { %v812_v23 = vpop.permute.xlu1 %811 }
 0x140   : > { %v1592_v34 = vpop.permute.xlu0 %1591  ;;  %v1669_v11 = vsel %vm459_vm2, %v10456_v4, %v812_v23  ;;  %v457_v4 = vld [vmem:[%s10288_s21 + $0x170] sm:$0xff]  ;;  %s11139_s21 = sshll.u32 %s10055_s30, 3 }
 0x141   : > { %v1870_v20 = vsel %vm14896_vm11, %v1841_v55, %v1592_v34  ;;  %1273 = vrot.lane.b32.xlu1 %v10799_v18, %s10078_s26  ;;  %507 = vst.msk [vmem:[#allocation2 + $0x170] sm:$0xff] %vm459_vm2, %v457_v4  ;;  %v10925_v55 = vld [vmem:[#allocation2 + $0x111] sm:$0xff]  ;;  %v10927_v23 = vld [vmem:[#allocation2 + $0x109] sm:$0xff]  ;;  %s8073_s30 = sadd.s32 4294967293, %s11139_s21  ;;  %p350_p6 = scmp.lt.s32.totalorder %s11139_s21, 15 }
 0x142   : > { %1271 = vrot.lane.b32.xlu0 %v10793_v14, %s10078_s26  ;;  %8505 = vmatprep.mubr.msk.f32.mxu0 %vm14895_vm12, %v1870_v20  ;;  %v10933_v20 = vld [vmem:[#allocation2 + $0x10a] sm:$0xff] }
 0x143   : > { %v814_v43 = vpop.permute.xlu1 %813 }
 0x144   : > { %v1594_v38 = vpop.permute.xlu0 %1593  ;;  %v1670_v29 = vsel %vm459_vm2, %v10454_v3, %v814_v43 }
 0x145   : > { %v1871_v50 = vsel %vm14896_vm11, %v1842_v60, %v1594_v38  ;;  %1385 = vrot.lane.b32.xlu1 %v10843_v56, %s14900_s29 }
 0x146   : > { %1383 = vrot.lane.b32.xlu0 %v10845_v48, %s14900_s29  ;;  %8506 = vmatmul.mubr.msk.f32.gmra.mrb[8].mxu0 %vm14895_vm12, %v1871_v50 }
 0x147   : > { %v926_v59 = vpop.permute.xlu1 %925 }
 0x148   : > { %v924_v49 = vpop.permute.xlu0 %923  ;;  %v1699_v37 = vsel %vm1687_vm5, %v1670_v29, %v926_v59 }
 0x149   : > { %1497 = vrot.lane.b32.xlu1 %v10855_v61, %s10080_s28 }
 0x14a   : > { %1495 = vrot.lane.b32.xlu0 %v10857_v63, %s10080_s28 }
 0x14b   : > { %v1038_v2 = vpop.permute.xlu1 %1037 }
 0x14c   : > { %v1036_v5 = vpop.permute.xlu0 %1035  ;;  %v1728_v3 = vsel %vm1716_vm6, %v1699_v37, %v1038_v2  ;;  %v10985_v37 = vld [vmem:[#allocation2 + $0x129] sm:$0xff] }
 0x14d   : > { %827 = vrot.lane.b32.xlu1 %v10787_v12, %s10075_s23 }
 0x14e   : > { %1607 = vrot.lane.b32.xlu0 %v10863_v1, %s14935_s18 }
 0x14f   : > { %v1150_v8 = vpop.permute.xlu1 %1149 }
 0x150   : > { %v1148_v9 = vpop.permute.xlu0 %1147  ;;  %v1757_v27 = vsel %vm1745_vm7, %v1728_v3, %v1150_v8 }
 0x151   : > { %829 = vrot.lane.b32.xlu1 %v10785_v10, %s10075_s23  ;;  %v1698_v10 = vsel %vm1687_vm5, %v1669_v11, %v924_v49 }
 0x152   : > { %1609 = vrot.lane.b32.xlu0 %v10869_v6, %s14935_s18  ;;  %v1727_v16 = vsel %vm1716_vm6, %v1698_v10, %v1036_v5 }
 0x153   : > { %v1262_v7 = vpop.permute.xlu1 %1261 }
 0x154   : > { %v1260_v39 = vpop.permute.xlu0 %1259  ;;  %v1786_v47 = vsel %vm14899_vm8, %v1757_v27, %v1262_v7 }
 0x155   : > { %941 = vrot.lane.b32.xlu1 %v10799_v18, %s14902_s22 }
 0x156   : > { %939 = vrot.lane.b32.xlu0 %v10793_v14, %s14902_s22  ;;  %v1756_v14 = vsel %vm1745_vm7, %v1727_v16, %v1148_v9 }
 0x157   : > { %v1374_v12 = vpop.permute.xlu1 %1373  ;;  %v1785_v30 = vsel %vm14899_vm8, %v1756_v14, %v1260_v39  ;;  %v10976_v14 = vld [vmem:[#allocation2 + $0x120] sm:$0xff] }
 0x158   : > { %v1372_v13 = vpop.permute.xlu0 %1371  ;;  %v1815_v42 = vsel %vm14898_vm9, %v1786_v47, %v1374_v12 }
 0x159   : > { %1053 = vrot.lane.b32.xlu1 %v10843_v56, %s10076_s24  ;;  %v1814_v24 = vsel %vm14898_vm9, %v1785_v30, %v1372_v13 }
 0x15a   : > { %1051 = vrot.lane.b32.xlu0 %v10845_v48, %s10076_s24 }
 0x15b   : > { %v1486_v17 = vpop.permute.xlu1 %1485 }
 0x15c   : > { %v1484_v18 = vpop.permute.xlu0 %1483  ;;  %v1844_v53 = vsel %vm14897_vm10, %v1815_v42, %v1486_v17 }
 0x15d   : > { %1165 = vrot.lane.b32.xlu1 %v10855_v61, %s10077_s25  ;;  %v1843_v15 = vsel %vm14897_vm10, %v1814_v24, %v1484_v18  ;;  %v10974_v18 = vld [vmem:[#allocation2 + $0x128] sm:$0xff] }
 0x15e   : > { %1163 = vrot.lane.b32.xlu0 %v10857_v63, %s10077_s25  ;;  %v10987_v24 = vld [vmem:[#allocation2 + $0x121] sm:$0xff] }
 0x15f   : > { %v816_v19 = vpop.permute.xlu1 %815 }
 0x160   : > { %v1596_v41 = vpop.permute.xlu0 %1595  ;;  %v1671_v49 = vsel %vm459_vm2, %v10520_v33, %v816_v19  ;;  %v10993_v19 = vld [vmem:[#allocation2 + $0x122] sm:$0xff] }
 0x161   : > { %v1872_v46 = vsel %vm14896_vm11, %v1843_v15, %v1596_v41  ;;  %1277 = vrot.lane.b32.xlu1 %v10869_v6, %s10078_s26 }
 0x162   : > { %1275 = vrot.lane.b32.xlu0 %v10863_v1, %s10078_s26  ;;  %8508 = vmatprep.mubr.msk.f32.mxu0 %vm14895_vm12, %v1872_v46  ;;  %v10999_v46 = vld [vmem:[#allocation2 + $0x12a] sm:$0xff] }
 0x163   : > { %v818_v54 = vpop.permute.xlu1 %817 }
 0x164   : > { %v1598_v35 = vpop.permute.xlu0 %1597 }
 0x165   : > { %v1873_v57 = vsel %vm14896_vm11, %v1844_v53, %v1598_v35  ;;  %1389 = vrot.lane.b32.xlu1 %v10913_v51, %s14900_s29 }
 0x166   : > { %1387 = vrot.lane.b32.xlu0 %v10915_v58, %s14900_s29  ;;  %8509 = vmatmul.mubr.msk.f32.gmra.mrb[10].mxu0 %vm14895_vm12, %v1873_v57 }
 0x167   : > { %v930_v34 = vpop.permute.xlu1 %929 }
 0x168   : > { %v928_v52 = vpop.permute.xlu0 %927 }
 0x169   : > { %1501 = vrot.lane.b32.xlu1 %v10925_v55, %s10080_s28 }
 0x16a   : > { %1499 = vrot.lane.b32.xlu0 %v10927_v23, %s10080_s28 }
 0x16b   : > { %v1042_v28 = vpop.permute.xlu1 %1041 }
 0x16c   : > { %v1040_v44 = vpop.permute.xlu0 %1039 }
 0x16d   : > { %831 = vrot.lane.b32.xlu1 %v10857_v63, %s10075_s23 }
 0x16e   : > { %1611 = vrot.lane.b32.xlu0 %v10933_v20, %s14935_s18 }
 0x16f   : > { %v1154_v60 = vpop.permute.xlu1 %1153 }
 0x170   : > { %v1152_v43 = vpop.permute.xlu0 %1151 }
 0x171   : > { %833 = vrot.lane.b32.xlu1 %v10855_v61, %s10075_s23  ;;  %v1700_v61 = vsel %vm1687_vm5, %v1671_v49, %v928_v52 }
 0x172   : > { %1613 = vrot.lane.b32.xlu0 %v754_v40, %s14935_s18  ;;  %v1729_v2 = vsel %vm1716_vm6, %v1700_v61, %v1040_v44  ;;  %v11037_v61 = vld [vmem:[#allocation2 + $0x140] sm:$0xff] }
 0x173   : > { %v1266_v38 = vpop.permute.xlu1 %1265  ;;  %v1758_v8 = vsel %vm1745_vm7, %v1729_v2, %v1152_v43  ;;  %v11039_v2 = vld [vmem:[#allocation2 + $0x138] sm:$0xff] }
 0x174   : > { %v1264_v50 = vpop.permute.xlu0 %1263 }
 0x175   : > { %945 = vrot.lane.b32.xlu1 %v10869_v6, %s14902_s22  ;;  %v1787_v9 = vsel %vm14899_vm8, %v1758_v8, %v1264_v50 }
 0x176   : > { %943 = vrot.lane.b32.xlu0 %v10863_v1, %s14902_s22  ;;  %v1672_v1 = vsel %vm459_vm2, %v10518_v32, %v818_v54 }
 0x177   : > { %v1378_v63 = vpop.permute.xlu1 %1377  ;;  %v1701_v33 = vsel %vm1687_vm5, %v1672_v1, %v930_v34 }
 0x178   : > { %v1376_v59 = vpop.permute.xlu0 %1375  ;;  %v1730_v39 = vsel %vm1716_vm6, %v1701_v33, %v1042_v28  ;;  %v11050_v33 = vld [vmem:[#allocation2 + $0x139] sm:$0xff] }
 0x179   : > { %1057 = vrot.lane.b32.xlu1 %v10913_v51, %s10076_s24  ;;  %v1816_v7 = vsel %vm14898_vm9, %v1787_v9, %v1376_v59  ;;  %v1759_v32 = vsel %vm1745_vm7, %v1730_v39, %v1154_v60  ;;  %v11048_v9 = vld [vmem:[#allocation2 + $0x141] sm:$0xff] }
 0x17a   : > { %1055 = vrot.lane.b32.xlu0 %v10915_v58, %s10076_s24  ;;  %v1788_v16 = vsel %vm14899_vm8, %v1759_v32, %v1266_v38 }
 0x17b   : > { %v1490_v5 = vpop.permute.xlu1 %1489  ;;  %v1817_v17 = vsel %vm14898_vm9, %v1788_v16, %v1378_v63  ;;  %v11066_v16 = vld [vmem:[#allocation2 + $0x142] sm:$0xff] }
 0x17c   : > { %v1488_v6 = vpop.permute.xlu0 %1487  ;;  %v1846_v29 = vsel %vm14897_vm10, %v1817_v17, %v1490_v5 }
 0x17d   : > { %1169 = vrot.lane.b32.xlu1 %v10925_v55, %s10077_s25  ;;  %v1845_v12 = vsel %vm14897_vm10, %v1816_v7, %v1488_v6 }
 0x17e   : > { %1167 = vrot.lane.b32.xlu0 %v10927_v23, %s10077_s25 }
 0x17f   : > { %v820_v13 = vpop.permute.xlu1 %819 }
 0x180   : > { %v1600_v11 = vpop.permute.xlu0 %1599  ;;  %v1673_v57 = vsel %vm459_vm2, %v10606_v22, %v820_v13 }
 0x181   : > { %v1874_v10 = vsel %vm14896_vm11, %v1845_v12, %v1600_v11  ;;  %1281 = vrot.lane.b32.xlu1 %v754_v40, %s10078_s26  ;;  %v11060_v11 = vld [vmem:[#allocation2 + $0x13a] sm:$0xff] }
 0x182   : > { %1279 = vrot.lane.b32.xlu0 %v10933_v20, %s10078_s26  ;;  %8511 = vmatprep.mubr.msk.f32.mxu0 %vm14895_vm12, %v1874_v10 }
 0x183   : > { %v822_v30 = vpop.permute.xlu1 %821 }
 0x184   : > { %v1602_v4 = vpop.permute.xlu0 %1601 }
 0x185   : > { %v1875_v36 = vsel %vm14896_vm11, %v1846_v29, %v1602_v4  ;;  %1393 = vrot.lane.b32.xlu1 %v10974_v18, %s14900_s29 }
 0x186   : > { %1391 = vrot.lane.b32.xlu0 %v10976_v14, %s14900_s29  ;;  %8512 = vmatmul.mubr.msk.f32.gmra.mrb[12].mxu0 %vm14895_vm12, %v1875_v36 }
 0x187   : > { %v934_v3 = vpop.permute.xlu1 %933 }
 0x188   : > { %v932_v15 = vpop.permute.xlu0 %931 }
 0x189   : > { %1505 = vrot.lane.b32.xlu1 %v10985_v37, %s10080_s28 }
 0x18a   : > { %1503 = vrot.lane.b32.xlu0 %v10987_v24, %s10080_s28 }
 0x18b   : > { %v1046_v41 = vpop.permute.xlu1 %1045 }
 0x18c   : > { %v1044_v27 = vpop.permute.xlu0 %1043 }
 0x18d   : > { %835 = vrot.lane.b32.xlu1 %v10927_v23, %s10075_s23 }
 0x18e   : > { %1615 = vrot.lane.b32.xlu0 %v10993_v19, %s14935_s18 }
 0x18f   : > { %v1158_v47 = vpop.permute.xlu1 %1157 }
 0x190   : > { %v1156_v45 = vpop.permute.xlu0 %1155 }
 0x191   : > { %837 = vrot.lane.b32.xlu1 %v10925_v55, %s10075_s23  ;;  %v1702_v55 = vsel %vm1687_vm5, %v1673_v57, %v932_v15 }
 0x192   : > { %1617 = vrot.lane.b32.xlu0 %v10999_v46, %s14935_s18  ;;  %v1731_v23 = vsel %vm1716_vm6, %v1702_v55, %v1044_v27 }
 0x193   : > { %v1270_v42 = vpop.permute.xlu1 %1269  ;;  %v1760_v28 = vsel %vm1745_vm7, %v1731_v23, %v1156_v45 }
 0x194   : > { %v1268_v53 = vpop.permute.xlu0 %1267 }
 0x195   : > { %949 = vrot.lane.b32.xlu1 %v754_v40, %s14902_s22  ;;  %v1789_v44 = vsel %vm14899_vm8, %v1760_v28, %v1268_v53 }
 0x196   : > { %947 = vrot.lane.b32.xlu0 %v10933_v20, %s14902_s22  ;;  %v1674_v20 = vsel %vm459_vm2, %v10604_v21, %v822_v30 }
 0x197   : > { %v1382_v54 = vpop.permute.xlu1 %1381  ;;  %v1703_v22 = vsel %vm1687_vm5, %v1674_v20, %v934_v3 }
 0x198   : > { %v1380_v35 = vpop.permute.xlu0 %1379  ;;  %v1732_v60 = vsel %vm1716_vm6, %v1703_v22, %v1046_v41 }
 0x199   : > { %1061 = vrot.lane.b32.xlu1 %v10974_v18, %s10076_s24  ;;  %v1818_v40 = vsel %vm14898_vm9, %v1789_v44, %v1380_v35  ;;  %v1761_v21 = vsel %vm1745_vm7, %v1732_v60, %v1158_v47  ;;  %v731_v60 = vld [vmem:[#allocation2 + $0x151] sm:$0xff] }
 0x19a   : > { %1059 = vrot.lane.b32.xlu0 %v10976_v14, %s10076_s24  ;;  %v1790_v59 = vsel %vm14899_vm8, %v1761_v21, %v1270_v42 }
 0x19b   : > { %v1494_v34 = vpop.permute.xlu1 %1493  ;;  %v1819_v49 = vsel %vm14898_vm9, %v1790_v59, %v1382_v54  ;;  %v759_v59 = vld [vmem:[#allocation2 + $0x152] sm:$0xff] }
 0x19c   : > { %v1492_v52 = vpop.permute.xlu0 %1491  ;;  %v1848_v5 = vsel %vm14897_vm10, %v1819_v49, %v1494_v34  ;;  %v704_v34 = vld [vmem:[#allocation2 + $0x158] sm:$0xff] }
 0x19d   : > { %1173 = vrot.lane.b32.xlu1 %v10985_v37, %s10077_s25  ;;  %v1847_v43 = vsel %vm14897_vm10, %v1818_v40, %v1492_v52  ;;  %v703_v52 = vld [vmem:[#allocation2 + $0x150] sm:$0xff]  ;;  %v732_v40 = vld [vmem:[#allocation2 + $0x159] sm:$0xff] }
 0x19e   : > { %1171 = vrot.lane.b32.xlu0 %v10987_v24, %s10077_s25 }
 0x19f   : > { %v824_v38 = vpop.permute.xlu1 %823 }
 0x1a0   : > { %v1604_v50 = vpop.permute.xlu0 %1603  ;;  %v1675_v3 = vsel %vm459_vm2, %v10705_v26, %v824_v38 }
 0x1a1   : > { %v1876_v63 = vsel %vm14896_vm11, %v1847_v43, %v1604_v50  ;;  %1285 = vrot.lane.b32.xlu1 %v10999_v46, %s10078_s26 }
 0x1a2   : > { %1283 = vrot.lane.b32.xlu0 %v10993_v19, %s10078_s26  ;;  %8514 = vmatprep.mubr.msk.f32.mxu0 %vm14895_vm12, %v1876_v63  ;;  %v760_v63 = vld [vmem:[#allocation2 + $0x15a] sm:$0xff] }
 0x1a3   : > { %v826_v6 = vpop.permute.xlu1 %825 }
 0x1a4   : > { %v1606_v8 = vpop.permute.xlu0 %1605 }
 0x1a5   : > { %v1877_v1 = vsel %vm14896_vm11, %v1848_v5, %v1606_v8  ;;  %1397 = vrot.lane.b32.xlu1 %v11037_v61, %s14900_s29 }
 0x1a6   : > { %1395 = vrot.lane.b32.xlu0 %v11039_v2, %s14900_s29  ;;  %8515 = vmatmul.mubr.msk.f32.gmra.mrb[14].mxu0 %vm14895_vm12, %v1877_v1 }
 0x1a7   : > { %v938_v7 = vpop.permute.xlu1 %937 }
 0x1a8   : > { %v936_v39 = vpop.permute.xlu0 %935  ;;  %v11052_v12 = vpop.f32.mrb[0].mxu0 }
 0x1a9   : > { %1509 = vrot.lane.b32.xlu1 %v11048_v9, %s10080_s28  ;;  %v11058_v13 = vpop.f32.mrb[1].mxu0 }
 0x1aa   : > { %1507 = vrot.lane.b32.xlu0 %v11050_v33, %s10080_s28 }
 0x1ab   : > { %v1050_v32 = vpop.permute.xlu1 %1049 }
 0x1ac   : > { %v1048_v10 = vpop.permute.xlu0 %1047 }
 0x1ad   : > { %839 = vrot.lane.b32.xlu1 %v10987_v24, %s10075_s23 }
 0x1ae   : > { %1619 = vrot.lane.b32.xlu0 %v11060_v11, %s14935_s18 }
 0x1af   : > { %v1162_v17 = vpop.permute.xlu1 %1161 }
 0x1b0   : > { %v1160_v29 = vpop.permute.xlu0 %1159 }
 0x1b1   : > { %841 = vrot.lane.b32.xlu1 %v10985_v37, %s10075_s23  ;;  %v1704_v37 = vsel %vm1687_vm5, %v1675_v3, %v936_v39 }
 0x1b2   : > { %1621 = vrot.lane.b32.xlu0 %v11066_v16, %s14935_s18  ;;  %v1733_v15 = vsel %vm1716_vm6, %v1704_v37, %v1048_v10 }
 0x1b3   : > { %v1274_v30 = vpop.permute.xlu1 %1273 }
 0x1b4   : > { %v1272_v4 = vpop.permute.xlu0 %1271 }
 0x1b5   : > { %953 = vrot.lane.b32.xlu1 %v10999_v46, %s14902_s22  ;;  %v1762_v46 = vsel %vm1745_vm7, %v1733_v15, %v1160_v29 }
 0x1b6   : > { %951 = vrot.lane.b32.xlu0 %v10993_v19, %s14902_s22  ;;  %v1676_v19 = vsel %vm459_vm2, %v10703_v25, %v826_v6  ;;  %v1791_v47 = vsel %vm14899_vm8, %v1762_v46, %v1272_v4 }
 0x1b7   : > { %v1386_v36 = vpop.permute.xlu1 %1385  ;;  %v1705_v26 = vsel %vm1687_vm5, %v1676_v19, %v938_v7 }
 0x1b8   : > { %v1384_v24 = vpop.permute.xlu0 %1383  ;;  %v1734_v42 = vsel %vm1716_vm6, %v1705_v26, %v1050_v32  ;;  %v705_v26 = vld [vmem:[#allocation2 + $0x168] sm:$0xff] }
 0x1b9   : > { %1065 = vrot.lane.b32.xlu1 %v11037_v61, %s10076_s24  ;;  %v1820_v45 = vsel %vm14898_vm9, %v1791_v47, %v1384_v24  ;;  %v1763_v25 = vsel %vm1745_vm7, %v1734_v42, %v1162_v17  ;;  %v706_v47 = vld [vmem:[#allocation2 + $0x170] sm:$0xff] }
 0x1ba   : > { %1063 = vrot.lane.b32.xlu0 %v11039_v2, %s10076_s24  ;;  %v1792_v55 = vsel %vm14899_vm8, %v1763_v25, %v1274_v30  ;;  %v11162_v25 = vstv %s8073_s30  ;;  %s8100_s30 = sadd.s32 4294967294, %s11139_s21 }
 0x1bb   : > { %v1498_v41 = vpop.permute.xlu1 %1497  ;;  %v1821_v23 = vsel %vm14898_vm9, %v1792_v55, %v1386_v36  ;;  %vm2295_vm3 = vcmp.ge.s32.totalorder %v11162_v25, 0  ;;  %vm2309_vm0 = vcmp.lt.s32.totalorder %v11162_v25, 16 }
 0x1bc   : > { %v1496_v27 = vpop.permute.xlu0 %1495  ;;  %v1850_v28 = vsel %vm14897_vm10, %v1821_v23, %v1498_v41  ;;  %v2282_v23 = vadd.s32 1, %v11162_v25 }
 0x1bd   : > { %1177 = vrot.lane.b32.xlu1 %v11048_v9, %s10077_s25  ;;  %v1849_v53 = vsel %vm14897_vm10, %v1820_v45, %v1496_v27 }
 0x1be   : > { %1175 = vrot.lane.b32.xlu0 %v11050_v33, %s10077_s25  ;;  %vm2296_vm13 = vcmp.ge.s32.totalorder %v2282_v23, 0  ;;  %vm2310_vm1 = vcmp.lt.s32.totalorder %v2282_v23, 16 }
 0x1bf   : > { %v828_v54 = vpop.permute.xlu1 %827  ;;  %vm2324_vm4 = vmand %vm2296_vm13, %vm2310_vm1  ;;  %vm14945_vm1 = vcmask 228352  }
 0x1c0   : > { %v1608_v35 = vpop.permute.xlu0 %1607  ;;  %v1677_v10 = vsel %vm459_vm2, %v10775_v62, %v828_v54  ;;  %v11159_v54 = vld [vmem:[%s14885_s2] ss:$0 sm:$0xff] }
 0x1c1   : > { %v1878_v57 = vsel %vm14896_vm11, %v1849_v53, %v1608_v35  ;;  %1289 = vrot.lane.b32.xlu1 %v11066_v16, %s10078_s26 }
 0x1c2   : > { %1287 = vrot.lane.b32.xlu0 %v11060_v11, %s10078_s26  ;;  %8517 = vmatprep.mubr.msk.f32.mxu0 %vm14895_vm12, %v1878_v57 }
 0x1c3   : > { %v830_v20 = vpop.permute.xlu1 %829 }
 0x1c4   : > { %v1610_v44 = vpop.permute.xlu0 %1609  ;;  %v1678_v4 = vsel %vm459_vm2, %v10773_v31, %v830_v20 }
 0x1c5   : > { %v1879_v22 = vsel %vm14896_vm11, %v1850_v28, %v1610_v44  ;;  %1401 = vrot.lane.b32.xlu1 %v704_v34, %s14900_s29  ;;  %v2058_v44 = vadd.f32 %v11159_v54, %v11058_v13  ;;  %v2063_v13 = vadd.f32 %v11052_v12, %v11159_v54 }
 0x1c6   : > { %1399 = vrot.lane.b32.xlu0 %v703_v52, %s14900_s29  ;;  %8518 = vmatmul.mubr.msk.f32.gmra.mrb[16].mxu0 %vm14895_vm12, %v1879_v22 }
 0x1c7   : > { %v942_v43 = vpop.permute.xlu1 %941 }
 0x1c8   : > { %v940_v38 = vpop.permute.xlu0 %939  ;;  %v1707_v36 = vsel %vm1687_vm5, %v1678_v4, %v942_v43  ;;  %v762_v43 = vld [vmem:[#allocation2 + $0x172] sm:$0xff] }
 0x1c9   : > { %v8498_v50 = vpop.f32.mrb[2].mxu0  ;;  %1513 = vrot.lane.b32.xlu1 %v732_v40, %s10080_s28 }
 0x1ca   : > { %1511 = vrot.lane.b32.xlu0 %v731_v60, %s10080_s28  ;;  %v2067_v21 = vpop.f32.mrb[3].mxu0  ;;  %v2073_v57 = vadd.f32 %v8498_v50, %v11159_v54  ;;  %v2283_v50 = vadd.s32 2, %v11162_v25 }
 0x1cb   : > { %v1054_v49 = vpop.permute.xlu1 %1053  ;;  %v2068_v55 = vadd.f32 %v11159_v54, %v2067_v21 }
 0x1cc   : > { %v1052_v5 = vpop.permute.xlu0 %1051  ;;  %v1736_v3 = vsel %vm1716_vm6, %v1707_v36, %v1054_v49  ;;  %v2227_v22 = vmul.f32 0.2, %v2073_v57  ;;  %vm2199_vm14 = vcmp.ge.f32.partialorder %v2073_v57, 0.0 }
 0x1cd   : > { %1625 = vrot.lane.b32.xlu1 %v760_v63, %s14935_s18  ;;  %vm2198_vm15 = vcmp.ge.f32.partialorder %v2068_v55, 0.0 }
 0x1ce   : > { %1623 = vrot.lane.b32.xlu0 %v759_v59, %s14935_s18 }
 0x1cf   : > { %v1166_v6 = vpop.permute.xlu1 %1165 }
 0x1d0   : > { %v1164_v8 = vpop.permute.xlu0 %1163  ;;  %v1765_v41 = vsel %vm1745_vm7, %v1736_v3, %v1166_v6  ;;  %v2255_v6 = vsel %vm2199_vm14, %v2073_v57, %v2227_v22 }
 0x1d1   : > { %845 = vrot.lane.b32.xlu1 %v11048_v9, %s10075_s23  ;;  %v1706_v9 = vsel %vm1687_vm5, %v1677_v10, %v940_v38  ;;  %v761_v38 = vld [vmem:[#allocation2 + $0x16a] sm:$0xff]  ;;  %v2225_v10 = vmul.f32 0.2, %v2063_v13 }
 0x1d2   : > { %843 = vrot.lane.b32.xlu0 %v11050_v33, %s10075_s23 }
 0x1d3   : > { %v1278_v1 = vpop.permute.xlu1 %1277 }
 0x1d4   : > { %v1276_v7 = vpop.permute.xlu0 %1275  ;;  %v1794_v46 = vsel %vm14899_vm8, %v1765_v41, %v1278_v1 }
 0x1d5   : > { %957 = vrot.lane.b32.xlu1 %v11066_v16, %s14902_s22  ;;  %v1735_v16 = vsel %vm1716_vm6, %v1706_v9, %v1052_v5 }
 0x1d6   : > { %955 = vrot.lane.b32.xlu0 %v11060_v11, %s14902_s22  ;;  %v1764_v11 = vsel %vm1745_vm7, %v1735_v16, %v1164_v8  ;;  %s14906_s22 = smov 124  }
 0x1d7   : > { %v1390_v39 = vpop.permute.xlu1 %1389  ;;  %v1793_v62 = vsel %vm14899_vm8, %v1764_v11, %v1276_v7  ;;  %v2368_v7 = vsel %vm2324_vm4, %v2255_v6, 0.0  ;;  %vm11197_vm8 = vmand %vm2295_vm3, %vm2309_vm0  ;;  %vm14946_vm3 = vcmask 261120  }
 0x1d8   : > { %v1388_v32 = vpop.permute.xlu0 %1387  ;;  %v1823_v19 = vsel %vm14898_vm9, %v1794_v46, %v1390_v39 }
 0x1d9   : > { %v11124_v17 = vpop.f32.mrb[4].mxu0  ;;  %1069 = vrot.lane.b32.xlu1 %v704_v34, %s10076_s24  ;;  %v1822_v24 = vsel %vm14898_vm9, %v1793_v62, %v1388_v32  ;;  %v734_v34 = vld [vmem:[#allocation2 + $0x171] sm:$0xff]  ;;  %vm2311_vm9 = vcmp.lt.s32.totalorder %v2283_v50, 16 }
 0x1da   : > { %1067 = vrot.lane.b32.xlu0 %v703_v52, %s10076_s24  ;;  %v2077_v33 = vpop.f32.mrb[5].mxu0  ;;  %v733_v52 = vld [vmem:[#allocation2 + $0x169] sm:$0xff]  ;;  %v2083_v49 = vadd.f32 %v11124_v17, %v11159_v54  ;;  %s10085_s24 = smov 36  }
 0x1db   : > { %v1502_v29 = vpop.permute.xlu1 %1501 }
 0x1dc   : > { %v1500_v30 = vpop.permute.xlu0 %1499  ;;  %v1852_v45 = vsel %vm14897_vm10, %v1823_v19, %v1502_v29  ;;  %v2229_v17 = vmul.f32 0.2, %v2083_v49  ;;  %vm2201_vm14 = vcmp.ge.f32.partialorder %v2083_v49, 0.0 }
 0x1dd   : > { %1181 = vrot.lane.b32.xlu1 %v732_v40, %s10077_s25  ;;  %v1851_v37 = vsel %vm14897_vm10, %v1822_v24, %v1500_v30  ;;  %v2226_v40 = vmul.f32 0.2, %v2068_v55  ;;  %vm2297_vm10 = vcmp.ge.s32.totalorder %v2283_v50, 0  ;;  %v2284_v24 = vadd.s32 3, %v11162_v25 }
 0x1de   : > { %1179 = vrot.lane.b32.xlu0 %v731_v60, %s10077_s25  ;;  %v2078_v60 = vadd.f32 %v11159_v54, %v2077_v33  ;;  %vm11203_vm13 = vmand %vm2297_vm10, %vm2311_vm9  ;;  %v2257_v62 = vsel %vm2201_vm14, %v2083_v49, %v2229_v17 }
 0x1df   : > { %v11143_v15 = vpop.permute.xlu1 %831  ;;  %v2254_v8 = vsel %vm2198_vm15, %v2068_v55, %v2226_v40  ;;  %vm2298_vm0 = vcmp.ge.s32.totalorder %v2284_v24, 0  ;;  %vm2312_vm9 = vcmp.lt.s32.totalorder %v2284_v24, 16  ;;  %vm14944_vm15 = vcmask 195584  }
 0x1e0   : > { %v1612_v31 = vpop.permute.xlu0 %1611  ;;  %v2228_v5 = vmul.f32 0.2, %v2078_v60  ;;  %v2367_v39 = vsel %vm2324_vm4, %v2254_v8, 0.0  ;;  %vm2197_vm4 = vcmp.ge.f32.partialorder %v2063_v13, 0.0  ;;  %vm11230_vm10 = vmand %vm2298_vm0, %vm2312_vm9 }
 0x1e1   : > { %v1880_v27 = vsel %vm14896_vm11, %v1851_v37, %v1612_v31  ;;  %1293 = vrot.lane.b32.xlu1 %v760_v63, %s10078_s26  ;;  %v2253_v36 = vsel %vm2197_vm4, %v2063_v13, %v2225_v10  ;;  %v2370_v31 = vsel %vm11203_vm13, %v2257_v62, 0.0  ;;  %vm14948_vm4 = vcmask 293888   ;;  %vm14949_vm14 = vmmov %vm14944_vm15 }
 0x1e2   : > { %1291 = vrot.lane.b32.xlu0 %v759_v59, %s10078_s26  ;;  %8520 = vmatprep.mubr.msk.f32.mxu0 %vm14895_vm12, %v1880_v27  ;;  %v2224_v59 = vmul.f32 0.2, %v2058_v44  ;;  %v2366_v41 = vsel %vm11197_vm8, %v2253_v36, 0.0  ;;  %v1679_v27 = vsel %vm459_vm2, %v10845_v48, %v11143_v15  ;;  %vm14950_vm0 = vmmov %vm14945_vm1  ;;  %s14990_s26 = smov 124  }
 0x1e3   : > { %v11154_v42 = vpop.permute.xlu1 %833  ;;  %vm14951_vm9 = vmmov %vm14946_vm3 }
 0x1e4   : > { %v1614_v53 = vpop.permute.xlu0 %1613  ;;  %v1680_v23 = vsel %vm459_vm2, %v10843_v56, %v11154_v42 }
 0x1e5   : > { %v1881_v35 = vsel %vm14896_vm11, %v1852_v45, %v1614_v53  ;;  %1405 = vrot.lane.b32.xlu1 %v706_v47, %s14900_s29  ;;  %vm2200_vm11 = vcmp.ge.f32.partialorder %v2078_v60, 0.0 }
 0x1e6   : > { %1403 = vrot.lane.b32.xlu0 %v705_v26, %s14900_s29  ;;  %8521 = vmatmul.mubr.msk.f32.gmra.mrb[18].mxu0 %vm14895_vm12, %v1881_v35  ;;  %vm2196_vm12 = vcmp.ge.f32.partialorder %v2058_v44, 0.0  ;;  %v2256_v9 = vsel %vm2200_vm11, %v2078_v60, %v2228_v5  ;;  %vm14943_vm11 = vcmask 162816   ;;  %s15050_s29 = smov 24  }
 0x1e7   : > { %v11170_v28 = vpop.permute.xlu1 %945  ;;  %v2252_v16 = vsel %vm2196_vm12, %v2058_v44, %v2224_v59  ;;  %v2369_v11 = vsel %vm11203_vm13, %v2256_v9, 0.0  ;;  %vm14947_vm13 = vmmov %vm14943_vm11  ;;  %v2285_v9 = vadd.s32 4, %v11162_v25 }
 0x1e8   : > { %v11172_v20 = vpop.permute.xlu0 %943  ;;  %v2365_v4 = vsel %vm11197_vm8, %v2252_v16, 0.0 }
 0x1e9   : > { %1517 = vrot.lane.b32.xlu1 %v734_v34, %s10080_s28  ;;  %v1708_v19 = vsel %vm1687_vm5, %v1679_v27, %v11172_v20  ;;  %v1709_v20 = vsel %vm1687_vm5, %v1680_v23, %v11170_v28 }
 0x1ea   : > { %1515 = vrot.lane.b32.xlu0 %v733_v52, %s10080_s28  ;;  %s14992_s28 = smov 52  }
 0x1eb   : > { %v11180_v21 = vpop.permute.xlu1 %1057 }
 0x1ec   : > { %v1056_v63 = vpop.permute.xlu0 %1055  ;;  %v1738_v40 = vsel %vm1716_vm6, %v1709_v20, %v11180_v21 }
 0x1ed   : > { %1629 = vrot.lane.b32.xlu1 %v762_v43, %s14935_s18  ;;  %v1737_v45 = vsel %vm1716_vm6, %v1708_v19, %v1056_v63 }
 0x1ee   : > { %1627 = vrot.lane.b32.xlu0 %v761_v38, %s14935_s18 }
 0x1ef   : > { %v1170_v12 = vpop.permute.xlu1 %1169 }
 0x1f0   : > { %v1168_v1 = vpop.permute.xlu0 %1167  ;;  %v1767_v50 = vsel %vm1745_vm7, %v1738_v40, %v1170_v12 }
 0x1f1   : > { %2427 = vrot.lane.b32.xlu1 %v2368_v7, %s10075_s23  ;;  %v1766_v48 = vsel %vm1745_vm7, %v1737_v45, %v1168_v1 }
 0x1f2   : > { %2425 = vrot.lane.b32.xlu0 %v2367_v39, %s10075_s23 }
 0x1f3   : > { %v1282_v29 = vpop.permute.xlu1 %1281 }
 0x1f4   : > { %v1280_v30 = vpop.permute.xlu0 %1279  ;;  %v1796_v13 = vsel %vm14947_vm13, %v1767_v50, %v1282_v29 }
 0x1f5   : > { %2429 = vrot.lane.b32.xlu1 %v2369_v11, %s10075_s23  ;;  %v1795_v34 = vsel %vm14943_vm11, %v1766_v48, %v1280_v30  ;;  %vm2313_vm11 = vcmp.lt.s32.totalorder %v2285_v9, 16 }
 0x1f6   : > { %2421 = vrot.lane.b32.xlu0 %v2365_v4, %s10075_s23 }
 0x1f7   : > { %v1394_v3 = vpop.permute.xlu1 %1393 }
 0x1f8   : > { %v1392_v37 = vpop.permute.xlu0 %1391  ;;  %v1825_v21 = vsel %vm14949_vm14, %v1796_v13, %v1394_v3 }
 0x1f9   : > { %v8504_v46 = vpop.f32.mrb[6].mxu0  ;;  %2431 = vrot.lane.b32.xlu1 %v2370_v31, %s10075_s23  ;;  %v1824_v44 = vsel %vm14944_vm15, %v1795_v34, %v1392_v37 }
 0x1fa   : > { %2423 = vrot.lane.b32.xlu0 %v2366_v41, %s10075_s23  ;;  %v2093_v47 = vadd.f32 %v8504_v46, %v11159_v54  ;;  %v2087_v26 = vpop.f32.mrb[7].mxu0 }
 0x1fb   : > { %v2088_v53 = vadd.f32 %v11159_v54, %v2087_v26  ;;  %v1506_v35 = vpop.permute.xlu1 %1505 }
 0x1fc   : > { %v1504_v57 = vpop.permute.xlu0 %1503  ;;  %vm2203_vm8 = vcmp.ge.f32.partialorder %v2093_v47, 0.0  ;;  %v2231_v15 = vmul.f32 0.2, %v2093_v47  ;;  %v1854_v59 = vsel %vm14950_vm0, %v1825_v21, %v1506_v35  ;;  %v2286_v21 = vadd.s32 5, %v11162_v25 }
 0x1fd   : > { %vm2202_vm12 = vcmp.ge.f32.partialorder %v2088_v53, 0.0  ;;  %v2230_v52 = vmul.f32 0.2, %v2088_v53  ;;  %v1853_v60 = vsel %vm14945_vm1, %v1824_v44, %v1504_v57  ;;  %vm14955_vm1 = vmmov %vm14947_vm13 }
 0x1fe   : > { %v2259_v22 = vsel %vm2203_vm8, %v2093_v47, %v2231_v15  ;;  %vm14952_vm8 = vmmov %vm14948_vm4 }
 0x1ff   : > { %v836_v43 = vpop.permute.xlu1 %835  ;;  %v2372_v56 = vsel %vm11230_vm10, %v2259_v22, 0.0  ;;  %v2258_v42 = vsel %vm2202_vm12, %v2088_v53, %v2230_v52  ;;  %vm14956_vm13 = vmmov %vm14949_vm14 }
 0x200   : > { %v1616_v38 = vpop.permute.xlu0 %1615  ;;  %2435 = vrot.lane.b32.xlu1 %v2372_v56, %s10075_s23  ;;  %v2371_v28 = vsel %vm11230_vm10, %v2258_v42, 0.0  ;;  %v1681_v29 = vsel %vm459_vm2, %v10915_v58, %v836_v43  ;;  %vm2299_vm10 = vcmp.ge.s32.totalorder %v2285_v9, 0  ;;  %vm14958_vm14 = vmmov %vm14951_vm9 }
 0x201   : > { %v1882_v63 = vsel %vm14946_vm3, %v1853_v60, %v1616_v38  ;;  %2433 = vrot.lane.b32.xlu0 %v2371_v28, %s10075_s23  ;;  %vm11266_vm15 = vmand %vm2299_vm10, %vm2313_vm11 }
 0x202   : > { %8523 = vmatprep.mubr.msk.f32.mxu0 %vm14948_vm4, %v1882_v63  ;;  %vm14957_vm4 = vmmov %vm14950_vm0 }
 0x203   : > { %v838_v49 = vpop.permute.xlu1 %837  ;;  %vm14959_vm0 = vmmov %vm14955_vm1 }
 0x204   : > { %v1618_v5 = vpop.permute.xlu0 %1617  ;;  %v1682_v27 = vsel %vm459_vm2, %v10913_v51, %v838_v49  ;;  %vm14962_vm10 = vmmov %vm14957_vm4 }
 0x205   : > { %v1883_v6 = vsel %vm14951_vm9, %v1854_v59, %v1618_v5  ;;  %vm14960_vm9 = vmmov %vm14952_vm8 }
 0x206   : > { %8524 = vmatmul.mubr.msk.f32.gmra.mrb[20].mxu0 %vm14952_vm8, %v1883_v6  ;;  %vm14961_vm8 = vmmov %vm14956_vm13 }
 0x207   : > { %v950_v8 = vpop.permute.xlu1 %949  ;;  %vm14963_vm11 = vmmov %vm14958_vm14 }
 0x208   : > { %v948_v12 = vpop.permute.xlu0 %947  ;;  %v1711_v47 = vsel %vm1687_vm5, %v1682_v27, %v950_v8 }
 0x209   : > { %v1710_v11 = vsel %vm1687_vm5, %v1681_v29, %v948_v12 }
 0x20b   : > { %v1062_v1 = vpop.permute.xlu1 %1061 }
 0x20c   : > { %v1060_v7 = vpop.permute.xlu0 %1059  ;;  %v1740_v53 = vsel %vm1716_vm6, %v1711_v47, %v1062_v1 }
 0x20d   : > { %v1739_v36 = vsel %vm1716_vm6, %v1710_v11, %v1060_v7 }
 0x20f   : > { %v1174_v39 = vpop.permute.xlu1 %1173 }
 0x210   : > { %v1172_v32 = vpop.permute.xlu0 %1171  ;;  %v1769_v51 = vsel %vm1745_vm7, %v1740_v53, %v1174_v39 }
 0x211   : > { %v1768_v31 = vsel %vm1745_vm7, %v1739_v36, %v1172_v32 }
 0x213   : > { %v1286_v10 = vpop.permute.xlu1 %1285 }
 0x214   : > { %v1284_v17 = vpop.permute.xlu0 %1283  ;;  %v1798_v52 = vsel %vm14959_vm0, %v1769_v51, %v1286_v10 }
 0x215   : > { %v1797_v46 = vsel %vm14955_vm1, %v1768_v31, %v1284_v17  ;;  %vm2314_vm1 = vcmp.lt.s32.totalorder %v2286_v21, 16 }
 0x217   : > { %v1398_v33 = vpop.permute.xlu1 %1397 }
 0x218   : > { %v1396_v16 = vpop.permute.xlu0 %1395  ;;  %v1827_v20 = vsel %vm14961_vm8, %v1798_v52, %v1398_v33 }
 0x219   : > { %v8507_v30 = vpop.f32.mrb[8].mxu0  ;;  %v1826_v26 = vsel %vm14956_vm13, %v1797_v46, %v1396_v16 }
 0x21a   : > { %v2103_v4 = vadd.f32 %v8507_v30, %v11159_v54  ;;  %v2097_v62 = vpop.f32.mrb[9].mxu0 }
 0x21b   : > { %v2098_v24 = vadd.f32 %v11159_v54, %v2097_v62  ;;  %v1510_v3 = vpop.permute.xlu1 %1509 }
 0x21c   : > { %v1508_v37 = vpop.permute.xlu0 %1507  ;;  %vm2205_vm12 = vcmp.ge.f32.partialorder %v2103_v4, 0.0  ;;  %v2233_v41 = vmul.f32 0.2, %v2103_v4  ;;  %v1856_v44 = vsel %vm14962_vm10, %v1827_v20, %v1510_v3 }
 0x21d   : > { %vm2204_vm3 = vcmp.ge.f32.partialorder %v2098_v24, 0.0  ;;  %v2232_v19 = vmul.f32 0.2, %v2098_v24  ;;  %v1855_v35 = vsel %vm14957_vm4, %v1826_v26, %v1508_v37  ;;  %vm14967_vm4 = vmmov %vm14959_vm0 }
 0x21e   : > { %v2261_v45 = vsel %vm2205_vm12, %v2103_v4, %v2233_v41  ;;  %vm14964_vm12 = vmmov %vm14960_vm9 }
 0x21f   : > { %v840_v57 = vpop.permute.xlu1 %839  ;;  %v2374_v15 = vsel %vm11266_vm15, %v2261_v45, 0.0  ;;  %v2260_v55 = vsel %vm2204_vm3, %v2098_v24, %v2232_v19 }
 0x220   : > { %v1620_v48 = vpop.permute.xlu0 %1619  ;;  %2439 = vrot.lane.b32.xlu1 %v2374_v15, %s10075_s23  ;;  %v2373_v34 = vsel %vm11266_vm15, %v2260_v55, 0.0  ;;  %v1683_v5 = vsel %vm459_vm2, %v10976_v14, %v840_v57  ;;  %vm2300_vm15 = vcmp.ge.s32.totalorder %v2286_v21, 0 }
 0x221   : > { %v1884_v23 = vsel %vm14958_vm14, %v1855_v35, %v1620_v48  ;;  %2437 = vrot.lane.b32.xlu0 %v2373_v34, %s10075_s23  ;;  %vm11305_vm13 = vmand %vm2300_vm15, %vm2314_vm1  ;;  %vm14973_vm1 = vcmask 293888  }
 0x222   : > { %8526 = vmatprep.mubr.msk.f32.mxu0 %vm14960_vm9, %v1884_v23  ;;  %vm14968_vm14 = vmmov %vm14959_vm0 }
 0x223   : > { %v842_v22 = vpop.permute.xlu1 %841  ;;  %vm14969_vm9 = vmmov %vm14961_vm8 }
 0x224   : > { %v1622_v40 = vpop.permute.xlu0 %1621  ;;  %v1684_v6 = vsel %vm459_vm2, %v10974_v18, %v842_v22 }
 0x225   : > { %v1885_v60 = vsel %vm14963_vm11, %v1856_v44, %v1622_v40  ;;  %vm14970_vm11 = vmmov %vm14962_vm10 }
 0x226   : > { %8527 = vmatmul.mubr.msk.f32.gmra.mrb[22].mxu0 %vm14964_vm12, %v1885_v60  ;;  %vm14971_vm12 = vcmask 261120  }
 0x227   : > { %v954_v43 = vpop.permute.xlu1 %953  ;;  %vm14972_vm15 = vmmov %vm14971_vm12 }
 0x228   : > { %v952_v38 = vpop.permute.xlu0 %951  ;;  %v1713_v12 = vsel %vm1687_vm5, %v1684_v6, %v954_v43 }
 0x229   : > { %v1712_v1 = vsel %vm1687_vm5, %v1683_v5, %v952_v38 }
 0x22b   : > { %v1066_v56 = vpop.permute.xlu1 %1065 }
 0x22c   : > { %v1064_v42 = vpop.permute.xlu0 %1063  ;;  %v1742_v32 = vsel %vm1716_vm6, %v1713_v12, %v1066_v56 }
 0x22d   : > { %v1741_v10 = vsel %vm1716_vm6, %v1712_v1, %v1064_v42 }
 0x22f   : > { %v1178_v50 = vpop.permute.xlu1 %1177 }
 0x230   : > { %v1176_v63 = vpop.permute.xlu0 %1175  ;;  %v1771_v18 = vsel %vm1745_vm7, %v1742_v32, %v1178_v50 }
 0x231   : > { %v1770_v33 = vsel %vm1745_vm7, %v1741_v10, %v1176_v63 }
 0x233   : > { %v1290_v28 = vpop.permute.xlu1 %1289 }
 0x234   : > { %v1288_v13 = vpop.permute.xlu0 %1287  ;;  %v1800_v30 = vsel %vm14967_vm4, %v1771_v18, %v1290_v28 }
 0x235   : > { %v1799_v11 = vsel %vm14968_vm14, %v1770_v33, %v1288_v13 }
 0x237   : > { %v1402_v59 = vpop.permute.xlu1 %1401 }
 0x238   : > { %v1400_v49 = vpop.permute.xlu0 %1399  ;;  %v1829_v62 = vsel %vm14969_vm9, %v1800_v30, %v1402_v59  ;;  %vm14976_vm9 = vmmov %vm14961_vm8 }
 0x239   : > { %v8510_v8 = vpop.f32.mrb[10].mxu0  ;;  %v1828_v36 = vsel %vm14961_vm8, %v1799_v11, %v1400_v49 }
 0x23a   : > { %v2113_v7 = vadd.f32 %v8510_v8, %v11159_v54  ;;  %v2107_v39 = vpop.f32.mrb[11].mxu0 }
 0x23b   : > { %v2108_v17 = vadd.f32 %v11159_v54, %v2107_v39  ;;  %v1514_v14 = vpop.permute.xlu1 %1513 }
 0x23c   : > { %v1512_v9 = vpop.permute.xlu0 %1511  ;;  %vm2207_vm3 = vcmp.ge.f32.partialorder %v2113_v7, 0.0  ;;  %v2235_v16 = vmul.f32 0.2, %v2113_v7  ;;  %v1858_v3 = vsel %vm14962_vm10, %v1829_v62, %v1514_v14 }
 0x23d   : > { %vm2206_vm0 = vcmp.ge.f32.partialorder %v2108_v17, 0.0  ;;  %v2234_v4 = vmul.f32 0.2, %v2108_v17  ;;  %v1857_v37 = vsel %vm14970_vm11, %v1828_v36, %v1512_v9 }
 0x23e   : > { %v2263_v24 = vsel %vm2207_vm3, %v2113_v7, %v2235_v16  ;;  %vm14974_vm3 = vmmov %vm14973_vm1 }
 0x23f   : > { %v1626_v31 = vpop.permute.xlu1 %1625  ;;  %v2376_v58 = vsel %vm11305_vm13, %v2263_v24, 0.0  ;;  %v2262_v27 = vsel %vm2206_vm0, %v2108_v17, %v2234_v4  ;;  %v2288_v24 = vadd.s32 7, %v11162_v25 }
 0x240   : > { %v1624_v41 = vpop.permute.xlu0 %1623  ;;  %v1887_v46 = vsel %vm14971_vm12, %v1858_v3, %v1626_v31  ;;  %2443 = vrot.lane.b32.xlu1 %v2376_v58, %s10075_s23  ;;  %v2375_v47 = vsel %vm11305_vm13, %v2262_v27, 0.0  ;;  %vm14975_vm13 = vmmov %vm14967_vm4  ;;  %vm14978_vm12 = vcmask 228352  }
 0x241   : > { %v1886_v19 = vsel %vm14972_vm15, %v1857_v37, %v1624_v41  ;;  %2441 = vrot.lane.b32.xlu0 %v2375_v47, %s10075_s23  ;;  %vm14979_vm15 = vmmov %vm14978_vm12 }
 0x242   : > { %8529 = vmatprep.mubr.msk.f32.mxu0 %vm14973_vm1, %v1886_v19  ;;  %vm14980_vm1 = vcmask 261120  }
 0x243   : > { %8530 = vmatmul.mubr.msk.f32.gmra.mrb[24].mxu0 %vm14974_vm3, %v1887_v46  ;;  %v846_v26 = vpop.permute.xlu1 %845  ;;  %vm14981_vm3 = vmmov %vm14980_vm1 }
 0x244   : > { %v844_v45 = vpop.permute.xlu0 %843  ;;  %v1686_v57 = vsel %vm459_vm2, %v11037_v61, %v846_v26 }
 0x245   : > { %v1685_v48 = vsel %vm459_vm2, %v11039_v2, %v844_v45  ;;  %v2287_v2 = vadd.s32 6, %v11162_v25 }
 0x247   : > { %v958_v53 = vpop.permute.xlu1 %957  ;;  %vm2301_vm14 = vcmp.ge.s32.totalorder %v2287_v2, 0  ;;  %vm2315_vm0 = vcmp.lt.s32.totalorder %v2287_v2, 16  ;;  %v3718_v2 = vld [vmem:[%s14886_s3 + $0x10] sm:$0xff] }
 0x248   : > { %v956_v35 = vpop.permute.xlu0 %955  ;;  %v1715_v51 = vsel %vm1687_vm5, %v1686_v57, %v958_v53  ;;  %vm2329_vm10 = vmand %vm2301_vm14, %vm2315_vm0  ;;  %vm2302_vm0 = vcmp.ge.s32.totalorder %v2288_v24, 0 }
 0x249   : > { %v1714_v23 = vsel %vm1687_vm5, %v1685_v48, %v956_v35  ;;  %v2289_v35 = vadd.s32 8, %v11162_v25 }
 0x24b   : > { %v1070_v15 = vpop.permute.xlu1 %1069 }
 0x24c   : > { %v1068_v55 = vpop.permute.xlu0 %1067  ;;  %v1744_v20 = vsel %vm1716_vm6, %v1715_v51, %v1070_v15 }
 0x24d   : > { %v1743_v44 = vsel %vm1716_vm6, %v1714_v23, %v1068_v55  ;;  %vm14977_vm6 = vmmov %vm14961_vm8 }
 0x24f   : > { %v1182_v34 = vpop.permute.xlu1 %1181 }
 0x250   : > { %v1180_v52 = vpop.permute.xlu0 %1179  ;;  %v1773_v60 = vsel %vm1745_vm7, %v1744_v20, %v1182_v34 }
 0x251   : > { %v1772_v61 = vsel %vm1745_vm7, %v1743_v44, %v1180_v52 }
 0x253   : > { %v1294_v22 = vpop.permute.xlu1 %1293 }
 0x254   : > { %v1292_v40 = vpop.permute.xlu0 %1291  ;;  %v1802_v43 = vsel %vm14975_vm13, %v1773_v60, %v1294_v22  ;;  %vm2505_vm13 = vcmask 293920   ;;  %v14914_v22 = vmov 0.0|0.0   ;;  %v3717_v60 = vld [vmem:[%s14886_s3 + $0x8] sm:$0xff] }
 0x255   : > { %v1801_v38 = vsel %vm14967_vm4, %v1772_v61, %v1292_v40  ;;  %vm14982_vm4 = vcmask 293888   ;;  %8653 = vmatprep.subr.bf16.mxu1 %v14914_v22  ;;  %v3716_v40 = vld [vmem:[%s14886_s3] sm:$0xff] }
 0x256   : > { %vm14983_vm14 = vmmov %vm14982_vm4  ;;  %v8654_v61 = vpack.c.bf16 %v3717_v60, %v3716_v40  ;;  %v3739_v40 = vld [vmem:[%s14886_s3 + $0xb8] sm:$0xff] }
 0x257   : > { %v1406_v56 = vpop.permute.xlu1 %1405 }
 0x258   : > { %v1404_v42 = vpop.permute.xlu0 %1403  ;;  %v1831_v63 = vsel %vm14976_vm9, %v1802_v43, %v1406_v56  ;;  %vm2316_vm9 = vcmp.lt.s32.totalorder %v2288_v24, 16  ;;  %8655 = vmatpush1.bf16.msra.mxu1 %v8654_v61  ;;  %v3719_v43 = vld [vmem:[%s14886_s3 + $0x18] sm:$0xff]  ;;  %v3720_v56 = vld [vmem:[%s14886_s3 + $0x20] sm:$0xff] }
 0x259   : > { %v8513_v50 = vpop.f32.mrb[12].mxu0  ;;  %v1830_v28 = vsel %vm14977_vm6, %v1801_v38, %v1404_v42  ;;  %8656 = vmatprep.subr.bf16.mxu1 %v14914_v22  ;;  %v8657_v38 = vpack.c.bf16 %v3719_v43, %v3718_v2  ;;  %v3721_v42 = vld [vmem:[%s14886_s3 + $0x28] sm:$0xff]  ;;  %v3748_v2 = vld [vmem:[%s14886_s3 + $0x100] sm:$0xff] }
 0x25a   : > { %v2123_v13 = vadd.f32 %v8513_v50, %v11159_v54  ;;  %v2117_v21 = vpop.f32.mrb[13].mxu0  ;;  %v8660_v50 = vpack.c.bf16 %v3721_v42, %v3720_v56  ;;  %v3749_v43 = vld [vmem:[%s14886_s3 + $0x108] sm:$0xff] }
 0x25b   : > { %v2118_v59 = vadd.f32 %v11159_v54, %v2117_v21  ;;  %v1518_v49 = vpop.permute.xlu1 %1517 }
 0x25c   : > { %v1516_v5 = vpop.permute.xlu0 %1515  ;;  %vm2209_vm8 = vcmp.ge.f32.partialorder %v2123_v13, 0.0  ;;  %v2237_v6 = vmul.f32 0.2, %v2123_v13  ;;  %v1860_v12 = vsel %vm14978_vm12, %v1831_v63, %v1518_v49  ;;  %vm2317_vm12 = vcmp.lt.s32.totalorder %v2289_v35, 16  ;;  %8658 = vmatpush1.bf16.msra.mxu1 %v8657_v38  ;;  %v3722_v63 = vld [vmem:[%s14886_s3 + $0x30] sm:$0xff] }
 0x25d   : > { %vm2208_vm11 = vcmp.ge.f32.partialorder %v2118_v59, 0.0  ;;  %v2236_v8 = vmul.f32 0.2, %v2118_v59  ;;  %v1859_v1 = vsel %vm14979_vm15, %v1830_v28, %v1516_v5  ;;  %8659 = vmatprep.subr.bf16.mxu1 %v14914_v22  ;;  %v3723_v28 = vld [vmem:[%s14886_s3 + $0x38] sm:$0xff]  ;;  %v2290_v49 = vadd.s32 9, %v11162_v25  ;;  %v3724_v5 = vld [vmem:[%s14886_s3 + $0x40] sm:$0xff] }
 0x25e   : > { %v2265_v7 = vsel %vm2209_vm8, %v2123_v13, %v2237_v6  ;;  %vm2330_vm8 = vmand %vm2302_vm0, %vm2316_vm9  ;;  %v8663_v21 = vpack.c.bf16 %v3723_v28, %v3722_v63  ;;  %v3725_v6 = vld [vmem:[%s14886_s3 + $0x48] sm:$0xff]  ;;  %v2291_v28 = vadd.s32 10, %v11162_v25 }
 0x25f   : > { %v1630_v39 = vpop.permute.xlu1 %1629  ;;  %v2378_v10 = vsel %vm2329_vm10, %v2265_v7, 0.0  ;;  %v2264_v17 = vsel %vm2208_vm11, %v2118_v59, %v2236_v8  ;;  %vm2303_vm11 = vcmp.ge.s32.totalorder %v2289_v35, 0  ;;  %v8666_v8 = vpack.c.bf16 %v3725_v6, %v3724_v5  ;;  %v3727_v7 = vld [vmem:[%s14886_s3 + $0x58] sm:$0xff]  ;;  %v3734_v35 = vld [vmem:[%s14886_s3 + $0x90] sm:$0xff] }
 0x260   : > { %v1628_v32 = vpop.permute.xlu0 %1627  ;;  %v1889_v14 = vsel %vm14980_vm1, %v1860_v12, %v1630_v39  ;;  %2447 = vrot.lane.b32.xlu1 %v2378_v10, %s10075_s23  ;;  %v2377_v18 = vsel %vm2329_vm10, %v2264_v17, 0.0  ;;  %vm2331_vm1 = vmand %vm2303_vm11, %vm2317_vm12  ;;  %8661 = vmatpush1.bf16.msra.mxu1 %v8660_v50  ;;  %v8701_v50 = vpack.c.bf16 %v3749_v43, %v3748_v2  ;;  %v3750_v5 = vld [vmem:[%s14886_s3 + $0x110] sm:$0xff]  ;;  %v3751_v6 = vld [vmem:[%s14886_s3 + $0x118] sm:$0xff] }
 0x261   : > { %v1888_v9 = vsel %vm14981_vm3, %v1859_v1, %v1628_v32  ;;  %2445 = vrot.lane.b32.xlu0 %v2377_v18, %s10075_s23  ;;  %8662 = vmatprep.subr.bf16.mxu1 %v14914_v22  ;;  %v3726_v1 = vld [vmem:[%s14886_s3 + $0x50] sm:$0xff] }
 0x262   : > { %8532 = vmatprep.mubr.msk.f32.mxu0 %vm14982_vm4, %v1888_v9  ;;  %vm2304_vm4 = vcmp.ge.s32.totalorder %v2290_v49, 0  ;;  %v8669_v10 = vpack.c.bf16 %v3727_v7, %v3726_v1  ;;  %8702 = vmatprep.subr.bf16.mxu0 %v8701_v50  ;;  %v3742_v7 = vld [vmem:[%s14886_s3 + $0xd0] sm:$0xff] }
 0x263   : > { %8533 = vmatmul.mubr.msk.f32.gmra.mrb[26].mxu0 %vm14983_vm14, %v1889_v14  ;;  %v2428_v33 = vpop.permute.xlu1 %2427  ;;  %vm2318_vm14 = vcmp.lt.s32.totalorder %v2290_v49, 16 }
 0x264   : > { %v2426_v16 = vpop.permute.xlu0 %2425  ;;  %2509 = vst.msk [vmem:[#allocation2 + $0x39] sm:$0xff] %vm2505_vm13, %v2428_v33  ;;  %8664 = vmatpush1.bf16.msra.mxu1 %v8663_v21  ;;  %vm11417_vm9 = vmand %vm2304_vm4, %vm2318_vm14  ;;  %v3728_v33 = vld [vmem:[%s14886_s3 + $0x60] sm:$0xff]  ;;  %v3741_v21 = vld [vmem:[%s14886_s3 + $0xc8] sm:$0xff]  ;;  %8704 = vmatpush3.bf16.msra.mxu0 %v8701_v50 }
 0x265   : > { %2508 = vst.msk [vmem:[#allocation2 + $0x31] sm:$0xff] %vm2505_vm13, %v2426_v16  ;;  %8665 = vmatprep.subr.bf16.mxu1 %v14914_v22  ;;  %v3729_v16 = vld [vmem:[%s14886_s3 + $0x68] sm:$0xff] }
 0x267   : > { %v2430_v29 = vpop.permute.xlu1 %2429 }
 0x268   : > { %v2422_v30 = vpop.permute.xlu0 %2421  ;;  %2510 = vst.msk [vmem:[#allocation2 + $0x49] sm:$0xff] %vm2505_vm13, %v2430_v29  ;;  %8667 = vmatpush1.bf16.msra.mxu1 %v8666_v8  ;;  %v8705_v8 = vpack.c.bf16 %v3751_v6, %v3750_v5 }
 0x269   : > { %2506 = vst.msk [vmem:[#allocation2 + $0x19] sm:$0xff] %vm2505_vm13, %v2422_v30  ;;  %8668 = vmatprep.subr.bf16.mxu1 %v14914_v22  ;;  %v8672_v30 = vpack.c.bf16 %v3729_v16, %v3728_v33  ;;  %v3753_v16 = vld [vmem:[%s14886_s3 + $0x128] sm:$0xff] }
 0x26a   : > { %8706 = vmatprep.subr.bf16.mxu0 %v8705_v8 }
 0x26b   : > { %v2432_v11 = vpop.permute.xlu1 %2431  ;;  %8708 = vmatpush3.bf16.msra.mxu0 %v8705_v8 }
 0x26c   : > { %v2424_v4 = vpop.permute.xlu0 %2423  ;;  %2511 = vst.msk [vmem:[#allocation2 + $0x51] sm:$0xff] %vm2505_vm13, %v2432_v11  ;;  %8670 = vmatpush1.bf16.msra.mxu1 %v8669_v10 }
 0x26d   : > { %2507 = vst.msk [vmem:[#allocation2 + $0x21] sm:$0xff] %vm2505_vm13, %v2424_v4  ;;  %8671 = vmatprep.subr.bf16.mxu1 %v14914_v22 }
 0x26f   : > { %v2608_v63 = vld [vmem:[#allocation2 + $0x48] sm:$0xff] }
 0x270   : > { %8673 = vmatpush1.bf16.msra.mxu1 %v8672_v30  ;;  %v3745_v30 = vld [vmem:[%s14886_s3 + $0xe8] sm:$0xff] }
 0x271   : > { %8674 = vmatprep.subr.bf16.mxu1 %v14914_v22 }
 0x272   : > { %v2436_v62 = vpop.permute.xlu1 %2435 }
 0x273   : > { %2513 = vst.msk [vmem:[#allocation2 + $0x69] sm:$0xff] %vm2505_vm13, %v2436_v62  ;;  %v2434_v36 = vpop.permute.xlu0 %2433  ;;  %v2606_v62 = vld [vmem:[#allocation2 + $0x30] sm:$0xff] }
 0x274   : > { %2512 = vst.msk [vmem:[#allocation2 + $0x61] sm:$0xff] %vm2505_vm13, %v2434_v36  ;;  %v2607_v36 = vld [vmem:[#allocation2 + $0x38] sm:$0xff]  ;;  %v2609_v42 = vld [vmem:[#allocation2 + $0x50] sm:$0xff] }
 0x275   : > { %v11483_v56 = vld [vmem:[#allocation2 + $0x51] sm:$0xff] }
 0x279   : > { %v8516_v3 = vpop.f32.mrb[14].mxu0 }
 0x27a   : > { %v2133_v37 = vadd.f32 %v8516_v3, %v11159_v54  ;;  %v2127_v31 = vpop.f32.mrb[15].mxu0  ;;  %v3730_v3 = vld [vmem:[%s14886_s3 + $0x70] sm:$0xff] }
 0x27b   : > { %v2128_v41 = vadd.f32 %v11159_v54, %v2127_v31  ;;  %v9100_v31 = vpack.i.bf16 %v2607_v36, %v2606_v62  ;;  %v3754_v62 = vld [vmem:[%s14886_s3 + $0x130] sm:$0xff]  ;;  %v3755_v36 = vld [vmem:[%s14886_s3 + $0x138] sm:$0xff] }
 0x27c   : > { %vm2211_vm6 = vcmp.ge.f32.partialorder %v2133_v37, 0.0  ;;  %v2239_v58 = vmul.f32 0.2, %v2133_v37 }
 0x27d   : > { %vm2210_vm10 = vcmp.ge.f32.partialorder %v2128_v41, 0.0  ;;  %v2238_v27 = vmul.f32 0.2, %v2128_v41 }
 0x27e   : > { %v2267_v46 = vsel %vm2211_vm6, %v2133_v37, %v2239_v58  ;;  %v3731_v37 = vld [vmem:[%s14886_s3 + $0x78] sm:$0xff] }
 0x27f   : > { %v2380_v19 = vsel %vm2330_vm8, %v2267_v46, 0.0  ;;  %v2266_v47 = vsel %vm2210_vm10, %v2128_v41, %v2238_v27  ;;  %v8675_v41 = vpack.c.bf16 %v3731_v37, %v3730_v3  ;;  %v2654_v58 = vld [vmem:[#allocation2 + $0x32] sm:$0xff]  ;;  %v2655_v27 = vld [vmem:[#allocation2 + $0x3a] sm:$0xff]  ;;  %vm2319_vm10 = vcmp.lt.s32.totalorder %v2291_v28, 16 }
 0x280   : > { %2451 = vrot.lane.b32.xlu1 %v2380_v19, %s10075_s23  ;;  %v2379_v26 = vsel %vm2330_vm8, %v2266_v47, 0.0  ;;  %v3732_v46 = vld [vmem:[%s14886_s3 + $0x80] sm:$0xff]  ;;  %v3733_v19 = vld [vmem:[%s14886_s3 + $0x88] sm:$0xff]  ;;  %v11449_v47 = vpack.i.bf16 %v2655_v27, %v2654_v58  ;;  %vm2305_vm8 = vcmp.ge.s32.totalorder %v2291_v28, 0  ;;  %v2560_v37 = vld [vmem:[#allocation2 + $0x31] sm:$0xff] }
 0x281   : > { %2449 = vrot.lane.b32.xlu0 %v2379_v26, %s10075_s23  ;;  %8676 = vmatpush1.bf16.msra.mxu1 %v8675_v41  ;;  %v8678_v26 = vpack.c.bf16 %v3733_v19, %v3732_v46  ;;  %vm11523_vm12 = vmand %vm2305_vm8, %vm2319_vm10  ;;  %v8713_v41 = vpack.c.bf16 %v3755_v36, %v3754_v62  ;;  %v3746_v27 = vld [vmem:[%s14886_s3 + $0xf0] sm:$0xff]  ;;  %v3747_v46 = vld [vmem:[%s14886_s3 + $0xf8] sm:$0xff] }
 0x282   : > { %8677 = vmatprep.subr.bf16.mxu1 %v14914_v22 }
 0x285   : > { %8679 = vmatpush1.bf16.msra.mxu1 %v8678_v26  ;;  %v8699_v26 = vpack.c.bf16 %v3747_v46, %v3746_v27 }
 0x286   : > { %8680 = vmatprep.subr.bf16.mxu1 %v14914_v22 }
 0x292   : > { %v2440_v45 = vpop.permute.xlu1 %2439 }
 0x293   : > { %2515 = vst.msk [vmem:[#allocation2 + $0x81] sm:$0xff] %vm2505_vm13, %v2440_v45  ;;  %v2438_v53 = vpop.permute.xlu0 %2437  ;;  %v2559_v45 = vld [vmem:[#allocation2 + $0x21] sm:$0xff] }
 0x294   : > { %2514 = vst.msk [vmem:[#allocation2 + $0x79] sm:$0xff] %vm2505_vm13, %v2438_v53  ;;  %v2558_v53 = vld [vmem:[#allocation2 + $0x19] sm:$0xff] }
 0x299   : > { %v8519_v57 = vpop.f32.mrb[16].mxu0 }
 0x29a   : > { %v2143_v48 = vadd.f32 %v8519_v57, %v11159_v54  ;;  %v2137_v15 = vpop.f32.mrb[17].mxu0  ;;  %v3735_v57 = vld [vmem:[%s14886_s3 + $0x98] sm:$0xff] }
 0x29b   : > { %v2138_v55 = vadd.f32 %v11159_v54, %v2137_v15  ;;  %v8681_v15 = vpack.c.bf16 %v3735_v57, %v3734_v35  ;;  %v2729_v57 = vld [vmem:[#allocation2 + $0x62] sm:$0xff] }
 0x29c   : > { %vm2213_vm15 = vcmp.ge.f32.partialorder %v2143_v48, 0.0  ;;  %v2241_v51 = vmul.f32 0.2, %v2143_v48 }
 0x29d   : > { %vm2212_vm3 = vcmp.ge.f32.partialorder %v2138_v55, 0.0  ;;  %v2240_v23 = vmul.f32 0.2, %v2138_v55  ;;  %8682 = vmatpush1.bf16.msra.mxu1 %v8681_v15  ;;  %v2730_v15 = vld [vmem:[#allocation2 + $0x6a] sm:$0xff] }
 0x29e   : > { %v2269_v34 = vsel %vm2213_vm15, %v2143_v48, %v2241_v51  ;;  %v9115_v48 = vpack.i.bf16 %v2559_v45, %v2558_v53  ;;  %v2583_v51 = vld [vmem:[#allocation2 + $0x22] sm:$0xff]  ;;  %8683 = vmatprep.subr.bf16.mxu1 %v14914_v22 }
 0x29f   : > { %v2382_v52 = vsel %vm2331_vm1, %v2269_v34, 0.0  ;;  %v2268_v20 = vsel %vm2212_vm3, %v2138_v55, %v2240_v23  ;;  %v2582_v55 = vld [vmem:[#allocation2 + $0x1a] sm:$0xff]  ;;  %v3737_v34 = vld [vmem:[%s14886_s3 + $0xa8] sm:$0xff] }
 0x2a0   : > { %2455 = vrot.lane.b32.xlu1 %v2382_v52, %s10075_s23  ;;  %v2381_v44 = vsel %vm2331_vm1, %v2268_v20, 0.0  ;;  %v3736_v23 = vld [vmem:[%s14886_s3 + $0xa0] sm:$0xff]  ;;  %v9125_v52 = vpack.i.bf16 %v2583_v51, %v2582_v55  ;;  %vm14988_vm1 = vcmask 1043456   ;;  %v2611_v51 = vld [vmem:[#allocation2 + $0x68] sm:$0xff] }
 0x2a1   : > { %2453 = vrot.lane.b32.xlu0 %v2381_v44, %s10075_s23  ;;  %v8684_v20 = vpack.c.bf16 %v3737_v34, %v3736_v23  ;;  %v3738_v44 = vld [vmem:[%s14886_s3 + $0xb0] sm:$0xff]  ;;  %v3756_v45 = vld [vmem:[%s14886_s3 + $0x140] sm:$0xf]  ;;  %vm14989_vm3 = vmmov %vm14988_vm1 }
 0x2a2   : > { %v8687_v61 = vpack.c.bf16 %v3739_v40, %v3738_v44  ;;  %v2610_v55 = vld [vmem:[#allocation2 + $0x60] sm:$0xff] }
 0x2a3   : > { %8685 = vmatpush1.bf16.msra.mxu1 %v8684_v20  ;;  %v9160_v23 = vpack.i.bf16 %v2611_v51, %v2610_v55  ;;  %v9170_v20 = vpack.i.bf16 %v2730_v15, %v2729_v57 }
 0x2a4   : > { %8686 = vmatprep.subr.bf16.mxu1 %v14914_v22 }
 0x2a7   : > { %8688 = vmatpush1.bf16.msra.mxu1 %v8687_v61 }
 0x2a8   : > { %8689 = vmatprep.subr.bf16.mxu1 %v14914_v22 }
 0x2b2   : > { %v2444_v13 = vpop.permute.xlu1 %2443 }
 0x2b3   : > { %2517 = vst.msk [vmem:[#allocation2 + $0x99] sm:$0xff] %vm2505_vm13, %v2444_v13  ;;  %v2442_v59 = vpop.permute.xlu0 %2441  ;;  %v3740_v13 = vld [vmem:[%s14886_s3 + $0xc0] sm:$0xff] }
 0x2b4   : > { %2516 = vst.msk [vmem:[#allocation2 + $0x91] sm:$0xff] %vm2505_vm13, %v2442_v59  ;;  %v11496_v59 = vpack.i.bf16 %v2609_v42, %v2608_v63  ;;  %v8690_v49 = vpack.c.bf16 %v3741_v21, %v3740_v13  ;;  %v2732_v21 = vld [vmem:[#allocation2 + $0x82] sm:$0xff] }
 0x2b6   : > { %8691 = vmatpush1.bf16.msra.mxu1 %v8690_v49  ;;  %v2637_v49 = vld [vmem:[#allocation2 + $0x81] sm:$0xff] }
 0x2b7   : > { %8692 = vmatprep.subr.bf16.mxu1 %v14914_v22 }
 0x2b9   : > { %v8522_v12 = vpop.f32.mrb[18].mxu0 }
 0x2ba   : > { %v2153_v39 = vadd.f32 %v8522_v12, %v11159_v54  ;;  %v2147_v32 = vpop.f32.mrb[19].mxu0 }
 0x2bb   : > { %v2148_v17 = vadd.f32 %v11159_v54, %v2147_v32  ;;  %v2685_v51 = vld [vmem:[#allocation2 + $0x90] sm:$0xff] }
 0x2bc   : > { %vm2215_vm0 = vcmp.ge.f32.partialorder %v2153_v39, 0.0  ;;  %v2243_v14 = vmul.f32 0.2, %v2153_v39 }
 0x2bd   : > { %vm2214_vm6 = vcmp.ge.f32.partialorder %v2148_v17, 0.0  ;;  %v2242_v18 = vmul.f32 0.2, %v2148_v17 }
 0x2be   : > { %v2271_v29 = vsel %vm2215_vm0, %v2153_v39, %v2243_v14  ;;  %v3743_v39 = vld [vmem:[%s14886_s3 + $0xd8] sm:$0xff]  ;;  %v11517_v14 = vld [vmem:[#allocation2 + $0x4a] sm:$0xff] }
 0x2bf   : > { %v2384_v11 = vsel %vm11417_vm9, %v2271_v29, 0.0  ;;  %v2270_v4 = vsel %vm2214_vm6, %v2148_v17, %v2242_v18  ;;  %v8693_v10 = vpack.c.bf16 %v3743_v39, %v3742_v7  ;;  %v3752_v17 = vld [vmem:[%s14886_s3 + $0x120] sm:$0xff] }
 0x2c0   : > { %2459 = vrot.lane.b32.xlu1 %v2384_v11, %s10075_s23  ;;  %v2383_v24 = vsel %vm11417_vm9, %v2270_v4, 0.0  ;;  %v8709_v29 = vpack.c.bf16 %v3753_v16, %v3752_v17 }
 0x2c1   : > { %2457 = vrot.lane.b32.xlu0 %v2383_v24, %s10075_s23  ;;  %8694 = vmatpush1.bf16.msra.mxu1 %v8693_v10  ;;  %v2728_v24 = vld [vmem:[#allocation2 + $0x52] sm:$0xff] }
 0x2c2   : > { %8695 = vmatprep.subr.bf16.mxu1 %v14914_v22  ;;  %8710 = vmatprep.subr.bf16.mxu0 %v8709_v29  ;;  %v9185_v42 = vpack.i.bf16 %v2728_v24, %v11517_v14 }
 0x2c3   : > { %8712 = vmatpush3.bf16.msra.mxu0 %v8709_v29 }
 0x2c4   : > { %9101 = vrot.lane.b32.xlu1 %v9100_v31, %s14908_s17  ;;  %v2561_v31 = vld [vmem:[#allocation2 + $0x39] sm:$0xff]  ;;  %8714 = vmatprep.subr.bf16.mxu0 %v8713_v41 }
 0x2c5   : > { %v9145_v19 = vpack.i.bf16 %v2561_v31, %v2560_v37  ;;  %v2683_v31 = vld [vmem:[#allocation2 + $0x78] sm:$0xff] }
 0x2c7   : > { %8716 = vmatpush3.bf16.msra.mxu0 %v8713_v41  ;;  %v2684_v41 = vld [vmem:[#allocation2 + $0x80] sm:$0xff] }
 0x2c8   : > { %9111 = vrot.lane.b32.xlu1 %v11449_v47, %s14904_s20  ;;  %8551 = vmatprep.subr.msk.mxu0 %vm14988_vm1, %v3756_v45  ;;  %v9180_v27 = vpack.i.bf16 %v2684_v41, %v2683_v31  ;;  %vm3617_vm1 = vcmask 424960   ;;  %v2534_v41 = vld [vmem:[#allocation2 + $0x18] sm:$0xff] }
 0x2cb   : > { %8552 = vmatpush3.msk.msra.mxu0 %vm14989_vm3, %v3756_v45  ;;  %vm3642_vm3 = vcmask 719872  }
 0x2cc   : > { %9116 = vrot.lane.b32.xlu1 %v9115_v48, %s10085_s24  ;;  %8717 = vmatprep.subr.bf16.mxu0 %v14914_v22  ;;  %v2703_v48 = vld [vmem:[#allocation2 + $0x49] sm:$0xff] }
 0x2cd   : > { %v9175_v2 = vpack.i.bf16 %v11483_v56, %v2703_v48 }
 0x2d0   : > { %9126 = vrot.lane.b32.xlu1 %v9125_v52, %s14921_s16  ;;  %v2292_v52 = vadd.s32 11, %v11162_v25 }
 0x2d2   : > { %v2448_v60 = vpop.permute.xlu1 %2447  ;;  %vm2306_vm4 = vcmp.ge.s32.totalorder %v2292_v52, 0  ;;  %vm2320_vm14 = vcmp.lt.s32.totalorder %v2292_v52, 16 }
 0x2d3   : > { %2519 = vst.msk [vmem:[#allocation2 + $0xb1] sm:$0xff] %vm2505_vm13, %v2448_v60  ;;  %v2446_v38 = vpop.permute.xlu0 %2445  ;;  %v11580_v60 = vld [vmem:[%s14885_s2] ss:$0 sm:$0xff]  ;;  %vm11585_vm9 = vmand %vm2306_vm4, %vm2320_vm14  ;;  %vm3543_vm4 = vcmask 588800   ;;  %vm3667_vm14 = vcmask 1014784  }
 0x2d4   : > { %2518 = vst.msk [vmem:[#allocation2 + $0xa9] sm:$0xff] %vm2505_vm13, %v2446_v38  ;;  %3353 = vrot.lane.b32.xlu1 %v11483_v56, %s14906_s22  ;;  %s14910_s22 = smov 88   ;;  %v2731_v56 = vld [vmem:[#allocation2 + $0x7a] sm:$0xff] }
 0x2d8   : > { %9131 = vrot.lane.b32.xlu1 %v11496_v59, %s14908_s17  ;;  %s10090_s17 = smov 84  }
 0x2d9   : > { %v8525_v12 = vpop.f32.mrb[20].mxu0 }
 0x2da   : > { %v2157_v1 = vpop.f32.mrb[21].mxu0  ;;  %v2163_v9 = vadd.f32 %v8525_v12, %v11159_v54  ;;  %v2564_v12 = vld [vmem:[#allocation2 + $0x61] sm:$0xff]  ;;  %v2641_v45 = vld [vmem:[#allocation2 + $0xb1] sm:$0xff] }
 0x2db   : > { %v2158_v32 = vadd.f32 %v11159_v54, %v2157_v1  ;;  %v3744_v54 = vld [vmem:[%s14886_s3 + $0xe0] sm:$0xff]  ;;  %v2565_v1 = vld [vmem:[#allocation2 + $0x69] sm:$0xff] }
 0x2dc   : > { %3447 = vrot.lane.b32.xlu1 %v11517_v14, %s14935_s18  ;;  %v8696_v4 = vpack.c.bf16 %v3745_v30, %v3744_v54  ;;  %v2245_v58 = vmul.f32 0.2, %v2163_v9  ;;  %vm2217_vm15 = vcmp.ge.f32.partialorder %v2163_v9, 0.0  ;;  %v9205_v7 = vpack.i.bf16 %v2565_v1, %v2564_v12  ;;  %v2734_v54 = vld [vmem:[#allocation2 + $0x9a] sm:$0xff]  ;;  %v2735_v46 = vld [vmem:[#allocation2 + $0xaa] sm:$0xff] }
 0x2dd   : > { %vm2216_vm11 = vcmp.ge.f32.partialorder %v2158_v32, 0.0  ;;  %v2244_v18 = vmul.f32 0.2, %v2158_v32 }
 0x2de   : > { %8697 = vmatpush1.bf16.msra.mxu1 %v8696_v4  ;;  %v2273_v53 = vsel %vm2217_vm15, %v2163_v9, %v2245_v58  ;;  %v2639_v4 = vld [vmem:[#allocation2 + $0x99] sm:$0xff]  ;;  %v9245_v58 = vpack.i.bf16 %v2732_v21, %v2731_v56 }
 0x2df   : > { %v2272_v11 = vsel %vm2216_vm11, %v2158_v32, %v2244_v18  ;;  %8698 = vmatprep.subr.bf16.mxu1 %v14914_v22  ;;  %v2386_v35 = vsel %vm11523_vm12, %v2273_v53, 0.0  ;;  %v2293_v32 = vadd.s32 12, %v11162_v25  ;;  %v2733_v18 = vld [vmem:[#allocation2 + $0x92] sm:$0xff] }
 0x2e0   : > { %v2385_v3 = vsel %vm11523_vm12, %v2272_v11, 0.0  ;;  %3449 = vrot.lane.b32.xlu1 %v2728_v24, %s14935_s18  ;;  %v2638_v11 = vld [vmem:[#allocation2 + $0x91] sm:$0xff] }
 0x2e1   : > { %2461 = vrot.lane.b32.xlu0 %v2385_v3, %s10075_s23  ;;  %vm2307_vm8 = vcmp.ge.s32.totalorder %v2293_v32, 0  ;;  %vm2321_vm10 = vcmp.lt.s32.totalorder %v2293_v32, 16  ;;  %v9225_v24 = vpack.i.bf16 %v2639_v4, %v2638_v11 }
 0x2e2   : > { %8700 = vmatpush1.bf16.msra.mxu1 %v8699_v26  ;;  %vm11614_vm12 = vmand %vm2307_vm8, %vm2321_vm10  ;;  %v2640_v26 = vld [vmem:[#allocation2 + $0xa9] sm:$0xff]  ;;  %vm14998_vm8 = vcmask 261120  }
 0x2e3   : > { %vm14999_vm10 = vmmov %vm14998_vm8 }
 0x2e4   : > { %9146 = vrot.lane.b32.xlu1 %v9145_v19, %s10085_s24 }
 0x2e5   : > { %9106 = vrot.lane.b32.xlu0 %v9145_v19, %s10077_s25  ;;  %v2736_v19 = vld [vmem:[#allocation2 + $0xb2] sm:$0xff] }
 0x2e8   : > { %9156 = vrot.lane.b32.xlu1 %v11449_v47, %s14921_s16 }
 0x2e9   : > { %2463 = vrot.lane.b32.xlu0 %v2386_v35, %s10075_s23  ;;  %v9255_v35 = vpack.i.bf16 %v2641_v45, %v2640_v26 }
 0x2ec   : > { %3451 = vrot.lane.b32.xlu1 %v2729_v57, %s14935_s18 }
 0x2ed   : > { %9121 = vrot.lane.b32.xlu0 %v11496_v59, %s14910_s22  ;;  %v2636_v59 = vld [vmem:[#allocation2 + $0x79] sm:$0xff] }
 0x2ee   : > { %v9195_v6 = vpack.i.bf16 %v2637_v49, %v2636_v59 }
 0x2f0   : > { %3453 = vrot.lane.b32.xlu1 %v2730_v15, %s14935_s18 }
 0x2f1   : > { %3351 = vrot.lane.b32.xlu0 %v2703_v48, %s14990_s26 }
 0x2f2   : > { %v2452_v47 = vpop.permute.xlu1 %2451 }
 0x2f3   : > { %2521 = vst.msk [vmem:[#allocation2 + $0xc9] sm:$0xff] %vm2505_vm13, %v2452_v47  ;;  %v2450_v34 = vpop.permute.xlu0 %2449  ;;  %v2686_v47 = vld [vmem:[#allocation2 + $0x98] sm:$0xff] }
 0x2f4   : > { %2520 = vst.msk [vmem:[#allocation2 + $0xc1] sm:$0xff] %vm2505_vm13, %v2450_v34  ;;  %9161 = vrot.lane.b32.xlu1 %v9160_v23, %s14991_s27  ;;  %v9275_v34 = vpack.i.bf16 %v2734_v54, %v2733_v18  ;;  %v9210_v52 = vpack.i.bf16 %v2686_v47, %v2685_v51 }
 0x2f8   : > { %9171 = vrot.lane.b32.xlu1 %v9170_v20, %s14992_s28 }
 0x2f9   : > { %v8528_v44 = vpop.f32.mrb[22].mxu0 }
 0x2fa   : > { %v2167_v40 = vpop.f32.mrb[23].mxu0  ;;  %v2173_v28 = vadd.f32 %v11580_v60, %v8528_v44 }
 0x2fb   : > { %v2168_v61 = vadd.f32 %v11580_v60, %v2167_v40  ;;  %v11652_v44 = vld [vmem:[#allocation2 + $0xc2] sm:$0xff] }
 0x2fc   : > { %9176 = vrot.lane.b32.xlu1 %v9175_v2, %s10085_s24  ;;  %v2247_v13 = vmul.f32 0.2, %v2173_v28  ;;  %vm2219_vm6 = vcmp.ge.f32.partialorder %v2173_v28, 0.0  ;;  %v2690_v31 = vld [vmem:[#allocation2 + $0xc8] sm:$0xff] }
 0x2fd   : > { %vm2218_vm0 = vcmp.ge.f32.partialorder %v2168_v61, 0.0  ;;  %v2246_v43 = vmul.f32 0.2, %v2168_v61 }
 0x2fe   : > { %v2275_v5 = vsel %vm2219_vm6, %v2173_v28, %v2247_v13  ;;  %v2688_v28 = vld [vmem:[#allocation2 + $0xb0] sm:$0xff]  ;;  %v9305_v13 = vpack.i.bf16 %v2736_v19, %v2735_v46  ;;  %vm14997_vm6 = vcmask 293888  }
 0x2ff   : > { %v2274_v50 = vsel %vm2218_vm0, %v2168_v61, %v2246_v43  ;;  %v2388_v8 = vsel %vm11585_vm9, %v2275_v5, 0.0  ;;  %v11659_v61 = vld [vmem:[#allocation2 + $0xca] sm:$0xff]  ;;  %vm3568_vm0 = vcmask 883712  }
 0x300   : > { %v2387_v63 = vsel %vm11585_vm9, %v2274_v50, 0.0  ;;  %9186 = vrot.lane.b32.xlu1 %v9185_v42, %s14921_s16  ;;  %v11663_v43 = vld [vmem:[#allocation2 + $0xc9] sm:$0xff]  ;;  %vm3764_vm9 = vcmask 556032  }
 0x301   : > { %2465 = vrot.lane.b32.xlu0 %v2387_v63, %s10075_s23  ;;  %v2687_v63 = vld [vmem:[#allocation2 + $0xa8] sm:$0xff] }
 0x304   : > { %3455 = vrot.lane.b32.xlu1 %v2731_v56, %s14935_s18 }
 0x305   : > { %9136 = vrot.lane.b32.xlu0 %v9175_v2, %s10077_s25  ;;  %v11661_v2 = vld [vmem:[#allocation2 + $0xc1] sm:$0xff] }
 0x308   : > { %3457 = vrot.lane.b32.xlu1 %v2732_v21, %s14935_s18  ;;  %v9240_v21 = vpack.i.bf16 %v2688_v28, %v2687_v63 }
 0x309   : > { %9141 = vrot.lane.b32.xlu0 %v9185_v42, %s14992_s28  ;;  %v9285_v42 = vpack.i.bf16 %v11663_v43, %v11661_v2 }
 0x30c   : > { %9196 = vrot.lane.b32.xlu1 %v9195_v6, %s10077_s25 }
 0x30d   : > { %2467 = vrot.lane.b32.xlu0 %v2388_v8, %s10075_s23 }
 0x310   : > { %9206 = vrot.lane.b32.xlu1 %v9205_v7, %s10085_s24 }
 0x311   : > { %9151 = vrot.lane.b32.xlu0 %v9160_v23, %s14910_s22 }
 0x312   : > { %v2456_v39 = vpop.permute.xlu1 %2455 }
 0x313   : > { %2523 = vst.msk [vmem:[#allocation2 + $0xe1] sm:$0xff] %vm2505_vm13, %v2456_v39  ;;  %v2454_v10 = vpop.permute.xlu0 %2453 }
 0x314   : > { %2522 = vst.msk [vmem:[#allocation2 + $0xd9] sm:$0xff] %vm2505_vm13, %v2454_v10  ;;  %9216 = vrot.lane.b32.xlu1 %v9170_v20, %s14921_s16 }
 0x315   : > { %3355 = vrot.lane.b32.xlu0 %v2564_v12, %s14990_s26 }
 0x316   : > { %v8531_v17 = vpop.f32.mrb[24].mxu0 }
 0x317   : > { %v2177_v14 = vpop.f32.mrb[25].mxu0  ;;  %v2183_v33 = vadd.f32 %v11580_v60, %v8531_v17 }
 0x318   : > { %v2178_v9 = vadd.f32 %v11580_v60, %v2177_v14  ;;  %3459 = vrot.lane.b32.xlu1 %v2733_v18, %s14935_s18 }
 0x319   : > { %3357 = vrot.lane.b32.xlu0 %v2565_v1, %s14990_s26  ;;  %v2249_v36 = vmul.f32 0.2, %v2183_v33  ;;  %vm2221_vm15 = vcmp.ge.f32.partialorder %v2183_v33, 0.0 }
 0x31a   : > { %vm2220_vm11 = vcmp.ge.f32.partialorder %v2178_v9, 0.0  ;;  %v2248_v16 = vmul.f32 0.2, %v2178_v9  ;;  %v11688_v12 = vld [vmem:[#allocation2 + $0xe2] sm:$0xff] }
 0x31b   : > { %v2277_v3 = vsel %vm2221_vm15, %v2183_v33, %v2249_v36  ;;  %v11681_v5 = vld [vmem:[#allocation2 + $0xda] sm:$0xff]  ;;  %vm15002_vm15 = vmmov %vm14998_vm8 }
 0x31c   : > { %v2276_v30 = vsel %vm2220_vm11, %v2178_v9, %v2248_v16  ;;  %3461 = vrot.lane.b32.xlu1 %v2734_v54, %s14935_s18  ;;  %v2390_v37 = vsel %vm11614_vm12, %v2277_v3, 0.0  ;;  %v11690_v1 = vld [vmem:[#allocation2 + $0xd9] sm:$0xff]  ;;  %vm15000_vm11 = vmmov %vm14997_vm6 }
 0x31d   : > { %v2389_v62 = vsel %vm11614_vm12, %v2276_v30, 0.0  ;;  %vm15001_vm12 = vmmov %vm14997_vm6 }
 0x31e   : > { %2469 = vrot.lane.b32.xlu0 %v2389_v62, %s10075_s23 }
 0x320   : > { %9226 = vrot.lane.b32.xlu1 %v9225_v24, %s10077_s25 }
 0x322   : > { %9166 = vrot.lane.b32.xlu0 %v9205_v7, %s10077_s25  ;;  %v11692_v7 = vld [vmem:[#allocation2 + $0xe1] sm:$0xff] }
 0x323   : > { %v11701_v17 = vpack.i.bf16 %v11692_v7, %v11690_v1 }
 0x324   : > { %9236 = vrot.lane.b32.xlu1 %v9195_v6, %s10085_s24 }
 0x326   : > { %2471 = vrot.lane.b32.xlu0 %v2390_v37, %s10075_s23  ;;  %v2689_v37 = vld [vmem:[#allocation2 + $0xc0] sm:$0xff] }
 0x327   : > { %v9270_v47 = vpack.i.bf16 %v2690_v31, %v2689_v37 }
 0x328   : > { %9246 = vrot.lane.b32.xlu1 %v9245_v58, %s14921_s16 }
 0x32a   : > { %9181 = vrot.lane.b32.xlu0 %v9180_v27, %s14910_s22 }
 0x32c   : > { %3463 = vrot.lane.b32.xlu1 %v2735_v46, %s14935_s18 }
 0x32e   : > { %3359 = vrot.lane.b32.xlu0 %v2636_v59, %s14990_s26 }
 0x330   : > { %3465 = vrot.lane.b32.xlu1 %v2736_v19, %s14935_s18 }
 0x332   : > { %3361 = vrot.lane.b32.xlu0 %v2637_v49, %s14990_s26  ;;  %v2460_v53 = vpop.permute.xlu1 %2459 }
 0x333   : > { %2525 = vst.msk [vmem:[#allocation2 + $0xf9] sm:$0xff] %vm2505_vm13, %v2460_v53  ;;  %v2458_v57 = vpop.permute.xlu0 %2457  ;;  %v9335_v53 = vpack.i.bf16 %v11659_v61, %v11652_v44 }
 0x334   : > { %2524 = vst.msk [vmem:[#allocation2 + $0xf1] sm:$0xff] %vm2505_vm13, %v2458_v57  ;;  %9256 = vrot.lane.b32.xlu1 %v9255_v35, %s10077_s25 }
 0x336   : > { %9191 = vrot.lane.b32.xlu0 %v9180_v27, %s14991_s27  ;;  %v11638_v48 = vpop.f32.mrb[26].mxu0  ;;  %v11640_v15 = vpop.permute.xlu1 %9101 }
 0x337   : > { %v11642_v55 = vpop.f32.mrb[27].mxu0  ;;  %v9103_v14 = vunpack.i.l.bf16 %v11640_v15  ;;  %v9104_v18 = vunpack.i.h.bf16 %v11640_v15 }
 0x338   : > { %9266 = vrot.lane.b32.xlu1 %v9225_v24, %s10085_s24 }
 0x33a   : > { %9201 = vrot.lane.b32.xlu0 %v9245_v58, %s14992_s28  ;;  %v11646_v23 = vpop.permute.xlu1 %9111 }
 0x33b   : > { %v9113_v29 = vunpack.i.l.bf16 %v11646_v23  ;;  %v9114_v24 = vunpack.i.h.bf16 %v11646_v23  ;;  %v11746_v63 = vld [vmem:[#allocation2 + $0xf2] sm:$0xff] }
 0x33c   : > { %9276 = vrot.lane.b32.xlu1 %v9275_v34, %s14921_s16 }
 0x33e   : > { %9211 = vrot.lane.b32.xlu0 %v9210_v52, %s14910_s22  ;;  %v11650_v20 = vpop.permute.xlu1 %9116 }
 0x33f   : > { %v9118_v33 = vunpack.i.l.bf16 %v11650_v20  ;;  %v9119_v58 = vunpack.i.h.bf16 %v11650_v20 }
 0x340   : > { %3467 = vrot.lane.b32.xlu1 %v11652_v44, %s14935_s18 }
 0x341   : > { %v3519_v46 = vsel %vm14997_vm6, %v2534_v41, %v9118_v33 }
 0x342   : > { %3363 = vrot.lane.b32.xlu0 %v2638_v11, %s14990_s26  ;;  %v11657_v40 = vpop.permute.xlu1 %9126 }
 0x343   : > { %v9128_v54 = vunpack.i.l.bf16 %v11657_v40  ;;  %v9129_v19 = vunpack.i.h.bf16 %v11657_v40 }
 0x344   : > { %3469 = vrot.lane.b32.xlu1 %v11659_v61, %s14935_s18 }
 0x346   : > { %3365 = vrot.lane.b32.xlu0 %v2639_v4, %s14990_s26  ;;  %v11668_v38 = vpop.permute.xlu1 %3353 }
 0x348   : > { %9286 = vrot.lane.b32.xlu1 %v9285_v42, %s10077_s25 }
 0x34a   : > { %9221 = vrot.lane.b32.xlu0 %v9210_v52, %s14991_s27  ;;  %v11674_v50 = vpop.permute.xlu1 %9131 }
 0x34c   : > { %9296 = vrot.lane.b32.xlu1 %v9255_v35, %s10085_s24  ;;  %v3544_v35 = vsel %vm3543_vm4, %v3519_v46, %v9128_v54  ;;  %v2536_v46 = vld [vmem:[#allocation2 + $0x30] sm:$0xff] }
 0x34d   : > { %v3569_v20 = vsel %vm3568_vm0, %v3544_v35, %v9103_v14 }
 0x34e   : > { %9231 = vrot.lane.b32.xlu0 %v9275_v34, %s14992_s28  ;;  %v3448_v56 = vpop.permute.xlu1 %3447  ;;  %v2535_v34 = vld [vmem:[#allocation2 + $0x20] sm:$0xff] }
 0x34f   : > { %v3520_v44 = vsel %vm15000_vm11, %v2535_v34, %v9119_v58  ;;  %vm15004_vm11 = vmmov %vm14998_vm8 }
 0x350   : > { %9306 = vrot.lane.b32.xlu1 %v9305_v13, %s14921_s16 }
 0x352   : > { %9241 = vrot.lane.b32.xlu0 %v9240_v21, %s14910_s22  ;;  %v3450_v59 = vpop.permute.xlu1 %3449 }
 0x353   : > { %v2462_v49 = vpop.permute.xlu0 %2461  ;;  %v3693_v52 = vsel %vm14999_vm10, %v11668_v38, %v3450_v59  ;;  %vm15003_vm10 = vmmov %vm14997_vm6 }
 0x354   : > { %2526 = vst.msk [vmem:[#allocation2 + $0x109] sm:$0xff] %vm2505_vm13, %v2462_v49  ;;  %3471 = vrot.lane.b32.xlu1 %v11681_v5, %s14935_s18 }
 0x356   : > { %3367 = vrot.lane.b32.xlu0 %v2640_v26, %s14990_s26  ;;  %v11686_v6 = vpop.permute.xlu1 %9146 }
 0x357   : > { %v9107_v8 = vpop.permute.xlu0 %9106 }
 0x358   : > { %3473 = vrot.lane.b32.xlu1 %v11688_v12, %s14935_s18  ;;  %v9108_v39 = vunpack.i.l.bf16 %v9107_v8  ;;  %v9109_v9 = vunpack.i.h.bf16 %v9107_v8 }
 0x35a   : > { %3369 = vrot.lane.b32.xlu0 %v2641_v45, %s14990_s26  ;;  %v11697_v32 = vpop.permute.xlu1 %9156  ;;  %v3593_v16 = vsel %vm1745_vm7, %v9103_v14, %v9108_v39  ;;  %v3594_v4 = vsel %vm1745_vm7, %v9104_v18, %v9109_v9  ;;  %v11776_v39 = vld [vmem:[#allocation2 + $0xd8] sm:$0xff]  ;;  %v9365_v9 = vpack.i.bf16 %v11688_v12, %v11681_v5 }
 0x35b   : > { %v2464_v10 = vpop.permute.xlu0 %2463  ;;  %v3618_v3 = vsel %vm3617_vm1, %v3593_v16, %v9113_v29  ;;  %v3619_v57 = vsel %vm3617_vm1, %v3594_v4, %v9114_v24  ;;  %v9158_v24 = vunpack.i.l.bf16 %v11697_v32 }
 0x35c   : > { %2527 = vst.msk [vmem:[#allocation2 + $0x111] sm:$0xff] %vm2505_vm13, %v2464_v10  ;;  %9316 = vrot.lane.b32.xlu1 %v11701_v17, %s10077_s25 }
 0x35e   : > { %9251 = vrot.lane.b32.xlu0 %v9240_v21, %s14991_s27  ;;  %v11713_v30 = vpop.permute.xlu1 %3451  ;;  %v11757_v21 = vld [vmem:[#allocation2 + $0xf1] sm:$0xff] }
 0x35f   : > { %v9122_v11 = vpop.permute.xlu0 %9121 }
 0x360   : > { %v9124_v62 = vunpack.i.h.bf16 %v9122_v11  ;;  %v9123_v36 = vunpack.i.l.bf16 %v9122_v11  ;;  %9326 = vrot.lane.b32.xlu1 %v9285_v42, %s10085_s24  ;;  %v3545_v42 = vsel %vm3543_vm4, %v3520_v44, %v9129_v19  ;;  %v9149_v19 = vunpack.i.h.bf16 %v11686_v6  ;;  %v11837_v44 = vld [vmem:[#allocation2 + $0xf0] sm:$0xff] }
 0x361   : > { %v3570_v28 = vsel %vm3568_vm0, %v3545_v42, %v9104_v18 }
 0x362   : > { %9261 = vrot.lane.b32.xlu0 %v9305_v13, %s14992_s28  ;;  %v3643_v27 = vsel %vm3642_vm3, %v3618_v3, %v9123_v36  ;;  %v11724_v26 = vpop.permute.xlu1 %3453  ;;  %v3644_v23 = vsel %vm3642_vm3, %v3619_v57, %v9124_v62  ;;  %v11755_v13 = vld [vmem:[#allocation2 + $0xfa] sm:$0xff]  ;;  %v9133_v62 = vunpack.i.l.bf16 %v11674_v50  ;;  %v9148_v36 = vunpack.i.l.bf16 %v11686_v6 }
 0x363   : > { %v3352_v45 = vpop.permute.xlu0 %3351  ;;  %v3669_v61 = vsel %vm3667_vm14, %v3644_v23, %v11668_v38  ;;  %v11759_v38 = vld [vmem:[#allocation2 + $0xf9] sm:$0xff]  ;;  %v11791_v16 = vld [vmem:[#allocation2 + $0x10a] sm:$0xff]  ;;  %v9134_v57 = vunpack.i.h.bf16 %v11674_v50 }
 0x364   : > { %v3668_v15 = vsel %vm3667_vm14, %v3643_v27, %v3352_v45  ;;  %v3692_v51 = vsel %vm14998_vm8, %v3352_v45, %v3448_v56  ;;  %9336 = vrot.lane.b32.xlu1 %v9335_v53, %s14921_s16  ;;  %v11800_v54 = vld [vmem:[#allocation2 + $0x112] sm:$0xff]  ;;  %v3521_v35 = vsel %vm15001_vm12, %v2536_v46, %v9148_v36  ;;  %vm15005_vm12 = vmmov %vm14997_vm6 }
 0x365   : > { %3904 = vmatprep.mubr.f32.mxu1 %v3668_v15  ;;  %8553 = vmatprep.mubr.msk.f32.mxu0 %vm3764_vm9, %v3692_v51  ;;  %v11802_v11 = vld [vmem:[#allocation2 + $0x111] sm:$0xff]  ;;  %v9159_v15 = vunpack.i.h.bf16 %v11697_v32  ;;  %v3546_v34 = vsel %vm3543_vm4, %v3521_v35, %v9158_v24 }
 0x366   : > { %9271 = vrot.lane.b32.xlu0 %v9270_v47, %s14910_s22  ;;  %v11740_v40 = vpop.permute.xlu1 %9161  ;;  %3905 = vmatmul.mubr.f32.vlgmr.msra.gmra.mrb[0].mxu1 %v3569_v20  ;;  %v11839_v50 = vld [vmem:[#allocation2 + $0xf8] sm:$0xff] }
 0x367   : > { %8554 = vmatmul.mubr.msk.f32.vlgmr.msra.gmra.mrb[28].mxu0 %vm3764_vm9, %v3693_v52  ;;  %3909 = vmatprep.mubr.f32.mxu1 %v3669_v61  ;;  %v2537_v32 = vld [vmem:[#allocation2 + $0x38] sm:$0xff]  ;;  %v3571_v61 = vsel %vm3568_vm0, %v3546_v34, %v9133_v62  ;;  %v9164_v34 = vunpack.i.h.bf16 %v11740_v40 }
 0x368   : > { %3475 = vrot.lane.b32.xlu1 %v11746_v63, %s14935_s18 }
 0x36a   : > { %3371 = vrot.lane.b32.xlu0 %v11661_v2, %s14990_s26  ;;  %v11753_v56 = vpop.permute.xlu1 %9171  ;;  %3910 = vmatmul.mubr.f32.gmra.mrb[2].mxu1 %v3570_v28  ;;  %v9345_v2 = vpack.i.bf16 %v11759_v38, %v11757_v21 }
 0x36c   : > { %3477 = vrot.lane.b32.xlu1 %v11755_v13, %s14935_s18 }
 0x36e   : > { %3373 = vrot.lane.b32.xlu0 %v11663_v43, %s14990_s26  ;;  %v11765_v59 = vpop.permute.xlu1 %9176  ;;  %v11778_v43 = vld [vmem:[#allocation2 + $0xe0] sm:$0xff] }
 0x36f   : > { %v9300_v18 = vpack.i.bf16 %v11778_v43, %v11776_v39  ;;  %v9178_v46 = vunpack.i.l.bf16 %v11765_v59 }
 0x370   : > { %9346 = vrot.lane.b32.xlu1 %v9345_v2, %s10077_s25 }
 0x372   : > { %9281 = vrot.lane.b32.xlu0 %v9270_v47, %s14991_s27  ;;  %v11771_v49 = vpop.permute.xlu1 %9186 }
 0x373   : > { %v2466_v8 = vpop.permute.xlu0 %2465 }
 0x374   : > { %2528 = vst.msk [vmem:[#allocation2 + $0x121] sm:$0xff] %vm2505_vm13, %v2466_v8  ;;  %9356 = vrot.lane.b32.xlu1 %v11701_v17, %s10085_s24  ;;  %v9395_v8 = vpack.i.bf16 %v11755_v13, %v11746_v63 }
 0x376   : > { %9291 = vrot.lane.b32.xlu0 %v9335_v53, %s14992_s28  ;;  %v11781_v10 = vpop.permute.xlu1 %3455 }
 0x377   : > { %v9137_v14 = vpop.permute.xlu0 %9136 }
 0x378   : > { %9366 = vrot.lane.b32.xlu1 %v9365_v9, %s14921_s16  ;;  %v9138_v12 = vunpack.i.l.bf16 %v9137_v14  ;;  %v9139_v27 = vunpack.i.h.bf16 %v9137_v14 }
 0x37a   : > { %9301 = vrot.lane.b32.xlu0 %v9300_v18, %s14910_s22  ;;  %v11789_v17 = vpop.permute.xlu1 %3457  ;;  %v3595_v41 = vsel %vm1745_vm7, %v9133_v62, %v9138_v12  ;;  %v3596_v20 = vsel %vm1745_vm7, %v9134_v57, %v9139_v27 }
 0x37b   : > { %v9142_v33 = vpop.permute.xlu0 %9141 }
 0x37c   : > { %3479 = vrot.lane.b32.xlu1 %v11791_v16, %s14935_s18  ;;  %v9143_v4 = vunpack.i.l.bf16 %v9142_v33  ;;  %v9144_v45 = vunpack.i.h.bf16 %v9142_v33 }
 0x37e   : > { %3375 = vrot.lane.b32.xlu0 %v11690_v1, %s14990_s26  ;;  %v11797_v29 = vpop.permute.xlu1 %9196  ;;  %v11810_v1 = vld [vmem:[#allocation2 + $0x109] sm:$0xff]  ;;  %v3621_v42 = vsel %vm3617_vm1, %v3596_v20, %v9144_v45 }
 0x37f   : > { %v2468_v5 = vpop.permute.xlu0 %2467  ;;  %v11817_v31 = vpack.i.bf16 %v11802_v11, %v11810_v1 }
 0x380   : > { %2529 = vst.msk [vmem:[#allocation2 + $0x129] sm:$0xff] %vm2505_vm13, %v2468_v5  ;;  %3481 = vrot.lane.b32.xlu1 %v11800_v54, %s14935_s18  ;;  %v9330_v5 = vpack.i.bf16 %v11839_v50, %v11837_v44 }
 0x382   : > { %3377 = vrot.lane.b32.xlu0 %v11692_v7, %s14990_s26  ;;  %v11813_v3 = vpop.permute.xlu1 %9206  ;;  %v3620_v7 = vsel %vm3617_vm1, %v3595_v41, %v9143_v4 }
 0x383   : > { %v9152_v37 = vpop.permute.xlu0 %9151 }
 0x384   : > { %v9153_v58 = vunpack.i.l.bf16 %v9152_v37  ;;  %9376 = vrot.lane.b32.xlu1 %v11817_v31, %s10077_s25  ;;  %v9154_v51 = vunpack.i.h.bf16 %v9152_v37  ;;  %v11880_v37 = vld [vmem:[#allocation2 + $0x121] sm:$0xff] }
 0x386   : > { %9311 = vrot.lane.b32.xlu0 %v9300_v18, %s14991_s27  ;;  %v3645_v53 = vsel %vm3642_vm3, %v3620_v7, %v9153_v58  ;;  %v11829_v47 = vpop.permute.xlu1 %9216  ;;  %v3646_v14 = vsel %vm3642_vm3, %v3621_v42, %v9154_v51  ;;  %v9163_v7 = vunpack.i.l.bf16 %v11740_v40  ;;  %v11901_v51 = vld [vmem:[#allocation2 + $0x110] sm:$0xff]  ;;  %v11911_v42 = vld [vmem:[#allocation2 + $0x108] sm:$0xff] }
 0x387   : > { %v3356_v23 = vpop.permute.xlu0 %3355  ;;  %v11863_v12 = vld [vmem:[#allocation2 + $0x122] sm:$0xff]  ;;  %v11872_v62 = vld [vmem:[#allocation2 + $0x12a] sm:$0xff] }
 0x388   : > { %v3670_v52 = vsel %vm3667_vm14, %v3645_v53, %v3356_v23  ;;  %v3694_v6 = vsel %vm15002_vm15, %v3356_v23, %v11713_v30  ;;  %9386 = vrot.lane.b32.xlu1 %v9345_v2, %s10085_s24  ;;  %v3522_v30 = vsel %vm14997_vm6, %v2537_v32, %v9149_v19  ;;  %v11874_v24 = vld [vmem:[#allocation2 + $0x129] sm:$0xff]  ;;  %v9173_v53 = vunpack.i.l.bf16 %v11753_v56  ;;  %vm15006_vm15 = vmmov %vm14998_vm8 }
 0x389   : > { %3914 = vmatprep.mubr.f32.mxu1 %v3670_v52  ;;  %8556 = vmatprep.mubr.msk.f32.mxu0 %vm3764_vm9, %v3694_v6  ;;  %v3547_v18 = vsel %vm3543_vm4, %v3522_v30, %v9159_v15  ;;  %v2538_v23 = vld [vmem:[#allocation2 + $0x48] sm:$0xff]  ;;  %v9179_v52 = vunpack.i.h.bf16 %v11765_v59  ;;  %v9189_v32 = vunpack.i.h.bf16 %v11771_v49 }
 0x38a   : > { %9321 = vrot.lane.b32.xlu0 %v9365_v9, %s14992_s28  ;;  %v11846_v28 = vpop.permute.xlu1 %3459  ;;  %3915 = vmatmul.mubr.f32.gmra.mrb[4].mxu1 %v3571_v61  ;;  %v3572_v63 = vsel %vm3568_vm0, %v3547_v18, %v9134_v57  ;;  %v3523_v20 = vsel %vm15003_vm10, %v2538_v23, %v9178_v46 }
 0x38b   : > { %v3358_v2 = vpop.permute.xlu0 %3357 }
 0x38c   : > { %v3671_v33 = vsel %vm3667_vm14, %v3646_v14, %v3358_v2  ;;  %v3695_v9 = vsel %vm14998_vm8, %v3358_v2, %v11724_v26  ;;  %9396 = vrot.lane.b32.xlu1 %v9395_v8, %s14921_s16  ;;  %v9174_v14 = vunpack.i.h.bf16 %v11753_v56 }
 0x38d   : > { %3919 = vmatprep.mubr.f32.mxu1 %v3671_v33  ;;  %8557 = vmatmul.mubr.msk.f32.gmra.mrb[30].mxu0 %vm3764_vm9, %v3695_v9  ;;  %v2539_v33 = vld [vmem:[#allocation2 + $0x50] sm:$0xff] }
 0x38e   : > { %9331 = vrot.lane.b32.xlu0 %v9330_v5, %s14910_s22  ;;  %v11861_v13 = vpop.permute.xlu1 %3461  ;;  %3920 = vmatmul.mubr.f32.gmra.mrb[6].mxu1 %v3572_v63 }
 0x390   : > { %v2470_v4 = vpop.permute.xlu0 %2469  ;;  %3483 = vrot.lane.b32.xlu1 %v11863_v12, %s14935_s18 }
 0x391   : > { %2530 = vst.msk [vmem:[#allocation2 + $0x139] sm:$0xff] %vm2505_vm13, %v2470_v4 }
 0x392   : > { %3379 = vrot.lane.b32.xlu0 %v11757_v21, %s14990_s26  ;;  %v11870_v26 = vpop.permute.xlu1 %9226  ;;  %v11886_v21 = vpack.i.bf16 %v11874_v24, %v11880_v37 }
 0x394   : > { %v9167_v36 = vpop.permute.xlu0 %9166  ;;  %3485 = vrot.lane.b32.xlu1 %v11872_v62, %s14935_s18 }
 0x395   : > { %v9168_v41 = vunpack.i.l.bf16 %v9167_v36  ;;  %v9169_v35 = vunpack.i.h.bf16 %v9167_v36 }
 0x396   : > { %3381 = vrot.lane.b32.xlu0 %v11759_v38, %s14990_s26  ;;  %v11882_v58 = vpop.permute.xlu1 %9236  ;;  %v9188_v38 = vunpack.i.l.bf16 %v11771_v49 }
 0x397   : > { %v3597_v19 = vsel %vm1745_vm7, %v9163_v7, %v9168_v41  ;;  %v3598_v40 = vsel %vm1745_vm7, %v9164_v34, %v9169_v35 }
 0x398   : > { %v2472_v27 = vpop.permute.xlu0 %2471  ;;  %9406 = vrot.lane.b32.xlu1 %v11886_v21, %s10077_s25  ;;  %v3622_v6 = vsel %vm3617_vm1, %v3597_v19, %v9173_v53  ;;  %v3548_v30 = vsel %vm3543_vm4, %v3523_v20, %v9188_v38  ;;  %v3623_v56 = vsel %vm3617_vm1, %v3598_v40, %v9174_v14  ;;  %v2294_v19 = vadd.s32 13, %v11162_v25 }
 0x399   : > { %2531 = vst.msk [vmem:[#allocation2 + $0x141] sm:$0xff] %vm2505_vm13, %v2472_v27  ;;  %v3573_v9 = vsel %vm3568_vm0, %v3548_v30, %v9163_v7  ;;  %v2193_v27 = vadd.f32 %v11580_v60, %v11638_v48  ;;  %v9218_v40 = vunpack.i.l.bf16 %v11829_v47 }
 0x39a   : > { %9341 = vrot.lane.b32.xlu0 %v9330_v5, %s14991_s27  ;;  %v11896_v45 = vpop.permute.xlu1 %9246  ;;  %v3524_v5 = vsel %vm15005_vm12, %v2539_v33, %v9179_v52  ;;  %vm2308_vm8 = vcmp.ge.s32.totalorder %v2294_v19, 0  ;;  %vm2322_vm10 = vcmp.lt.s32.totalorder %v2294_v19, 16 }
 0x39b   : > { %v3549_v4 = vsel %vm3543_vm4, %v3524_v5, %v9189_v32  ;;  %vm2223_vm6 = vcmp.ge.f32.partialorder %v2193_v27, 0.0  ;;  %v2697_v5 = vld [vmem:[#allocation2 + $0x120] sm:$0xff] }
 0x39c   : > { %v9182_v57 = vpop.permute.xlu0 %9181  ;;  %9416 = vrot.lane.b32.xlu1 %v11817_v31, %s10085_s24  ;;  %v3574_v38 = vsel %vm3568_vm0, %v3549_v4, %v9164_v34  ;;  %v2540_v4 = vld [vmem:[#allocation2 + $0x60] sm:$0xff] }
 0x39d   : > { %v9183_v15 = vunpack.i.l.bf16 %v9182_v57  ;;  %v9184_v2 = vunpack.i.h.bf16 %v9182_v57  ;;  %v2251_v57 = vmul.f32 0.2, %v2193_v27 }
 0x39e   : > { %9351 = vrot.lane.b32.xlu0 %v9395_v8, %s14992_s28  ;;  %v11909_v61 = vpop.permute.xlu1 %3463  ;;  %v9360_v8 = vpack.i.bf16 %v11901_v51, %v11911_v42 }
 0x39f   : > { %v3647_v31 = vsel %vm3642_vm3, %v3622_v6, %v9183_v15  ;;  %v3648_v41 = vsel %vm3642_vm3, %v3623_v56, %v9184_v2  ;;  %v2279_v15 = vsel %vm2223_vm6, %v2193_v27, %v2251_v57  ;;  %v9208_v6 = vunpack.i.l.bf16 %v11813_v3  ;;  %vm15009_vm6 = vmmov %vm15005_vm12 }
 0x3a0   : > { %v3360_v59 = vpop.permute.xlu0 %3359  ;;  %2911 = vrot.lane.b32.xlu1 %v11791_v16, %s14921_s16  ;;  %v11932_v36 = vld [vmem:[#allocation2 + $0x13a] sm:$0xff]  ;;  %v11949_v48 = vld [vmem:[#allocation2 + $0x142] sm:$0xff] }
 0x3a1   : > { %v3672_v49 = vsel %vm3667_vm14, %v3647_v31, %v3360_v59  ;;  %v3696_v18 = vsel %vm15004_vm11, %v3360_v59, %v11781_v10  ;;  %vm11962_vm11 = vmand %vm2308_vm8, %vm2322_vm10  ;;  %v9380_v31 = vpack.i.bf16 %v11800_v54, %v11791_v16  ;;  %v11975_v30 = vld [vmem:[#allocation2 + $0x141] sm:$0xff]  ;;  %v9199_v16 = vunpack.i.h.bf16 %v11797_v29 }
 0x3a2   : > { %9361 = vrot.lane.b32.xlu0 %v9360_v8, %s14910_s22  ;;  %3924 = vmatprep.mubr.f32.mxu1 %v3672_v49  ;;  %v11927_v63 = vpop.permute.xlu1 %3465  ;;  %v2392_v20 = vsel %vm11962_vm11, %v2279_v15, 0.0  ;;  %v11982_v49 = vld [vmem:[#allocation2 + $0x139] sm:$0xff]  ;;  %v2541_v15 = vld [vmem:[#allocation2 + $0x68] sm:$0xff]  ;;  %vm15010_vm8 = vmmov %vm15006_vm15 }
 0x3a3   : > { %8559 = vmatprep.mubr.msk.f32.mxu0 %vm3764_vm9, %v3696_v18  ;;  %3925 = vmatmul.mubr.f32.gmra.mrb[8].mxu1 %v3573_v9  ;;  %v9425_v9 = vpack.i.bf16 %v11975_v30, %v11982_v49  ;;  %vm15011_vm10 = vmmov %vm15009_vm6 }
 0x3a4   : > { %v3362_v10 = vpop.permute.xlu0 %3361  ;;  %3487 = vrot.lane.b32.xlu1 %v11932_v36, %s14935_s18 }
 0x3a5   : > { %v3673_v7 = vsel %vm3667_vm14, %v3648_v41, %v3362_v10  ;;  %v3697_v46 = vsel %vm15006_vm15, %v3362_v10, %v11789_v17  ;;  %v9209_v10 = vunpack.i.h.bf16 %v11813_v3 }
 0x3a6   : > { %3383 = vrot.lane.b32.xlu0 %v11810_v1, %s14990_s26  ;;  %3929 = vmatprep.mubr.f32.mxu1 %v3673_v7  ;;  %v11946_v53 = vpop.permute.xlu1 %9256 }
 0x3a7   : > { %8560 = vmatmul.mubr.msk.f32.gmra.mrb[32].mxu0 %vm3764_vm9, %v3697_v46  ;;  %3930 = vmatmul.mubr.f32.gmra.mrb[10].mxu1 %v3574_v38  ;;  %v3525_v46 = vsel %vm15005_vm12, %v2540_v4, %v9208_v6  ;;  %v9219_v38 = vunpack.i.h.bf16 %v11829_v47  ;;  %vm15012_vm12 = vmmov %vm15010_vm8 }
 0x3a8   : > { %v11951_v35 = vpop.permute.xlu0 %9191  ;;  %3489 = vrot.lane.b32.xlu1 %v11949_v48, %s14935_s18 }
 0x3a9   : > { %v9193_v1 = vunpack.i.l.bf16 %v11951_v35  ;;  %v9194_v14 = vunpack.i.h.bf16 %v11951_v35  ;;  %v3550_v35 = vsel %vm3543_vm4, %v3525_v46, %v9218_v40 }
 0x3aa   : > { %3385 = vrot.lane.b32.xlu0 %v11802_v11, %s14990_s26  ;;  %v11957_v25 = vpop.permute.xlu1 %9266  ;;  %v9198_v11 = vunpack.i.l.bf16 %v11797_v29 }
 0x3ab   : > { %v3600_v57 = vsel %vm1745_vm7, %v9194_v14, %v9199_v16  ;;  %v3575_v3 = vsel %vm3568_vm0, %v3550_v35, %v9193_v1 }
 0x3ac   : > { %v9202_v17 = vpop.permute.xlu0 %9201  ;;  %2913 = vrot.lane.b32.xlu1 %v11800_v54, %s14921_s16  ;;  %v3599_v2 = vsel %vm1745_vm7, %v9193_v1, %v9198_v11  ;;  %v3526_v11 = vsel %vm15009_vm6, %v2541_v15, %v9209_v10  ;;  %v2542_v10 = vld [vmem:[#allocation2 + $0x78] sm:$0xff]  ;;  %v2543_v15 = vld [vmem:[#allocation2 + $0x80] sm:$0xff] }
 0x3ad   : > { %v9203_v34 = vunpack.i.l.bf16 %v9202_v17  ;;  %v9204_v54 = vunpack.i.h.bf16 %v9202_v17 }
 0x3ae   : > { %9371 = vrot.lane.b32.xlu0 %v9360_v8, %s14991_s27  ;;  %v11968_v52 = vpop.permute.xlu1 %9276  ;;  %v2698_v8 = vld [vmem:[#allocation2 + $0x128] sm:$0xff] }
 0x3af   : > { %v3624_v18 = vsel %vm3617_vm1, %v3599_v2, %v9203_v34  ;;  %v9390_v7 = vpack.i.bf16 %v2698_v8, %v2697_v5  ;;  %v3625_v47 = vsel %vm3617_vm1, %v3600_v57, %v9204_v54  ;;  %v9228_v8 = vunpack.i.l.bf16 %v11870_v26 }
 0x3b0   : > { %v9212_v32 = vpop.permute.xlu0 %9211  ;;  %2475 = vrot.lane.b32.xlu1 %v2392_v20, %s10075_s23  ;;  %v3551_v20 = vsel %vm3543_vm4, %v3526_v11, %v9219_v38 }
 0x3b1   : > { %v9213_v59 = vunpack.i.l.bf16 %v9212_v32  ;;  %v9214_v41 = vunpack.i.h.bf16 %v9212_v32  ;;  %v3576_v32 = vsel %vm3568_vm0, %v3551_v20, %v9194_v14  ;;  %v2188_v20 = vadd.f32 %v11580_v60, %v11642_v55 }
 0x3b2   : > { %9381 = vrot.lane.b32.xlu0 %v9380_v31, %s14992_s28  ;;  %v11986_v33 = vpop.permute.xlu1 %3467 }
 0x3b3   : > { %v3649_v56 = vsel %vm3642_vm3, %v3624_v18, %v9213_v59  ;;  %v9238_v18 = vunpack.i.l.bf16 %v11882_v58 }
 0x3b4   : > { %v3364_v27 = vpop.permute.xlu0 %3363  ;;  %9426 = vrot.lane.b32.xlu1 %v9425_v9, %s10077_s25 }
 0x3b5   : > { %v3674_v29 = vsel %vm3667_vm14, %v3649_v56, %v3364_v27  ;;  %v3698_v19 = vsel %vm15006_vm15, %v3364_v27, %v11846_v28  ;;  %v3650_v28 = vsel %vm3642_vm3, %v3625_v47, %v9214_v41  ;;  %v9229_v41 = vunpack.i.h.bf16 %v11870_v26  ;;  %vm15013_vm15 = vmmov %vm15009_vm6 }
 0x3b6   : > { %9391 = vrot.lane.b32.xlu0 %v9390_v7, %s14910_s22  ;;  %3934 = vmatprep.mubr.f32.mxu1 %v3674_v29  ;;  %v12002_v17 = vpop.permute.xlu1 %3469  ;;  %v9239_v27 = vunpack.i.h.bf16 %v11882_v58  ;;  %v3527_v38 = vsel %vm15011_vm10, %v2542_v10, %v9238_v18  ;;  %v9249_v29 = vunpack.i.h.bf16 %v11896_v45  ;;  %vm15014_vm6 = vmmov %vm15010_vm8 }
 0x3b7   : > { %8562 = vmatprep.mubr.msk.f32.mxu0 %vm3764_vm9, %v3698_v19  ;;  %3935 = vmatmul.mubr.f32.gmra.mrb[12].mxu1 %v3575_v3  ;;  %v12043_v19 = vld [vmem:[#allocation2 + $0x138] sm:$0xff] }
 0x3b8   : > { %v3366_v34 = vpop.permute.xlu0 %3365  ;;  %9436 = vrot.lane.b32.xlu1 %v11886_v21, %s10085_s24  ;;  %v9445_v21 = vpack.i.bf16 %v11872_v62, %v11863_v12  ;;  %v9248_v62 = vunpack.i.l.bf16 %v11896_v45 }
 0x3b9   : > { %v3675_v6 = vsel %vm3667_vm14, %v3650_v28, %v3366_v34  ;;  %v3699_v1 = vsel %vm15010_vm8, %v3366_v34, %v11861_v13  ;;  %v3528_v28 = vsel %vm15013_vm15, %v2543_v15, %v9239_v27  ;;  %vm2222_vm8 = vcmp.ge.f32.partialorder %v2188_v20, 0.0  ;;  %vm15018_vm15 = vmmov %vm15014_vm6 }
 0x3ba   : > { %3387 = vrot.lane.b32.xlu0 %v11880_v37, %s14990_s26  ;;  %3939 = vmatprep.mubr.f32.mxu1 %v3675_v6  ;;  %v12017_v31 = vpop.permute.xlu1 %9286  ;;  %v3552_v3 = vsel %vm3543_vm4, %v3527_v38, %v9248_v62  ;;  %v9269_v38 = vunpack.i.h.bf16 %v11957_v25 }
 0x3bb   : > { %8563 = vmatmul.mubr.msk.f32.gmra.mrb[34].mxu0 %vm3764_vm9, %v3699_v1  ;;  %3940 = vmatmul.mubr.f32.gmra.mrb[14].mxu1 %v3576_v32  ;;  %v3553_v1 = vsel %vm3543_vm4, %v3528_v28, %v9249_v29 }
 0x3bc   : > { %v9222_v40 = vpop.permute.xlu0 %9221  ;;  %9446 = vrot.lane.b32.xlu1 %v9445_v21, %s14921_s16 }
 0x3bd   : > { %v9223_v2 = vunpack.i.l.bf16 %v9222_v40 }
 0x3be   : > { %3389 = vrot.lane.b32.xlu0 %v11874_v24, %s14990_s26  ;;  %v12025_v13 = vpop.permute.xlu1 %9296  ;;  %v9224_v24 = vunpack.i.h.bf16 %v9222_v40 }
 0x3bf   : > { %v3601_v16 = vsel %vm1745_vm7, %v9223_v2, %v9228_v8  ;;  %v3577_v26 = vsel %vm3568_vm0, %v3552_v3, %v9223_v2  ;;  %v2700_v2 = vld [vmem:[#allocation2 + $0x140] sm:$0xff]  ;;  %v9258_v8 = vunpack.i.l.bf16 %v11946_v53 }
 0x3c0   : > { %v9232_v37 = vpop.permute.xlu0 %9231  ;;  %v3602_v47 = vsel %vm1745_vm7, %v9224_v24, %v9229_v41  ;;  %v3578_v32 = vsel %vm3568_vm0, %v3553_v1, %v9224_v24  ;;  %v9420_v41 = vpack.i.bf16 %v2700_v2, %v12043_v19 }
 0x3c1   : > { %v9233_v59 = vunpack.i.l.bf16 %v9232_v37  ;;  %v9234_v5 = vunpack.i.h.bf16 %v9232_v37  ;;  %v2250_v37 = vmul.f32 0.2, %v2188_v20 }
 0x3c2   : > { %9401 = vrot.lane.b32.xlu0 %v9390_v7, %s14991_s27  ;;  %v12029_v14 = vpop.permute.xlu1 %9306 }
 0x3c3   : > { %v3626_v9 = vsel %vm3617_vm1, %v3601_v16, %v9233_v59  ;;  %v3627_v45 = vsel %vm3617_vm1, %v3602_v47, %v9234_v5  ;;  %v2278_v59 = vsel %vm2222_vm8, %v2188_v20, %v2250_v37  ;;  %v9278_v16 = vunpack.i.l.bf16 %v11968_v52 }
 0x3c4   : > { %v9242_v12 = vpop.permute.xlu0 %9241  ;;  %v2391_v24 = vsel %vm11962_vm11, %v2278_v59, 0.0  ;;  %vm15015_vm11 = vmmov %vm15011_vm10 }
 0x3c5   : > { %v9243_v54 = vunpack.i.l.bf16 %v9242_v12  ;;  %v9244_v7 = vunpack.i.h.bf16 %v9242_v12  ;;  %v9268_v12 = vunpack.i.l.bf16 %v11957_v25  ;;  %vm15016_vm10 = vmmov %vm15014_vm6 }
 0x3c6   : > { %9411 = vrot.lane.b32.xlu0 %v9445_v21, %s14992_s28  ;;  %v12036_v56 = vpop.permute.xlu1 %3471  ;;  %vm15020_vm8 = vmmov %vm15016_vm10 }
 0x3c7   : > { %v3651_v4 = vsel %vm3642_vm3, %v3626_v9, %v9243_v54 }
 0x3c8   : > { %v3368_v46 = vpop.permute.xlu0 %3367 }
 0x3c9   : > { %v3676_v35 = vsel %vm3667_vm14, %v3651_v4, %v3368_v46  ;;  %v3700_v57 = vsel %vm15012_vm12, %v3368_v46, %v11909_v61  ;;  %v3652_v61 = vsel %vm3642_vm3, %v3627_v45, %v9244_v7  ;;  %v2544_v7 = vld [vmem:[#allocation2 + $0x90] sm:$0xff]  ;;  %v9259_v46 = vunpack.i.h.bf16 %v11946_v53  ;;  %v2545_v45 = vld [vmem:[#allocation2 + $0x98] sm:$0xff]  ;;  %vm15017_vm12 = vmmov %vm15015_vm11 }
 0x3ca   : > { %3295 = vrot.lane.b32.xlu0 %v12043_v19, %s14910_s22  ;;  %3944 = vmatprep.mubr.f32.mxu1 %v3676_v35  ;;  %v12053_v58 = vpop.permute.xlu1 %3473  ;;  %v3529_v35 = vsel %vm15015_vm11, %v2544_v7, %v9268_v12  ;;  %v9309_v7 = vunpack.i.h.bf16 %v12029_v14 }
 0x3cb   : > { %8565 = vmatprep.mubr.msk.f32.mxu0 %vm3764_vm9, %v3700_v57  ;;  %3945 = vmatmul.mubr.f32.gmra.mrb[16].mxu1 %v3577_v26  ;;  %v9279_v57 = vunpack.i.h.bf16 %v11968_v52  ;;  %v3554_v19 = vsel %vm3543_vm4, %v3529_v35, %v9278_v16 }
 0x3cc   : > { %v3370_v34 = vpop.permute.xlu0 %3369 }
 0x3cd   : > { %v3677_v11 = vsel %vm3667_vm14, %v3652_v61, %v3370_v34  ;;  %v3701_v6 = vsel %vm15014_vm6, %v3370_v34, %v11927_v63  ;;  %v3530_v61 = vsel %vm15017_vm12, %v2545_v45, %v9269_v38  ;;  %vm15019_vm6 = vmmov %vm15015_vm11 }
 0x3ce   : > { %3391 = vrot.lane.b32.xlu0 %v11982_v49, %s14990_s26  ;;  %3949 = vmatprep.mubr.f32.mxu1 %v3677_v11  ;;  %v12068_v21 = vpop.permute.xlu1 %9316  ;;  %vm15021_vm11 = vmmov %vm15019_vm6 }
 0x3cf   : > { %8566 = vmatmul.mubr.msk.f32.gmra.mrb[36].mxu0 %vm3764_vm9, %v3701_v6  ;;  %3950 = vmatmul.mubr.f32.gmra.mrb[18].mxu1 %v3578_v32  ;;  %v3555_v6 = vsel %vm3543_vm4, %v3530_v61, %v9279_v57  ;;  %vm15023_vm12 = vmmov %vm15019_vm6 }
 0x3d0   : > { %v9252_v40 = vpop.permute.xlu0 %9251 }
 0x3d1   : > { %v9253_v55 = vunpack.i.l.bf16 %v9252_v40  ;;  %v9254_v9 = vunpack.i.h.bf16 %v9252_v40 }
 0x3d2   : > { %3393 = vrot.lane.b32.xlu0 %v11975_v30, %s14990_s26  ;;  %v12073_v63 = vpop.permute.xlu1 %9326 }
 0x3d3   : > { %v3603_v30 = vsel %vm1745_vm7, %v9253_v55, %v9258_v8  ;;  %v3604_v26 = vsel %vm1745_vm7, %v9254_v9, %v9259_v46  ;;  %v3579_v53 = vsel %vm3568_vm0, %v3554_v19, %v9253_v55  ;;  %v3580_v1 = vsel %vm3568_vm0, %v3555_v6, %v9254_v9 }
 0x3d4   : > { %v9262_v60 = vpop.permute.xlu0 %9261  ;;  %v9298_v55 = vunpack.i.l.bf16 %v12025_v13  ;;  %v9289_v9 = vunpack.i.h.bf16 %v12017_v31 }
 0x3d5   : > { %v9263_v49 = vunpack.i.l.bf16 %v9262_v60  ;;  %v9264_v4 = vunpack.i.h.bf16 %v9262_v60 }
 0x3d6   : > { %3297 = vrot.lane.b32.xlu0 %v2700_v2, %s14910_s22  ;;  %v12077_v18 = vpop.permute.xlu1 %9336 }
 0x3d7   : > { %v3628_v5 = vsel %vm3617_vm1, %v3603_v30, %v9263_v49  ;;  %v3629_v52 = vsel %vm3617_vm1, %v3604_v26, %v9264_v4  ;;  %v9308_v49 = vunpack.i.l.bf16 %v12029_v14  ;;  %v2547_v14 = vld [vmem:[#allocation2 + $0xb0] sm:$0xff] }
 0x3d8   : > { %v9272_v62 = vpop.permute.xlu0 %9271 }
 0x3d9   : > { %v9273_v54 = vunpack.i.l.bf16 %v9272_v62  ;;  %v9274_v29 = vunpack.i.h.bf16 %v9272_v62 }
 0x3da   : > { %2473 = vrot.lane.b32.xlu0 %v2391_v24, %s10075_s23  ;;  %v12086_v10 = vpop.permute.xlu1 %3475  ;;  %v2546_v24 = vld [vmem:[#allocation2 + $0xa8] sm:$0xff]  ;;  %s10091_s23 = smov 76  }
 0x3db   : > { %v3653_v27 = vsel %vm3642_vm3, %v3628_v5, %v9273_v54  ;;  %v3654_v34 = vsel %vm3642_vm3, %v3629_v52, %v9274_v29  ;;  %v9299_v5 = vunpack.i.h.bf16 %v12025_v13 }
 0x3dc   : > { %v3372_v23 = vpop.permute.xlu0 %3371 }
 0x3dd   : > { %v3678_v3 = vsel %vm3667_vm14, %v3653_v27, %v3372_v23  ;;  %v3702_v47 = vsel %vm15016_vm10, %v3372_v23, %v11986_v33  ;;  %v9430_v33 = vpack.i.bf16 %v11949_v48, %v11932_v36  ;;  %v3531_v27 = vsel %vm15019_vm6, %v2546_v24, %v9298_v55  ;;  %vm15022_vm10 = vmmov %vm15020_vm8 }
 0x3de   : > { %9421 = vrot.lane.b32.xlu0 %v9420_v41, %s14991_s27  ;;  %3954 = vmatprep.mubr.f32.mxu1 %v3678_v3  ;;  %v12101_v25 = vpop.permute.xlu1 %3477  ;;  %v3556_v29 = vsel %vm3543_vm4, %v3531_v27, %v9308_v49  ;;  %v2548_v49 = vld [vmem:[#allocation2 + $0xc0] sm:$0xff]  ;;  %s10092_s27 = smov 92  }
 0x3df   : > { %8568 = vmatprep.mubr.msk.f32.mxu0 %vm3764_vm9, %v3702_v47  ;;  %3955 = vmatmul.mubr.f32.gmra.mrb[20].mxu1 %v3579_v53 }
 0x3e0   : > { %v3374_v15 = vpop.permute.xlu0 %3373 }
 0x3e1   : > { %v3679_v28 = vsel %vm3667_vm14, %v3654_v34, %v3374_v15  ;;  %v3703_v11 = vsel %vm15018_vm15, %v3374_v15, %v12002_v17  ;;  %v9288_v17 = vunpack.i.l.bf16 %v12017_v31  ;;  %vm15024_vm15 = vmmov %vm15020_vm8 }
 0x3e2   : > { %9431 = vrot.lane.b32.xlu0 %v9430_v33, %s14992_s28  ;;  %3959 = vmatprep.mubr.f32.mxu1 %v3679_v28  ;;  %v12115_v20 = vpop.permute.xlu1 %9346  ;;  %v9318_v28 = vunpack.i.l.bf16 %v12068_v21  ;;  %s15045_s28 = smov 8  }
 0x3e3   : > { %8569 = vmatmul.mubr.msk.f32.gmra.mrb[38].mxu0 %vm3764_vm9, %v3703_v11  ;;  %3960 = vmatmul.mubr.f32.gmra.mrb[22].mxu1 %v3580_v1  ;;  %v9338_v1 = vunpack.i.l.bf16 %v12077_v18 }
 0x3e4   : > { %v9282_v36 = vpop.permute.xlu0 %9281 }
 0x3e5   : > { %v9283_v40 = vunpack.i.l.bf16 %v9282_v36  ;;  %v9284_v12 = vunpack.i.h.bf16 %v9282_v36 }
 0x3e6   : > { %v12118_v48 = vpop.permute.xlu1 %9356 }
 0x3e7   : > { %v3605_v59 = vsel %vm1745_vm7, %v9283_v40, %v9288_v17  ;;  %v3606_v23 = vsel %vm1745_vm7, %v9284_v12, %v9289_v9  ;;  %v3581_v31 = vsel %vm3568_vm0, %v3556_v29, %v9283_v40 }
 0x3e8   : > { %v9292_v32 = vpop.permute.xlu0 %9291 }
 0x3e9   : > { %v9293_v37 = vunpack.i.l.bf16 %v9292_v32  ;;  %v9294_v16 = vunpack.i.h.bf16 %v9292_v32 }
 0x3ea   : > { %v12121_v60 = vpop.permute.xlu1 %9366 }
 0x3eb   : > { %v3630_v62 = vsel %vm3617_vm1, %v3605_v59, %v9293_v37  ;;  %v3631_v35 = vsel %vm3617_vm1, %v3606_v23, %v9294_v16  ;;  %v9319_v59 = vunpack.i.h.bf16 %v12068_v21 }
 0x3ec   : > { %v9302_v2 = vpop.permute.xlu0 %9301 }
 0x3ed   : > { %v9303_v8 = vunpack.i.l.bf16 %v9302_v2  ;;  %v9304_v4 = vunpack.i.h.bf16 %v9302_v2 }
 0x3ee   : > { %v12127_v30 = vpop.permute.xlu1 %3479 }
 0x3ef   : > { %v3655_v54 = vsel %vm3642_vm3, %v3630_v62, %v9303_v8  ;;  %v3656_v3 = vsel %vm3642_vm3, %v3631_v35, %v9304_v4  ;;  %v9329_v8 = vunpack.i.h.bf16 %v12073_v63 }
 0x3f0   : > { %v3376_v41 = vpop.permute.xlu0 %3375 }
 0x3f1   : > { %v3680_v46 = vsel %vm3667_vm14, %v3655_v54, %v3376_v41  ;;  %v3704_v38 = vsel %vm15020_vm8, %v3376_v41, %v12036_v56  ;;  %v3532_v56 = vsel %vm15021_vm11, %v2547_v14, %v9299_v5  ;;  %v9339_v54 = vunpack.i.h.bf16 %v12077_v18  ;;  %v2549_v18 = vld [vmem:[#allocation2 + $0xc8] sm:$0xff]  ;;  %vm15025_vm11 = vmmov %vm15019_vm6 }
 0x3f2   : > { %3964 = vmatprep.mubr.f32.mxu1 %v3680_v46  ;;  %8571 = vmatprep.mubr.msk.f32.mxu0 %vm3764_vm9, %v3704_v38  ;;  %v12141_v13 = vpop.permute.xlu1 %3481  ;;  %v3557_v26 = vsel %vm3543_vm4, %v3532_v56, %v9309_v7 }
 0x3f3   : > { %3965 = vmatmul.mubr.f32.gmra.mrb[24].mxu1 %v3581_v31  ;;  %v3582_v53 = vsel %vm3568_vm0, %v3557_v26, %v9284_v12 }
 0x3f4   : > { %v3378_v57 = vpop.permute.xlu0 %3377 }
 0x3f5   : > { %v3681_v47 = vsel %vm3667_vm14, %v3656_v3, %v3378_v57  ;;  %v3705_v19 = vsel %vm15022_vm10, %v3378_v57, %v12053_v58  ;;  %v9328_v58 = vunpack.i.l.bf16 %v12073_v63  ;;  %vm15026_vm10 = vmmov %vm15020_vm8 }
 0x3f6   : > { %3969 = vmatprep.mubr.f32.mxu1 %v3681_v47  ;;  %8572 = vmatmul.mubr.msk.f32.gmra.mrb[40].mxu0 %vm3764_vm9, %v3705_v19  ;;  %v12152_v52 = vpop.permute.xlu1 %9376  ;;  %v9348_v47 = vunpack.i.l.bf16 %v12115_v20 }
 0x3f7   : > { %3970 = vmatmul.mubr.f32.gmra.mrb[26].mxu1 %v3582_v53  ;;  %v3533_v16 = vsel %vm15023_vm12, %v2548_v49, %v9328_v58  ;;  %v9368_v53 = vunpack.i.l.bf16 %v12121_v60  ;;  %vm15027_vm12 = vmmov %vm15019_vm6 }
 0x3f8   : > { %v9312_v45 = vpop.permute.xlu0 %9311  ;;  %v3558_v5 = vsel %vm3543_vm4, %v3533_v16, %v9338_v1  ;;  %v9349_v1 = vunpack.i.h.bf16 %v12115_v20 }
 0x3f9   : > { %v9313_v34 = vunpack.i.l.bf16 %v9312_v45  ;;  %v9314_v40 = vunpack.i.h.bf16 %v9312_v45 }
 0x3fa   : > { %v12154_v15 = vpop.permute.xlu1 %9386 }
 0x3fb   : > { %v3607_v36 = vsel %vm1745_vm7, %v9313_v34, %v9318_v28  ;;  %v3608_v4 = vsel %vm1745_vm7, %v9314_v40, %v9319_v59  ;;  %v3583_v21 = vsel %vm3568_vm0, %v3558_v5, %v9313_v34 }
 0x3fc   : > { %v9322_v33 = vpop.permute.xlu0 %9321 }
 0x3fd   : > { %v9323_v61 = vunpack.i.l.bf16 %v9322_v33  ;;  %v9324_v17 = vunpack.i.h.bf16 %v9322_v33 }
 0x3fe   : > { %v12157_v11 = vpop.permute.xlu1 %9396 }
 0x3ff   : > { %v3632_v37 = vsel %vm3617_vm1, %v3607_v36, %v9323_v61  ;;  %v3633_v41 = vsel %vm3617_vm1, %v3608_v4, %v9324_v17  ;;  %v9359_v36 = vunpack.i.h.bf16 %v12118_v48  ;;  %v9369_v17 = vunpack.i.h.bf16 %v12121_v60 }
 0x400   : > { %v9332_v6 = vpop.permute.xlu0 %9331 }
 0x401   : > { %v9333_v32 = vunpack.i.l.bf16 %v9332_v6  ;;  %v9334_v12 = vunpack.i.h.bf16 %v9332_v6 }
 0x402   : > { %v12163_v55 = vpop.permute.xlu1 %3483 }
 0x403   : > { %v3657_v2 = vsel %vm3642_vm3, %v3632_v37, %v9333_v32  ;;  %v3658_v7 = vsel %vm3642_vm3, %v3633_v41, %v9334_v12 }
 0x404   : > { %v3380_v62 = vpop.permute.xlu0 %3379 }
 0x405   : > { %v3682_v24 = vsel %vm3667_vm14, %v3657_v2, %v3380_v62  ;;  %v3706_v9 = vsel %vm15024_vm15, %v3380_v62, %v12086_v10  ;;  %v3534_v10 = vsel %vm15019_vm6, %v2549_v18, %v9329_v8  ;;  %vm15028_vm15 = vmmov %vm15020_vm8  ;;  %v9378_v18 = vunpack.i.l.bf16 %v12152_v52 }
 0x406   : > { %3974 = vmatprep.mubr.f32.mxu1 %v3682_v24  ;;  %8574 = vmatprep.mubr.msk.f32.mxu0 %vm3764_vm9, %v3706_v9  ;;  %v12177_v63 = vpop.permute.xlu1 %3485  ;;  %v3559_v29 = vsel %vm3543_vm4, %v3534_v10, %v9339_v54 }
 0x407   : > { %3975 = vmatmul.mubr.f32.gmra.mrb[28].mxu1 %v3583_v21  ;;  %v3584_v23 = vsel %vm3568_vm0, %v3559_v29, %v9314_v40 }
 0x408   : > { %v3382_v27 = vpop.permute.xlu0 %3381 }
 0x409   : > { %v3683_v46 = vsel %vm3667_vm14, %v3658_v7, %v3382_v27  ;;  %v3707_v38 = vsel %vm15020_vm8, %v3382_v27, %v12101_v25  ;;  %v9358_v25 = vunpack.i.l.bf16 %v12118_v48  ;;  %v9398_v7 = vunpack.i.l.bf16 %v12157_v11 }
 0x40a   : > { %3979 = vmatprep.mubr.f32.mxu1 %v3683_v46  ;;  %8575 = vmatmul.mubr.msk.f32.gmra.mrb[42].mxu0 %vm3764_vm9, %v3707_v38  ;;  %v12188_v31 = vpop.permute.xlu1 %9406 }
 0x40b   : > { %3980 = vmatmul.mubr.f32.gmra.mrb[30].mxu1 %v3584_v23  ;;  %v3535_v37 = vsel %vm15025_vm11, %v11776_v39, %v9358_v25  ;;  %vm15029_vm11 = vmmov %vm15019_vm6 }
 0x40c   : > { %v9342_v35 = vpop.permute.xlu0 %9341  ;;  %v3560_v59 = vsel %vm3543_vm4, %v3535_v37, %v9368_v53 }
 0x40d   : > { %v9343_v3 = vunpack.i.l.bf16 %v9342_v35  ;;  %v9344_v34 = vunpack.i.h.bf16 %v9342_v35 }
 0x40e   : > { %v12190_v14 = vpop.permute.xlu1 %9416 }
 0x40f   : > { %v3609_v45 = vsel %vm1745_vm7, %v9343_v3, %v9348_v47  ;;  %v3610_v8 = vsel %vm1745_vm7, %v9344_v34, %v9349_v1  ;;  %v3585_v20 = vsel %vm3568_vm0, %v3560_v59, %v9343_v3  ;;  %v9389_v3 = vunpack.i.h.bf16 %v12154_v15 }
 0x410   : > { %v9352_v57 = vpop.permute.xlu0 %9351 }
 0x411   : > { %v9353_v56 = vunpack.i.l.bf16 %v9352_v57  ;;  %v9354_v28 = vunpack.i.h.bf16 %v9352_v57  ;;  %v9379_v57 = vunpack.i.h.bf16 %v12152_v52 }
 0x412   : > { %v12193_v19 = vpop.permute.xlu1 %2911 }
 0x413   : > { %v3634_v61 = vsel %vm3617_vm1, %v3609_v45, %v9353_v56  ;;  %v3635_v39 = vsel %vm3617_vm1, %v3610_v8, %v9354_v28 }
 0x414   : > { %v9362_v26 = vpop.permute.xlu0 %9361 }
 0x415   : > { %v9363_v33 = vunpack.i.l.bf16 %v9362_v26  ;;  %v9364_v32 = vunpack.i.h.bf16 %v9362_v26  ;;  %v9399_v26 = vunpack.i.h.bf16 %v12157_v11 }
 0x416   : > { %v12199_v58 = vpop.permute.xlu1 %3487 }
 0x417   : > { %v3659_v6 = vsel %vm3642_vm3, %v3634_v61, %v9363_v33  ;;  %v3660_v12 = vsel %vm3642_vm3, %v3635_v39, %v9364_v32  ;;  %v3538_v61 = vsel %vm15029_vm11, %v11839_v50, %v9389_v3  ;;  %v12260_v50 = vld [vmem:[%s14887_s4] ss:$0 sm:$0xff] }
 0x418   : > { %v3384_v40 = vpop.permute.xlu0 %3383 }
 0x419   : > { %v3684_v2 = vsel %vm3667_vm14, %v3659_v6, %v3384_v40  ;;  %v3708_v49 = vsel %vm15026_vm10, %v3384_v40, %v12127_v30  ;;  %v3536_v30 = vsel %vm15027_vm12, %v11778_v43, %v9359_v36  ;;  %vm15030_vm10 = vmmov %vm15020_vm8  ;;  %v3563_v6 = vsel %vm3543_vm4, %v3538_v61, %v9399_v26 }
 0x41a   : > { %3984 = vmatprep.mubr.f32.mxu1 %v3684_v2  ;;  %8577 = vmatprep.mubr.msk.f32.mxu0 %vm3764_vm9, %v3708_v49  ;;  %v12214_v48 = vpop.permute.xlu1 %3489  ;;  %v3561_v54 = vsel %vm3543_vm4, %v3536_v30, %v9369_v17  ;;  %v9408_v17 = vunpack.i.l.bf16 %v12188_v31  ;;  %vm15031_vm12 = vmmov %vm15019_vm6  ;;  %v12297_v26 = vstv %s8100_s30  ;;  %s10089_s30 = smov 68  }
 0x41b   : > { %3985 = vmatmul.mubr.f32.gmra.mrb[32].mxu1 %v3585_v20  ;;  %v3586_v24 = vsel %vm3568_vm0, %v3561_v54, %v9344_v34 }
 0x41c   : > { %v3386_v60 = vpop.permute.xlu0 %3385 }
 0x41d   : > { %v3685_v62 = vsel %vm3667_vm14, %v3660_v12, %v3386_v60  ;;  %v3709_v16 = vsel %vm15028_vm15, %v3386_v60, %v12141_v13  ;;  %v9388_v13 = vunpack.i.l.bf16 %v12154_v15  ;;  %vm15032_vm15 = vmmov %vm15020_vm8 }
 0x41e   : > { %3989 = vmatprep.mubr.f32.mxu1 %v3685_v62  ;;  %8578 = vmatmul.mubr.msk.f32.gmra.mrb[44].mxu0 %vm3764_vm9, %v3709_v16  ;;  %v12226_v9 = vpop.permute.xlu1 %2913 }
 0x41f   : > { %3990 = vmatmul.mubr.f32.gmra.mrb[34].mxu1 %v3586_v24  ;;  %v3537_v25 = vsel %vm15019_vm6, %v11837_v44, %v9388_v13  ;;  %vm15033_vm6 = vmmov %vm15020_vm8 }
 0x420   : > { %v9372_v5 = vpop.permute.xlu0 %9371  ;;  %v3562_v33 = vsel %vm3543_vm4, %v3537_v25, %v9398_v7 }
 0x421   : > { %v9373_v21 = vunpack.i.l.bf16 %v9372_v5  ;;  %v9374_v38 = vunpack.i.h.bf16 %v9372_v5 }
 0x422   : > { %v2476_v4 = vpop.permute.xlu1 %2475 }
 0x423   : > { %2533 = vst.msk [vmem:[#allocation2 + $0x159] sm:$0xff] %vm2505_vm13, %v2476_v4  ;;  %v3611_v10 = vsel %vm1745_vm7, %v9373_v21, %v9378_v18  ;;  %v3612_v34 = vsel %vm1745_vm7, %v9374_v38, %v9379_v57  ;;  %v3587_v52 = vsel %vm3568_vm0, %v3562_v33, %v9373_v21  ;;  %v3588_v1 = vsel %vm3568_vm0, %v3563_v6, %v9374_v38 }
 0x424   : > { %v9382_v43 = vpop.permute.xlu0 %9381 }
 0x425   : > { %v9383_v41 = vunpack.i.l.bf16 %v9382_v43  ;;  %v9384_v23 = vunpack.i.h.bf16 %v9382_v43 }
 0x427   : > { %v3636_v29 = vsel %vm3617_vm1, %v3611_v10, %v9383_v41  ;;  %v3637_v15 = vsel %vm3617_vm1, %v3612_v34, %v9384_v23  ;;  %v9409_v10 = vunpack.i.h.bf16 %v12188_v31 }
 0x428   : > { %v9392_v27 = vpop.permute.xlu0 %9391 }
 0x429   : > { %v9393_v46 = vunpack.i.l.bf16 %v9392_v27  ;;  %v9394_v56 = vunpack.i.h.bf16 %v9392_v27 }
 0x42b   : > { %v3661_v35 = vsel %vm3642_vm3, %v3636_v29, %v9393_v46  ;;  %v3662_v11 = vsel %vm3642_vm3, %v3637_v15, %v9394_v56 }
 0x42c   : > { %v3388_v47 = vpop.permute.xlu0 %3387 }
 0x42d   : > { %v3686_v53 = vsel %vm3667_vm14, %v3661_v35, %v3388_v47  ;;  %v3710_v45 = vsel %vm15020_vm8, %v3388_v47, %v12163_v55  ;;  %vm15034_vm8 = vmmov %vm15029_vm11 }
 0x42e   : > { %3994 = vmatprep.mubr.f32.mxu1 %v3686_v53  ;;  %8580 = vmatprep.mubr.msk.f32.mxu0 %vm3764_vm9, %v3710_v45 }
 0x42f   : > { %3995 = vmatmul.mubr.f32.gmra.mrb[36].mxu1 %v3587_v52 }
 0x430   : > { %v3390_v44 = vpop.permute.xlu0 %3389 }
 0x431   : > { %v3687_v55 = vsel %vm3667_vm14, %v3662_v11, %v3390_v44  ;;  %v3711_v28 = vsel %vm15030_vm10, %v3390_v44, %v12177_v63  ;;  %v9418_v63 = vunpack.i.l.bf16 %v12190_v14  ;;  %vm4295_vm10 = vcmp.ge.s32.totalorder %v12297_v26, 0  ;;  %v2726_v44 = vld [vmem:[#allocation2 + $0x159] sm:$0xff] }
 0x432   : > { %3999 = vmatprep.mubr.f32.mxu1 %v3687_v55  ;;  %8581 = vmatmul.mubr.msk.f32.gmra.mrb[46].mxu0 %vm3764_vm9, %v3711_v28  ;;  %v4284_v11 = vadd.s32 1, %v12297_v26 }
 0x433   : > { %4000 = vmatmul.mubr.f32.gmra.mrb[38].mxu1 %v3588_v1  ;;  %v3539_v62 = vsel %vm15031_vm12, %v11911_v42, %v9418_v63  ;;  %vm4307_vm12 = vcmp.lt.s32.totalorder %v12297_v26, 16 }
 0x434   : > { %v9402_v36 = vpop.permute.xlu0 %9401  ;;  %v3564_v43 = vsel %vm3543_vm4, %v3539_v62, %v12193_v19  ;;  %v9419_v19 = vunpack.i.h.bf16 %v12190_v14 }
 0x435   : > { %v9403_v32 = vunpack.i.l.bf16 %v9402_v36  ;;  %v9404_v13 = vunpack.i.h.bf16 %v9402_v36 }
 0x436   : > { %v3540_v23 = vsel %vm15034_vm8, %v11901_v51, %v9419_v19  ;;  %vm4308_vm8 = vcmp.lt.s32.totalorder %v4284_v11, 16 }
 0x437   : > { %v3613_v60 = vsel %vm1745_vm7, %v9403_v32, %v9408_v17  ;;  %v3589_v42 = vsel %vm3568_vm0, %v3564_v43, %v9403_v32  ;;  %v3565_v31 = vsel %vm3543_vm4, %v3540_v23, %v12226_v9  ;;  %v2750_v9 = vld [vmem:[#allocation2 + $0x15a] sm:$0xff] }
 0x438   : > { %v9412_v40 = vpop.permute.xlu0 %9411 }
 0x439   : > { %v9413_v37 = vunpack.i.l.bf16 %v9412_v40  ;;  %v3906_v2 = vpop.f32.mrb[0].mxu1  ;;  %v9414_v27 = vunpack.i.h.bf16 %v9412_v40 }
 0x43a   : > { %v8555_v49 = vpop.f32.mrb[28].mxu0  ;;  %v3907_v59 = vadd.f32 %v12260_v50, %v3906_v2  ;;  %v3908_v8 = vpop.f32.mrb[1].mxu1 }
 0x43b   : > { %v4091_v20 = vpop.f32.mrb[29].mxu0  ;;  %v3638_v30 = vsel %vm3617_vm1, %v3613_v60, %v9413_v37 }
 0x43c   : > { %v3296_v39 = vpop.permute.xlu0 %3295  ;;  %v12266_v12 = vadd.f32 %v4091_v20, %v3907_v59 }
 0x43d   : > { %v3911_v16 = vpop.f32.mrb[2].mxu1  ;;  %v3663_v5 = vsel %vm3642_vm3, %v3638_v30, %v3296_v39  ;;  %v4285_v30 = vadd.s32 2, %v12297_v26 }
 0x43e   : > { %v3912_v54 = vadd.f32 %v12260_v50, %v3911_v16  ;;  %v3913_v24 = vpop.f32.mrb[3].mxu1  ;;  %v4234_v33 = vmul.f32 0.2, %v12266_v12 }
 0x440   : > { %v3392_v4 = vpop.permute.xlu0 %3391  ;;  %v4097_v21 = vadd.f32 %v8555_v49, %v3912_v54 }
 0x441   : > { %v3688_v41 = vsel %vm3667_vm14, %v3663_v5, %v3392_v4  ;;  %v3712_v18 = vsel %vm15032_vm15, %v3392_v4, %v12199_v58  ;;  %v3614_v58 = vsel %vm1745_vm7, %v9404_v13, %v9409_v10  ;;  %vm4210_vm15 = vcmp.ge.f32.partialorder %v12266_v12, 0.0 }
 0x442   : > { %4004 = vmatprep.mubr.f32.mxu1 %v3688_v41  ;;  %8583 = vmatprep.mubr.msk.f32.mxu0 %vm3764_vm9, %v3712_v18  ;;  %v3639_v29 = vsel %vm3617_vm1, %v3614_v58, %v9414_v27  ;;  %v4235_v25 = vmul.f32 0.2, %v4097_v21  ;;  %vm4211_vm11 = vcmp.ge.f32.partialorder %v4097_v21, 0.0  ;;  %v4258_v55 = vsel %vm4210_vm15, %v12266_v12, %v4234_v33 }
 0x443   : > { %4005 = vmatmul.mubr.f32.gmra.mrb[40].mxu1 %v3589_v42  ;;  %vm4309_vm15 = vcmp.lt.s32.totalorder %v4285_v30, 16 }
 0x444   : > { %v3394_v7 = vpop.permute.xlu0 %3393  ;;  %v4259_v53 = vsel %vm4211_vm11, %v4097_v21, %v4235_v25 }
 0x445   : > { %v3713_v46 = vsel %vm15033_vm6, %v3394_v7, %v12214_v48  ;;  %v3590_v48 = vsel %vm3568_vm0, %v3565_v31, %v9404_v13  ;;  %vm4296_vm6 = vcmp.ge.s32.totalorder %v4284_v11, 0 }
 0x446   : > { %8584 = vmatmul.mubr.msk.f32.gmra.mrb[48].mxu0 %vm3764_vm9, %v3713_v46  ;;  %v4286_v46 = vadd.s32 3, %v12297_v26 }
 0x448   : > { %v3298_v38 = vpop.permute.xlu0 %3297 }
 0x449   : > { %v3664_v35 = vsel %vm3642_vm3, %v3639_v29, %v3298_v38 }
 0x44a   : > { %v3689_v14 = vsel %vm3667_vm14, %v3664_v35, %v3394_v7 }
 0x44b   : > { %4009 = vmatprep.mubr.f32.mxu1 %v3689_v14 }
 0x44c   : > { %v2474_v57 = vpop.permute.xlu0 %2473  ;;  %4010 = vmatmul.mubr.f32.gmra.mrb[42].mxu1 %v3590_v48 }
 0x44d   : > { %2532 = vst.msk [vmem:[#allocation2 + $0x151] sm:$0xff] %vm2505_vm13, %v2474_v57  ;;  %vm12305_vm13 = vmand %vm4295_vm10, %vm4307_vm12 }
 0x44e   : > { %v4356_v52 = vsel %vm12305_vm13, %v4259_v53, 0.0  ;;  %v4355_v32 = vsel %vm12305_vm13, %v4258_v55, 0.0  ;;  %vm4320_vm10 = vmand %vm4296_vm6, %vm4308_vm8  ;;  %vm4297_vm13 = vcmp.ge.s32.totalorder %v4285_v30, 0 }
 0x44f   : > { %vm4321_vm8 = vmand %vm4297_vm13, %vm4309_vm15 }
 0x454   : > { %v2749_v3 = vld [vmem:[#allocation2 + $0x152] sm:$0xff] }
 0x455   : > { %v2701_v56 = vld [vmem:[#allocation2 + $0x150] sm:$0xff]  ;;  %v2702_v47 = vld [vmem:[#allocation2 + $0x158] sm:$0xff]  ;;  %3491 = vrot.lane.b32.xlu1 %v2749_v3, %s14935_s18 }
 0x456   : > { %v9440_v51 = vpack.i.bf16 %v2702_v47, %v2701_v56  ;;  %v2725_v45 = vld [vmem:[#allocation2 + $0x151] sm:$0xff] }
 0x458   : > { %9441 = vrot.lane.b32.xlu0 %v9440_v51, %s14910_s22  ;;  %s10094_s22 = smov 44  }
 0x459   : > { %3493 = vrot.lane.b32.xlu1 %v2750_v9, %s14935_s18 }
 0x45c   : > { %3395 = vrot.lane.b32.xlu0 %v2725_v45, %s14990_s26  ;;  %v4287_v45 = vadd.s32 4, %v12297_v26 }
 0x45d   : > { %4405 = vrot.lane.b32.xlu1 %v4356_v52, %s10085_s24  ;;  %v3916_v15 = vpop.f32.mrb[4].mxu1 }
 0x45e   : > { %v3918_v61 = vpop.f32.mrb[5].mxu1  ;;  %v3917_v28 = vadd.f32 %v12260_v50, %v3916_v15 }
 0x460   : > { %3397 = vrot.lane.b32.xlu0 %v2726_v44, %s14990_s26  ;;  %v8558_v6 = vpop.f32.mrb[30].mxu0 }
 0x461   : > { %v3921_v1 = vpop.f32.mrb[6].mxu1  ;;  %v4101_v36 = vpop.f32.mrb[31].mxu0 }
 0x462   : > { %v3922_v40 = vadd.f32 %v12260_v50, %v3921_v1  ;;  %v4102_v37 = vadd.f32 %v4101_v36, %v3917_v28  ;;  %v3923_v17 = vpop.f32.mrb[7].mxu1 }
 0x464   : > { %4403 = vrot.lane.b32.xlu0 %v4355_v32, %s10085_s24  ;;  %v4107_v63 = vadd.f32 %v8558_v6, %v3922_v40  ;;  %vm4212_vm11 = vcmp.ge.f32.partialorder %v4102_v37, 0.0  ;;  %v4236_v2 = vmul.f32 0.2, %v4102_v37 }
 0x466   : > { %v4237_v49 = vmul.f32 0.2, %v4107_v63  ;;  %v4260_v59 = vsel %vm4212_vm11, %v4102_v37, %v4236_v2  ;;  %vm4213_vm12 = vcmp.ge.f32.partialorder %v4107_v63, 0.0  ;;  %v12339_v2 = vpop.permute.xlu1 %9426 }
 0x467   : > { %v4357_v8 = vsel %vm4320_vm10, %v4260_v59, 0.0 }
 0x468   : > { %4407 = vrot.lane.b32.xlu0 %v4357_v8, %s10085_s24  ;;  %v4261_v20 = vsel %vm4213_vm12, %v4107_v63, %v4237_v49  ;;  %vm4310_vm12 = vcmp.lt.s32.totalorder %v4286_v46, 16  ;;  %v4288_v63 = vadd.s32 5, %v12297_v26 }
 0x469   : > { %v4358_v39 = vsel %vm4320_vm10, %v4261_v20, 0.0  ;;  %vm4298_vm10 = vcmp.ge.s32.totalorder %v4286_v46, 0 }
 0x46a   : > { %4409 = vrot.lane.b32.xlu1 %v4358_v39, %s10085_s24  ;;  %vm4322_vm15 = vmand %vm4298_vm10, %vm4310_vm12 }
 0x476   : > { %v3926_v60 = vpop.f32.mrb[8].mxu1 }
 0x477   : > { %v3928_v12 = vpop.f32.mrb[9].mxu1  ;;  %v3927_v62 = vadd.f32 %v12260_v50, %v3926_v60 }
 0x47a   : > { %v8561_v16 = vpop.f32.mrb[32].mxu0  ;;  %v3931_v54 = vpop.f32.mrb[10].mxu1 }
 0x47b   : > { %v3932_v24 = vadd.f32 %v12260_v50, %v3931_v54  ;;  %v4111_v5 = vpop.f32.mrb[33].mxu0  ;;  %v3933_v4 = vpop.f32.mrb[11].mxu1 }
 0x47c   : > { %v4112_v43 = vadd.f32 %v4111_v5, %v3927_v62 }
 0x47d   : > { %v4117_v21 = vadd.f32 %v8561_v16, %v3932_v24  ;;  %v12343_v24 = vpop.permute.xlu1 %9436 }
 0x47e   : > { %vm4214_vm6 = vcmp.ge.f32.partialorder %v4112_v43, 0.0  ;;  %v4238_v41 = vmul.f32 0.2, %v4112_v43 }
 0x47f   : > { %v4239_v18 = vmul.f32 0.2, %v4117_v21  ;;  %vm4215_vm11 = vcmp.ge.f32.partialorder %v4117_v21, 0.0 }
 0x480   : > { %v4262_v42 = vsel %vm4214_vm6, %v4112_v43, %v4238_v41  ;;  %v12345_v43 = vpop.permute.xlu0 %9421 }
 0x481   : > { %v4359_v13 = vsel %vm4321_vm8, %v4262_v42, 0.0  ;;  %v4263_v27 = vsel %vm4215_vm11, %v4117_v21, %v4239_v18  ;;  %vm4311_vm11 = vcmp.lt.s32.totalorder %v4287_v45, 16  ;;  %v12349_v41 = vpop.permute.xlu1 %9446  ;;  %v9423_v42 = vunpack.i.l.bf16 %v12345_v43 }
 0x482   : > { %4411 = vrot.lane.b32.xlu0 %v4359_v13, %s10085_s24  ;;  %v4360_v7 = vsel %vm4321_vm8, %v4263_v27, 0.0  ;;  %vm4299_vm8 = vcmp.ge.s32.totalorder %v4287_v45, 0  ;;  %v4289_v27 = vadd.s32 6, %v12297_v26 }
 0x483   : > { %4413 = vrot.lane.b32.xlu1 %v4360_v7, %s10085_s24  ;;  %vm4323_vm12 = vmand %vm4299_vm8, %vm4311_vm11  ;;  %v9438_v7 = vunpack.i.l.bf16 %v12343_v24 }
 0x484   : > { %v9432_v18 = vpop.permute.xlu0 %9431 }
 0x48a   : > { %v3936_v10 = vpop.f32.mrb[12].mxu1 }
 0x48b   : > { %v3938_v19 = vpop.f32.mrb[13].mxu1  ;;  %v3937_v58 = vadd.f32 %v12260_v50, %v3936_v10  ;;  %v9433_v10 = vunpack.i.l.bf16 %v9432_v18 }
 0x48e   : > { %v8564_v38 = vpop.f32.mrb[34].mxu0  ;;  %v3941_v29 = vpop.f32.mrb[14].mxu1 }
 0x48f   : > { %v3942_v23 = vadd.f32 %v12260_v50, %v3941_v29  ;;  %v4121_v35 = vpop.f32.mrb[35].mxu0  ;;  %v3943_v31 = vpop.f32.mrb[15].mxu1  ;;  %v9439_v29 = vunpack.i.h.bf16 %v12343_v24 }
 0x490   : > { %v4122_v14 = vadd.f32 %v4121_v35, %v3937_v58  ;;  %v9429_v58 = vunpack.i.h.bf16 %v12339_v2  ;;  %v9424_v35 = vunpack.i.h.bf16 %v12345_v43  ;;  %v4290_v43 = vadd.s32 7, %v12297_v26 }
 0x491   : > { %v4127_v48 = vadd.f32 %v8564_v38, %v3942_v23  ;;  %v9428_v38 = vunpack.i.l.bf16 %v12339_v2  ;;  %v9448_v23 = vunpack.i.l.bf16 %v12349_v41 }
 0x492   : > { %vm4216_vm13 = vcmp.ge.f32.partialorder %v4122_v14, 0.0  ;;  %v4240_v57 = vmul.f32 0.2, %v4122_v14 }
 0x493   : > { %v4241_v3 = vmul.f32 0.2, %v4127_v48  ;;  %vm4217_vm6 = vcmp.ge.f32.partialorder %v4127_v48, 0.0 }
 0x494   : > { %v4264_v56 = vsel %vm4216_vm13, %v4122_v14, %v4240_v57  ;;  %v3615_v57 = vsel %vm1745_vm7, %v9423_v42, %v9428_v38 }
 0x495   : > { %v4361_v47 = vsel %vm4322_vm15, %v4264_v56, 0.0  ;;  %v4265_v25 = vsel %vm4217_vm6, %v4127_v48, %v4241_v3  ;;  %vm4312_vm6 = vcmp.lt.s32.totalorder %v4288_v63, 16 }
 0x496   : > { %4415 = vrot.lane.b32.xlu0 %v4361_v47, %s10085_s24  ;;  %v4362_v51 = vsel %vm4322_vm15, %v4265_v25, 0.0  ;;  %vm4300_vm15 = vcmp.ge.s32.totalorder %v4288_v63, 0  ;;  %v2556_v25 = vld [vmem:[#allocation2 + $0x120] sm:$0xff] }
 0x497   : > { %4417 = vrot.lane.b32.xlu1 %v4362_v51, %s10085_s24  ;;  %vm4324_vm11 = vmand %vm4300_vm15, %vm4312_vm6  ;;  %vm15037_vm15 = vcmask 293888   ;;  %vm4475_vm6 = vcmask 556320  }
 0x49e   : > { %v3946_v9 = vpop.f32.mrb[16].mxu1 }
 0x49f   : > { %v3948_v53 = vpop.f32.mrb[17].mxu1  ;;  %v3947_v33 = vadd.f32 %v12260_v50, %v3946_v9 }
 0x4a2   : > { %v8567_v34 = vpop.f32.mrb[36].mxu0  ;;  %v3951_v52 = vpop.f32.mrb[18].mxu1 }
 0x4a3   : > { %v3952_v15 = vadd.f32 %v12260_v50, %v3951_v52  ;;  %v4131_v44 = vpop.f32.mrb[37].mxu0  ;;  %v3953_v11 = vpop.f32.mrb[19].mxu1  ;;  %v9449_v52 = vunpack.i.h.bf16 %v12349_v41 }
 0x4a4   : > { %v4132_v61 = vadd.f32 %v4131_v44, %v3947_v33  ;;  %v3640_v33 = vsel %vm3617_vm1, %v3615_v57, %v9433_v10 }
 0x4a5   : > { %v4137_v55 = vadd.f32 %v8567_v34, %v3952_v15  ;;  %v3541_v34 = vsel %vm15037_vm15, %v2556_v25, %v9438_v7  ;;  %v9434_v15 = vunpack.i.h.bf16 %v9432_v18 }
 0x4a6   : > { %vm4218_vm10 = vcmp.ge.f32.partialorder %v4132_v61, 0.0  ;;  %v4242_v28 = vmul.f32 0.2, %v4132_v61 }
 0x4a7   : > { %v4243_v6 = vmul.f32 0.2, %v4137_v55  ;;  %vm4219_vm13 = vcmp.ge.f32.partialorder %v4137_v55, 0.0 }
 0x4a8   : > { %v4266_v1 = vsel %vm4218_vm10, %v4132_v61, %v4242_v28 }
 0x4a9   : > { %v4363_v36 = vsel %vm4323_vm12, %v4266_v1, 0.0  ;;  %v4267_v32 = vsel %vm4219_vm13, %v4137_v55, %v4243_v6  ;;  %vm4313_vm13 = vcmp.lt.s32.totalorder %v4289_v27, 16  ;;  %v3616_v1 = vsel %vm1745_vm7, %v9424_v35, %v9429_v58 }
 0x4aa   : > { %4419 = vrot.lane.b32.xlu0 %v4363_v36, %s10085_s24  ;;  %v4364_v40 = vsel %vm4323_vm12, %v4267_v32, 0.0  ;;  %vm4301_vm12 = vcmp.ge.s32.totalorder %v4289_v27, 0 }
 0x4ab   : > { %4421 = vrot.lane.b32.xlu1 %v4364_v40, %s10085_s24  ;;  %v3566_v40 = vsel %vm3543_vm4, %v3541_v34, %v9448_v23 }
 0x4ac   : > { %v3591_v63 = vsel %vm3568_vm0, %v3566_v40, %v9423_v42  ;;  %v5492_v40 = vld [vmem:[%s14888_s5 + $0x40] sm:$0xff] }
 0x4b2   : > { %v3956_v37 = vpop.f32.mrb[20].mxu1 }
 0x4b3   : > { %v3958_v17 = vpop.f32.mrb[21].mxu1  ;;  %v3957_v49 = vadd.f32 %v12260_v50, %v3956_v37 }
 0x4b6   : > { %v8570_v59 = vpop.f32.mrb[38].mxu0  ;;  %v3961_v8 = vpop.f32.mrb[22].mxu1 }
 0x4b7   : > { %v3962_v20 = vadd.f32 %v12260_v50, %v3961_v8  ;;  %v4141_v39 = vpop.f32.mrb[39].mxu0  ;;  %v3963_v60 = vpop.f32.mrb[23].mxu1  ;;  %v2557_v8 = vld [vmem:[#allocation2 + $0x128] sm:$0xff] }
 0x4b8   : > { %v4142_v12 = vadd.f32 %v4141_v39, %v3957_v49 }
 0x4b9   : > { %v4147_v30 = vadd.f32 %v8570_v59, %v3962_v20  ;;  %v3641_v59 = vsel %vm3617_vm1, %v3616_v1, %v9434_v15  ;;  %vm4302_vm1 = vcmp.ge.s32.totalorder %v4290_v43, 0  ;;  %v5491_v15 = vld [vmem:[%s14888_s5 + $0x38] sm:$0xff] }
 0x4ba   : > { %vm4220_vm8 = vcmp.ge.f32.partialorder %v4142_v12, 0.0  ;;  %v4244_v62 = vmul.f32 0.2, %v4142_v12 }
 0x4bb   : > { %v4245_v16 = vmul.f32 0.2, %v4147_v30  ;;  %vm4221_vm10 = vcmp.ge.f32.partialorder %v4147_v30, 0.0 }
 0x4bc   : > { %v4268_v54 = vsel %vm4220_vm8, %v4142_v12, %v4244_v62 }
 0x4bd   : > { %v4365_v5 = vsel %vm4324_vm11, %v4268_v54, 0.0  ;;  %v4269_v4 = vsel %vm4221_vm10, %v4147_v30, %v4245_v16  ;;  %vm15040_vm10 = vcmask 261120  }
 0x4be   : > { %4423 = vrot.lane.b32.xlu0 %v4365_v5, %s10085_s24  ;;  %v4366_v21 = vsel %vm4324_vm11, %v4269_v4, 0.0  ;;  %vm12368_vm11 = vmand %vm4301_vm12, %vm4313_vm13 }
 0x4bf   : > { %4425 = vrot.lane.b32.xlu1 %v4366_v21, %s10085_s24  ;;  %vm15041_vm13 = vmmov %vm15037_vm15 }
 0x4c0   : > { %v3542_v12 = vsel %vm15041_vm13, %v2557_v8, %v9439_v29  ;;  %vm15042_vm15 = vmmov %vm15040_vm10 }
 0x4c1   : > { %v3567_v54 = vsel %vm3543_vm4, %v3542_v12, %v9449_v52  ;;  %v5490_v52 = vld [vmem:[%s14888_s5 + $0x30] sm:$0xff] }
 0x4c2   : > { %v3592_v24 = vsel %vm3568_vm0, %v3567_v54, %v9424_v35  ;;  %v5497_v54 = vld [vmem:[%s14888_s5 + $0x68] sm:$0xff] }
 0x4c6   : > { %v3966_v13 = vpop.f32.mrb[24].mxu1 }
 0x4c7   : > { %v3492_v19 = vpop.permute.xlu1 %3491  ;;  %v3968_v46 = vpop.f32.mrb[25].mxu1  ;;  %v3967_v31 = vadd.f32 %v12260_v50, %v3966_v13 }
 0x4c9   : > { %v8573_v14 = vpop.f32.mrb[40].mxu0 }
 0x4ca   : > { %v9442_v48 = vpop.permute.xlu0 %9441  ;;  %v3971_v56 = vpop.f32.mrb[26].mxu1 }
 0x4cb   : > { %v9443_v3 = vunpack.i.l.bf16 %v9442_v48  ;;  %v4151_v47 = vpop.f32.mrb[41].mxu0  ;;  %v3972_v51 = vadd.f32 %v12260_v50, %v3971_v56  ;;  %v3494_v53 = vpop.permute.xlu1 %3493  ;;  %v9444_v11 = vunpack.i.h.bf16 %v9442_v48  ;;  %v5486_v56 = vld [vmem:[%s14888_s5 + $0x10] sm:$0xff] }
 0x4cc   : > { %v4152_v9 = vadd.f32 %v4151_v47, %v3967_v31  ;;  %v3973_v45 = vpop.f32.mrb[27].mxu1  ;;  %v5484_v31 = vld [vmem:[%s14888_s5] sm:$0xff]  ;;  %v5487_v47 = vld [vmem:[%s14888_s5 + $0x18] sm:$0xff] }
 0x4cd   : > { %v3665_v44 = vsel %vm3642_vm3, %v3640_v33, %v9443_v3  ;;  %v4157_v61 = vadd.f32 %v8573_v14, %v3972_v51  ;;  %v3666_v39 = vsel %vm3642_vm3, %v3641_v59, %v9444_v11  ;;  %v5485_v14 = vld [vmem:[%s14888_s5 + $0x8] sm:$0xff]  ;;  %v8721_v25 = vpack.c.bf16 %v5487_v47, %v5486_v56  ;;  %v5502_v47 = vld [vmem:[%s14888_s5 + $0x90] sm:$0xff] }
 0x4ce   : > { %vm4222_vm8 = vcmp.ge.f32.partialorder %v4152_v9, 0.0  ;;  %v4246_v55 = vmul.f32 0.2, %v4152_v9  ;;  %v3396_v28 = vpop.permute.xlu0 %3395  ;;  %v8718_v57 = vpack.c.bf16 %v5485_v14, %v5484_v31  ;;  %v5489_v45 = vld [vmem:[%s14888_s5 + $0x28] sm:$0xff] }
 0x4cf   : > { %v3690_v36 = vsel %vm3667_vm14, %v3665_v44, %v3396_v28  ;;  %v3714_v32 = vsel %vm15040_vm10, %v3396_v28, %v3492_v19  ;;  %v4247_v37 = vmul.f32 0.2, %v4157_v61  ;;  %v4406_v17 = vpop.permute.xlu1 %4405  ;;  %vm4223_vm12 = vcmp.ge.f32.partialorder %v4157_v61, 0.0 }
 0x4d0   : > { %4014 = vmatprep.mubr.f32.mxu1 %v3690_v36  ;;  %8586 = vmatprep.mubr.msk.f32.mxu0 %vm3764_vm9, %v3714_v32  ;;  %v4270_v2 = vsel %vm4222_vm8, %v4152_v9, %v4246_v55  ;;  %4477 = vst.msk [vmem:[#allocation2 + $0x39] sm:$0xff] %vm4475_vm6, %v4406_v17  ;;  %v4291_v9 = vadd.s32 8, %v12297_v26  ;;  %v8727_v36 = vpack.c.bf16 %v5491_v15, %v5490_v52  ;;  %v5505_v52 = vld [vmem:[%s14888_s5 + $0xa8] sm:$0xff] }
 0x4d1   : > { %4015 = vmatmul.mubr.f32.gmra.mrb[44].mxu1 %v3591_v63  ;;  %v4367_v49 = vsel %vm12368_vm11, %v4270_v2, 0.0  ;;  %v4271_v60 = vsel %vm4223_vm12, %v4157_v61, %v4247_v37  ;;  %8719 = vmatpush1.bf16.msra.mxu0 %v8718_v57  ;;  %v5493_v37 = vld [vmem:[%s14888_s5 + $0x48] sm:$0xff] }
 0x4d2   : > { %v3398_v20 = vpop.permute.xlu0 %3397  ;;  %4427 = vrot.lane.b32.xlu0 %v4367_v49, %s10085_s24  ;;  %v4368_v16 = vsel %vm12368_vm11, %v4271_v60, 0.0  ;;  %8720 = vmatprep.subr.bf16.mxu0 %v14914_v22  ;;  %vm4303_vm10 = vcmp.ge.s32.totalorder %v4291_v9, 0  ;;  %vm4315_vm12 = vcmp.lt.s32.totalorder %v4291_v9, 16  ;;  %v8730_v8 = vpack.c.bf16 %v5493_v37, %v5492_v40  ;;  %v5495_v60 = vld [vmem:[%s14888_s5 + $0x58] sm:$0xff] }
 0x4d3   : > { %v3691_v30 = vsel %vm3667_vm14, %v3666_v39, %v3398_v20  ;;  %v3715_v62 = vsel %vm15042_vm15, %v3398_v20, %v3494_v53  ;;  %4429 = vrot.lane.b32.xlu1 %v4368_v16, %s10085_s24  ;;  %vm4314_vm14 = vcmp.lt.s32.totalorder %v4290_v43, 16  ;;  %v5488_v53 = vld [vmem:[%s14888_s5 + $0x20] sm:$0xff]  ;;  %vm4327_vm15 = vmand %vm4303_vm10, %vm4315_vm12  ;;  %v5494_v39 = vld [vmem:[%s14888_s5 + $0x50] sm:$0xff] }
 0x4d4   : > { %4019 = vmatprep.mubr.f32.mxu1 %v3691_v30  ;;  %8587 = vmatmul.mubr.msk.f32.gmra.mrb[50].mxu0 %vm3764_vm9, %v3715_v62  ;;  %vm4326_vm8 = vmand %vm4302_vm1, %vm4314_vm14  ;;  %v8724_v34 = vpack.c.bf16 %v5489_v45, %v5488_v53  ;;  %v8733_v62 = vpack.c.bf16 %v5495_v60, %v5494_v39  ;;  %v5496_v16 = vld [vmem:[%s14888_s5 + $0x60] sm:$0xff] }
 0x4d5   : > { %4020 = vmatmul.mubr.f32.gmra.mrb[46].mxu1 %v3592_v24  ;;  %8722 = vmatpush1.bf16.msra.mxu0 %v8721_v25  ;;  %v8736_v24 = vpack.c.bf16 %v5497_v54, %v5496_v16  ;;  %v5503_v25 = vld [vmem:[%s14888_s5 + $0x98] sm:$0xff] }
 0x4d6   : > { %v4404_v5 = vpop.permute.xlu0 %4403  ;;  %8723 = vmatprep.subr.bf16.mxu0 %v14914_v22  ;;  %v8745_v9 = vpack.c.bf16 %v5503_v25, %v5502_v47 }
 0x4d7   : > { %4476 = vst.msk [vmem:[#allocation2 + $0x31] sm:$0xff] %vm4475_vm6, %v4404_v5 }
 0x4d9   : > { %8725 = vmatpush1.bf16.msra.mxu0 %v8724_v34  ;;  %v4541_v34 = vld [vmem:[#allocation2 + $0x3a] sm:$0xff] }
 0x4da   : > { %v3976_v4 = vpop.f32.mrb[28].mxu1  ;;  %v4408_v21 = vpop.permute.xlu0 %4407  ;;  %8726 = vmatprep.subr.bf16.mxu0 %v14914_v22 }
 0x4db   : > { %v3978_v41 = vpop.f32.mrb[29].mxu1  ;;  %4478 = vst.msk [vmem:[#allocation2 + $0x49] sm:$0xff] %vm4475_vm6, %v4408_v21  ;;  %v3977_v18 = vadd.f32 %v12260_v50, %v3976_v4  ;;  %v4292_v4 = vadd.s32 9, %v12297_v26  ;;  %v5498_v21 = vld [vmem:[%s14888_s5 + $0x70] sm:$0xff] }
 0x4dc   : > { %v4410_v42 = vpop.permute.xlu1 %4409  ;;  %v5499_v41 = vld [vmem:[%s14888_s5 + $0x78] sm:$0xff] }
 0x4dd   : > { %v8576_v13 = vpop.f32.mrb[42].mxu0  ;;  %4479 = vst.msk [vmem:[#allocation2 + $0x51] sm:$0xff] %vm4475_vm6, %v4410_v42  ;;  %8728 = vmatpush1.bf16.msra.mxu0 %v8727_v36  ;;  %vm4304_vm14 = vcmp.ge.s32.totalorder %v4292_v4, 0  ;;  %v4293_v36 = vadd.s32 10, %v12297_v26 }
 0x4de   : > { %v3981_v27 = vpop.f32.mrb[30].mxu1  ;;  %v4161_v7 = vpop.f32.mrb[43].mxu0  ;;  %8729 = vmatprep.subr.bf16.mxu0 %v14914_v22  ;;  %v4540_v45 = vld [vmem:[#allocation2 + $0x32] sm:$0xff] }
 0x4df   : > { %v3982_v10 = vadd.f32 %v12260_v50, %v3981_v27  ;;  %v4162_v19 = vadd.f32 %v4161_v7, %v3977_v18  ;;  %v3983_v46 = vpop.f32.mrb[31].mxu1  ;;  %v9455_v15 = vpack.i.bf16 %v4541_v34, %v4540_v45  ;;  %vm4305_vm12 = vcmp.ge.s32.totalorder %v4293_v36, 0  ;;  %v5553_v45 = vld [vmem:[%s14888_s5 + $0x228] sm:$0xff]  ;;  %v4521_v34 = vld [vmem:[#allocation2 + $0x39] sm:$0xff] }
 0x4e1   : > { %v4167_v58 = vadd.f32 %v8576_v13, %v3982_v10  ;;  %vm4224_vm0 = vcmp.ge.f32.partialorder %v4162_v19, 0.0  ;;  %v4248_v38 = vmul.f32 0.2, %v4162_v19  ;;  %8731 = vmatpush1.bf16.msra.mxu0 %v8730_v8  ;;  %v8739_v13 = vpack.c.bf16 %v5499_v41, %v5498_v21  ;;  %v5548_v21 = vld [vmem:[%s14888_s5 + $0x200] sm:$0xff]  ;;  %v5549_v41 = vld [vmem:[%s14888_s5 + $0x208] sm:$0xff] }
 0x4e2   : > { %8732 = vmatprep.subr.bf16.mxu0 %v14914_v22 }
 0x4e3   : > { %v4249_v29 = vmul.f32 0.2, %v4167_v58  ;;  %v4272_v23 = vsel %vm4224_vm0, %v4162_v19, %v4248_v38  ;;  %vm4225_vm11 = vcmp.ge.f32.partialorder %v4167_v58, 0.0  ;;  %vm4316_vm0 = vcmp.lt.s32.totalorder %v4292_v4, 16  ;;  %v5500_v38 = vld [vmem:[%s14888_s5 + $0x80] sm:$0xff] }
 0x4e4   : > { %v4369_v35 = vsel %vm4326_vm8, %v4272_v23, 0.0  ;;  %v4600_v37 = vld [vmem:[#allocation2 + $0x4a] sm:$0xff] }
 0x4e5   : > { %4431 = vrot.lane.b32.xlu0 %v4369_v35, %s10085_s24  ;;  %v4273_v48 = vsel %vm4225_vm11, %v4167_v58, %v4249_v29  ;;  %8734 = vmatpush1.bf16.msra.mxu0 %v8733_v62  ;;  %v5501_v29 = vld [vmem:[%s14888_s5 + $0x88] sm:$0xff]  ;;  %vm12474_vm11 = vmand %vm4304_vm14, %vm4316_vm0  ;;  %v5511_v62 = vld [vmem:[%s14888_s5 + $0xd8] sm:$0xff]  ;;  %vm15048_vm0 = vcmask 1043456  }
 0x4e6   : > { %v4370_v3 = vsel %vm4326_vm8, %v4273_v48, 0.0  ;;  %8735 = vmatprep.subr.bf16.mxu0 %v14914_v22  ;;  %v8742_v48 = vpack.c.bf16 %v5501_v29, %v5500_v38  ;;  %v5550_v29 = vld [vmem:[%s14888_s5 + $0x210] sm:$0xff] }
 0x4e7   : > { %4433 = vrot.lane.b32.xlu1 %v4370_v3, %s10085_s24 }
 0x4e9   : > { %8737 = vmatpush1.bf16.msra.mxu0 %v8736_v24 }
 0x4ea   : > { %8738 = vmatprep.subr.bf16.mxu0 %v14914_v22 }
 0x4ed   : > { %8740 = vmatpush1.bf16.msra.mxu0 %v8739_v13 }
 0x4ee   : > { %v3986_v51 = vpop.f32.mrb[32].mxu1  ;;  %8741 = vmatprep.subr.bf16.mxu0 %v14914_v22 }
 0x4ef   : > { %v3988_v33 = vpop.f32.mrb[33].mxu1  ;;  %v3987_v44 = vadd.f32 %v12260_v50, %v3986_v51 }
 0x4f0   : > { %v5504_v33 = vld [vmem:[%s14888_s5 + $0xa0] sm:$0xff] }
 0x4f1   : > { %v8579_v11 = vpop.f32.mrb[44].mxu0  ;;  %8743 = vmatpush1.bf16.msra.mxu0 %v8742_v48  ;;  %v5514_v48 = vld [vmem:[%s14888_s5 + $0xf0] sm:$0xff] }
 0x4f2   : > { %v3991_v61 = vpop.f32.mrb[34].mxu1  ;;  %v4171_v55 = vpop.f32.mrb[45].mxu0  ;;  %8744 = vmatprep.subr.bf16.mxu0 %v14914_v22 }
 0x4f3   : > { %v3992_v28 = vadd.f32 %v12260_v50, %v3991_v61  ;;  %v4172_v6 = vadd.f32 %v4171_v55, %v3987_v44  ;;  %v3993_v1 = vpop.f32.mrb[35].mxu1  ;;  %v8748_v44 = vpack.c.bf16 %v5505_v52, %v5504_v33  ;;  %v5506_v61 = vld [vmem:[%s14888_s5 + $0xb0] sm:$0xff]  ;;  %v5507_v55 = vld [vmem:[%s14888_s5 + $0xb8] sm:$0xff] }
 0x4f4   : > { %v4412_v32 = vpop.permute.xlu0 %4411  ;;  %v4522_v1 = vld [vmem:[#allocation2 + $0x49] sm:$0xff] }
 0x4f5   : > { %v4177_v17 = vadd.f32 %v8579_v11, %v3992_v28  ;;  %vm4226_vm13 = vcmp.ge.f32.partialorder %v4172_v6, 0.0  ;;  %v4250_v63 = vmul.f32 0.2, %v4172_v6  ;;  %v4414_v2 = vpop.permute.xlu1 %4413  ;;  %4480 = vst.msk [vmem:[#allocation2 + $0x61] sm:$0xff] %vm4475_vm6, %v4412_v32  ;;  %8746 = vmatpush1.bf16.msra.mxu0 %v8745_v9  ;;  %v4523_v11 = vld [vmem:[#allocation2 + $0x51] sm:$0xff]  ;;  %v8751_v28 = vpack.c.bf16 %v5507_v55, %v5506_v61  ;;  %v12600_v55 = vld [vmem:[#allocation2 + $0x48] sm:$0xff] }
 0x4f6   : > { %4481 = vst.msk [vmem:[#allocation2 + $0x69] sm:$0xff] %vm4475_vm6, %v4414_v2  ;;  %8747 = vmatprep.subr.bf16.mxu0 %v14914_v22  ;;  %v9465_v40 = vpack.i.bf16 %v4523_v11, %v4522_v1  ;;  %v5509_v2 = vld [vmem:[%s14888_s5 + $0xc8] sm:$0xff]  ;;  %v5555_v11 = vld [vmem:[%s14888_s5 + $0x238] sm:$0xff] }
 0x4f7   : > { %v4251_v49 = vmul.f32 0.2, %v4177_v17  ;;  %v4274_v59 = vsel %vm4226_vm13, %v4172_v6, %v4250_v63  ;;  %vm4227_vm1 = vcmp.ge.f32.partialorder %v4177_v17, 0.0  ;;  %v5508_v63 = vld [vmem:[%s14888_s5 + $0xc0] sm:$0xff]  ;;  %vm4317_vm13 = vcmp.lt.s32.totalorder %v4293_v36, 16  ;;  %v5557_v1 = vld [vmem:[%s14888_s5 + $0x248] sm:$0xff] }
 0x4f8   : > { %v4371_v20 = vsel %vm4327_vm15, %v4274_v59, 0.0  ;;  %v8754_v8 = vpack.c.bf16 %v5509_v2, %v5508_v63  ;;  %v5559_v63 = vld [vmem:[%s14888_s5 + $0x258] sm:$0xff] }
 0x4f9   : > { %4435 = vrot.lane.b32.xlu0 %v4371_v20, %s10085_s24  ;;  %v4275_v12 = vsel %vm4227_vm1, %v4177_v17, %v4251_v49  ;;  %8749 = vmatpush1.bf16.msra.mxu0 %v8748_v44  ;;  %v4601_v17 = vld [vmem:[#allocation2 + $0x52] sm:$0xff]  ;;  %vm12529_vm1 = vmand %vm4305_vm12, %vm4317_vm13  ;;  %vm15068_vm13 = vcmask 818176  }
 0x4fa   : > { %v4372_v30 = vsel %vm4327_vm15, %v4275_v12, 0.0  ;;  %8750 = vmatprep.subr.bf16.mxu0 %v14914_v22  ;;  %v12518_v60 = vpack.i.bf16 %v4601_v17, %v4600_v37  ;;  %v5554_v44 = vld [vmem:[%s14888_s5 + $0x230] sm:$0xff] }
 0x4fb   : > { %4437 = vrot.lane.b32.xlu1 %v4372_v30, %s10085_s24  ;;  %v5510_v30 = vld [vmem:[%s14888_s5 + $0xd0] sm:$0xff]  ;;  %v8825_v61 = vpack.c.bf16 %v5555_v11, %v5554_v44 }
 0x4fc   : > { %v5558_v17 = vld [vmem:[%s14888_s5 + $0x250] sm:$0xff] }
 0x4fd   : > { %8752 = vmatpush1.bf16.msra.mxu0 %v8751_v28 }
 0x4fe   : > { %8753 = vmatprep.subr.bf16.mxu0 %v14914_v22 }
 0x501   : > { %8755 = vmatpush1.bf16.msra.mxu0 %v8754_v8 }
 0x502   : > { %v3996_v5 = vpop.f32.mrb[36].mxu1  ;;  %8756 = vmatprep.subr.bf16.mxu0 %v14914_v22 }
 0x503   : > { %v3998_v43 = vpop.f32.mrb[37].mxu1  ;;  %v3997_v18 = vadd.f32 %v12260_v50, %v3996_v5  ;;  %v8757_v5 = vpack.c.bf16 %v5511_v62, %v5510_v30 }
 0x505   : > { %v8582_v42 = vpop.f32.mrb[46].mxu0  ;;  %8758 = vmatpush1.bf16.msra.mxu0 %v8757_v5 }
 0x506   : > { %v4001_v27 = vpop.f32.mrb[38].mxu1  ;;  %v4181_v7 = vpop.f32.mrb[47].mxu0  ;;  %8759 = vmatprep.subr.bf16.mxu0 %v14914_v22 }
 0x507   : > { %v4002_v10 = vadd.f32 %v12260_v50, %v4001_v27  ;;  %v4182_v19 = vadd.f32 %v4181_v7, %v3997_v18  ;;  %v4003_v46 = vpop.f32.mrb[39].mxu1  ;;  %v5512_v18 = vld [vmem:[%s14888_s5 + $0xe0] sm:$0xff]  ;;  %v12547_v7 = vld [vmem:[#allocation2 + $0x68] sm:$0xff] }
 0x508   : > { %v4416_v58 = vpop.permute.xlu0 %4415 }
 0x509   : > { %v4187_v23 = vadd.f32 %v8582_v42, %v4002_v10  ;;  %vm4228_vm8 = vcmp.ge.f32.partialorder %v4182_v19, 0.0  ;;  %v4252_v35 = vmul.f32 0.2, %v4182_v19  ;;  %v4418_v31 = vpop.permute.xlu1 %4417  ;;  %4482 = vst.msk [vmem:[#allocation2 + $0x79] sm:$0xff] %vm4475_vm6, %v4416_v58  ;;  %v8813_v10 = vpack.c.bf16 %v5549_v41, %v5548_v21  ;;  %v12554_v58 = vld [vmem:[#allocation2 + $0x60] sm:$0xff] }
 0x50a   : > { %4483 = vst.msk [vmem:[#allocation2 + $0x81] sm:$0xff] %vm4475_vm6, %v4418_v31  ;;  %v12558_v38 = vpack.i.bf16 %v12547_v7, %v12554_v58  ;;  %v4525_v31 = vld [vmem:[#allocation2 + $0x69] sm:$0xff] }
 0x50b   : > { %v4253_v57 = vmul.f32 0.2, %v4187_v23  ;;  %v4276_v3 = vsel %vm4228_vm8, %v4182_v19, %v4252_v35  ;;  %vm4229_vm10 = vcmp.ge.f32.partialorder %v4187_v23, 0.0  ;;  %v5513_v19 = vld [vmem:[%s14888_s5 + $0xe8] sm:$0xff]  ;;  %8814 = vmatprep.subr.bf16.mxu1 %v8813_v10  ;;  %vm15049_vm8 = vmmov %vm15048_vm0 }
 0x50c   : > { %v4373_v56 = vsel %vm12474_vm11, %v4276_v3, 0.0  ;;  %8816 = vmatpush3.bf16.msra.mxu1 %v8813_v10  ;;  %v4524_v3 = vld [vmem:[#allocation2 + $0x61] sm:$0xff] }
 0x50d   : > { %4439 = vrot.lane.b32.xlu0 %v4373_v56, %s10085_s24  ;;  %v4277_v51 = vsel %vm4229_vm10, %v4187_v23, %v4253_v57  ;;  %v5551_v23 = vld [vmem:[%s14888_s5 + $0x218] sm:$0xff]  ;;  %v12577_v25 = vpack.i.bf16 %v4525_v31, %v4524_v3  ;;  %vm15066_vm10 = vcmask 261120  }
 0x50e   : > { %v4374_v53 = vsel %vm12474_vm11, %v4277_v51, 0.0  ;;  %v8817_v14 = vpack.c.bf16 %v5551_v23, %v5550_v29  ;;  %v5515_v56 = vld [vmem:[%s14888_s5 + $0xf8] sm:$0xff]  ;;  %vm5361_vm11 = vcmask 621568   ;;  %vm15067_vm12 = vmmov %vm15066_vm10 }
 0x50f   : > { %v4520_v51 = vld [vmem:[#allocation2 + $0x31] sm:$0xff]  ;;  %v8763_v9 = vpack.c.bf16 %v5515_v56, %v5514_v48 }
 0x510   : > { %8818 = vmatprep.subr.bf16.mxu1 %v8817_v14  ;;  %v9450_v52 = vpack.i.bf16 %v4521_v34, %v4520_v51  ;;  %v4643_v2 = vld [vmem:[#allocation2 + $0x79] sm:$0xff] }
 0x511   : > { %4441 = vrot.lane.b32.xlu0 %v4374_v53, %s10085_s24  ;;  %8820 = vmatpush3.bf16.msra.mxu1 %v8817_v14  ;;  %v5552_v53 = vld [vmem:[%s14888_s5 + $0x220] sm:$0xff]  ;;  %v12625_v8 = vld [vmem:[#allocation2 + $0x78] sm:$0xff] }
 0x512   : > { %v8821_v33 = vpack.c.bf16 %v5553_v45, %v5552_v53  ;;  %v4547_v30 = vld [vmem:[#allocation2 + $0x82] sm:$0xff] }
 0x513   : > { %v4527_v21 = vld [vmem:[#allocation2 + $0x81] sm:$0xff] }
 0x514   : > { %8822 = vmatprep.subr.bf16.mxu1 %v8821_v33 }
 0x515   : > { %9456 = vrot.lane.b32.xlu0 %v9455_v15, %s15045_s28  ;;  %v12589_v15 = vld [vmem:[#allocation2 + $0x50] sm:$0xff]  ;;  %8824 = vmatpush3.bf16.msra.mxu1 %v8821_v33 }
 0x516   : > { %v4006_v6 = vpop.f32.mrb[40].mxu1  ;;  %v9460_v28 = vpack.i.bf16 %v12589_v15, %v12600_v55  ;;  %8826 = vmatprep.subr.bf16.mxu1 %v8825_v61 }
 0x517   : > { %v4008_v32 = vpop.f32.mrb[41].mxu1  ;;  %v4007_v49 = vadd.f32 %v12260_v50, %v4006_v6  ;;  %v5556_v6 = vld [vmem:[%s14888_s5 + $0x240] sm:$0xff] }
 0x518   : > { %v4662_v32 = vld [vmem:[#allocation2 + $0x6a] sm:$0xff] }
 0x519   : > { %v8585_v59 = vpop.f32.mrb[48].mxu0  ;;  %9466 = vrot.lane.b32.xlu0 %v9465_v40, %s10089_s30  ;;  %8828 = vmatpush3.bf16.msra.mxu1 %v8825_v61 }
 0x51a   : > { %v4191_v20 = vpop.f32.mrb[49].mxu0 }
 0x51b   : > { %v4192_v39 = vadd.f32 %v4191_v20, %v4007_v49  ;;  %v12622_v49 = vld [vmem:[#allocation2 + $0x80] sm:$0xff] }
 0x51c   : > { %v4420_v12 = vpop.permute.xlu0 %4419  ;;  %v9515_v20 = vpack.i.bf16 %v12622_v49, %v12625_v8 }
 0x51d   : > { %vm4230_vm15 = vcmp.ge.f32.partialorder %v4192_v39, 0.0  ;;  %v4254_v16 = vmul.f32 0.2, %v4192_v39  ;;  %4484 = vst.msk [vmem:[#allocation2 + $0x91] sm:$0xff] %vm4475_vm6, %v4420_v12  ;;  %v4422_v54 = vpop.permute.xlu1 %4421  ;;  %9476 = vrot.lane.b32.xlu0 %v12518_v60, %s10090_s17  ;;  %v5560_v12 = vld [vmem:[%s14888_s5 + $0x260] sm:$0xf] }
 0x51e   : > { %4485 = vst.msk [vmem:[#allocation2 + $0x99] sm:$0xff] %vm4475_vm6, %v4422_v54 }
 0x51f   : > { %v4011_v4 = vpop.f32.mrb[42].mxu1  ;;  %v4278_v43 = vsel %vm4230_vm15, %v4192_v39, %v4254_v16  ;;  %v4544_v39 = vld [vmem:[#allocation2 + $0x62] sm:$0xff]  ;;  %vm15069_vm15 = vmmov %vm15066_vm10 }
 0x520   : > { %v4012_v42 = vadd.f32 %v12260_v50, %v4011_v4  ;;  %v4013_v13 = vpop.f32.mrb[43].mxu1  ;;  %v4375_v27 = vsel %vm12529_vm1, %v4278_v43, 0.0  ;;  %v8760_v50 = vpack.c.bf16 %v5513_v19, %v5512_v18  ;;  %v9495_v62 = vpack.i.bf16 %v4662_v32, %v4544_v39 }
 0x521   : > { %4443 = vrot.lane.b32.xlu1 %v4375_v27, %s10085_s24  ;;  %9481 = vrot.lane.b32.xlu0 %v9465_v40, %s10077_s25  ;;  %v8829_v40 = vpack.c.bf16 %v5557_v1, %v5556_v6  ;;  %v9520_v18 = vpack.i.bf16 %v4527_v21, %v4643_v2 }
 0x522   : > { %v4197_v46 = vadd.f32 %v8585_v59, %v4012_v42  ;;  %8761 = vmatpush1.bf16.msra.mxu0 %v8760_v50  ;;  %v8833_v59 = vpack.c.bf16 %v5559_v63, %v5558_v17 }
 0x523   : > { %8762 = vmatprep.subr.bf16.mxu0 %v14914_v22  ;;  %8830 = vmatprep.subr.bf16.mxu1 %v8829_v40 }
 0x524   : > { %v4255_v35 = vmul.f32 0.2, %v4197_v46  ;;  %vm4231_vm14 = vcmp.ge.f32.partialorder %v4197_v46, 0.0  ;;  %8832 = vmatpush3.bf16.msra.mxu1 %v8829_v40  ;;  %v4528_v4 = vld [vmem:[#allocation2 + $0x91] sm:$0xff] }
 0x525   : > { %9486 = vrot.lane.b32.xlu0 %v12558_v38, %s10091_s23  ;;  %8834 = vmatprep.subr.bf16.mxu1 %v8833_v59  ;;  %v4529_v5 = vld [vmem:[#allocation2 + $0x99] sm:$0xff]  ;;  %v12676_v23 = vld [vmem:[#allocation2 + $0x90] sm:$0xff] }
 0x526   : > { %v4279_v57 = vsel %vm4231_vm14, %v4197_v46, %v4255_v35  ;;  %8764 = vmatpush1.bf16.msra.mxu0 %v8763_v9  ;;  %v12647_v43 = vpack.i.bf16 %v4529_v5, %v4528_v4  ;;  %v12669_v50 = vld [vmem:[#allocation2 + $0x98] sm:$0xff] }
 0x527   : > { %v4376_v47 = vsel %vm12529_vm1, %v4279_v57, 0.0  ;;  %8765 = vmatprep.subr.bf16.mxu0 %v14914_v22  ;;  %15051 = vst [vmem:[#allocation3_spill] sm:$0xff] %v12669_v50  ;;  %v9540_v35 = vpack.i.bf16 %v12669_v50, %v12676_v23  ;;  %v4548_v48 = vld [vmem:[#allocation2 + $0x92] sm:$0xff]  ;;  %v12687_v57 = vld [vmem:[#allocation2 + $0x9a] sm:$0xff]  ;;  %vm15070_vm1 = vmmov %vm15068_vm13 }
 0x528   : > { %4445 = vrot.lane.b32.xlu1 %v4376_v47, %s10085_s24  ;;  %8836 = vmatpush3.bf16.msra.mxu1 %v8833_v59  ;;  %vm15071_vm14 = vmmov %vm15070_vm1 }
 0x529   : > { %9491 = vrot.lane.b32.xlu0 %v12577_v25, %s10089_s30  ;;  %8613 = vmatprep.subr.msk.mxu1 %vm15048_vm0, %v5560_v12  ;;  %vm15072_vm0 = vmmov %vm15066_vm10 }
 0x52c   : > { %9451 = vrot.lane.b32.xlu1 %v9450_v52, %s10089_s30  ;;  %8614 = vmatpush3.msk.msra.mxu1 %vm15049_vm8, %v5560_v12  ;;  %vm15073_vm8 = vmmov %vm15070_vm1 }
 0x52d   : > { %5183 = vrot.lane.b32.xlu0 %v4525_v31, %s10092_s27 }
 0x530   : > { %v4424_v36 = vpop.permute.xlu0 %4423  ;;  %9461 = vrot.lane.b32.xlu1 %v9460_v28, %s10091_s23 }
 0x531   : > { %4486 = vst.msk [vmem:[#allocation2 + $0xa9] sm:$0xff] %vm4475_vm6, %v4424_v36  ;;  %v4426_v37 = vpop.permute.xlu1 %4425  ;;  %5263 = vrot.lane.b32.xlu0 %v4662_v32, %s14935_s18 }
 0x532   : > { %4487 = vst.msk [vmem:[#allocation2 + $0xb1] sm:$0xff] %vm4475_vm6, %v4426_v37 }
 0x534   : > { %9471 = vrot.lane.b32.xlu1 %v12518_v60, %s15045_s28  ;;  %v4546_v60 = vld [vmem:[#allocation2 + $0x7a] sm:$0xff] }
 0x535   : > { %5185 = vrot.lane.b32.xlu0 %v4643_v2, %s10092_s27  ;;  %v9525_v16 = vpack.i.bf16 %v4547_v30, %v4546_v60 }
 0x538   : > { %5181 = vrot.lane.b32.xlu1 %v4524_v3, %s10092_s27  ;;  %v4568_v42 = vld [vmem:[#allocation2 + $0xa8] sm:$0xff]  ;;  %v12693_v3 = vpack.i.bf16 %v12687_v57, %v4548_v48 }
 0x539   : > { %9516 = vrot.lane.b32.xlu0 %v9515_v20, %s10091_s23  ;;  %v4569_v41 = vld [vmem:[#allocation2 + $0xb0] sm:$0xff] }
 0x53a   : > { %v12653_v13 = vpack.i.bf16 %v4569_v41, %v4568_v42  ;;  %v12656_v27 = vld [vmem:[#allocation2 + $0xaa] sm:$0xff]  ;;  %v12658_v10 = vld [vmem:[#allocation2 + $0xb2] sm:$0xff] }
 0x53b   : > { %v12664_v19 = vpack.i.bf16 %v12658_v10, %v12656_v27  ;;  %v12699_v51 = vld [vmem:[#allocation2 + $0xb1] sm:$0xff]  ;;  %v12708_v45 = vld [vmem:[#allocation2 + $0xa9] sm:$0xff] }
 0x53c   : > { %9496 = vrot.lane.b32.xlu1 %v9495_v62, %s15045_s28  ;;  %v12712_v33 = vpack.i.bf16 %v12699_v51, %v12708_v45 }
 0x53d   : > { %9526 = vrot.lane.b32.xlu0 %v9525_v16, %s15045_s28 }
 0x540   : > { %9501 = vrot.lane.b32.xlu1 %v12558_v38, %s15050_s29 }
 0x541   : > { %9531 = vrot.lane.b32.xlu0 %v9515_v20, %s15050_s29 }
 0x544   : > { %v4428_v54 = vpop.permute.xlu0 %4427  ;;  %5261 = vrot.lane.b32.xlu1 %v4544_v39, %s14935_s18 }
 0x545   : > { %4488 = vst.msk [vmem:[#allocation2 + $0xc1] sm:$0xff] %vm4475_vm6, %v4428_v54  ;;  %5265 = vrot.lane.b32.xlu0 %v4546_v60, %s14935_s18  ;;  %v4430_v24 = vpop.permute.xlu1 %4429 }
 0x546   : > { %4489 = vst.msk [vmem:[#allocation2 + $0xc9] sm:$0xff] %vm4475_vm6, %v4430_v24 }
 0x548   : > { %9506 = vrot.lane.b32.xlu1 %v9495_v62, %s10090_s17 }
 0x549   : > { %9536 = vrot.lane.b32.xlu0 %v9525_v16, %s10090_s17 }
 0x54c   : > { %9511 = vrot.lane.b32.xlu1 %v12577_v25, %s10077_s25  ;;  %v12681_v31 = vld [vmem:[#allocation2 + $0xc1] sm:$0xff] }
 0x54d   : > { %9546 = vrot.lane.b32.xlu0 %v12647_v43, %s10089_s30  ;;  %v12673_v38 = vld [vmem:[#allocation2 + $0xc9] sm:$0xff]  ;;  %v12722_v44 = vld [vmem:[#allocation2 + $0xc0] sm:$0xff] }
 0x54e   : > { %v12685_v14 = vpack.i.bf16 %v12673_v38, %v12681_v31  ;;  %v4571_v52 = vld [vmem:[#allocation2 + $0xc8] sm:$0xff]  ;;  %15052 = vst [vmem:[#allocation4_spill] sm:$0xff] %v12722_v44 }
 0x54f   : > { %v12725_v11 = vpack.i.bf16 %v4571_v52, %v12722_v44  ;;  %v12732_v6 = vld [vmem:[#allocation2 + $0xc2] sm:$0xff]  ;;  %v12734_v1 = vld [vmem:[#allocation2 + $0xca] sm:$0xff] }
 0x550   : > { %9521 = vrot.lane.b32.xlu1 %v9520_v18, %s10089_s30  ;;  %v12739_v36 = vpack.i.bf16 %v12734_v1, %v12732_v6 }
 0x551   : > { %9561 = vrot.lane.b32.xlu0 %v12653_v13, %s10091_s23 }
 0x554   : > { %5187 = vrot.lane.b32.xlu1 %v4527_v21, %s10092_s27 }
 0x555   : > { %9571 = vrot.lane.b32.xlu0 %v12664_v19, %s15045_s28 }
 0x557   : > { %v4432_v46 = vpop.permute.xlu0 %4431 }
 0x558   : > { %4490 = vst.msk [vmem:[#allocation2 + $0xd9] sm:$0xff] %vm4475_vm6, %v4432_v46  ;;  %5267 = vrot.lane.b32.xlu1 %v4547_v30, %s14935_s18 }
 0x559   : > { %v4434_v29 = vpop.permute.xlu1 %4433  ;;  %9576 = vrot.lane.b32.xlu0 %v9520_v18, %s10077_s25 }
 0x55a   : > { %4491 = vst.msk [vmem:[#allocation2 + $0xe1] sm:$0xff] %vm4475_vm6, %v4434_v29 }
 0x55c   : > { %9541 = vrot.lane.b32.xlu1 %v9540_v35, %s10091_s23 }
 0x55d   : > { %9586 = vrot.lane.b32.xlu0 %v12685_v14, %s10089_s30 }
 0x55f   : > { %v4572_v56 = vld [vmem:[#allocation2 + $0xd8] sm:$0xff] }
 0x560   : > { %9551 = vrot.lane.b32.xlu1 %v12693_v3, %s15045_s28  ;;  %v12745_v40 = vld [vmem:[#allocation2 + $0xd9] sm:$0xff] }
 0x561   : > { %v4573_v47 = vld [vmem:[#allocation2 + $0xe0] sm:$0xff] }
 0x562   : > { %v12697_v25 = vpack.i.bf16 %v4573_v47, %v4572_v56  ;;  %v12701_v9 = vld [vmem:[#allocation2 + $0xda] sm:$0xff]  ;;  %v12703_v53 = vld [vmem:[#allocation2 + $0xe2] sm:$0xff] }
 0x563   : > { %v12716_v34 = vpack.i.bf16 %v12703_v53, %v12701_v9  ;;  %v12741_v32 = vld [vmem:[#allocation2 + $0xe1] sm:$0xff] }
 0x564   : > { %9556 = vrot.lane.b32.xlu1 %v9540_v35, %s15050_s29  ;;  %9596 = vrot.lane.b32.xlu0 %v12697_v25, %s10091_s23  ;;  %v12753_v63 = vpack.i.bf16 %v12741_v32, %v12745_v40 }
 0x568   : > { %9566 = vrot.lane.b32.xlu1 %v12712_v33, %s10089_s30  ;;  %9606 = vrot.lane.b32.xlu0 %v12716_v34, %s15045_s28 }
 0x56b   : > { %v4436_v61 = vpop.permute.xlu0 %4435 }
 0x56c   : > { %4492 = vst.msk [vmem:[#allocation2 + $0xf1] sm:$0xff] %vm4475_vm6, %v4436_v61  ;;  %9581 = vrot.lane.b32.xlu1 %v12725_v11, %s10091_s23  ;;  %5191 = vrot.lane.b32.xlu0 %v4529_v5, %s10092_s27 }
 0x56d   : > { %v4438_v28 = vpop.permute.xlu1 %4437 }
 0x56e   : > { %4493 = vst.msk [vmem:[#allocation2 + $0xf9] sm:$0xff] %vm4475_vm6, %v4438_v28 }
 0x570   : > { %5189 = vrot.lane.b32.xlu1 %v4528_v4, %s10092_s27 }
 0x573   : > { %v12747_v37 = vld [vmem:[#allocation2 + $0xf1] sm:$0xff] }
 0x574   : > { %9591 = vrot.lane.b32.xlu1 %v12739_v36, %s15045_s28  ;;  %v4574_v20 = vld [vmem:[#allocation2 + $0xf0] sm:$0xff] }
 0x575   : > { %v12749_v17 = vld [vmem:[#allocation2 + $0xf9] sm:$0xff] }
 0x576   : > { %v12757_v2 = vpack.i.bf16 %v12749_v17, %v12747_v37  ;;  %v4575_v59 = vld [vmem:[#allocation2 + $0xf8] sm:$0xff] }
 0x577   : > { %v12763_v39 = vpack.i.bf16 %v4575_v59, %v4574_v20  ;;  %v12767_v60 = vld [vmem:[#allocation2 + $0xf2] sm:$0xff]  ;;  %v12769_v30 = vld [vmem:[#allocation2 + $0xfa] sm:$0xff] }
 0x578   : > { %15053 = vst [vmem:[#allocation5_spill] sm:$0xff] %v12757_v2  ;;  %9601 = vrot.lane.b32.xlu1 %v12753_v63, %s10089_s30  ;;  %9616 = vrot.lane.b32.xlu0 %v12757_v2, %s10089_s30  ;;  %15054 = vst [vmem:[#allocation6_spill] sm:$0xff] %v12767_v60  ;;  %v12775_v62 = vpack.i.bf16 %v12769_v30, %v12767_v60 }
 0x57a   : > { %15055 = vst [vmem:[#allocation7_spill] sm:$0xff] %v12775_v62 }
 0x57c   : > { %9611 = vrot.lane.b32.xlu1 %v12763_v39, %s10091_s23 }
 0x57f   : > { %v4440_v12 = vpop.permute.xlu0 %4439 }
 0x580   : > { %4494 = vst.msk [vmem:[#allocation2 + $0x109] sm:$0xff] %vm4475_vm6, %v4440_v12  ;;  %5269 = vrot.lane.b32.xlu1 %v4548_v48, %s14935_s18 }
 0x583   : > { %v4442_v16 = vpop.permute.xlu0 %4441 }
 0x584   : > { %4495 = vst.msk [vmem:[#allocation2 + $0x111] sm:$0xff] %vm4475_vm6, %v4442_v16  ;;  %9621 = vrot.lane.b32.xlu1 %v12775_v62, %s15045_s28  ;;  %v5517_v16 = vld [vmem:[%s14888_s5 + $0x108] sm:$0xff] }
 0x587   : > { %v9457_v54 = vpop.permute.xlu0 %9456  ;;  %v4576_v24 = vld [vmem:[#allocation2 + $0x108] sm:$0xff] }
 0x588   : > { %v12782_v21 = vld [vmem:[#allocation2 + $0x109] sm:$0xff] }
 0x58b   : > { %v12780_v5 = vpop.permute.xlu0 %9466  ;;  %v4577_v4 = vld [vmem:[#allocation2 + $0x110] sm:$0xff] }
 0x58c   : > { %v12784_v41 = vld [vmem:[#allocation2 + $0x111] sm:$0xff]  ;;  %v12786_v18 = vpack.i.bf16 %v4577_v4, %v4576_v24 }
 0x58d   : > { %15056 = vst [vmem:[#allocation8_spill] sm:$0xff] %v12784_v41  ;;  %v12790_v42 = vpack.i.bf16 %v12784_v41, %v12782_v21  ;;  %v12792_v46 = vld [vmem:[#allocation2 + $0x10a] sm:$0xff]  ;;  %v12794_v29 = vld [vmem:[#allocation2 + $0x112] sm:$0xff] }
 0x58e   : > { %15058 = vst [vmem:[#allocation10_spill] sm:$0xff] %v12794_v29  ;;  %9626 = vrot.lane.b32.xlu0 %v12786_v18, %s10091_s23  ;;  %v12804_v48 = vpack.i.bf16 %v12794_v29, %v12792_v46  ;;  %v9459_v29 = vunpack.i.h.bf16 %v9457_v54 }
 0x58f   : > { %15057 = vst [vmem:[#allocation9_spill] sm:$0xff] %v12790_v42  ;;  %9631 = vrot.lane.b32.xlu1 %v12790_v42, %s10089_s30  ;;  %v12800_v35 = vpop.permute.xlu0 %9476  ;;  %v9468_v42 = vunpack.i.l.bf16 %v12780_v5 }
 0x590   : > { %15059 = vst [vmem:[#allocation11_spill] sm:$0xff] %v12800_v35  ;;  %15060 = vst [vmem:[#allocation12_spill] sm:$0xff] %v12804_v48 }
 0x592   : > { %9636 = vrot.lane.b32.xlu0 %v12804_v48, %s15045_s28 }
 0x593   : > { %v4444_v56 = vpop.permute.xlu1 %4443  ;;  %v12808_v47 = vpop.permute.xlu0 %9481 }
 0x594   : > { %15061 = vst [vmem:[#allocation13_spill] sm:$0xff] %v12808_v47  ;;  %4496 = vst.msk [vmem:[#allocation2 + $0x121] sm:$0xff] %vm4475_vm6, %v4444_v56 }
 0x596   : > { %5271 = vrot.lane.b32.xlu0 %v12687_v57, %s14935_s18  ;;  %v5516_v57 = vld [vmem:[%s14888_s5 + $0x100] sm:$0xff] }
 0x597   : > { %v12813_v52 = vpop.permute.xlu0 %9486  ;;  %v8766_v41 = vpack.c.bf16 %v5517_v16, %v5516_v57 }
 0x598   : > { %v9488_v50 = vunpack.i.l.bf16 %v12813_v52 }
 0x59a   : > { %v4446_v61 = vpop.permute.xlu1 %4445  ;;  %9651 = vrot.lane.b32.xlu0 %v12653_v13, %s15050_s29  ;;  %v9458_v13 = vunpack.i.l.bf16 %v9457_v54  ;;  %v4500_v54 = vld [vmem:[#allocation2 + $0x30] sm:$0xff] }
 0x59b   : > { %4497 = vst.msk [vmem:[#allocation2 + $0x129] sm:$0xff] %vm4475_vm6, %v4446_v61  ;;  %v12818_v28 = vpop.permute.xlu0 %9491  ;;  %v4578_v56 = vld [vmem:[#allocation2 + $0x120] sm:$0xff]  ;;  %v5519_v61 = vld [vmem:[%s14888_s5 + $0x118] sm:$0xff] }
 0x59e   : > { %v9452_v59 = vpop.permute.xlu1 %9451  ;;  %5193 = vrot.lane.b32.xlu0 %v12708_v45, %s10092_s27 }
 0x59f   : > { %v12822_v20 = vpop.permute.xlu0 %5183  ;;  %v9453_v12 = vunpack.i.l.bf16 %v9452_v59  ;;  %v9454_v24 = vunpack.i.h.bf16 %v9452_v59 }
 0x5a1   : > { %v5341_v59 = vsel %vm1687_vm5, %v9453_v12, %v9458_v13 }
 0x5a2   : > { %v12830_v4 = vpop.permute.xlu1 %9461  ;;  %5273 = vrot.lane.b32.xlu0 %v12656_v27, %s14935_s18  ;;  %v4579_v45 = vld [vmem:[#allocation2 + $0x128] sm:$0xff]  ;;  %v5518_v27 = vld [vmem:[%s14888_s5 + $0x110] sm:$0xff] }
 0x5a3   : > { %15062 = vst [vmem:[#allocation14_spill] sm:$0xff] %v12830_v4  ;;  %v14926_v0 = vunpack.i.l.bf16 %v12830_v4  ;;  %v12836_v47 = vpop.permute.xlu0 %5263  ;;  %v12838_v35 = vpack.i.bf16 %v4579_v45, %v4578_v56  ;;  %v5321_v45 = vsel %vm3764_vm9, %v4500_v54, %v9453_v12  ;;  %v15064_v48 = vunpack.i.h.bf16 %v12830_v4  ;;  %v4501_v54 = vld [vmem:[#allocation2 + $0x38] sm:$0xff] }
 0x5a4   : > { %v4016_v22 = vpop.f32.mrb[44].mxu1  ;;  %v8769_v62 = vpack.c.bf16 %v5519_v61, %v5518_v27  ;;  %v15065_v4 = vmov 0.0|0.0  }
 0x5a5   : > { %15063 = vst [vmem:[#allocation15_spill] sm:$0xff] %v12838_v35  ;;  %v4018_v44 = vpop.f32.mrb[45].mxu1  ;;  %9641 = vrot.lane.b32.xlu1 %v12838_v35, %s10091_s23  ;;  %v5362_v56 = vsel %vm5361_vm11, %v5341_v59, %v14926_v0  ;;  %v5342_v35 = vsel %vm1687_vm5, %v9454_v24, %v9459_v29 }
 0x5a6   : > { %v10016_v44 = vld [vmem:[%s14887_s4] ss:$0 sm:$0xff]  ;;  %v9472_v13 = vpop.permute.xlu1 %9471  ;;  %9661 = vrot.lane.b32.xlu0 %v12664_v19, %s10090_s17  ;;  %5695 = vmatprep.mubr.f32.mxu0 %v5362_v56 }
 0x5a7   : > { %v4017_v57 = vadd.f32 %v10016_v44, %v4016_v22  ;;  %v8588_v16 = vpop.f32.mrb[50].mxu0  ;;  %v9473_v2 = vunpack.i.l.bf16 %v9472_v13  ;;  %5696 = vmatmul.mubr.f32.vlgmr.msra.gmra.mrb[52].mxu0 %v5321_v45  ;;  %v5363_v22 = vsel %vm5361_vm11, %v5342_v35, %v15064_v48  ;;  %v9474_v60 = vunpack.i.h.bf16 %v9472_v13  ;;  %v12866_v12 = vpop.permute.xlu0 %5185  ;;  %v5520_v35 = vld [vmem:[%s14888_s5 + $0x120] sm:$0xff] }
 0x5a8   : > { %v4021_v59 = vpop.f32.mrb[46].mxu1  ;;  %v4201_v0 = vpop.f32.mrb[51].mxu0  ;;  %5700 = vmatprep.mubr.f32.mxu0 %v5363_v22  ;;  %8767 = vmatpush1.bf16.msra.mxu0 %v8766_v41  ;;  %v9469_v48 = vunpack.i.h.bf16 %v12780_v5 }
 0x5a9   : > { %v4022_v19 = vadd.f32 %v10016_v44, %v4021_v59  ;;  %v12864_v56 = vadd.f32 %v4201_v0, %v4017_v57  ;;  %v4023_v29 = vpop.f32.mrb[47].mxu1  ;;  %9646 = vrot.lane.b32.xlu1 %v12693_v3, %s10090_s17  ;;  %v5343_v45 = vsel %vm1687_vm5, %v9468_v42, %v9473_v2  ;;  %8768 = vmatprep.subr.bf16.mxu0 %v15065_v4  ;;  %v5521_v0 = vld [vmem:[%s14888_s5 + $0x128] sm:$0xff]  ;;  %v9489_v57 = vunpack.i.h.bf16 %v12813_v52 }
 0x5aa   : > { %v12881_v41 = vpop.permute.xlu1 %5181  ;;  %9671 = vrot.lane.b32.xlu0 %v12712_v33, %s10077_s25  ;;  %v5322_v3 = vsel %vm3764_vm9, %v4501_v54, %v9454_v24  ;;  %v5364_v2 = vsel %vm5361_vm11, %v5343_v45, %v9488_v50  ;;  %v5344_v44 = vsel %vm1687_vm5, %v9469_v48, %v9474_v60  ;;  %v8772_v5 = vpack.c.bf16 %v5521_v0, %v5520_v35  ;;  %v5522_v33 = vld [vmem:[%s14888_s5 + $0x130] sm:$0xff]  ;;  %v5523_v24 = vld [vmem:[%s14888_s5 + $0x138] sm:$0xff] }
 0x5ab   : > { %v12879_v61 = vadd.f32 %v8588_v16, %v4022_v19  ;;  %5701 = vmatmul.mubr.f32.gmra.mrb[54].mxu0 %v5322_v3  ;;  %v12889_v27 = vpop.permute.xlu0 %9516  ;;  %v5323_v60 = vsel %vm3764_vm9, %v12600_v55, %v9468_v42  ;;  %v5365_v13 = vsel %vm5361_vm11, %v5344_v44, %v9489_v57  ;;  %v8775_v29 = vpack.c.bf16 %v5523_v24, %v5522_v33 }
 0x5ac   : > { %5705 = vmatprep.mubr.f32.mxu0 %v5364_v2  ;;  %8770 = vmatpush1.bf16.msra.mxu0 %v8769_v62  ;;  %v9493_v62 = vunpack.i.l.bf16 %v12818_v28  ;;  %v9518_v59 = vunpack.i.l.bf16 %v12889_v27  ;;  %v5324_v54 = vsel %vm3764_vm9, %v12589_v15, %v9469_v48  ;;  %v5524_v15 = vld [vmem:[%s14888_s5 + $0x140] sm:$0xff]  ;;  %v5465_v2 = vsel %vm15067_vm12, %v12822_v20, %v12836_v47  ;;  %v5527_v47 = vld [vmem:[%s14888_s5 + $0x158] sm:$0xff] }
 0x5ad   : > { %9656 = vrot.lane.b32.xlu1 %v12647_v43, %s10077_s25  ;;  %8771 = vmatprep.subr.bf16.mxu0 %v15065_v4 }
 0x5ae   : > { %v9497_v16 = vpop.permute.xlu1 %9496  ;;  %5199 = vrot.lane.b32.xlu0 %v12673_v38, %s10092_s27  ;;  %v9494_v38 = vunpack.i.h.bf16 %v12818_v28  ;;  %v9519_v28 = vunpack.i.h.bf16 %v12889_v27  ;;  %v5325_v48 = vsel %vm3764_vm9, %v12554_v58, %v9493_v62 }
 0x5af   : > { %v9498_v43 = vunpack.i.l.bf16 %v9497_v16  ;;  %5706 = vmatmul.mubr.f32.gmra.mrb[56].mxu0 %v5323_v60  ;;  %v9499_v22 = vunpack.i.h.bf16 %v9497_v16  ;;  %v12911_v19 = vpop.permute.xlu0 %9526  ;;  %v5528_v16 = vld [vmem:[%s14888_s5 + $0x160] sm:$0xff] }
 0x5b0   : > { %5710 = vmatprep.mubr.f32.mxu0 %v5365_v13  ;;  %8773 = vmatpush1.bf16.msra.mxu0 %v8772_v5  ;;  %v5526_v5 = vld [vmem:[%s14888_s5 + $0x150] sm:$0xff] }
 0x5b1   : > { %5195 = vrot.lane.b32.xlu1 %v12699_v51, %s10092_s27  ;;  %v5345_v55 = vsel %vm1687_vm5, %v9493_v62, %v9498_v43  ;;  %8774 = vmatprep.subr.bf16.mxu0 %v15065_v4  ;;  %v5346_v35 = vsel %vm1687_vm5, %v9494_v38, %v9499_v22  ;;  %v8781_v24 = vpack.c.bf16 %v5527_v47, %v5526_v5  ;;  %v5531_v62 = vld [vmem:[%s14888_s5 + $0x178] sm:$0xff]  ;;  %v5533_v22 = vld [vmem:[%s14888_s5 + $0x188] sm:$0xff] }
 0x5b2   : > { %v12918_v42 = vpop.permute.xlu1 %9501  ;;  %5279 = vrot.lane.b32.xlu0 %v12734_v1, %s14935_s18  ;;  %v5366_v45 = vsel %vm5361_vm11, %v5345_v55, %v9518_v59  ;;  %v5525_v1 = vld [vmem:[%s14888_s5 + $0x148] sm:$0xff]  ;;  %v5367_v3 = vsel %vm5361_vm11, %v5346_v35, %v9519_v28  ;;  %v5536_v35 = vld [vmem:[%s14888_s5 + $0x1a0] sm:$0xff] }
 0x5b3   : > { %5711 = vmatmul.mubr.f32.gmra.mrb[58].mxu0 %v5324_v54  ;;  %v12927_v51 = vpop.permute.xlu0 %9531 }
 0x5b4   : > { %5715 = vmatprep.mubr.f32.mxu0 %v5366_v45  ;;  %8776 = vmatpush1.bf16.msra.mxu0 %v8775_v29 }
 0x5b5   : > { %5275 = vrot.lane.b32.xlu1 %v12658_v10, %s14935_s18  ;;  %8777 = vmatprep.subr.bf16.mxu0 %v15065_v4 }
 0x5b6   : > { %v5262_v0 = vpop.permute.xlu1 %5261  ;;  %9681 = vrot.lane.b32.xlu0 %v12697_v25, %s15050_s29  ;;  %v8778_v25 = vpack.c.bf16 %v5525_v1, %v5524_v15  ;;  %v9528_v15 = vunpack.i.l.bf16 %v12911_v19 }
 0x5b7   : > { %v5464_v10 = vsel %vm15066_vm10, %v12881_v41, %v5262_v0  ;;  %5716 = vmatmul.mubr.f32.gmra.mrb[60].mxu0 %v5325_v48  ;;  %v5266_v44 = vpop.permute.xlu0 %5265  ;;  %vm4232_vm10 = vcmp.ge.f32.partialorder %v12864_v56, 0.0 }
 0x5b8   : > { %5720 = vmatprep.mubr.f32.mxu0 %v5367_v3  ;;  %8615 = vmatprep.mubr.msk.f32.mxu1 %vm15068_vm13, %v5464_v10  ;;  %v5466_v58 = vsel %vm15069_vm15, %v12866_v12, %v5266_v44  ;;  %v9529_v3 = vunpack.i.h.bf16 %v12911_v19  ;;  %v5539_v19 = vld [vmem:[%s14888_s5 + $0x1b8] sm:$0xff] }
 0x5b9   : > { %9666 = vrot.lane.b32.xlu1 %v12725_v11, %s15050_s29  ;;  %8616 = vmatmul.mubr.msk.f32.vlgmr.msra.gmra.mrb[48].mxu1 %vm15070_vm1, %v5465_v2  ;;  %v5326_v11 = vsel %vm3764_vm9, %v12547_v7, %v9494_v38  ;;  %v5535_v38 = vld [vmem:[%s14888_s5 + $0x198] sm:$0xff]  ;;  %vm4233_vm1 = vcmp.ge.f32.partialorder %v12879_v61, 0.0 }
 0x5ba   : > { %v12964_v33 = vpop.permute.xlu1 %9506  ;;  %5201 = vrot.lane.b32.xlu0 %v12745_v40, %s10092_s27  ;;  %8618 = vmatprep.mubr.msk.f32.mxu1 %vm15071_vm14, %v5466_v58  ;;  %v5529_v40 = vld [vmem:[%s14888_s5 + $0x168] sm:$0xff]  ;;  %vm15085_vm14 = vmmov %vm15072_vm0 }
 0x5bb   : > { %5721 = vmatmul.mubr.f32.gmra.mrb[62].mxu0 %v5326_v11  ;;  %v8784_v7 = vpack.c.bf16 %v5529_v40, %v5528_v16  ;;  %v4294_v16 = vadd.s32 11, %v12297_v26  ;;  %v5541_v26 = vld [vmem:[%s14888_s5 + $0x1c8] sm:$0xff] }
 0x5bc   : > { %8779 = vmatpush1.bf16.msra.mxu0 %v8778_v25 }
 0x5bd   : > { %5197 = vrot.lane.b32.xlu1 %v12681_v31, %s10092_s27  ;;  %8780 = vmatprep.subr.bf16.mxu0 %v15065_v4  ;;  %v5530_v31 = vld [vmem:[%s14888_s5 + $0x170] sm:$0xff]  ;;  %vm4306_vm12 = vcmp.ge.s32.totalorder %v4294_v16, 0  ;;  %vm4318_vm13 = vcmp.lt.s32.totalorder %v4294_v16, 16  ;;  %v4510_v16 = vld [vmem:[#allocation2 + $0xa8] sm:$0xff] }
 0x5be   : > { %v12980_v60 = vpop.permute.xlu1 %9511  ;;  %5281 = vrot.lane.b32.xlu0 %v12701_v9, %s14935_s18  ;;  %v12997_v9 = vpop.permute.xlu0 %9536  ;;  %v8787_v13 = vpack.c.bf16 %v5531_v62, %v5530_v31  ;;  %v5540_v62 = vld [vmem:[%s14888_s5 + $0x1c0] sm:$0xff]  ;;  %vm13116_vm15 = vmand %vm4306_vm12, %vm4318_vm13 }
 0x5c0   : > { %8782 = vmatpush1.bf16.msra.mxu0 %v8781_v24 }
 0x5c1   : > { %5277 = vrot.lane.b32.xlu1 %v12732_v6, %s14935_s18  ;;  %8783 = vmatprep.subr.bf16.mxu0 %v15065_v4  ;;  %v5532_v6 = vld [vmem:[%s14888_s5 + $0x180] sm:$0xff] }
 0x5c2   : > { %v12993_v43 = vpop.permute.xlu1 %9521  ;;  %9691 = vrot.lane.b32.xlu0 %v12716_v34, %s10090_s17  ;;  %v8790_v34 = vpack.c.bf16 %v5533_v22, %v5532_v6  ;;  %v13012_v55 = vpop.permute.xlu0 %9546 }
 0x5c3   : > { %v9523_v45 = vunpack.i.l.bf16 %v12993_v43  ;;  %v9524_v1 = vunpack.i.h.bf16 %v12993_v43  ;;  %v9548_v47 = vunpack.i.l.bf16 %v13012_v55  ;;  %v4256_v43 = vmul.f32 0.2, %v12864_v56 }
 0x5c4   : > { %8785 = vmatpush1.bf16.msra.mxu0 %v8784_v7 }
 0x5c5   : > { %9676 = vrot.lane.b32.xlu1 %v12739_v36, %s10090_s17  ;;  %8786 = vmatprep.subr.bf16.mxu0 %v15065_v4  ;;  %v5534_v36 = vld [vmem:[%s14888_s5 + $0x190] sm:$0xff]  ;;  %v5347_v2 = vsel %vm1687_vm5, %v9523_v45, %v9528_v15  ;;  %v5348_v5 = vsel %vm1687_vm5, %v9524_v1, %v9529_v3  ;;  %v5545_v15 = vld [vmem:[%s14888_s5 + $0x1e8] sm:$0xff] }
 0x5c6   : > { %v13008_v29 = vpop.permute.xlu1 %5187  ;;  %9701 = vrot.lane.b32.xlu0 %v12753_v63, %s10077_s25 }
 0x5c8   : > { %8788 = vmatpush1.bf16.msra.mxu0 %v8787_v13  ;;  %v9549_v13 = vunpack.i.h.bf16 %v13012_v55  ;;  %v8802_v55 = vpack.c.bf16 %v5541_v26, %v5540_v62 }
 0x5c9   : > { %9686 = vrot.lane.b32.xlu1 %v12685_v14, %s10077_s25  ;;  %8789 = vmatprep.subr.bf16.mxu0 %v15065_v4  ;;  %v8793_v14 = vpack.c.bf16 %v5535_v38, %v5534_v36 }
 0x5ca   : > { %v5268_v54 = vpop.permute.xlu1 %5267  ;;  %5207 = vrot.lane.b32.xlu0 %v12749_v17, %s10092_s27  ;;  %v5537_v17 = vld [vmem:[%s14888_s5 + $0x1a8] sm:$0xff] }
 0x5cb   : > { %v5467_v63 = vsel %vm15072_vm0, %v13008_v29, %v5268_v54  ;;  %v8796_v44 = vpack.c.bf16 %v5537_v17, %v5536_v35  ;;  %v5329_v54 = vsel %vm3764_vm9, %v12676_v23, %v9548_v47  ;;  %v15076_v35 = vld [vmem:[#allocation6_spill] sm:$0xff]  ;;  %v5544_v17 = vld [vmem:[%s14888_s5 + $0x1e0] sm:$0xff]  ;;  %vm15086_vm0 = vmmov %vm15073_vm8 }
 0x5cc   : > { %8619 = vmatmul.mubr.msk.f32.gmra.mrb[50].mxu1 %vm15073_vm8, %v5467_v63  ;;  %8791 = vmatpush1.bf16.msra.mxu0 %v8790_v34  ;;  %vm15088_vm8 = vmmov %vm15085_vm14 }
 0x5cd   : > { %5203 = vrot.lane.b32.xlu1 %v12741_v32, %s10092_s27  ;;  %8792 = vmatprep.subr.bf16.mxu0 %v15065_v4  ;;  %v13044_v32 = vpop.permute.xlu0 %9561  ;;  %vm15090_vm12 = vmmov %vm15088_vm8 }
 0x5ce   : > { %v13040_v0 = vpop.permute.xlu1 %9541  ;;  %5287 = vrot.lane.b32.xlu0 %v12769_v30, %s14935_s18  ;;  %v5538_v30 = vld [vmem:[%s14888_s5 + $0x1b0] sm:$0xff]  ;;  %v9563_v40 = vunpack.i.l.bf16 %v13044_v32  ;;  %v9564_v36 = vunpack.i.h.bf16 %v13044_v32  ;;  %vm15091_vm13 = vmmov %vm15086_vm0 }
 0x5cf   : > { %v9544_v48 = vunpack.i.h.bf16 %v13040_v0  ;;  %v9543_v10 = vunpack.i.l.bf16 %v13040_v0 }
 0x5d0   : > { %8794 = vmatpush1.bf16.msra.mxu0 %v8793_v14 }
 0x5d1   : > { %5283 = vrot.lane.b32.xlu1 %v12703_v53, %s14935_s18  ;;  %v5368_v25 = vsel %vm5361_vm11, %v5347_v2, %v9543_v10  ;;  %8795 = vmatprep.subr.bf16.mxu0 %v15065_v4  ;;  %v5327_v53 = vsel %vm3764_vm9, %v12625_v8, %v9523_v45  ;;  %v5369_v24 = vsel %vm5361_vm11, %v5348_v5, %v9544_v48  ;;  %v13073_v31 = vpop.permute.xlu0 %9571 }
 0x5d2   : > { %v9552_v58 = vpop.permute.xlu1 %9551  ;;  %9711 = vrot.lane.b32.xlu0 %v12786_v18, %s15050_s29  ;;  %5725 = vmatprep.mubr.f32.mxu0 %v5368_v25  ;;  %v8799_v18 = vpack.c.bf16 %v5539_v19, %v5538_v30  ;;  %v8808_v5 = vpack.c.bf16 %v5545_v15, %v5544_v17 }
 0x5d3   : > { %v9553_v11 = vunpack.i.l.bf16 %v9552_v58  ;;  %5726 = vmatmul.mubr.f32.gmra.mrb[64].mxu0 %v5327_v53  ;;  %v9554_v7 = vunpack.i.h.bf16 %v9552_v58  ;;  %v9574_v58 = vunpack.i.h.bf16 %v13073_v31 }
 0x5d4   : > { %5730 = vmatprep.mubr.f32.mxu0 %v5369_v24  ;;  %8797 = vmatpush1.bf16.msra.mxu0 %v8796_v44  ;;  %v15077_v44 = vld [vmem:[#allocation3_spill] sm:$0xff] }
 0x5d5   : > { %9696 = vrot.lane.b32.xlu1 %v12763_v39, %s15050_s29  ;;  %v5349_v8 = vsel %vm1687_vm5, %v9548_v47, %v9553_v11  ;;  %8798 = vmatprep.subr.bf16.mxu0 %v15065_v4  ;;  %v5328_v39 = vsel %vm3764_vm9, %v12622_v49, %v9524_v1  ;;  %v5350_v34 = vsel %vm1687_vm5, %v9549_v13, %v9554_v7  ;;  %v5542_v49 = vld [vmem:[%s14888_s5 + $0x1d0] sm:$0xff]  ;;  %v13120_v45 = vpop.permute.xlu0 %9576  ;;  %v9573_v1 = vunpack.i.l.bf16 %v13073_v31  ;;  %v15078_v11 = vld [vmem:[#allocation7_spill] sm:$0xff] }
 0x5d6   : > { %v13087_v6 = vpop.permute.xlu1 %9556  ;;  %5209 = vrot.lane.b32.xlu0 %v12782_v21, %s10092_s27  ;;  %v5370_v22 = vsel %vm5361_vm11, %v5349_v8, %v9563_v40  ;;  %v5543_v21 = vld [vmem:[%s14888_s5 + $0x1d8] sm:$0xff]  ;;  %v5371_v14 = vsel %vm5361_vm11, %v5350_v34, %v9564_v36  ;;  %v5330_v25 = vsel %vm3764_vm9, %v15077_v44, %v9549_v13  ;;  %v5546_v7 = vld [vmem:[%s14888_s5 + $0x1f0] sm:$0xff]  ;;  %v15079_v8 = vld [vmem:[#allocation12_spill] sm:$0xff] }
 0x5d7   : > { %5731 = vmatmul.mubr.f32.gmra.mrb[66].mxu0 %v5328_v39  ;;  %v8805_v23 = vpack.c.bf16 %v5543_v21, %v5542_v49  ;;  %v4511_v34 = vld [vmem:[#allocation2 + $0xb0] sm:$0xff] }
 0x5d8   : > { %5735 = vmatprep.mubr.f32.mxu0 %v5370_v22  ;;  %8800 = vmatpush1.bf16.msra.mxu0 %v8799_v18  ;;  %v5547_v18 = vld [vmem:[%s14888_s5 + $0x1f8] sm:$0xff]  ;;  %v15080_v22 = vld [vmem:[#allocation5_spill] sm:$0xff] }
 0x5d9   : > { %5205 = vrot.lane.b32.xlu1 %v12747_v37, %s10092_s27  ;;  %8801 = vmatprep.subr.bf16.mxu0 %v15065_v4  ;;  %v4280_v37 = vsel %vm4232_vm10, %v12864_v56, %v4256_v43  ;;  %v9587_v47 = vpop.permute.xlu0 %9586  ;;  %v8811_v13 = vpack.c.bf16 %v5547_v18, %v5546_v7  ;;  %v15081_v49 = vld [vmem:[#allocation9_spill] sm:$0xff]  ;;  %vm15089_vm10 = vmmov %vm15086_vm0 }
 0x5da   : > { %v9567_v38 = vpop.permute.xlu1 %9566  ;;  %5289 = vrot.lane.b32.xlu0 %v12792_v46, %s14935_s18  ;;  %v4377_v56 = vsel %vm13116_vm15, %v4280_v37, 0.0 }
 0x5db   : > { %5736 = vmatmul.mubr.f32.gmra.mrb[68].mxu0 %v5329_v54  ;;  %v9568_v46 = vunpack.i.l.bf16 %v9567_v38  ;;  %v9569_v3 = vunpack.i.h.bf16 %v9567_v38  ;;  %v9589_v38 = vunpack.i.h.bf16 %v9587_v47  ;;  %v9588_v54 = vunpack.i.l.bf16 %v9587_v47 }
 0x5dc   : > { %5740 = vmatprep.mubr.f32.mxu0 %v5371_v14  ;;  %8803 = vmatpush1.bf16.msra.mxu0 %v8802_v55 }
 0x5dd   : > { %5285 = vrot.lane.b32.xlu1 %v15076_v35, %s14935_s18  ;;  %8804 = vmatprep.subr.bf16.mxu0 %v15065_v4  ;;  %v5351_v53 = vsel %vm1687_vm5, %v9568_v46, %v9573_v1  ;;  %v5331_v62 = vsel %vm3764_vm9, %v4510_v16, %v9568_v46  ;;  %v5352_v26 = vsel %vm1687_vm5, %v9569_v3, %v9574_v58  ;;  %v13167_v39 = vpop.permute.xlu0 %9596  ;;  %v15082_v35 = vld [vmem:[#allocation8_spill] sm:$0xff] }
 0x5de   : > { %v13136_v2 = vpop.permute.xlu1 %9581  ;;  %4447 = vrot.lane.b32.xlu0 %v4377_v56, %s10085_s24  ;;  %v5332_v21 = vsel %vm3764_vm9, %v4511_v34, %v9569_v3  ;;  %v9598_v46 = vunpack.i.l.bf16 %v13167_v39  ;;  %v13179_v56 = vld [vmem:[#allocation2 + $0x129] sm:$0xff]  ;;  %v9599_v1 = vunpack.i.h.bf16 %v13167_v39 }
 0x5df   : > { %v9584_v30 = vunpack.i.h.bf16 %v13136_v2  ;;  %v9583_v19 = vunpack.i.l.bf16 %v13136_v2  ;;  %5741 = vmatmul.mubr.f32.gmra.mrb[70].mxu0 %v5330_v25  ;;  %v15083_v58 = vld [vmem:[#allocation4_spill] sm:$0xff] }
 0x5e0   : > { %8806 = vmatpush1.bf16.msra.mxu0 %v8805_v23  ;;  %v4257_v23 = vmul.f32 0.2, %v12879_v61 }
 0x5e1   : > { %9706 = vrot.lane.b32.xlu1 %v15078_v11, %s10090_s17  ;;  %v5372_v24 = vsel %vm5361_vm11, %v5351_v53, %v9583_v19  ;;  %8807 = vmatprep.subr.bf16.mxu0 %v15065_v4  ;;  %v5373_v43 = vsel %vm5361_vm11, %v5352_v26, %v9584_v30  ;;  %v9607_v25 = vpop.permute.xlu0 %9606  ;;  %v5333_v53 = vsel %vm3764_vm9, %v15083_v58, %v9588_v54  ;;  %v15084_v11 = vld [vmem:[#allocation10_spill] sm:$0xff] }
 0x5e2   : > { %v13158_v31 = vpop.permute.xlu1 %5189  ;;  %9721 = vrot.lane.b32.xlu0 %v15079_v8, %s10090_s17  ;;  %5745 = vmatprep.mubr.f32.mxu0 %v5372_v24  ;;  %v4678_v24 = vld [vmem:[#allocation2 + $0x12a] sm:$0xff]  ;;  %v4281_v16 = vsel %vm4233_vm1, %v12879_v61, %v4257_v23  ;;  %v9608_v7 = vunpack.i.l.bf16 %v9607_v25  ;;  %v9609_v61 = vunpack.i.h.bf16 %v9607_v25  ;;  %v4515_v23 = vld [vmem:[#allocation2 + $0xe0] sm:$0xff]  ;;  %vm5443_vm1 = vcmask 752640  }
 0x5e3   : > { %5746 = vmatmul.mubr.f32.gmra.mrb[72].mxu0 %v5331_v62  ;;  %v4513_v8 = vld [vmem:[#allocation2 + $0xc8] sm:$0xff] }
 0x5e4   : > { %5750 = vmatprep.mubr.f32.mxu0 %v5373_v43  ;;  %8809 = vmatpush1.bf16.msra.mxu0 %v8808_v5  ;;  %v5334_v43 = vsel %vm3764_vm9, %v4513_v8, %v9589_v38  ;;  %v4677_v25 = vld [vmem:[#allocation2 + $0x122] sm:$0xff] }
 0x5e5   : > { %9716 = vrot.lane.b32.xlu1 %v15080_v22, %s10077_s25  ;;  %8810 = vmatprep.subr.bf16.mxu0 %v15065_v4  ;;  %v4378_v22 = vsel %vm13116_vm15, %v4281_v16, 0.0  ;;  %vm15093_vm15 = vcmask 195584  }
 0x5e6   : > { %v9592_v55 = vpop.permute.xlu1 %9591  ;;  %9726 = vrot.lane.b32.xlu0 %v15081_v49, %s10077_s25 }
 0x5e7   : > { %v9594_v37 = vunpack.i.h.bf16 %v9592_v55  ;;  %v9593_v14 = vunpack.i.l.bf16 %v9592_v55  ;;  %5751 = vmatmul.mubr.f32.gmra.mrb[74].mxu0 %v5332_v21  ;;  %v4514_v21 = vld [vmem:[#allocation2 + $0xd8] sm:$0xff] }
 0x5e8   : > { %8812 = vmatpush1.bf16.msra.mxu0 %v8811_v13 }
 0x5e9   : > { %5211 = vrot.lane.b32.xlu1 %v15082_v35, %s10092_s27  ;;  %v5353_v17 = vsel %vm1687_vm5, %v9588_v54, %v9593_v14  ;;  %v5354_v15 = vsel %vm1687_vm5, %v9589_v38, %v9594_v37  ;;  %v15087_v14 = vld [vmem:[#allocation15_spill] sm:$0xff] }
 0x5ea   : > { %v9602_v3 = vpop.permute.xlu1 %9601  ;;  %5215 = vrot.lane.b32.xlu0 %v13179_v56, %s10092_s27  ;;  %v5374_v44 = vsel %vm5361_vm11, %v5353_v17, %v9598_v46  ;;  %v5375_v47 = vsel %vm5361_vm11, %v5354_v15, %v9599_v1  ;;  %v13222_v17 = vpop.permute.xlu0 %5191  ;;  %v4657_v15 = vld [vmem:[#allocation2 + $0x121] sm:$0xff] }
 0x5eb   : > { %5755 = vmatprep.mubr.f32.mxu0 %v5374_v44  ;;  %v9603_v5 = vunpack.i.l.bf16 %v9602_v3  ;;  %v9604_v62 = vunpack.i.h.bf16 %v9602_v3 }
 0x5ec   : > { %5756 = vmatmul.mubr.f32.gmra.mrb[76].mxu0 %v5333_v53 }
 0x5ed   : > { %5291 = vrot.lane.b32.xlu1 %v15084_v11, %s14935_s18  ;;  %5760 = vmatprep.mubr.f32.mxu0 %v5375_v47  ;;  %v5355_v34 = vsel %vm1687_vm5, %v9603_v5, %v9608_v7  ;;  %v5335_v54 = vsel %vm3764_vm9, %v4514_v21, %v9603_v5  ;;  %v5356_v63 = vsel %vm1687_vm5, %v9604_v62, %v9609_v61  ;;  %v4517_v21 = vld [vmem:[#allocation2 + $0xf8] sm:$0xff] }
 0x5ee   : > { %v13198_v18 = vpop.permute.xlu1 %9611  ;;  %5295 = vrot.lane.b32.xlu0 %v4678_v24, %s14935_s18  ;;  %v5336_v35 = vsel %vm3764_vm9, %v4515_v23, %v9604_v62  ;;  %v9617_v44 = vpop.permute.xlu0 %9616 }
 0x5ef   : > { %v9613_v26 = vunpack.i.l.bf16 %v13198_v18  ;;  %v9614_v13 = vunpack.i.h.bf16 %v13198_v18  ;;  %v9618_v53 = vunpack.i.l.bf16 %v9617_v44  ;;  %v9619_v7 = vunpack.i.h.bf16 %v9617_v44 }
 0x5f0   : > { %5761 = vmatmul.mubr.f32.gmra.mrb[78].mxu0 %v5334_v43  ;;  %v9735_v43 = vpack.i.bf16 %v4678_v24, %v4677_v25 }
 0x5f1   : > { %4449 = vrot.lane.b32.xlu1 %v4378_v22, %s10085_s24  ;;  %v5376_v55 = vsel %vm5361_vm11, %v5355_v34, %v9613_v26  ;;  %v5377_v37 = vsel %vm5361_vm11, %v5356_v63, %v9614_v13  ;;  %v4516_v22 = vld [vmem:[#allocation2 + $0xf0] sm:$0xff]  ;;  %s8123_s24 = sadd.s32 4294967295, %s11139_s21  ;;  %s15203_s21 = smov (!%p350_p6, %s11139_s21), 15 }
 0x5f2   : > { %v5270_v49 = vpop.permute.xlu1 %5269  ;;  %5765 = vmatprep.mubr.f32.mxu0 %v5376_v55  ;;  %v5337_v61 = vsel %vm3764_vm9, %v4516_v22, %v9618_v53  ;;  %v4518_v22 = vld [vmem:[#allocation2 + $0x108] sm:$0xff] }
 0x5f3   : > { %v5468_v38 = vsel %vm15085_vm14, %v13158_v31, %v5270_v49  ;;  %vm15100_vm14 = vmmov %vm15088_vm8 }
 0x5f4   : > { %5766 = vmatmul.mubr.f32.gmra.mrb[80].mxu0 %v5335_v54  ;;  %8621 = vmatprep.mubr.msk.f32.mxu1 %vm15086_vm0, %v5468_v38  ;;  %v5338_v54 = vsel %vm3764_vm9, %v4517_v21, %v9619_v7 }
 0x5f5   : > { %9731 = vrot.lane.b32.xlu1 %v15087_v14, %s15050_s29  ;;  %5770 = vmatprep.mubr.f32.mxu0 %v5377_v37 }
 0x5f6   : > { %v9622_v3 = vpop.permute.xlu1 %9621 }
 0x5f7   : > { %v9623_v58 = vunpack.i.l.bf16 %v9622_v3  ;;  %v9624_v5 = vunpack.i.h.bf16 %v9622_v3 }
 0x5f8   : > { %5771 = vmatmul.mubr.f32.gmra.mrb[82].mxu0 %v5336_v35 }
 0x5f9   : > { %5213 = vrot.lane.b32.xlu1 %v4657_v15, %s10092_s27  ;;  %v5357_v8 = vsel %vm1687_vm5, %v9618_v53, %v9623_v58  ;;  %v5358_v55 = vsel %vm1687_vm5, %v9619_v7, %v9624_v5  ;;  %v9503_v7 = vunpack.i.l.bf16 %v12918_v42 }
 0x5fd   : > { %5293 = vrot.lane.b32.xlu1 %v4677_v25, %s14935_s18 }
 0x600   : > { %v13226_v47 = vpop.permute.xlu0 %9626 }
 0x601   : > { %v9629_v11 = vunpack.i.h.bf16 %v13226_v47  ;;  %v9628_v16 = vunpack.i.l.bf16 %v13226_v47  ;;  %4977 = vrot.lane.b32.xlu1 %v4657_v15, %s10077_s25  ;;  %v9632_v14 = vpop.permute.xlu1 %9631 }
 0x602   : > { %v9633_v3 = vunpack.i.l.bf16 %v9632_v14 }
 0x603   : > { %v5378_v62 = vsel %vm5361_vm11, %v5357_v8, %v9628_v16  ;;  %v5379_v49 = vsel %vm5361_vm11, %v5358_v55, %v9629_v11  ;;  %v9634_v8 = vunpack.i.h.bf16 %v9632_v14 }
 0x604   : > { %v9637_v34 = vpop.permute.xlu0 %9636  ;;  %5775 = vmatprep.mubr.f32.mxu0 %v5378_v62 }
 0x605   : > { %9736 = vrot.lane.b32.xlu1 %v9735_v43, %s10090_s17  ;;  %5776 = vmatmul.mubr.f32.gmra.mrb[84].mxu0 %v5337_v61  ;;  %v9638_v35 = vunpack.i.l.bf16 %v9637_v34  ;;  %v9639_v44 = vunpack.i.h.bf16 %v9637_v34  ;;  %v15092_v61 = vld [vmem:[#allocation11_spill] sm:$0xff]  ;;  %s15151_s17 = smov 72  }
 0x606   : > { %5780 = vmatprep.mubr.f32.mxu0 %v5379_v49  ;;  %v9478_v34 = vunpack.i.l.bf16 %v15092_v61  ;;  %v5339_v49 = vsel %vm3764_vm9, %v4518_v22, %v9633_v3 }
 0x607   : > { %v5359_v62 = vsel %vm1687_vm5, %v9633_v3, %v9638_v35  ;;  %v5360_v21 = vsel %vm1687_vm5, %v9634_v8, %v9639_v44  ;;  %v9479_v3 = vunpack.i.h.bf16 %v15092_v61  ;;  %vm5402_vm5 = vcmask 687104  }
 0x608   : > { %v5272_v38 = vpop.permute.xlu0 %5271  ;;  %v5423_v14 = vsel %vm15093_vm15, %v9478_v34, %v9503_v7 }
 0x609   : > { %v5469_v24 = vsel %vm15088_vm8, %v13222_v17, %v5272_v38  ;;  %5781 = vmatmul.mubr.f32.gmra.mrb[86].mxu0 %v5338_v54  ;;  %v5444_v22 = vsel %vm5443_vm1, %v5423_v14, %v12881_v41  ;;  %v9513_v41 = vunpack.i.l.bf16 %v12980_v60 }
 0x60a   : > { %8622 = vmatmul.mubr.msk.f32.gmra.mrb[52].mxu1 %vm15089_vm10, %v5469_v24  ;;  %v9504_v24 = vunpack.i.h.bf16 %v12918_v42  ;;  %v15095_v42 = vld [vmem:[#allocation14_spill] sm:$0xff] }
 0x60c   : > { %v13245_v63 = vpop.permute.xlu0 %9651 }
 0x610   : > { %v13247_v37 = vpop.permute.xlu0 %5193 }
 0x614   : > { %v5274_v23 = vpop.permute.xlu0 %5273 }
 0x615   : > { %v5470_v15 = vsel %vm15090_vm12, %v13247_v37, %v5274_v23  ;;  %v15094_v23 = vld [vmem:[#allocation13_spill] sm:$0xff] }
 0x616   : > { %8624 = vmatprep.mubr.msk.f32.mxu1 %vm15091_vm13, %v5470_v15  ;;  %v9483_v35 = vunpack.i.l.bf16 %v15094_v23  ;;  %v4519_v15 = vld [vmem:[#allocation2 + $0x110] sm:$0xff]  ;;  %vm15104_vm13 = vmmov %vm15100_vm14 }
 0x617   : > { %v13252_v25 = vpop.permute.xlu1 %9641  ;;  %v5340_v44 = vsel %vm3764_vm9, %v4519_v15, %v9634_v8  ;;  %v9533_v8 = vunpack.i.l.bf16 %v12927_v51 }
 0x618   : > { %v14933_v58 = vunpack.i.h.bf16 %v13252_v25  ;;  %v14934_v53 = vunpack.i.l.bf16 %v13252_v25  ;;  %v13256_v5 = vpop.permute.xlu0 %9661 }
 0x61a   : > { %v5380_v43 = vsel %vm5361_vm11, %v5359_v62, %v14934_v53  ;;  %v5381_v54 = vsel %vm5361_vm11, %v5360_v21, %v14933_v58  ;;  %v9508_v21 = vunpack.i.l.bf16 %v12964_v33  ;;  %vm15097_vm11 = vmmov %vm15093_vm15 }
 0x61b   : > { %v13264_v55 = vpop.permute.xlu1 %9646  ;;  %5785 = vmatprep.mubr.f32.mxu0 %v5380_v43  ;;  %v5424_v61 = vsel %vm15097_vm11, %v9479_v3, %v9504_v24  ;;  %vm15099_vm9 = vmmov %vm15097_vm11 }
 0x61c   : > { %v13268_v38 = vpop.permute.xlu0 %9671  ;;  %5786 = vmatmul.mubr.f32.gmra.mrb[88].mxu0 %v5339_v49  ;;  %v15096_v49 = vunpack.i.l.bf16 %v15095_v42  ;;  %v5425_v24 = vsel %vm15099_vm9, %v9508_v21, %v9533_v8  ;;  %vm15101_vm8 = vmmov %vm15099_vm9  ;;  %v9559_v8 = vunpack.i.h.bf16 %v13087_v6 }
 0x61d   : > { %5790 = vmatprep.mubr.f32.mxu0 %v5381_v54  ;;  %v9484_v54 = vunpack.i.h.bf16 %v15094_v23  ;;  %v9509_v23 = vunpack.i.h.bf16 %v12964_v33  ;;  %v9534_v33 = vunpack.i.h.bf16 %v12927_v51  ;;  %vm15102_vm10 = vmmov %vm15101_vm8 }
 0x61e   : > { %v5382_v7 = vsel %vm1745_vm7, %v15096_v49, %v9483_v35  ;;  %v5445_v35 = vsel %vm5443_vm1, %v5424_v61, %v12822_v20  ;;  %v15098_v49 = vunpack.i.h.bf16 %v15095_v42  ;;  %v5446_v20 = vsel %vm5443_vm1, %v5425_v24, %v12866_v12  ;;  %vm15103_vm12 = vmmov %vm15101_vm8 }
 0x61f   : > { %v13277_v62 = vpop.permute.xlu1 %9656  ;;  %v5384_v42 = vsel %vm1745_vm7, %v9488_v50, %v9513_v41  ;;  %v9578_v61 = vunpack.i.l.bf16 %v13120_v45  ;;  %v9653_v24 = vunpack.i.l.bf16 %v13245_v63  ;;  %vm15105_vm15 = vmmov %vm15104_vm13 }
 0x620   : > { %v13280_v43 = vpop.permute.xlu0 %5199  ;;  %5791 = vmatmul.mubr.f32.gmra.mrb[90].mxu0 %v5340_v44  ;;  %v5403_v44 = vsel %vm5402_vm5, %v5382_v7, %v9478_v34  ;;  %v9514_v34 = vunpack.i.h.bf16 %v12980_v60  ;;  %v9558_v60 = vunpack.i.l.bf16 %v13087_v6  ;;  %v9648_v6 = vunpack.i.l.bf16 %v13264_v55  ;;  %vm15106_vm11 = vmmov %vm15086_vm0 }
 0x621   : > { %5860 = vmatprep.mubr.f32.mxu0 %v5444_v22  ;;  %v5383_v22 = vsel %vm1745_vm7, %v15098_v49, %v9484_v54  ;;  %v9538_v54 = vunpack.i.l.bf16 %v12997_v9  ;;  %v9579_v49 = vunpack.i.h.bf16 %v13120_v45  ;;  %v5386_v52 = vsel %vm1745_vm7, %v9518_v59, %v9578_v61  ;;  %vm15107_vm9 = vmmov %vm15101_vm8 }
 0x622   : > { %v5404_v53 = vsel %vm5402_vm5, %v5383_v22, %v9479_v3  ;;  %v5385_v51 = vsel %vm1745_vm7, %v9489_v57, %v9514_v34  ;;  %v9539_v57 = vunpack.i.h.bf16 %v12997_v9 }
 0x623   : > { %v13291_v15 = vpop.permute.xlu1 %5195  ;;  %v5406_v41 = vsel %vm5402_vm5, %v5385_v51, %v9509_v23  ;;  %v5407_v34 = vsel %vm5402_vm5, %v5386_v52, %v9538_v54  ;;  %v5387_v9 = vsel %vm1745_vm7, %v9519_v28, %v9579_v49  ;;  %v9659_v28 = vunpack.i.h.bf16 %v13277_v62 }
 0x624   : > { %v5280_v14 = vpop.permute.xlu0 %5279  ;;  %5861 = vmatmul.mubr.f32.vlgmr.msra.gmra.mrb[52].mxu0 %v5403_v44  ;;  %v5428_v45 = vsel %vm15103_vm12, %v9539_v57, %v9559_v8  ;;  %v5408_v27 = vsel %vm5402_vm5, %v5387_v9, %v9539_v57  ;;  %v9663_v51 = vunpack.i.l.bf16 %v13256_v5  ;;  %vm15111_vm12 = vmmov %vm15107_vm9  ;;  %v9674_v57 = vunpack.i.h.bf16 %v13268_v38 }
 0x625   : > { %5865 = vmatprep.mubr.f32.mxu0 %v5445_v35  ;;  %v5427_v35 = vsel %vm15102_vm10, %v9538_v54, %v9558_v60  ;;  %v5449_v59 = vsel %vm5443_vm1, %v5428_v45, %v13222_v17  ;;  %vm15110_vm10 = vmmov %vm15107_vm9 }
 0x627   : > { %v5276_v58 = vpop.permute.xlu1 %5275 }
 0x628   : > { %v5471_v7 = vsel %vm15100_vm14, %v13291_v15, %v5276_v58  ;;  %v13306_v44 = vpop.permute.xlu0 %9681  ;;  %5866 = vmatmul.mubr.f32.gmra.mrb[54].mxu0 %v5404_v53  ;;  %v5405_v58 = vsel %vm5402_vm5, %v5384_v42, %v9508_v21  ;;  %v5426_v53 = vsel %vm15101_vm8, %v9509_v23, %v9534_v33  ;;  %v5473_v42 = vsel %vm15105_vm15, %v13280_v43, %v5280_v14  ;;  %vm15108_vm14 = vmmov %vm15104_vm13 }
 0x629   : > { %5870 = vmatprep.mubr.f32.mxu0 %v5446_v20  ;;  %8625 = vmatmul.mubr.msk.f32.gmra.mrb[54].mxu1 %vm15086_vm0, %v5471_v7  ;;  %v5447_v50 = vsel %vm5443_vm1, %v5426_v53, %v13008_v29  ;;  %v5448_v29 = vsel %vm5443_vm1, %v5427_v35, %v13158_v31  ;;  %v9658_v7 = vunpack.i.l.bf16 %v13277_v62  ;;  %v5429_v33 = vsel %vm15107_vm9, %v9648_v6, %v9653_v24  ;;  %vm15109_vm8 = vmmov %vm15086_vm0 }
 0x62a   : > { %v5450_v53 = vsel %vm5443_vm1, %v5429_v33, %v13247_v37  ;;  %vm15113_vm15 = vmmov %vm15108_vm14 }
 0x62b   : > { %v13316_v3 = vpop.permute.xlu1 %9666  ;;  %v5388_v61 = vsel %vm1745_vm7, %v9543_v10, %v9658_v7 }
 0x62c   : > { %v13321_v12 = vpop.permute.xlu0 %5201  ;;  %5871 = vmatmul.mubr.f32.gmra.mrb[56].mxu0 %v5405_v58  ;;  %v9649_v58 = vunpack.i.h.bf16 %v13264_v55  ;;  %v9654_v55 = vunpack.i.h.bf16 %v13245_v63  ;;  %v5409_v62 = vsel %vm5402_vm5, %v5388_v61, %v9648_v6  ;;  %v5389_v63 = vsel %vm1745_vm7, %v9544_v48, %v9659_v28 }
 0x62d   : > { %5875 = vmatprep.mubr.f32.mxu0 %v5447_v50  ;;  %v9668_v50 = vunpack.i.l.bf16 %v13316_v3  ;;  %v9669_v37 = vunpack.i.h.bf16 %v13316_v3 }
 0x62e   : > { %v5430_v8 = vsel %vm15110_vm10, %v9649_v58, %v9654_v55  ;;  %v5410_v52 = vsel %vm5402_vm5, %v5389_v63, %v9649_v58 }
 0x62f   : > { %v5198_v21 = vpop.permute.xlu1 %5197  ;;  %v5451_v10 = vsel %vm5443_vm1, %v5430_v8, %v13291_v15  ;;  %v5431_v49 = vsel %vm15111_vm12, %v9663_v51, %v9668_v50 }
 0x630   : > { %v5282_v22 = vpop.permute.xlu0 %5281  ;;  %5876 = vmatmul.mubr.f32.gmra.mrb[58].mxu0 %v5406_v41  ;;  %v9673_v41 = vunpack.i.l.bf16 %v13268_v38  ;;  %v5452_v15 = vsel %vm5443_vm1, %v5431_v49, %v5198_v21 }
 0x631   : > { %5880 = vmatprep.mubr.f32.mxu0 %v5448_v29  ;;  %v5474_v60 = vsel %vm15108_vm14, %v13321_v12, %v5282_v22  ;;  %v9664_v22 = vunpack.i.h.bf16 %v13256_v5  ;;  %v9683_v5 = vunpack.i.l.bf16 %v13306_v44  ;;  %vm15115_vm14 = vmmov %vm15107_vm9 }
 0x632   : > { %v5390_v0 = vsel %vm1745_vm7, %v9563_v40, %v9673_v41  ;;  %v5391_v40 = vsel %vm1745_vm7, %v9564_v36, %v9674_v57  ;;  %v9684_v36 = vunpack.i.h.bf16 %v13306_v44 }
 0x633   : > { %v5278_v23 = vpop.permute.xlu1 %5277  ;;  %v5412_v9 = vsel %vm5402_vm5, %v5391_v40, %v9664_v22 }
 0x634   : > { %v5472_v31 = vsel %vm15104_vm13, %v5198_v21, %v5278_v23  ;;  %v13345_v20 = vpop.permute.xlu0 %9691  ;;  %5881 = vmatmul.mubr.f32.gmra.mrb[60].mxu0 %v5407_v34  ;;  %vm15112_vm13 = vmmov %vm15107_vm9  ;;  %v5411_v23 = vsel %vm5402_vm5, %v5390_v0, %v9663_v51 }
 0x635   : > { %5885 = vmatprep.mubr.f32.mxu0 %v5449_v59  ;;  %8627 = vmatprep.mubr.msk.f32.mxu1 %vm15106_vm11, %v5472_v31  ;;  %v5432_v3 = vsel %vm15112_vm13, %v9664_v22, %v9669_v37  ;;  %vm15114_vm11 = vmmov %vm15086_vm0  ;;  %v9693_v58 = vunpack.i.l.bf16 %v13345_v20  ;;  %v9694_v50 = vunpack.i.h.bf16 %v13345_v20 }
 0x636   : > { %8628 = vmatmul.mubr.msk.f32.gmra.mrb[56].mxu1 %vm15086_vm0, %v5473_v42  ;;  %v5453_v21 = vsel %vm5443_vm1, %v5432_v3, %v13280_v43  ;;  %vm15116_vm0 = vmmov %vm15107_vm9 }
 0x637   : > { %v13360_v17 = vpop.permute.xlu1 %9676  ;;  %8630 = vmatprep.mubr.msk.f32.mxu1 %vm15109_vm8, %v5474_v60  ;;  %vm15117_vm8 = vmmov %vm15113_vm15 }
 0x638   : > { %v13365_v14 = vpop.permute.xlu0 %9701  ;;  %5886 = vmatmul.mubr.f32.gmra.mrb[62].mxu0 %v5408_v27  ;;  %v9678_v48 = vunpack.i.l.bf16 %v13360_v17  ;;  %v9679_v31 = vunpack.i.h.bf16 %v13360_v17  ;;  %vm15118_vm10 = vmmov %vm15117_vm8 }
 0x639   : > { %5890 = vmatprep.mubr.f32.mxu0 %v5450_v53  ;;  %v9703_v53 = vunpack.i.l.bf16 %v13365_v14  ;;  %vm15119_vm12 = vmmov %vm15114_vm11 }
 0x63a   : > { %v5433_v7 = vsel %vm15107_vm9, %v9678_v48, %v9683_v5  ;;  %v5434_v28 = vsel %vm15115_vm14, %v9679_v31, %v9684_v36  ;;  %vm15120_vm13 = vmmov %vm15116_vm0 }
 0x63b   : > { %v9687_v54 = vpop.permute.xlu1 %9686  ;;  %v5454_v43 = vsel %vm5443_vm1, %v5433_v7, %v13321_v12  ;;  %v5394_v2 = vsel %vm1745_vm7, %v9598_v46, %v9703_v53  ;;  %vm15122_vm9 = vmmov %vm15114_vm11 }
 0x63c   : > { %v13378_v35 = vpop.permute.xlu0 %5207  ;;  %5891 = vmatmul.mubr.f32.gmra.mrb[64].mxu0 %v5409_v62  ;;  %v9688_v34 = vunpack.i.l.bf16 %v9687_v54  ;;  %v9689_v42 = vunpack.i.h.bf16 %v9687_v54  ;;  %v9704_v62 = vunpack.i.h.bf16 %v13365_v14  ;;  %v5415_v37 = vsel %vm5402_vm5, %v5394_v2, %v9693_v58  ;;  %vm15123_vm14 = vmmov %vm15116_vm0 }
 0x63d   : > { %5895 = vmatprep.mubr.f32.mxu0 %v5451_v10 }
 0x63e   : > { %v5392_v32 = vsel %vm1745_vm7, %v9583_v19, %v9688_v34  ;;  %v5393_v19 = vsel %vm1745_vm7, %v9584_v30, %v9689_v42 }
 0x63f   : > { %v5204_v29 = vpop.permute.xlu1 %5203  ;;  %v5413_v27 = vsel %vm5402_vm5, %v5392_v32, %v9678_v48  ;;  %v5414_v54 = vsel %vm5402_vm5, %v5393_v19, %v9679_v31 }
 0x640   : > { %v5288_v6 = vpop.permute.xlu0 %5287  ;;  %5896 = vmatmul.mubr.f32.gmra.mrb[66].mxu0 %v5410_v52  ;;  %v5455_v12 = vsel %vm5443_vm1, %v5434_v28, %v5204_v29 }
 0x641   : > { %5900 = vmatprep.mubr.f32.mxu0 %v5452_v15  ;;  %v5477_v30 = vsel %vm15118_vm10, %v13378_v35, %v5288_v6  ;;  %vm15124_vm10 = vmmov %vm15122_vm9 }
 0x643   : > { %v5284_v24 = vpop.permute.xlu1 %5283 }
 0x644   : > { %v5475_v38 = vsel %vm15113_vm15, %v5204_v29, %v5284_v24  ;;  %v13399_v45 = vpop.permute.xlu0 %9711  ;;  %5901 = vmatmul.mubr.f32.gmra.mrb[68].mxu0 %v5411_v23  ;;  %vm15121_vm15 = vmmov %vm15117_vm8  ;;  %v5395_v29 = vsel %vm1745_vm7, %v9599_v1, %v9704_v62 }
 0x645   : > { %5905 = vmatprep.mubr.f32.mxu0 %v5453_v21  ;;  %8631 = vmatmul.mubr.msk.f32.gmra.mrb[58].mxu1 %vm15114_vm11, %v5475_v38  ;;  %v9713_v46 = vunpack.i.l.bf16 %v13399_v45  ;;  %v5416_v15 = vsel %vm5402_vm5, %v5395_v29, %v9694_v50  ;;  %v9714_v24 = vunpack.i.h.bf16 %v13399_v45 }
 0x647   : > { %v9697_v59 = vpop.permute.xlu1 %9696 }
 0x648   : > { %v5210_v33 = vpop.permute.xlu0 %5209  ;;  %5906 = vmatmul.mubr.f32.gmra.mrb[70].mxu0 %v5412_v9  ;;  %v9698_v60 = vunpack.i.l.bf16 %v9697_v59  ;;  %v9699_v44 = vunpack.i.h.bf16 %v9697_v59 }
 0x649   : > { %5910 = vmatprep.mubr.f32.mxu0 %v5454_v43 }
 0x64a   : > { %v5435_v55 = vsel %vm15116_vm0, %v9693_v58, %v9698_v60  ;;  %v5436_v20 = vsel %vm15120_vm13, %v9694_v50, %v9699_v44  ;;  %vm15126_vm13 = vmmov %vm15116_vm0 }
 0x64b   : > { %v5206_v17 = vpop.permute.xlu1 %5205  ;;  %v5457_v22 = vsel %vm5443_vm1, %v5436_v20, %v13378_v35 }
 0x64c   : > { %v5290_v61 = vpop.permute.xlu0 %5289  ;;  %5911 = vmatmul.mubr.f32.gmra.mrb[72].mxu0 %v5413_v27  ;;  %v5456_v10 = vsel %vm5443_vm1, %v5435_v55, %v5206_v17 }
 0x64d   : > { %5915 = vmatprep.mubr.f32.mxu0 %v5455_v12  ;;  %v5478_v14 = vsel %vm15121_vm15, %v5210_v33, %v5290_v61 }
 0x64f   : > { %v5286_v51 = vpop.permute.xlu1 %5285 }
 0x650   : > { %v5476_v8 = vsel %vm15117_vm8, %v5206_v17, %v5286_v51  ;;  %v4448_v41 = vpop.permute.xlu0 %4447  ;;  %5916 = vmatmul.mubr.f32.gmra.mrb[74].mxu0 %v5414_v54 }
 0x651   : > { %4498 = vst.msk [vmem:[#allocation2 + $0x139] sm:$0xff] %vm4475_vm6, %v4448_v41  ;;  %5920 = vmatprep.mubr.f32.mxu0 %v5456_v10  ;;  %8633 = vmatprep.mubr.msk.f32.mxu1 %vm15119_vm12, %v5476_v8  ;;  %vm15125_vm12 = vmmov %vm15116_vm0 }
 0x652   : > { %8634 = vmatmul.mubr.msk.f32.gmra.mrb[60].mxu1 %vm15114_vm11, %v5477_v30  ;;  %vm15129_vm11 = vmmov %vm15122_vm9 }
 0x653   : > { %v9707_v63 = vpop.permute.xlu1 %9706  ;;  %8636 = vmatprep.mubr.msk.f32.mxu1 %vm15122_vm9, %v5478_v14 }
 0x654   : > { %v9708_v49 = vunpack.i.l.bf16 %v9707_v63  ;;  %5921 = vmatmul.mubr.f32.gmra.mrb[76].mxu0 %v5415_v37  ;;  %v9709_v57 = vunpack.i.h.bf16 %v9707_v63  ;;  %v9722_v34 = vpop.permute.xlu0 %9721 }
 0x655   : > { %5925 = vmatprep.mubr.f32.mxu0 %v5457_v22  ;;  %v9723_v18 = vunpack.i.l.bf16 %v9722_v34  ;;  %v9724_v32 = vunpack.i.h.bf16 %v9722_v34 }
 0x656   : > { %v5437_v52 = vsel %vm15123_vm14, %v9708_v49, %v9713_v46  ;;  %v5438_v23 = vsel %vm15116_vm0, %v9709_v57, %v9714_v24  ;;  %vm15130_vm14 = vmmov %vm15116_vm0  ;;  %v15131_v46 = vunpack.i.l.bf16 %v13252_v25 }
 0x657   : > { %v9717_v6 = vpop.permute.xlu1 %9716  ;;  %v5458_v0 = vsel %vm5443_vm1, %v5437_v52, %v5210_v33 }
 0x658   : > { %v9719_v48 = vunpack.i.h.bf16 %v9717_v6  ;;  %v9718_v3 = vunpack.i.l.bf16 %v9717_v6  ;;  %5926 = vmatmul.mubr.f32.gmra.mrb[78].mxu0 %v5416_v15  ;;  %v4639_v5 = vld [vmem:[#allocation2 + $0x138] sm:$0xff]  ;;  %v9727_v31 = vpop.permute.xlu0 %9726 }
 0x659   : > { %5137 = vrot.lane.b32.xlu0 %v4639_v5, %s15050_s29  ;;  %5930 = vmatprep.mubr.f32.mxu0 %v5458_v0  ;;  %v4659_v38 = vld [vmem:[#allocation2 + $0x139] sm:$0xff]  ;;  %v9728_v9 = vunpack.i.l.bf16 %v9727_v31  ;;  %v9729_v36 = vunpack.i.h.bf16 %v9727_v31 }
 0x65a   : > { %v5396_v39 = vsel %vm1745_vm7, %v9613_v26, %v9718_v3  ;;  %v5397_v45 = vsel %vm1745_vm7, %v9614_v13, %v9719_v48 }
 0x65b   : > { %v5212_v1 = vpop.permute.xlu1 %5211  ;;  %v5417_v35 = vsel %vm5402_vm5, %v5396_v39, %v9708_v49  ;;  %v5418_v26 = vsel %vm5402_vm5, %v5397_v45, %v9709_v57  ;;  %v5398_v58 = vsel %vm1745_vm7, %v9628_v16, %v9728_v9  ;;  %v5399_v16 = vsel %vm1745_vm7, %v9629_v11, %v9729_v36 }
 0x65c   : > { %5931 = vmatmul.mubr.f32.gmra.mrb[80].mxu0 %v5417_v35  ;;  %v5459_v21 = vsel %vm5443_vm1, %v5438_v23, %v5212_v1  ;;  %v5216_v33 = vpop.permute.xlu0 %5215  ;;  %v5419_v12 = vsel %vm5402_vm5, %v5398_v58, %v9723_v18  ;;  %v5420_v8 = vsel %vm5402_vm5, %v5399_v16, %v9724_v32  ;;  %v15136_v35 = vunpack.i.h.bf16 %v13252_v25 }
 0x65d   : > { %5217 = vrot.lane.b32.xlu0 %v4659_v38, %s10092_s27  ;;  %5935 = vmatprep.mubr.f32.mxu0 %v5459_v21  ;;  %v13515_v38 = vld [vmem:[%s14889_s6] ss:$0 sm:$0xff]  ;;  %v13517_v21 = vstv %s8123_s24 }
 0x65f   : > { %v5292_v40 = vpop.permute.xlu1 %5291 }
 0x660   : > { %v5479_v7 = vsel %vm15117_vm8, %v5212_v1, %v5292_v40  ;;  %5936 = vmatmul.mubr.f32.gmra.mrb[82].mxu0 %v5418_v26  ;;  %v5296_v19 = vpop.permute.xlu0 %5295 }
 0x661   : > { %8637 = vmatmul.mubr.msk.f32.gmra.mrb[62].mxu1 %vm15124_vm10, %v5479_v7 }
 0x663   : > { %v4450_v59 = vpop.permute.xlu1 %4449 }
 0x664   : > { %4499 = vst.msk [vmem:[#allocation2 + $0x141] sm:$0xff] %vm4475_vm6, %v4450_v59  ;;  %vm15127_vm6 = vmmov %vm15117_vm8 }
 0x665   : > { %vm15128_vm15 = vmmov %vm15127_vm6 }
 0x666   : > { %v5481_v62 = vsel %vm15128_vm15, %v5216_v33, %v5296_v19  ;;  %vm15132_vm0 = vmmov %vm15127_vm6 }
 0x667   : > { %v9732_v42 = vpop.permute.xlu1 %9731  ;;  %vm15133_vm8 = vmmov %vm15122_vm9 }
 0x668   : > { %v9734_v13 = vunpack.i.h.bf16 %v9732_v42  ;;  %v9733_v43 = vunpack.i.l.bf16 %v9732_v42  ;;  %vm15134_vm10 = vmmov %vm15132_vm0 }
 0x66a   : > { %v5439_v60 = vsel %vm15125_vm12, %v9723_v18, %v9733_v43  ;;  %v5440_v53 = vsel %vm15126_vm13, %v9724_v32, %v9734_v13  ;;  %vm15135_vm13 = vmmov %vm15133_vm8  ;;  %v6188_v13 = vadd.s32 1, %v13517_v21 }
 0x66b   : > { %v5214_v17 = vpop.permute.xlu1 %5213  ;;  %v4679_v27 = vld [vmem:[#allocation2 + $0x13a] sm:$0xff]  ;;  %v5461_v44 = vsel %vm5443_vm1, %v5440_v53, %v5216_v33  ;;  %v4680_v50 = vld [vmem:[#allocation2 + $0x142] sm:$0xff] }
 0x66c   : > { %v4660_v28 = vld [vmem:[#allocation2 + $0x141] sm:$0xff]  ;;  %5297 = vrot.lane.b32.xlu1 %v4679_v27, %s14935_s18  ;;  %v5460_v61 = vsel %vm5443_vm1, %v5439_v60, %v5214_v17 }
 0x66d   : > { %5219 = vrot.lane.b32.xlu0 %v4660_v28, %s10092_s27  ;;  %5940 = vmatprep.mubr.f32.mxu0 %v5460_v61  ;;  %v4640_v51 = vld [vmem:[#allocation2 + $0x140] sm:$0xff]  ;;  %s10093_s27 = smov 100  }
 0x66e   : > { %5941 = vmatmul.mubr.f32.gmra.mrb[84].mxu0 %v5419_v12 }
 0x66f   : > { %v5294_v55 = vpop.permute.xlu1 %5293  ;;  %5945 = vmatprep.mubr.f32.mxu0 %v5461_v44 }
 0x670   : > { %v5480_v54 = vsel %vm15127_vm6, %v5214_v17, %v5294_v55  ;;  %5299 = vrot.lane.b32.xlu1 %v4680_v50, %s14935_s18  ;;  %vm6207_vm6 = vcmp.lt.s32.totalorder %v13517_v21, 16  ;;  %v6189_v50 = vadd.s32 2, %v13517_v21 }
 0x671   : > { %5139 = vrot.lane.b32.xlu0 %v4640_v51, %s15050_s29  ;;  %8639 = vmatprep.mubr.msk.f32.mxu1 %vm15129_vm11, %v5480_v54  ;;  %s10095_s29 = smov 116  }
 0x672   : > { %5946 = vmatmul.mubr.f32.gmra.mrb[86].mxu0 %v5420_v8  ;;  %8640 = vmatmul.mubr.msk.f32.gmra.mrb[64].mxu1 %vm15122_vm9, %v5481_v62  ;;  %vm6198_vm9 = vcmp.ge.s32.totalorder %v6188_v13, 0 }
 0x673   : > { %v4978_v2 = vpop.permute.xlu1 %4977 }
 0x674   : > { %4979 = vrot.lane.b32.xlu1 %v13179_v56, %s10077_s25  ;;  %v5400_v49 = vsel %vm1745_vm7, %v15131_v46, %v4978_v2 }
 0x677   : > { %v9737_v30 = vpop.permute.xlu1 %9736 }
 0x678   : > { %v9738_v14 = vunpack.i.l.bf16 %v9737_v30  ;;  %v9739_v0 = vunpack.i.h.bf16 %v9737_v30 }
 0x67a   : > { %v5421_v56 = vsel %vm5402_vm5, %v5400_v49, %v9738_v14 }
 0x68c   : > { %v8617_v47 = vpop.f32.mrb[48].mxu1 }
 0x68d   : > { %v6027_v11 = vpop.f32.mrb[49].mxu1 }
 0x69f   : > { %v13489_v41 = vpop.f32.mrb[50].mxu1 }
 0x6a0   : > { %v6037_v10 = vpop.f32.mrb[51].mxu1 }
 0x6cb   : > { %v5138_v20 = vpop.permute.xlu0 %5137 }
 0x6cc   : > { %v5441_v63 = vsel %vm15130_vm14, %v9738_v14, %v5138_v20  ;;  %vm6208_vm14 = vcmp.lt.s32.totalorder %v6188_v13, 16 }
 0x6cf   : > { %v5218_v37 = vpop.permute.xlu0 %5217 }
 0x6d0   : > { %v5462_v22 = vsel %vm5443_vm1, %v5441_v63, %v5218_v37 }
 0x6d1   : > { %5950 = vmatprep.mubr.f32.mxu0 %v5462_v22 }
 0x6d2   : > { %5951 = vmatmul.mubr.f32.gmra.mrb[88].mxu0 %v5421_v56  ;;  %v6190_v56 = vadd.s32 3, %v13517_v21 }
 0x6dd   : > { %v13497_v29 = vpop.f32.mrb[52].mxu1 }
 0x6de   : > { %v13499_v52 = vpop.f32.mrb[53].mxu1  ;;  %v5298_v57 = vpop.permute.xlu1 %5297 }
 0x6df   : > { %v5482_v6 = vsel %vm15132_vm0, %v5218_v37, %v5298_v57  ;;  %v5220_v15 = vpop.permute.xlu0 %5219 }
 0x6e0   : > { %8642 = vmatprep.mubr.msk.f32.mxu1 %vm15133_vm8, %v5482_v6  ;;  %vm13538_vm8 = vmand %vm6198_vm9, %vm6208_vm14 }
 0x6e2   : > { %v5300_v48 = vpop.permute.xlu1 %5299 }
 0x6e3   : > { %v5483_v3 = vsel %vm15134_vm10, %v5220_v15, %v5300_v48  ;;  %v5140_v5 = vpop.permute.xlu0 %5139 }
 0x6e4   : > { %v5442_v24 = vsel %vm15125_vm12, %v9739_v0, %v5140_v5  ;;  %8643 = vmatmul.mubr.msk.f32.gmra.mrb[66].mxu1 %vm15135_vm13, %v5483_v3  ;;  %vm6199_vm12 = vcmp.ge.s32.totalorder %v6189_v50, 0  ;;  %vm6209_vm13 = vcmp.lt.s32.totalorder %v6189_v50, 16 }
 0x6e5   : > { %v5463_v39 = vsel %vm5443_vm1, %v5442_v24, %v5220_v15  ;;  %vm6197_vm1 = vcmp.ge.s32.totalorder %v13517_v21, 0 }
 0x6e6   : > { %5955 = vmatprep.mubr.f32.mxu0 %v5463_v39  ;;  %v4980_v1 = vpop.permute.xlu1 %4979  ;;  %vm13525_vm15 = vmand %vm6197_vm1, %vm6207_vm6 }
 0x6e7   : > { %v5401_v23 = vsel %vm1745_vm7, %v15136_v35, %v4980_v1  ;;  %vm13553_vm6 = vmand %vm6199_vm12, %vm6209_vm13 }
 0x6e8   : > { %v5422_v34 = vsel %vm5402_vm5, %v5401_v23, %v9739_v0 }
 0x6e9   : > { %5956 = vmatmul.mubr.f32.gmra.mrb[90].mxu0 %v5422_v34 }
 0x6f7   : > { %v5862_v45 = vpop.f32.mrb[52].mxu0 }
 0x6f8   : > { %v8975_v40 = vadd.f32 %v13515_v38, %v5862_v45  ;;  %v5864_v26 = vpop.f32.mrb[53].mxu0  ;;  %v6191_v45 = vadd.s32 4, %v13517_v21 }
 0x6fa   : > { %v6028_v25 = vadd.f32 %v8975_v40, %v6027_v11 }
 0x6fb   : > { %v5867_v7 = vpop.f32.mrb[54].mxu0 }
 0x6fc   : > { %v6146_v31 = vmul.f32 0.2, %v6028_v25  ;;  %v8976_v59 = vadd.f32 %v13515_v38, %v5867_v7  ;;  %v5869_v9 = vpop.f32.mrb[55].mxu0  ;;  %v13523_v42 = vpop.f32.mrb[54].mxu1  ;;  %vm6126_vm5 = vcmp.ge.f32.partialorder %v6028_v25, 0.0 }
 0x6fd   : > { %v6057_v33 = vpop.f32.mrb[55].mxu1 }
 0x6fe   : > { %v6033_v43 = vadd.f32 %v8976_v59, %v8617_v47  ;;  %v6166_v32 = vsel %vm6126_vm5, %v6028_v25, %v6146_v31 }
 0x6ff   : > { %v5872_v36 = vpop.f32.mrb[56].mxu0  ;;  %v6247_v60 = vsel %vm13525_vm15, %v6166_v32, 0.0 }
 0x700   : > { %v6147_v58 = vmul.f32 0.2, %v6033_v43  ;;  %v8977_v17 = vadd.f32 %v13515_v38, %v5872_v36  ;;  %v5874_v27 = vpop.f32.mrb[57].mxu0  ;;  %6287 = vrot.lane.b32.xlu0 %v6247_v60, %s10089_s30  ;;  %vm6127_vm11 = vcmp.ge.f32.partialorder %v6033_v43, 0.0 }
 0x701   : > { %v6192_v27 = vadd.s32 5, %v13517_v21 }
 0x702   : > { %v6038_v28 = vadd.f32 %v8977_v17, %v6037_v10  ;;  %v6167_v53 = vsel %vm6127_vm11, %v6033_v43, %v6147_v58  ;;  %vm6210_vm11 = vcmp.lt.s32.totalorder %v6190_v56, 16 }
 0x703   : > { %v5877_v61 = vpop.f32.mrb[58].mxu0  ;;  %v6248_v12 = vsel %vm13525_vm15, %v6167_v53, 0.0  ;;  %vm6200_vm15 = vcmp.ge.s32.totalorder %v6190_v56, 0 }
 0x704   : > { %v6148_v19 = vmul.f32 0.2, %v6038_v28  ;;  %v8978_v44 = vadd.f32 %v13515_v38, %v5877_v61  ;;  %v5879_v16 = vpop.f32.mrb[59].mxu0  ;;  %6289 = vrot.lane.b32.xlu1 %v6248_v12, %s10089_s30  ;;  %vm6128_vm0 = vcmp.ge.f32.partialorder %v6038_v28, 0.0  ;;  %vm13567_vm14 = vmand %vm6200_vm15, %vm6210_vm11 }
 0x706   : > { %v6043_v51 = vadd.f32 %v8978_v44, %v13489_v41  ;;  %v6168_v54 = vsel %vm6128_vm0, %v6038_v28, %v6148_v19 }
 0x707   : > { %v5882_v62 = vpop.f32.mrb[60].mxu0  ;;  %v6249_v8 = vsel %vm13538_vm8, %v6168_v54, 0.0 }
 0x708   : > { %v6149_v47 = vmul.f32 0.2, %v6043_v51  ;;  %v8979_v11 = vadd.f32 %v13515_v38, %v5882_v62  ;;  %v5884_v10 = vpop.f32.mrb[61].mxu0  ;;  %6291 = vrot.lane.b32.xlu0 %v6249_v8, %s10089_s30  ;;  %vm6129_vm10 = vcmp.ge.f32.partialorder %v6043_v51, 0.0 }
 0x709   : > { %v8629_v2 = vpop.f32.mrb[56].mxu1 }
 0x70a   : > { %v6048_v30 = vadd.f32 %v8979_v11, %v13499_v52  ;;  %v6067_v20 = vpop.f32.mrb[57].mxu1  ;;  %v6169_v14 = vsel %vm6129_vm10, %v6043_v51, %v6149_v47  ;;  %vm6211_vm10 = vcmp.lt.s32.totalorder %v6191_v45, 16 }
 0x70b   : > { %v5887_v41 = vpop.f32.mrb[62].mxu0  ;;  %v6250_v63 = vsel %vm13538_vm8, %v6169_v14, 0.0  ;;  %vm6201_vm8 = vcmp.ge.s32.totalorder %v6191_v45, 0 }
 0x70c   : > { %v6150_v37 = vmul.f32 0.2, %v6048_v30  ;;  %v8980_v46 = vadd.f32 %v13515_v38, %v5887_v41  ;;  %v5889_v49 = vpop.f32.mrb[63].mxu0  ;;  %6293 = vrot.lane.b32.xlu1 %v6250_v63, %s10089_s30  ;;  %vm6130_vm1 = vcmp.ge.f32.partialorder %v6048_v30, 0.0  ;;  %vm13581_vm13 = vmand %vm6201_vm8, %vm6211_vm10 }
 0x70e   : > { %v6053_v52 = vadd.f32 %v8980_v46, %v13497_v29  ;;  %v6170_v57 = vsel %vm6130_vm1, %v6048_v30, %v6150_v37 }
 0x70f   : > { %v5892_v6 = vpop.f32.mrb[64].mxu0  ;;  %v6251_v15 = vsel %vm13553_vm6, %v6170_v57, 0.0 }
 0x710   : > { %v6151_v0 = vmul.f32 0.2, %v6053_v52  ;;  %v8981_v48 = vadd.f32 %v13515_v38, %v5892_v6  ;;  %v5894_v3 = vpop.f32.mrb[65].mxu0  ;;  %6295 = vrot.lane.b32.xlu0 %v6251_v15, %s10089_s30  ;;  %vm6131_vm5 = vcmp.ge.f32.partialorder %v6053_v52, 0.0 }
 0x712   : > { %v6058_v5 = vadd.f32 %v8981_v48, %v6057_v33  ;;  %v6171_v24 = vsel %vm6131_vm5, %v6053_v52, %v6151_v0  ;;  %vm6212_vm5 = vcmp.lt.s32.totalorder %v6192_v27, 16 }
 0x713   : > { %v5897_v39 = vpop.f32.mrb[66].mxu0  ;;  %v6252_v29 = vsel %vm13553_vm6, %v6171_v24, 0.0  ;;  %vm6202_vm6 = vcmp.ge.s32.totalorder %v6192_v27, 0 }
 0x714   : > { %v6152_v1 = vmul.f32 0.2, %v6058_v5  ;;  %v8982_v35 = vadd.f32 %v13515_v38, %v5897_v39  ;;  %v5899_v23 = vpop.f32.mrb[67].mxu0  ;;  %6297 = vrot.lane.b32.xlu1 %v6252_v29, %s10089_s30  ;;  %vm6132_vm9 = vcmp.ge.f32.partialorder %v6058_v5, 0.0  ;;  %vm13594_vm11 = vmand %vm6202_vm6, %vm6212_vm5 }
 0x716   : > { %v6063_v40 = vadd.f32 %v8982_v35, %v13523_v42  ;;  %v6172_v26 = vsel %vm6132_vm9, %v6058_v5, %v6152_v1  ;;  %v6194_v35 = vadd.s32 7, %v13517_v21 }
 0x717   : > { %v5902_v25 = vpop.f32.mrb[68].mxu0  ;;  %v6253_v7 = vsel %vm13567_vm14, %v6172_v26, 0.0 }
 0x718   : > { %v6153_v31 = vmul.f32 0.2, %v6063_v40  ;;  %v8983_v59 = vadd.f32 %v13515_v38, %v5902_v25  ;;  %v5904_v9 = vpop.f32.mrb[69].mxu0  ;;  %v8632_v18 = vpop.f32.mrb[58].mxu1  ;;  %6299 = vrot.lane.b32.xlu0 %v6253_v7, %s10089_s30  ;;  %vm6133_vm0 = vcmp.ge.f32.partialorder %v6063_v40, 0.0 }
 0x719   : > { %v6077_v33 = vpop.f32.mrb[59].mxu1 }
 0x71a   : > { %v6068_v13 = vadd.f32 %v8983_v59, %v6067_v20  ;;  %v6173_v43 = vsel %vm6133_vm0, %v6063_v40, %v6153_v31 }
 0x71b   : > { %v5907_v32 = vpop.f32.mrb[70].mxu0  ;;  %v6254_v42 = vsel %vm13567_vm14, %v6173_v43, 0.0 }
 0x71c   : > { %v6154_v36 = vmul.f32 0.2, %v6068_v13  ;;  %v8984_v60 = vadd.f32 %v13515_v38, %v5907_v32  ;;  %v5909_v58 = vpop.f32.mrb[71].mxu0  ;;  %6301 = vrot.lane.b32.xlu1 %v6254_v42, %s10089_s30  ;;  %vm6134_vm12 = vcmp.ge.f32.partialorder %v6068_v13, 0.0 }
 0x71e   : > { %v6073_v28 = vadd.f32 %v8984_v60, %v8629_v2  ;;  %v6174_v53 = vsel %vm6134_vm12, %v6068_v13, %v6154_v36  ;;  %v6193_v2 = vadd.s32 6, %v13517_v21 }
 0x71f   : > { %v5912_v61 = vpop.f32.mrb[72].mxu0  ;;  %v6255_v12 = vsel %vm13581_vm13, %v6174_v53, 0.0 }
 0x720   : > { %v6155_v19 = vmul.f32 0.2, %v6073_v28  ;;  %v8985_v44 = vadd.f32 %v13515_v38, %v5912_v61  ;;  %v5914_v16 = vpop.f32.mrb[73].mxu0  ;;  %6303 = vrot.lane.b32.xlu0 %v6255_v12, %s10089_s30  ;;  %vm6135_vm1 = vcmp.ge.f32.partialorder %v6073_v28, 0.0  ;;  %vm6203_vm14 = vcmp.ge.s32.totalorder %v6193_v2, 0 }
 0x721   : > { %vm6213_vm0 = vcmp.lt.s32.totalorder %v6193_v2, 16  ;;  %v7173_v16 = vld [vmem:[%s14890_s7 + $0x88] sm:$0xff] }
 0x722   : > { %v6078_v55 = vadd.f32 %v8985_v44, %v6077_v33  ;;  %v6175_v50 = vsel %vm6135_vm1, %v6073_v28, %v6155_v19  ;;  %vm13607_vm10 = vmand %vm6203_vm14, %vm6213_vm0  ;;  %vm6214_vm1 = vcmp.lt.s32.totalorder %v6194_v35, 16  ;;  %v7172_v44 = vld [vmem:[%s14890_s7 + $0x80] sm:$0xff] }
 0x723   : > { %v5917_v51 = vpop.f32.mrb[74].mxu0  ;;  %v6256_v54 = vsel %vm13581_vm13, %v6175_v50, 0.0  ;;  %vm6204_vm13 = vcmp.ge.s32.totalorder %v6194_v35, 0  ;;  %v8837_v50 = vpack.c.bf16 %v7173_v16, %v7172_v44  ;;  %v7167_v35 = vld [vmem:[%s14890_s7 + $0x58] sm:$0xff] }
 0x724   : > { %v6156_v62 = vmul.f32 0.2, %v6078_v55  ;;  %v8986_v8 = vadd.f32 %v13515_v38, %v5917_v51  ;;  %v5919_v47 = vpop.f32.mrb[75].mxu0  ;;  %6305 = vrot.lane.b32.xlu1 %v6256_v54, %s10089_s30  ;;  %vm6136_vm15 = vcmp.ge.f32.partialorder %v6078_v55, 0.0  ;;  %v7157_v51 = vld [vmem:[%s14890_s7 + $0x8] sm:$0xff] }
 0x725   : > { %v8635_v10 = vpop.f32.mrb[60].mxu1  ;;  %8838 = vmatprep.subr.bf16.mxu1 %v8837_v50  ;;  %v7158_v47 = vld [vmem:[%s14890_s7 + $0x10] sm:$0xff] }
 0x726   : > { %v6083_v30 = vadd.f32 %v8986_v8, %v8632_v18  ;;  %v6087_v20 = vpop.f32.mrb[61].mxu1  ;;  %v6176_v14 = vsel %vm6136_vm15, %v6078_v55, %v6156_v62  ;;  %vm6224_vm15 = vmand %vm6204_vm13, %vm6214_vm1  ;;  %v7156_v55 = vld [vmem:[%s14890_s7] sm:$0xff]  ;;  %v7174_v62 = vld [vmem:[%s14890_s7 + $0x90] sm:$0xff] }
 0x727   : > { %v5922_v41 = vpop.f32.mrb[76].mxu0  ;;  %v6257_v63 = vsel %vm13594_vm11, %v6176_v14, 0.0  ;;  %v8839_v54 = vpack.c.bf16 %v7157_v51, %v7156_v55  ;;  %v7175_v8 = vld [vmem:[%s14890_s7 + $0x98] sm:$0xff]  ;;  %v7160_v14 = vld [vmem:[%s14890_s7 + $0x20] sm:$0xff] }
 0x728   : > { %v6157_v37 = vmul.f32 0.2, %v6083_v30  ;;  %v8987_v46 = vadd.f32 %v13515_v38, %v5922_v41  ;;  %v5924_v49 = vpop.f32.mrb[77].mxu0  ;;  %6307 = vrot.lane.b32.xlu0 %v6257_v63, %s10089_s30  ;;  %vm6137_vm9 = vcmp.ge.f32.partialorder %v6083_v30, 0.0  ;;  %v8841_v11 = vpack.c.bf16 %v7175_v8, %v7174_v62  ;;  %v7161_v63 = vld [vmem:[%s14890_s7 + $0x28] sm:$0xff] }
 0x729   : > { %8840 = vmatpush3.bf16.msra.mxu1 %v8839_v54  ;;  %v7179_v49 = vld [vmem:[%s14890_s7 + $0xb8] sm:$0xff] }
 0x72a   : > { %v6088_v22 = vadd.f32 %v8987_v46, %v6087_v20  ;;  %v6177_v56 = vsel %vm6137_vm9, %v6083_v30, %v6157_v37  ;;  %8842 = vmatprep.subr.bf16.mxu1 %v8841_v11  ;;  %v7176_v30 = vld [vmem:[%s14890_s7 + $0xa0] sm:$0xff]  ;;  %v7177_v20 = vld [vmem:[%s14890_s7 + $0xa8] sm:$0xff]  ;;  %v8847_v37 = vpack.c.bf16 %v7161_v63, %v7160_v14  ;;  %v7178_v46 = vld [vmem:[%s14890_s7 + $0xb0] sm:$0xff] }
 0x72b   : > { %v5927_v52 = vpop.f32.mrb[78].mxu0  ;;  %v6258_v57 = vsel %vm13594_vm11, %v6177_v56, 0.0  ;;  %v8845_v41 = vpack.c.bf16 %v7177_v20, %v7176_v30  ;;  %v8849_v56 = vpack.c.bf16 %v7179_v49, %v7178_v46  ;;  %vm6347_vm11 = vcmask 818720  }
 0x72c   : > { %v6158_v6 = vmul.f32 0.2, %v6088_v22  ;;  %v8988_v15 = vadd.f32 %v13515_v38, %v5927_v52  ;;  %v5929_v0 = vpop.f32.mrb[79].mxu0  ;;  %6309 = vrot.lane.b32.xlu1 %v6258_v57, %s10089_s30  ;;  %vm6138_vm8 = vcmp.ge.f32.partialorder %v6088_v22, 0.0  ;;  %v7163_v52 = vld [vmem:[%s14890_s7 + $0x38] sm:$0xff] }
 0x72d   : > { %v7164_v0 = vld [vmem:[%s14890_s7 + $0x40] sm:$0xff] }
 0x72e   : > { %v6093_v3 = vadd.f32 %v8988_v15, %v8635_v10  ;;  %v6178_v5 = vsel %vm6138_vm8, %v6088_v22, %v6158_v6  ;;  %v7159_v10 = vld [vmem:[%s14890_s7 + $0x18] sm:$0xff]  ;;  %v7162_v22 = vld [vmem:[%s14890_s7 + $0x30] sm:$0xff]  ;;  %v7180_v6 = vld [vmem:[%s14890_s7 + $0xc0] sm:$0xff] }
 0x72f   : > { %v5932_v24 = vpop.f32.mrb[80].mxu0  ;;  %v6259_v39 = vsel %vm13607_vm10, %v6178_v5, 0.0  ;;  %v8843_v2 = vpack.c.bf16 %v7159_v10, %v7158_v47  ;;  %v8851_v57 = vpack.c.bf16 %v7163_v52, %v7162_v22  ;;  %v7181_v15 = vld [vmem:[%s14890_s7 + $0xc8] sm:$0xff] }
 0x730   : > { %v6159_v29 = vmul.f32 0.2, %v6093_v3  ;;  %v5934_v1 = vpop.f32.mrb[81].mxu0  ;;  %6311 = vrot.lane.b32.xlu0 %v6259_v39, %s10089_s30  ;;  %vm6139_vm12 = vcmp.ge.f32.partialorder %v6093_v3, 0.0  ;;  %v8989_v40 = vadd.f32 %v13515_v38, %v5932_v24  ;;  %v8853_v48 = vpack.c.bf16 %v7181_v15, %v7180_v6  ;;  %v7182_v24 = vld [vmem:[%s14890_s7 + $0xd0] sm:$0xff]  ;;  %v7183_v39 = vld [vmem:[%s14890_s7 + $0xd8] sm:$0xff] }
 0x731   : > { %8844 = vmatpush3.bf16.msra.mxu1 %v8843_v2  ;;  %v8857_v1 = vpack.c.bf16 %v7183_v39, %v7182_v24  ;;  %v7205_v6 = vld [vmem:[%s14890_s7 + $0x188] sm:$0xff] }
 0x732   : > { %v6179_v23 = vsel %vm6139_vm12, %v6093_v3, %v6159_v29  ;;  %8846 = vmatprep.subr.bf16.mxu1 %v8845_v41  ;;  %v7165_v3 = vld [vmem:[%s14890_s7 + $0x48] sm:$0xff]  ;;  %v7166_v29 = vld [vmem:[%s14890_s7 + $0x50] sm:$0xff] }
 0x733   : > { %v5937_v34 = vpop.f32.mrb[82].mxu0  ;;  %v6260_v45 = vsel %vm13607_vm10, %v6179_v23, 0.0  ;;  %v8855_v5 = vpack.c.bf16 %v7165_v3, %v7164_v0  ;;  %v8859_v23 = vpack.c.bf16 %v7167_v35, %v7166_v29  ;;  %v6195_v35 = vadd.s32 8, %v13517_v21 }
 0x734   : > { %v8990_v26 = vadd.f32 %v13515_v38, %v5937_v34  ;;  %v5939_v25 = vpop.f32.mrb[83].mxu0  ;;  %v8638_v7 = vpop.f32.mrb[62].mxu1  ;;  %6313 = vrot.lane.b32.xlu1 %v6260_v45, %s10089_s30  ;;  %v7184_v34 = vld [vmem:[%s14890_s7 + $0xe0] sm:$0xff]  ;;  %v7185_v45 = vld [vmem:[%s14890_s7 + $0xe8] sm:$0xff] }
 0x735   : > { %v6097_v31 = vpop.f32.mrb[63].mxu1  ;;  %8848 = vmatpush3.bf16.msra.mxu1 %v8847_v37  ;;  %v7169_v25 = vld [vmem:[%s14890_s7 + $0x68] sm:$0xff]  ;;  %vm6205_vm9 = vcmp.ge.s32.totalorder %v6195_v35, 0  ;;  %vm6215_vm14 = vcmp.lt.s32.totalorder %v6195_v35, 16 }
 0x736   : > { %v6103_v59 = vadd.f32 %v8990_v26, %v8638_v7  ;;  %v6098_v9 = vadd.f32 %v8989_v40, %v6097_v31  ;;  %8850 = vmatprep.subr.bf16.mxu1 %v8849_v56  ;;  %v7168_v40 = vld [vmem:[%s14890_s7 + $0x60] sm:$0xff]  ;;  %v8861_v26 = vpack.c.bf16 %v7185_v45, %v7184_v34  ;;  %vm6225_vm10 = vmand %vm6205_vm9, %vm6215_vm14 }
 0x737   : > { %v8863_v7 = vpack.c.bf16 %v7169_v25, %v7168_v40 }
 0x738   : > { %vm6141_vm6 = vcmp.ge.f32.partialorder %v6103_v59, 0.0  ;;  %v6161_v18 = vmul.f32 0.2, %v6103_v59  ;;  %vm6140_vm5 = vcmp.ge.f32.partialorder %v6098_v9, 0.0  ;;  %v6160_v33 = vmul.f32 0.2, %v6098_v9 }
 0x739   : > { %8852 = vmatpush3.bf16.msra.mxu1 %v8851_v57  ;;  %v7204_v57 = vld [vmem:[%s14890_s7 + $0x180] sm:$0xff] }
 0x73a   : > { %v6181_v13 = vsel %vm6141_vm6, %v6103_v59, %v6161_v18  ;;  %v6180_v43 = vsel %vm6140_vm5, %v6098_v9, %v6160_v33  ;;  %8854 = vmatprep.subr.bf16.mxu1 %v8853_v48  ;;  %v7186_v59 = vld [vmem:[%s14890_s7 + $0xf0] sm:$0xff]  ;;  %v7187_v9 = vld [vmem:[%s14890_s7 + $0xf8] sm:$0xff]  ;;  %v8869_v15 = vpack.c.bf16 %v7205_v6, %v7204_v57 }
 0x73b   : > { %v6262_v32 = vsel %vm6224_vm15, %v6181_v13, 0.0  ;;  %v6261_v42 = vsel %vm6224_vm15, %v6180_v43, 0.0  ;;  %v7170_v18 = vld [vmem:[%s14890_s7 + $0x70] sm:$0xff]  ;;  %v8865_v33 = vpack.c.bf16 %v7187_v9, %v7186_v59  ;;  %v7171_v13 = vld [vmem:[%s14890_s7 + $0x78] sm:$0xff]  ;;  %vm15155_vm15 = vcmask 818176  }
 0x73c   : > { %6317 = vrot.lane.b32.xlu1 %v6262_v32, %s10089_s30  ;;  %6315 = vrot.lane.b32.xlu0 %v6261_v42, %s10089_s30  ;;  %v8867_v32 = vpack.c.bf16 %v7171_v13, %v7170_v18  ;;  %v7238_v57 = vld [vmem:[%s14890_s7 + $0x290] sm:$0xff]  ;;  %v7239_v6 = vld [vmem:[%s14890_s7 + $0x298] sm:$0xff]  ;;  %vm15156_vm9 = vmmov %vm15155_vm15 }
 0x73d   : > { %8856 = vmatpush3.bf16.msra.mxu1 %v8855_v5  ;;  %vm15157_vm14 = vmmov %vm15156_vm9 }
 0x73e   : > { %8858 = vmatprep.subr.bf16.mxu1 %v8857_v1 }
 0x741   : > { %v5942_v36 = vpop.f32.mrb[84].mxu0  ;;  %8860 = vmatpush3.bf16.msra.mxu1 %v8859_v23 }
 0x742   : > { %v5944_v60 = vpop.f32.mrb[85].mxu0  ;;  %v8991_v58 = vadd.f32 %v13515_v38, %v5942_v36  ;;  %8862 = vmatprep.subr.bf16.mxu1 %v8861_v26 }
 0x745   : > { %v5947_v17 = vpop.f32.mrb[86].mxu0  ;;  %v8641_v27 = vpop.f32.mrb[64].mxu1  ;;  %8864 = vmatpush3.bf16.msra.mxu1 %v8863_v7 }
 0x746   : > { %v8992_v28 = vadd.f32 %v13515_v38, %v5947_v17  ;;  %v5949_v53 = vpop.f32.mrb[87].mxu0  ;;  %v6107_v61 = vpop.f32.mrb[65].mxu1  ;;  %8866 = vmatprep.subr.bf16.mxu1 %v8865_v33 }
 0x747   : > { %v13624_v12 = vadd.f32 %v8991_v58, %v6107_v61 }
 0x748   : > { %v13626_v19 = vadd.f32 %v8992_v28, %v8641_v27 }
 0x749   : > { %8868 = vmatpush3.bf16.msra.mxu1 %v8867_v32  ;;  %v6162_v45 = vmul.f32 0.2, %v13624_v12  ;;  %vm6142_vm8 = vcmp.ge.f32.partialorder %v13624_v12, 0.0 }
 0x74a   : > { %8870 = vmatprep.subr.bf16.mxu1 %v8869_v15  ;;  %v6163_v34 = vmul.f32 0.2, %v13626_v19  ;;  %vm6143_vm0 = vcmp.ge.f32.partialorder %v13626_v19, 0.0  ;;  %v7222_v15 = vld [vmem:[%s14890_s7 + $0x210] sm:$0xff] }
 0x74c   : > { %v6183_v13 = vsel %vm6143_vm0, %v13626_v19, %v6163_v34  ;;  %v7241_v34 = vld [vmem:[%s14890_s7 + $0x2a8] sm:$0xff]  ;;  %vm15158_vm0 = vmmov %vm15156_vm9 }
 0x74d   : > { %v6264_v32 = vsel %vm6225_vm10, %v6183_v13, 0.0  ;;  %v7243_v13 = vld [vmem:[%s14890_s7 + $0x2b8] sm:$0xff] }
 0x772   : > { %v6288_v31 = vpop.permute.xlu0 %6287 }
 0x773   : > { %6348 = vst.msk [vmem:[#allocation2 + $0x49] sm:$0xff] %vm6347_vm11, %v6288_v31 }
 0x776   : > { %v6290_v43 = vpop.permute.xlu1 %6289 }
 0x777   : > { %6349 = vst.msk [vmem:[#allocation2 + $0x51] sm:$0xff] %vm6347_vm11, %v6290_v43  ;;  %v6182_v43 = vsel %vm6142_vm8, %v13624_v12, %v6162_v45  ;;  %vm15159_vm8 = vmmov %vm15158_vm0 }
 0x77a   : > { %v6292_v42 = vpop.permute.xlu0 %6291  ;;  %v6384_v36 = vld [vmem:[#allocation2 + $0x49] sm:$0xff] }
 0x77b   : > { %6350 = vst.msk [vmem:[#allocation2 + $0x61] sm:$0xff] %vm6347_vm11, %v6292_v42  ;;  %v6263_v42 = vsel %vm6225_vm10, %v6182_v43, 0.0  ;;  %vm15160_vm10 = vmmov %vm15158_vm0 }
 0x77e   : > { %v6294_v60 = vpop.permute.xlu1 %6293  ;;  %v6400_v58 = vld [vmem:[#allocation2 + $0x4a] sm:$0xff]  ;;  %v6401_v17 = vld [vmem:[#allocation2 + $0x52] sm:$0xff] }
 0x77f   : > { %v6385_v27 = vld [vmem:[#allocation2 + $0x51] sm:$0xff]  ;;  %v9745_v28 = vpack.i.bf16 %v6401_v17, %v6400_v58  ;;  %6351 = vst.msk [vmem:[#allocation2 + $0x69] sm:$0xff] %vm6347_vm11, %v6294_v60 }
 0x780   : > { %v9740_v53 = vpack.i.bf16 %v6385_v27, %v6384_v36 }
 0x781   : > { %9746 = vrot.lane.b32.xlu1 %v9745_v28, %s15151_s17 }
 0x782   : > { %9741 = vrot.lane.b32.xlu0 %v9740_v53, %s10093_s27  ;;  %v6296_v61 = vpop.permute.xlu0 %6295  ;;  %v6386_v44 = vld [vmem:[#allocation2 + $0x61] sm:$0xff] }
 0x783   : > { %6352 = vst.msk [vmem:[#allocation2 + $0x79] sm:$0xff] %vm6347_vm11, %v6296_v61  ;;  %v13812_v61 = vld [vmem:[#allocation2 + $0x60] sm:$0xff] }
 0x786   : > { %v6298_v16 = vpop.permute.xlu1 %6297  ;;  %v6402_v55 = vld [vmem:[#allocation2 + $0x62] sm:$0xff]  ;;  %v6403_v50 = vld [vmem:[#allocation2 + $0x6a] sm:$0xff] }
 0x787   : > { %v6387_v51 = vld [vmem:[#allocation2 + $0x69] sm:$0xff]  ;;  %6353 = vst.msk [vmem:[#allocation2 + $0x81] sm:$0xff] %vm6347_vm11, %v6298_v16  ;;  %v13732_v54 = vpack.i.bf16 %v6403_v50, %v6402_v55  ;;  %v7236_v16 = vld [vmem:[%s14890_s7 + $0x280] sm:$0xff] }
 0x788   : > { %v13734_v62 = vpack.i.bf16 %v6387_v51, %v6386_v44  ;;  %v13806_v12 = vld [vmem:[#allocation2 + $0x68] sm:$0xff] }
 0x789   : > { %9756 = vrot.lane.b32.xlu1 %v13732_v54, %s15151_s17  ;;  %v9805_v44 = vpack.i.bf16 %v13806_v12, %v13812_v61  ;;  %v7237_v55 = vld [vmem:[%s14890_s7 + $0x288] sm:$0xff] }
 0x78a   : > { %9751 = vrot.lane.b32.xlu0 %v13734_v62, %s10093_s27  ;;  %v6300_v8 = vpop.permute.xlu0 %6299  ;;  %v6388_v47 = vld [vmem:[#allocation2 + $0x79] sm:$0xff] }
 0x78b   : > { %6354 = vst.msk [vmem:[#allocation2 + $0x91] sm:$0xff] %vm6347_vm11, %v6300_v8 }
 0x78e   : > { %v6302_v11 = vpop.permute.xlu1 %6301  ;;  %v6404_v10 = vld [vmem:[#allocation2 + $0x7a] sm:$0xff]  ;;  %v6405_v2 = vld [vmem:[#allocation2 + $0x82] sm:$0xff] }
 0x78f   : > { %v6389_v30 = vld [vmem:[#allocation2 + $0x81] sm:$0xff]  ;;  %6355 = vst.msk [vmem:[#allocation2 + $0x99] sm:$0xff] %vm6347_vm11, %v6302_v11  ;;  %v13742_v20 = vpack.i.bf16 %v6405_v2, %v6404_v10 }
 0x790   : > { %v13744_v14 = vpack.i.bf16 %v6389_v30, %v6388_v47  ;;  %v8901_v47 = vpack.c.bf16 %v7237_v55, %v7236_v16  ;;  %v7228_v16 = vld [vmem:[%s14890_s7 + $0x240] sm:$0xff]  ;;  %v7229_v55 = vld [vmem:[%s14890_s7 + $0x248] sm:$0xff] }
 0x791   : > { %9766 = vrot.lane.b32.xlu1 %v13742_v20, %s15151_s17 }
 0x792   : > { %9761 = vrot.lane.b32.xlu0 %v13744_v14, %s10093_s27  ;;  %v6304_v41 = vpop.permute.xlu0 %6303  ;;  %v6390_v63 = vld [vmem:[#allocation2 + $0x91] sm:$0xff]  ;;  %8902 = vmatprep.subr.bf16.mxu0 %v8901_v47 }
 0x793   : > { %6356 = vst.msk [vmem:[#allocation2 + $0xa9] sm:$0xff] %vm6347_vm11, %v6304_v41  ;;  %v7247_v47 = vld [vmem:[%s14890_s7 + $0x2d8] sm:$0xff] }
 0x796   : > { %v6306_v37 = vpop.permute.xlu1 %6305  ;;  %v6406_v46 = vld [vmem:[#allocation2 + $0x92] sm:$0xff]  ;;  %v6407_v49 = vld [vmem:[#allocation2 + $0x9a] sm:$0xff] }
 0x797   : > { %v6391_v22 = vld [vmem:[#allocation2 + $0x99] sm:$0xff]  ;;  %6357 = vst.msk [vmem:[#allocation2 + $0xb1] sm:$0xff] %vm6347_vm11, %v6306_v37  ;;  %v13752_v56 = vpack.i.bf16 %v6407_v49, %v6406_v46  ;;  %v7221_v46 = vld [vmem:[%s14890_s7 + $0x208] sm:$0xff] }
 0x798   : > { %v13754_v52 = vpack.i.bf16 %v6391_v22, %v6390_v63  ;;  %v7220_v37 = vld [vmem:[%s14890_s7 + $0x200] sm:$0xff] }
 0x799   : > { %9776 = vrot.lane.b32.xlu1 %v13752_v56, %s15151_s17  ;;  %v8903_v22 = vpack.c.bf16 %v7221_v46, %v7220_v37  ;;  %v7231_v37 = vld [vmem:[%s14890_s7 + $0x258] sm:$0xff] }
 0x79a   : > { %9771 = vrot.lane.b32.xlu0 %v13754_v52, %s10093_s27  ;;  %v6308_v0 = vpop.permute.xlu0 %6307  ;;  %v6392_v48 = vld [vmem:[#allocation2 + $0xa9] sm:$0xff] }
 0x79b   : > { %6358 = vst.msk [vmem:[#allocation2 + $0xc1] sm:$0xff] %vm6347_vm11, %v6308_v0  ;;  %v13851_v0 = vld [vmem:[#allocation2 + $0x78] sm:$0xff]  ;;  %8904 = vmatpush3.bf16.msra.mxu0 %v8903_v22  ;;  %v13941_v46 = vld [vmem:[#allocation2 + $0xa8] sm:$0xff] }
 0x79e   : > { %v6310_v3 = vpop.permute.xlu1 %6309  ;;  %v13767_v5 = vld [vmem:[#allocation2 + $0xaa] sm:$0xff]  ;;  %v6409_v24 = vld [vmem:[#allocation2 + $0xb2] sm:$0xff] }
 0x79f   : > { %v6393_v39 = vld [vmem:[#allocation2 + $0xb1] sm:$0xff]  ;;  %6359 = vst.msk [vmem:[#allocation2 + $0xc9] sm:$0xff] %vm6347_vm11, %v6310_v3  ;;  %v13771_v29 = vpack.i.bf16 %v6409_v24, %v13767_v5 }
 0x7a0   : > { %v13773_v1 = vpack.i.bf16 %v6393_v39, %v6392_v48  ;;  %v8905_v48 = vpack.c.bf16 %v7239_v6, %v7238_v57  ;;  %v7223_v3 = vld [vmem:[%s14890_s7 + $0x218] sm:$0xff]  ;;  %v7248_v57 = vld [vmem:[%s14890_s7 + $0x2e0] sm:$0xff]  ;;  %v7249_v6 = vld [vmem:[%s14890_s7 + $0x2e8] sm:$0xff] }
 0x7a1   : > { %9786 = vrot.lane.b32.xlu1 %v13771_v29, %s15151_s17  ;;  %v8907_v39 = vpack.c.bf16 %v7223_v3, %v7222_v15  ;;  %v8925_v15 = vpack.c.bf16 %v7249_v6, %v7248_v57  ;;  %v7233_v3 = vld [vmem:[%s14890_s7 + $0x268] sm:$0xff]  ;;  %v7210_v57 = vld [vmem:[%s14890_s7 + $0x1b0] sm:$0xff]  ;;  %v7211_v6 = vld [vmem:[%s14890_s7 + $0x1b8] sm:$0xff] }
 0x7a2   : > { %9781 = vrot.lane.b32.xlu0 %v13773_v1, %s10093_s27  ;;  %v6312_v23 = vpop.permute.xlu0 %6311  ;;  %v6394_v26 = vld [vmem:[#allocation2 + $0xc1] sm:$0xff]  ;;  %8906 = vmatprep.subr.bf16.mxu0 %v8905_v48 }
 0x7a3   : > { %6360 = vst.msk [vmem:[#allocation2 + $0xd9] sm:$0xff] %vm6347_vm11, %v6312_v23  ;;  %v7240_v23 = vld [vmem:[%s14890_s7 + $0x2a0] sm:$0xff]  ;;  %8908 = vmatpush3.bf16.msra.mxu0 %v8907_v39 }
 0x7a4   : > { %v7232_v48 = vld [vmem:[%s14890_s7 + $0x260] sm:$0xff] }
 0x7a5   : > { %v5952_v40 = vpop.f32.mrb[88].mxu0  ;;  %v8927_v39 = vpack.c.bf16 %v7233_v3, %v7232_v48 }
 0x7a6   : > { %v5954_v25 = vpop.f32.mrb[89].mxu0  ;;  %v6314_v7 = vpop.permute.xlu1 %6313  ;;  %v6410_v31 = vld [vmem:[#allocation2 + $0xc2] sm:$0xff]  ;;  %v6411_v59 = vld [vmem:[#allocation2 + $0xca] sm:$0xff]  ;;  %v8993_v11 = vadd.f32 %v13515_v38, %v5952_v40 }
 0x7a7   : > { %v6395_v9 = vld [vmem:[#allocation2 + $0xc9] sm:$0xff]  ;;  %6361 = vst.msk [vmem:[#allocation2 + $0xe1] sm:$0xff] %vm6347_vm11, %v6314_v7  ;;  %v13786_v18 = vpack.i.bf16 %v6411_v59, %v6410_v31  ;;  %v7224_v25 = vld [vmem:[%s14890_s7 + $0x220] sm:$0xff]  ;;  %v6196_v31 = vadd.s32 9, %v13517_v21 }
 0x7a8   : > { %v13788_v33 = vpack.i.bf16 %v6395_v9, %v6394_v26  ;;  %v8909_v26 = vpack.c.bf16 %v7241_v34, %v7240_v23  ;;  %v7225_v7 = vld [vmem:[%s14890_s7 + $0x228] sm:$0xff]  ;;  %v7242_v9 = vld [vmem:[%s14890_s7 + $0x2b0] sm:$0xff]  ;;  %v7251_v34 = vld [vmem:[%s14890_s7 + $0x2f8] sm:$0xff] }
 0x7a9   : > { %9796 = vrot.lane.b32.xlu1 %v13786_v18, %s15151_s17  ;;  %v8911_v59 = vpack.c.bf16 %v7225_v7, %v7224_v25  ;;  %v7226_v21 = vld [vmem:[%s14890_s7 + $0x230] sm:$0xff]  ;;  %vm6206_vm13 = vcmp.ge.s32.totalorder %v6196_v31, 0  ;;  %vm6216_vm1 = vcmp.lt.s32.totalorder %v6196_v31, 16  ;;  %v7235_v25 = vld [vmem:[%s14890_s7 + $0x278] sm:$0xff]  ;;  %v13979_v7 = vld [vmem:[#allocation2 + $0xc0] sm:$0xff] }
 0x7aa   : > { %9791 = vrot.lane.b32.xlu0 %v13788_v33, %s10093_s27  ;;  %v6396_v36 = vld [vmem:[#allocation2 + $0xd9] sm:$0xff]  ;;  %8910 = vmatprep.subr.bf16.mxu0 %v8909_v26  ;;  %vm13910_vm6 = vmand %vm6206_vm13, %vm6216_vm1  ;;  %v7250_v23 = vld [vmem:[%s14890_s7 + $0x2f0] sm:$0xff] }
 0x7ab   : > { %8912 = vmatpush3.bf16.msra.mxu0 %v8911_v59  ;;  %v7234_v26 = vld [vmem:[%s14890_s7 + $0x270] sm:$0xff]  ;;  %vm15162_vm13 = vmmov %vm15158_vm0 }
 0x7ac   : > { %v8931_v31 = vpack.c.bf16 %v7235_v25, %v7234_v26  ;;  %v7195_v26 = vld [vmem:[%s14890_s7 + $0x138] sm:$0xff]  ;;  %v7212_v25 = vld [vmem:[%s14890_s7 + $0x1c0] sm:$0xff]  ;;  %vm15163_vm1 = vmmov %vm15158_vm0 }
 0x7ad   : > { %6321 = vrot.lane.b32.xlu1 %v6264_v32, %s10089_s30  ;;  %v13886_v32 = vld [vmem:[#allocation2 + $0x98] sm:$0xff] }
 0x7ae   : > { %6319 = vrot.lane.b32.xlu0 %v6263_v42, %s10089_s30  ;;  %v6318_v60 = vpop.permute.xlu1 %6317  ;;  %v6316_v58 = vpop.permute.xlu0 %6315  ;;  %v6412_v17 = vld [vmem:[#allocation2 + $0xda] sm:$0xff]  ;;  %v6413_v27 = vld [vmem:[#allocation2 + $0xe2] sm:$0xff] }
 0x7af   : > { %v6397_v28 = vld [vmem:[#allocation2 + $0xe1] sm:$0xff]  ;;  %6363 = vst.msk [vmem:[#allocation2 + $0xf9] sm:$0xff] %vm6347_vm11, %v6318_v60  ;;  %6362 = vst.msk [vmem:[#allocation2 + $0xf1] sm:$0xff] %vm6347_vm11, %v6316_v58  ;;  %v13802_v19 = vpack.i.bf16 %v6413_v27, %v6412_v17  ;;  %v7227_v42 = vld [vmem:[%s14890_s7 + $0x238] sm:$0xff] }
 0x7b0   : > { %v13804_v53 = vpack.i.bf16 %v6397_v28, %v6396_v36  ;;  %v13896_v36 = vld [vmem:[#allocation2 + $0x90] sm:$0xff]  ;;  %v7244_v58 = vld [vmem:[%s14890_s7 + $0x2c0] sm:$0xff]  ;;  %v7245_v17 = vld [vmem:[%s14890_s7 + $0x2c8] sm:$0xff] }
 0x7b1   : > { %9811 = vrot.lane.b32.xlu1 %v13802_v19, %s15151_s17  ;;  %v13900_v60 = vpack.i.bf16 %v13886_v32, %v13896_v36  ;;  %v13989_v59 = vld [vmem:[#allocation2 + $0xe0] sm:$0xff] }
 0x7b2   : > { %9801 = vrot.lane.b32.xlu0 %v13804_v53, %s10093_s27 }
 0x7b5   : > { %9816 = vrot.lane.b32.xlu1 %v13734_v62, %s10077_s25  ;;  %v13830_v62 = vld [vmem:[#allocation2 + $0x80] sm:$0xff] }
 0x7b6   : > { %9806 = vrot.lane.b32.xlu0 %v9805_v44, %s10094_s22  ;;  %v6414_v50 = vld [vmem:[#allocation2 + $0xf2] sm:$0xff]  ;;  %v6415_v51 = vld [vmem:[#allocation2 + $0xfa] sm:$0xff]  ;;  %v13858_v24 = vpack.i.bf16 %v13830_v62, %v13851_v0  ;;  %v8917_v44 = vpack.c.bf16 %v7245_v17, %v7244_v58 }
 0x7b7   : > { %v6398_v8 = vld [vmem:[#allocation2 + $0xf1] sm:$0xff]  ;;  %v8644_v10 = vpop.f32.mrb[66].mxu1  ;;  %v13826_v2 = vpack.i.bf16 %v6415_v51, %v6414_v50  ;;  %v6399_v30 = vld [vmem:[#allocation2 + $0xf9] sm:$0xff]  ;;  %v8919_v50 = vpack.c.bf16 %v7229_v55, %v7228_v16 }
 0x7b8   : > { %v6117_v41 = vpop.f32.mrb[67].mxu1  ;;  %v13828_v63 = vpack.i.bf16 %v6399_v30, %v6398_v8  ;;  %v7246_v8 = vld [vmem:[%s14890_s7 + $0x2d0] sm:$0xff]  ;;  %v7191_v16 = vld [vmem:[%s14890_s7 + $0x118] sm:$0xff]  ;;  %v7208_v55 = vld [vmem:[%s14890_s7 + $0x1a0] sm:$0xff] }
 0x7b9   : > { %v6118_v49 = vadd.f32 %v8993_v11, %v6117_v41  ;;  %9831 = vrot.lane.b32.xlu1 %v13826_v2, %s15151_s17  ;;  %v8921_v30 = vpack.c.bf16 %v7247_v47, %v7246_v8  ;;  %v7230_v41 = vld [vmem:[%s14890_s7 + $0x250] sm:$0xff]  ;;  %s10096_s17 = smov 60  }
 0x7ba   : > { %9821 = vrot.lane.b32.xlu0 %v13828_v63, %s10093_s27  ;;  %v6369_v47 = vld [vmem:[#allocation2 + $0x50] sm:$0xff] }
 0x7bb   : > { %v6164_v43 = vmul.f32 0.2, %v6118_v49  ;;  %vm6144_vm12 = vcmp.ge.f32.partialorder %v6118_v49, 0.0 }
 0x7bc   : > { %v5957_v35 = vpop.f32.mrb[90].mxu0 }
 0x7bd   : > { %v8994_v45 = vadd.f32 %v13515_v38, %v5957_v35  ;;  %v5959_v40 = vpop.f32.mrb[91].mxu0  ;;  %9836 = vrot.lane.b32.xlu1 %v13858_v24, %s10094_s22  ;;  %v6184_v27 = vsel %vm6144_vm12, %v6118_v49, %v6164_v43  ;;  %v8923_v49 = vpack.c.bf16 %v7231_v37, %v7230_v41  ;;  %v7206_v43 = vld [vmem:[%s14890_s7 + $0x190] sm:$0xff]  ;;  %v7193_v41 = vld [vmem:[%s14890_s7 + $0x128] sm:$0xff]  ;;  %vm15161_vm12 = vmmov %vm15158_vm0 }
 0x7be   : > { %9826 = vrot.lane.b32.xlu0 %v13732_v54, %s10095_s29  ;;  %v8913_v54 = vpack.c.bf16 %v7243_v13, %v7242_v9  ;;  %v6265_v51 = vsel %vm13910_vm6, %v6184_v27, 0.0  ;;  %v8929_v40 = vpack.c.bf16 %v7251_v34, %v7250_v23  ;;  %v8881_v34 = vpack.c.bf16 %v7211_v6, %v7210_v57 }
 0x7bf   : > { %v6123_v38 = vadd.f32 %v8994_v45, %v8644_v10  ;;  %v13931_v10 = vld [vmem:[#allocation2 + $0xb0] sm:$0xff]  ;;  %v13969_v45 = vld [vmem:[#allocation2 + $0xc8] sm:$0xff] }
 0x7c0   : > { %8914 = vmatprep.subr.bf16.mxu0 %v8913_v54  ;;  %v9865_v22 = vpack.i.bf16 %v13931_v10, %v13941_v46  ;;  %v7207_v54 = vld [vmem:[%s14890_s7 + $0x198] sm:$0xff] }
 0x7c1   : > { %9846 = vrot.lane.b32.xlu1 %v13742_v20, %s10095_s29  ;;  %v8915_v20 = vpack.c.bf16 %v7227_v42, %v7226_v21  ;;  %v6165_v11 = vmul.f32 0.2, %v6123_v38  ;;  %vm6145_vm5 = vcmp.ge.f32.partialorder %v6123_v38, 0.0  ;;  %v8873_v28 = vpack.c.bf16 %v7207_v54, %v7206_v43  ;;  %v7197_v43 = vld [vmem:[%s14890_s7 + $0x148] sm:$0xff] }
 0x7c2   : > { %9841 = vrot.lane.b32.xlu0 %v13744_v14, %s10077_s25 }
 0x7c3   : > { %8916 = vmatpush3.bf16.msra.mxu0 %v8915_v20 }
 0x7c4   : > { %8918 = vmatprep.subr.bf16.mxu0 %v8917_v44  ;;  %v7190_v44 = vld [vmem:[%s14890_s7 + $0x110] sm:$0xff] }
 0x7c5   : > { %9856 = vrot.lane.b32.xlu1 %v13754_v52, %s10077_s25  ;;  %v8875_v8 = vpack.c.bf16 %v7191_v16, %v7190_v44 }
 0x7c6   : > { %9851 = vrot.lane.b32.xlu0 %v13900_v60, %s10094_s22 }
 0x7c7   : > { %8920 = vmatpush3.bf16.msra.mxu0 %v8919_v50  ;;  %v7209_v50 = vld [vmem:[%s14890_s7 + $0x1a8] sm:$0xff] }
 0x7c8   : > { %8922 = vmatprep.subr.bf16.mxu0 %v8921_v30  ;;  %v7192_v30 = vld [vmem:[%s14890_s7 + $0x120] sm:$0xff] }
 0x7c9   : > { %6323 = vrot.lane.b32.xlu1 %v6265_v51, %s10089_s30 }
 0x7ca   : > { %9861 = vrot.lane.b32.xlu0 %v13752_v56, %s10095_s29  ;;  %v6185_v56 = vsel %vm6145_vm5, %v6123_v38, %v6165_v11  ;;  %v13983_v38 = vpack.i.bf16 %v13969_v45, %v13979_v7  ;;  %v8877_v11 = vpack.c.bf16 %v7209_v50, %v7208_v55  ;;  %vm15165_vm5 = vmmov %vm15158_vm0 }
 0x7cb   : > { %8924 = vmatpush3.bf16.msra.mxu0 %v8923_v49  ;;  %v6266_v35 = vsel %vm13910_vm6, %v6185_v56, 0.0  ;;  %vm15164_vm6 = vmmov %vm15158_vm0 }
 0x7cc   : > { %8926 = vmatprep.subr.bf16.mxu0 %v8925_v15 }
 0x7cd   : > { %9871 = vrot.lane.b32.xlu1 %v13773_v1, %s10077_s25 }
 0x7ce   : > { %9866 = vrot.lane.b32.xlu0 %v9865_v22, %s10094_s22 }
 0x7cf   : > { %8928 = vmatpush3.bf16.msra.mxu0 %v8927_v39  ;;  %v8879_v39 = vpack.c.bf16 %v7193_v41, %v7192_v30 }
 0x7d0   : > { %8930 = vmatprep.subr.bf16.mxu0 %v8929_v40  ;;  %v7194_v40 = vld [vmem:[%s14890_s7 + $0x130] sm:$0xff] }
 0x7d1   : > { %6325 = vrot.lane.b32.xlu1 %v6266_v35, %s10089_s30  ;;  %s15154_s30 = smov 88  }
 0x7d2   : > { %9876 = vrot.lane.b32.xlu0 %v13771_v29, %s10095_s29  ;;  %v13996_v29 = vld [vmem:[#allocation2 + $0xd8] sm:$0xff] }
 0x7d3   : > { %8932 = vmatpush3.bf16.msra.mxu0 %v8931_v31  ;;  %v14000_v9 = vpack.i.bf16 %v13989_v59, %v13996_v29  ;;  %v7213_v31 = vld [vmem:[%s14890_s7 + $0x1c8] sm:$0xff] }
 0x7d4   : > { %8933 = vmatprep.subr.bf16.mxu0 %v15065_v4 }
 0x7d5   : > { %9886 = vrot.lane.b32.xlu1 %v13788_v33, %s10077_s25 }
 0x7d6   : > { %9881 = vrot.lane.b32.xlu0 %v13983_v38, %s10094_s22 }
 0x7d9   : > { %9896 = vrot.lane.b32.xlu1 %v13858_v24, %s15154_s30  ;;  %v14017_v24 = vld [vmem:[#allocation2 + $0xf8] sm:$0xff] }
 0x7da   : > { %9891 = vrot.lane.b32.xlu0 %v13786_v18, %s10095_s29  ;;  %v14015_v18 = vld [vmem:[#allocation2 + $0xf0] sm:$0xff] }
 0x7dd   : > { %9906 = vrot.lane.b32.xlu1 %v14000_v9, %s10094_s22 }
 0x7de   : > { %9901 = vrot.lane.b32.xlu0 %v13744_v14, %s10096_s17  ;;  %v14023_v14 = vpack.i.bf16 %v14017_v24, %v14015_v18 }
 0x7e1   : > { %9916 = vrot.lane.b32.xlu1 %v13802_v19, %s10095_s29 }
 0x7e2   : > { %9911 = vrot.lane.b32.xlu0 %v13804_v53, %s10077_s25 }
 0x7e5   : > { %9926 = vrot.lane.b32.xlu1 %v13754_v52, %s10096_s17  ;;  %v7188_v52 = vld [vmem:[%s14890_s7 + $0x100] sm:$0xff] }
 0x7e6   : > { %9921 = vrot.lane.b32.xlu0 %v13900_v60, %s15154_s30  ;;  %v6368_v60 = vld [vmem:[#allocation2 + $0x48] sm:$0xff] }
 0x7e9   : > { %9931 = vrot.lane.b32.xlu1 %v9865_v22, %s15154_s30 }
 0x7ea   : > { %9936 = vrot.lane.b32.xlu0 %v13773_v1, %s10096_s17  ;;  %v7189_v1 = vld [vmem:[%s14890_s7 + $0x108] sm:$0xff] }
 0x7eb   : > { %v8871_v58 = vpack.c.bf16 %v7189_v1, %v7188_v52  ;;  %v8883_v52 = vpack.c.bf16 %v7195_v26, %v7194_v40  ;;  %v8885_v1 = vpack.c.bf16 %v7213_v31, %v7212_v25 }
 0x7ed   : > { %9946 = vrot.lane.b32.xlu1 %v13828_v63, %s10077_s25 }
 0x7ee   : > { %9941 = vrot.lane.b32.xlu0 %v14023_v14, %s10094_s22 }
 0x7f2   : > { %9951 = vrot.lane.b32.xlu0 %v13826_v2, %s10095_s29 }
 0x7f3   : > { %v14037_v19 = vpop.permute.xlu1 %9746 }
 0x7f4   : > { %v9742_v13 = vpop.permute.xlu0 %9741  ;;  %v9749_v2 = vunpack.i.h.bf16 %v14037_v19  ;;  %v9748_v21 = vunpack.i.l.bf16 %v14037_v19 }
 0x7f5   : > { %v9744_v42 = vunpack.i.h.bf16 %v9742_v13  ;;  %v9743_v20 = vunpack.i.l.bf16 %v9742_v13  ;;  %v7196_v13 = vld [vmem:[%s14890_s7 + $0x140] sm:$0xff] }
 0x7f6   : > { %v8887_v16 = vpack.c.bf16 %v7197_v43, %v7196_v13 }
 0x7f7   : > { %v7041_v17 = vsel %vm3543_vm4, %v9743_v20, %v9748_v21  ;;  %v7025_v27 = vsel %vm15155_vm15, %v6368_v60, %v9743_v20  ;;  %v7042_v51 = vsel %vm3543_vm4, %v9744_v42, %v9749_v2  ;;  %v7026_v22 = vsel %vm15156_vm9, %v6369_v47, %v9744_v42  ;;  %v7214_v60 = vld [vmem:[%s14890_s7 + $0x1d0] sm:$0xff]  ;;  %v7216_v47 = vld [vmem:[%s14890_s7 + $0x1e0] sm:$0xff]  ;;  %vm15166_vm15 = vmmov %vm15158_vm0 }
 0x7f8   : > { %7375 = vmatprep.mubr.f32.mxu1 %v7041_v17  ;;  %vm15167_vm9 = vmmov %vm15158_vm0 }
 0x7f9   : > { %7376 = vmatmul.mubr.f32.vlgmr.msra.gmra.mrb[68].mxu1 %v7025_v27 }
 0x7fa   : > { %7380 = vmatprep.mubr.f32.mxu1 %v7042_v51  ;;  %8872 = vmatpush3.bf16.msra.mxu1 %v8871_v58  ;;  %v7215_v58 = vld [vmem:[%s14890_s7 + $0x1d8] sm:$0xff]  ;;  %v7198_v51 = vld [vmem:[%s14890_s7 + $0x150] sm:$0xff] }
 0x7fb   : > { %8874 = vmatprep.subr.bf16.mxu1 %v8873_v28  ;;  %v14072_v37 = vpop.permute.xlu1 %9756  ;;  %v8889_v50 = vpack.c.bf16 %v7215_v58, %v7214_v60 }
 0x7fc   : > { %v9752_v49 = vpop.permute.xlu0 %9751  ;;  %v9759_v56 = vunpack.i.h.bf16 %v14072_v37  ;;  %v9758_v15 = vunpack.i.l.bf16 %v14072_v37 }
 0x7fd   : > { %v9754_v48 = vunpack.i.h.bf16 %v9752_v49  ;;  %v9753_v3 = vunpack.i.l.bf16 %v9752_v49  ;;  %7381 = vmatmul.mubr.f32.gmra.mrb[70].mxu1 %v7026_v22  ;;  %v7200_v49 = vld [vmem:[%s14890_s7 + $0x160] sm:$0xff]  ;;  %v7201_v22 = vld [vmem:[%s14890_s7 + $0x168] sm:$0xff] }
 0x7fe   : > { %8876 = vmatpush3.bf16.msra.mxu1 %v8875_v8  ;;  %v7199_v8 = vld [vmem:[%s14890_s7 + $0x158] sm:$0xff]  ;;  %v8895_v26 = vpack.c.bf16 %v7201_v22, %v7200_v49 }
 0x7ff   : > { %v7043_v35 = vsel %vm3543_vm4, %v9753_v3, %v9758_v15  ;;  %v7027_v23 = vsel %vm15157_vm14, %v13812_v61, %v9753_v3  ;;  %8878 = vmatprep.subr.bf16.mxu1 %v8877_v11  ;;  %v7044_v61 = vsel %vm3543_vm4, %v9754_v48, %v9759_v56  ;;  %v7028_v20 = vsel %vm15158_vm0, %v13806_v12, %v9754_v48  ;;  %v7217_v11 = vld [vmem:[%s14890_s7 + $0x1e8] sm:$0xff]  ;;  %v7218_v3 = vld [vmem:[%s14890_s7 + $0x1f0] sm:$0xff]  ;;  %vm15168_vm14 = vmmov %vm15158_vm0 }
 0x800   : > { %7385 = vmatprep.mubr.f32.mxu1 %v7043_v35  ;;  %v8891_v30 = vpack.c.bf16 %v7199_v8, %v7198_v51  ;;  %v8893_v41 = vpack.c.bf16 %v7217_v11, %v7216_v47 }
 0x801   : > { %7386 = vmatmul.mubr.f32.gmra.mrb[72].mxu1 %v7027_v23 }
 0x802   : > { %7390 = vmatprep.mubr.f32.mxu1 %v7044_v61  ;;  %8880 = vmatpush3.bf16.msra.mxu1 %v8879_v39  ;;  %v7219_v39 = vld [vmem:[%s14890_s7 + $0x1f8] sm:$0xff]  ;;  %v7202_v61 = vld [vmem:[%s14890_s7 + $0x170] sm:$0xff] }
 0x803   : > { %8882 = vmatprep.subr.bf16.mxu1 %v8881_v34  ;;  %v14109_v54 = vpop.permute.xlu1 %9766  ;;  %v8897_v31 = vpack.c.bf16 %v7219_v39, %v7218_v3 }
 0x804   : > { %v9762_v42 = vpop.permute.xlu0 %9761  ;;  %v9769_v17 = vunpack.i.h.bf16 %v14109_v54  ;;  %v9768_v27 = vunpack.i.l.bf16 %v14109_v54  ;;  %v7264_v54 = vld [vmem:[%s14890_s7 + $0x360] sm:$0xff] }
 0x805   : > { %v9764_v28 = vunpack.i.h.bf16 %v9762_v42  ;;  %v9763_v44 = vunpack.i.l.bf16 %v9762_v42  ;;  %7391 = vmatmul.mubr.f32.gmra.mrb[74].mxu1 %v7028_v20 }
 0x806   : > { %8884 = vmatpush3.bf16.msra.mxu1 %v8883_v52  ;;  %v7203_v52 = vld [vmem:[%s14890_s7 + $0x178] sm:$0xff] }
 0x807   : > { %v7045_v12 = vsel %vm3543_vm4, %v9763_v44, %v9768_v27  ;;  %v7029_v55 = vsel %vm15159_vm8, %v13851_v0, %v9763_v44  ;;  %8886 = vmatprep.subr.bf16.mxu1 %v8885_v1  ;;  %v7046_v0 = vsel %vm3543_vm4, %v9764_v28, %v9769_v17  ;;  %v7030_v48 = vsel %vm15160_vm10, %v13830_v62, %v9764_v28 }
 0x808   : > { %7395 = vmatprep.mubr.f32.mxu1 %v7045_v12  ;;  %v8899_v13 = vpack.c.bf16 %v7203_v52, %v7202_v61  ;;  %vm7090_vm8 = vcmask 949248   ;;  %vm7057_vm10 = vcmask 359424  }
 0x809   : > { %7396 = vmatmul.mubr.f32.gmra.mrb[76].mxu1 %v7029_v55 }
 0x80a   : > { %7400 = vmatprep.mubr.f32.mxu1 %v7046_v0  ;;  %8888 = vmatpush3.bf16.msra.mxu1 %v8887_v16 }
 0x80b   : > { %8890 = vmatprep.subr.bf16.mxu1 %v8889_v50  ;;  %v14147_v57 = vpop.permute.xlu1 %9776 }
 0x80c   : > { %v9772_v6 = vpop.permute.xlu0 %9771  ;;  %v9779_v35 = vunpack.i.h.bf16 %v14147_v57  ;;  %v9778_v23 = vunpack.i.l.bf16 %v14147_v57 }
 0x80d   : > { %v9774_v34 = vunpack.i.h.bf16 %v9772_v6  ;;  %v9773_v40 = vunpack.i.l.bf16 %v9772_v6  ;;  %7401 = vmatmul.mubr.f32.gmra.mrb[78].mxu1 %v7030_v48 }
 0x80e   : > { %8892 = vmatpush3.bf16.msra.mxu1 %v8891_v30 }
 0x80f   : > { %v7047_v62 = vsel %vm3543_vm4, %v9773_v40, %v9778_v23  ;;  %v7031_v25 = vsel %vm15161_vm12, %v13896_v36, %v9773_v40  ;;  %8894 = vmatprep.subr.bf16.mxu1 %v8893_v41  ;;  %v7048_v1 = vsel %vm3543_vm4, %v9774_v34, %v9779_v35  ;;  %v7032_v42 = vsel %vm15162_vm13, %v13886_v32, %v9774_v34 }
 0x810   : > { %7405 = vmatprep.mubr.f32.mxu1 %v7047_v62  ;;  %vm15172_vm12 = vcmask 1043456  }
 0x811   : > { %7406 = vmatmul.mubr.f32.gmra.mrb[80].mxu1 %v7031_v25  ;;  %vm15173_vm13 = vmmov %vm15172_vm12 }
 0x812   : > { %7410 = vmatprep.mubr.f32.mxu1 %v7048_v1  ;;  %8896 = vmatpush3.bf16.msra.mxu1 %v8895_v26 }
 0x813   : > { %8898 = vmatprep.subr.bf16.mxu1 %v8897_v31  ;;  %v14173_v36 = vpop.permute.xlu1 %9786 }
 0x814   : > { %v9782_v43 = vpop.permute.xlu0 %9781  ;;  %v9789_v20 = vunpack.i.h.bf16 %v14173_v36  ;;  %v9788_v60 = vunpack.i.l.bf16 %v14173_v36  ;;  %v6499_v36 = vld [vmem:[#allocation2 + $0x92] sm:$0xff] }
 0x815   : > { %v9784_v58 = vunpack.i.h.bf16 %v9782_v43  ;;  %v9783_v28 = vunpack.i.l.bf16 %v9782_v43  ;;  %7411 = vmatmul.mubr.f32.gmra.mrb[82].mxu1 %v7032_v42 }
 0x816   : > { %8900 = vmatpush3.bf16.msra.mxu1 %v8899_v13 }
 0x817   : > { %v7049_v44 = vsel %vm3543_vm4, %v9783_v28, %v9788_v60  ;;  %v7033_v16 = vsel %vm15163_vm1, %v13941_v46, %v9783_v28  ;;  %8957 = vmatprep.subr.bf16.mxu1 %v15065_v4  ;;  %v7050_v32 = vsel %vm3543_vm4, %v9784_v58, %v9789_v20  ;;  %v7034_v50 = vsel %vm15164_vm6, %v13931_v10, %v9784_v58 }
 0x818   : > { %7415 = vmatprep.mubr.f32.mxu1 %v7049_v44 }
 0x819   : > { %7416 = vmatmul.mubr.f32.gmra.mrb[84].mxu1 %v7033_v16 }
 0x81a   : > { %7420 = vmatprep.mubr.f32.mxu1 %v7050_v32 }
 0x81b   : > { %v14188_v12 = vpop.permute.xlu1 %9796 }
 0x81c   : > { %v9792_v55 = vpop.permute.xlu0 %9791  ;;  %v9799_v51 = vunpack.i.h.bf16 %v14188_v12  ;;  %v9798_v8 = vunpack.i.l.bf16 %v14188_v12 }
 0x81d   : > { %v9794_v46 = vunpack.i.h.bf16 %v9792_v55  ;;  %v9793_v47 = vunpack.i.l.bf16 %v9792_v55  ;;  %7421 = vmatmul.mubr.f32.gmra.mrb[86].mxu1 %v7034_v50 }
 0x81f   : > { %v7051_v11 = vsel %vm3543_vm4, %v9793_v47, %v9798_v8  ;;  %v7035_v0 = vsel %vm15165_vm5, %v13979_v7, %v9793_v47  ;;  %v6322_v30 = vpop.permute.xlu1 %6321  ;;  %v7052_v10 = vsel %vm3543_vm4, %v9794_v46, %v9799_v51  ;;  %v7036_v6 = vsel %vm15166_vm15, %v13969_v45, %v9794_v46 }
 0x820   : > { %v6320_v41 = vpop.permute.xlu0 %6319  ;;  %7425 = vmatprep.mubr.f32.mxu1 %v7051_v11  ;;  %6365 = vst.msk [vmem:[#allocation2 + $0x111] sm:$0xff] %vm6347_vm11, %v6322_v30 }
 0x821   : > { %6364 = vst.msk [vmem:[#allocation2 + $0x109] sm:$0xff] %vm6347_vm11, %v6320_v41  ;;  %7426 = vmatmul.mubr.f32.gmra.mrb[88].mxu1 %v7035_v0 }
 0x822   : > { %7430 = vmatprep.mubr.f32.mxu1 %v7052_v10  ;;  %v7252_v10 = vld [vmem:[%s14890_s7 + $0x300] sm:$0xff] }
 0x823   : > { %v14204_v49 = vpop.permute.xlu1 %9811 }
 0x824   : > { %v9802_v22 = vpop.permute.xlu0 %9801  ;;  %v9814_v7 = vunpack.i.h.bf16 %v14204_v49  ;;  %v9813_v48 = vunpack.i.l.bf16 %v14204_v49 }
 0x825   : > { %v9804_v3 = vunpack.i.h.bf16 %v9802_v22  ;;  %v9803_v39 = vunpack.i.l.bf16 %v9802_v22  ;;  %7431 = vmatmul.mubr.f32.gmra.mrb[90].mxu1 %v7036_v6  ;;  %v7253_v22 = vld [vmem:[%s14890_s7 + $0x308] sm:$0xff] }
 0x827   : > { %v7053_v34 = vsel %vm3543_vm4, %v9803_v39, %v9813_v48  ;;  %v7037_v40 = vsel %vm15167_vm9, %v13996_v29, %v9803_v39  ;;  %v14215_v26 = vpop.permute.xlu1 %9816  ;;  %v6447_v25 = vld [vmem:[#allocation2 + $0x111] sm:$0xff]  ;;  %v7054_v61 = vsel %vm3543_vm4, %v9804_v3, %v9814_v7  ;;  %v7038_v58 = vsel %vm15168_vm14, %v13989_v59, %v9804_v3 }
 0x828   : > { %v14217_v62 = vpop.permute.xlu0 %9806  ;;  %7435 = vmatprep.mubr.f32.mxu1 %v7053_v34  ;;  %v6446_v45 = vld [vmem:[#allocation2 + $0x109] sm:$0xff]  ;;  %v14228_v43 = vld [vmem:[#allocation2 + $0x112] sm:$0xff]  ;;  %v9818_v11 = vunpack.i.l.bf16 %v14215_v26  ;;  %v9819_v6 = vunpack.i.h.bf16 %v14215_v26 }
 0x829   : > { %v6430_v31 = vld [vmem:[#allocation2 + $0x108] sm:$0xff]  ;;  %7436 = vmatmul.mubr.f32.gmra.mrb[92].mxu1 %v7037_v40  ;;  %v6431_v52 = vld [vmem:[#allocation2 + $0x110] sm:$0xff]  ;;  %v14222_v1 = vpack.i.bf16 %v6447_v25, %v6446_v45  ;;  %v9808_v0 = vunpack.i.l.bf16 %v14217_v62  ;;  %v9809_v3 = vunpack.i.h.bf16 %v14217_v62  ;;  %v14281_v25 = vpack.c.bf16 %v7253_v22, %v7252_v10  ;;  %v7255_v62 = vld [vmem:[%s14890_s7 + $0x318] sm:$0xff] }
 0x82a   : > { %7440 = vmatprep.mubr.f32.mxu1 %v7054_v61  ;;  %v14224_v13 = vpack.i.bf16 %v6431_v52, %v6430_v31  ;;  %v14226_v29 = vld [vmem:[#allocation2 + $0x10a] sm:$0xff]  ;;  %v6503_v22 = vld [vmem:[#allocation2 + $0xc2] sm:$0xff] }
 0x82b   : > { %9961 = vrot.lane.b32.xlu0 %v14222_v1, %s10077_s25  ;;  %v14234_v42 = vpop.permute.xlu1 %9831  ;;  %v9970_v50 = vpack.i.bf16 %v14228_v43, %v14226_v29  ;;  %v7254_v26 = vld [vmem:[%s14890_s7 + $0x310] sm:$0xff]  ;;  %s8038_s25 = sshll.u32 %s15203_s21, 1 }
 0x82c   : > { %9956 = vrot.lane.b32.xlu1 %v14224_v13, %s10094_s22  ;;  %v9833_v28 = vunpack.i.l.bf16 %v14234_v42  ;;  %v9822_v44 = vpop.permute.xlu0 %9821  ;;  %v9834_v16 = vunpack.i.h.bf16 %v14234_v42  ;;  %s8039_s22 = sshll.u32 %s15201_s10, 5 }
 0x82d   : > { %7441 = vmatmul.mubr.f32.gmra.mrb[94].mxu1 %v7038_v58  ;;  %v9824_v32 = vunpack.i.h.bf16 %v9822_v44  ;;  %v9823_v55 = vunpack.i.l.bf16 %v9822_v44 }
 0x82f   : > { %9966 = vrot.lane.b32.xlu0 %v13983_v38, %s15154_s30  ;;  %v14245_v46 = vpop.permute.xlu1 %9836  ;;  %v7055_v59 = vsel %vm3543_vm4, %v9823_v55, %v9833_v28  ;;  %v7039_v47 = vsel %vm15158_vm0, %v14015_v18, %v9823_v55  ;;  %v7056_v41 = vsel %vm3543_vm4, %v9824_v32, %v9834_v16  ;;  %vm15169_vm4 = vmmov %vm15158_vm0 }
 0x830   : > { %9971 = vrot.lane.b32.xlu1 %v9970_v50, %s10095_s29  ;;  %v14254_v30 = vpop.permute.xlu0 %9826  ;;  %7445 = vmatprep.mubr.f32.mxu1 %v7055_v59  ;;  %v9838_v31 = vunpack.i.l.bf16 %v14245_v46  ;;  %v14308_v50 = vpack.c.bf16 %v7255_v62, %v7254_v26  ;;  %v7256_v59 = vld [vmem:[%s14890_s7 + $0x320] sm:$0xff]  ;;  %v6504_v26 = vld [vmem:[#allocation2 + $0xca] sm:$0xff]  ;;  %s354_s29 = sadd.s32 %s8039_s22, %s8038_s25 }
 0x831   : > { %v9828_v38 = vunpack.i.l.bf16 %v14254_v30  ;;  %7446 = vmatmul.mubr.f32.gmra.mrb[96].mxu1 %v7039_v47  ;;  %v9829_v34 = vunpack.i.h.bf16 %v14254_v30  ;;  %v7257_v47 = vld [vmem:[%s14890_s7 + $0x328] sm:$0xff]  ;;  %s8040_s21 = sshll.u32 %s354_s29, 3 }
 0x832   : > { %7450 = vmatprep.mubr.f32.mxu1 %v7056_v41  ;;  %v6498_v30 = vld [vmem:[#allocation2 + $0x82] sm:$0xff]  ;;  %s14821_s24 = scalar_lea.vmem %s14892_s9, %s8040_s21 }
 0x833   : > { %9981 = vrot.lane.b32.xlu0 %v14000_v9, %s15154_s30  ;;  %v14264_v18 = vpop.permute.xlu1 %9846  ;;  %v7040_v9 = vsel %vm15169_vm4, %v14017_v24, %v9824_v32  ;;  %v6502_v32 = vld [vmem:[#allocation2 + $0xb2] sm:$0xff] }
 0x834   : > { %9976 = vrot.lane.b32.xlu1 %v13788_v33, %s10096_s17  ;;  %v9842_v39 = vpop.permute.xlu0 %9841  ;;  %v7074_v33 = vsel %vm1745_vm7, %v9808_v0, %v9818_v11  ;;  %v9848_v52 = vunpack.i.l.bf16 %v14264_v18  ;;  %v9839_v11 = vunpack.i.h.bf16 %v14245_v46  ;;  %v9849_v41 = vunpack.i.h.bf16 %v14264_v18  ;;  %v7268_v18 = vld [vmem:[%s14890_s7 + $0x380] sm:$0xf] }
 0x835   : > { %7451 = vmatmul.mubr.f32.gmra.mrb[98].mxu1 %v7040_v9  ;;  %v7091_v40 = vsel %vm7090_vm8, %v7074_v33, %v9828_v38  ;;  %v9843_v45 = vunpack.i.l.bf16 %v9842_v39  ;;  %v9844_v44 = vunpack.i.h.bf16 %v9842_v39 }
 0x836   : > { %7520 = vmatprep.mubr.f32.mxu1 %v7091_v40 }
 0x837   : > { %6985 = vrot.lane.b32.xlu0 %v13767_v5, %s15170_s19  ;;  %v14287_v24 = vpop.permute.xlu1 %9856  ;;  %v7058_v5 = vsel %vm7057_vm10, %v9748_v21, %v9808_v0  ;;  %v7076_v55 = vsel %vm1745_vm7, %v9838_v31, %v9843_v45  ;;  %v7077_v46 = vsel %vm1745_vm7, %v9839_v11, %v9844_v44 }
 0x838   : > { %9986 = vrot.lane.b32.xlu1 %v13804_v53, %s10096_s17  ;;  %v14296_v61 = vpop.permute.xlu0 %9851  ;;  %v7075_v53 = vsel %vm1745_vm7, %v9809_v3, %v9819_v6  ;;  %v7093_v10 = vsel %vm7090_vm8, %v7076_v55, %v9848_v52  ;;  %v14333_v6 = vpack.c.bf16 %v7257_v47, %v7256_v59  ;;  %v9858_v39 = vunpack.i.l.bf16 %v14287_v24 }
 0x839   : > { %7521 = vmatmul.mubr.f32.vlgmr.msra.gmra.mrb[100].mxu1 %v7058_v5  ;;  %v7092_v58 = vsel %vm7090_vm8, %v7075_v53, %v9829_v34  ;;  %v9853_v9 = vunpack.i.l.bf16 %v14296_v61  ;;  %v7094_v45 = vsel %vm7090_vm8, %v7077_v46, %v9849_v41  ;;  %v7261_v5 = vld [vmem:[%s14890_s7 + $0x348] sm:$0xff]  ;;  %v9859_v53 = vunpack.i.h.bf16 %v14287_v24 }
 0x83a   : > { %7525 = vmatprep.mubr.f32.mxu1 %v7092_v58  ;;  %8966 = vmatpush1.bf16.msra.mxu1 %v14281_v25  ;;  %v9854_v58 = vunpack.i.h.bf16 %v14296_v61  ;;  %v6505_v61 = vld [vmem:[#allocation2 + $0xda] sm:$0xff] }
 0x83b   : > { %9991 = vrot.lane.b32.xlu0 %v14023_v14, %s15154_s30  ;;  %v6324_v21 = vpop.permute.xlu1 %6323  ;;  %v7059_v14 = vsel %vm7057_vm10, %v9749_v2, %v9809_v3  ;;  %8958 = vmatprep.subr.bf16.mxu1 %v15065_v4  ;;  %v7258_v2 = vld [vmem:[%s14890_s7 + $0x330] sm:$0xff]  ;;  %v7259_v3 = vld [vmem:[%s14890_s7 + $0x338] sm:$0xff] }
 0x83c   : > { %6987 = vrot.lane.b32.xlu1 %v6502_v32, %s15170_s19  ;;  %6366 = vst.msk [vmem:[#allocation2 + $0x121] sm:$0xff] %vm6347_vm11, %v6324_v21  ;;  %v14321_v0 = vpop.permute.xlu0 %9861  ;;  %v14359_v62 = vpack.c.bf16 %v7259_v3, %v7258_v2  ;;  %v7078_v32 = vsel %vm1745_vm7, %v9853_v9, %v9858_v39  ;;  %v7063_v3 = vsel %vm7057_vm10, %v9769_v17, %v9854_v58  ;;  %v7265_v17 = vld [vmem:[%s14890_s7 + $0x368] sm:$0xff] }
 0x83d   : > { %7526 = vmatmul.mubr.f32.gmra.mrb[102].mxu1 %v7059_v14  ;;  %v9863_v40 = vunpack.i.l.bf16 %v14321_v0  ;;  %v9864_v55 = vunpack.i.h.bf16 %v14321_v0  ;;  %v7079_v14 = vsel %vm1745_vm7, %v9854_v58, %v9859_v53 }
 0x83e   : > { %7530 = vmatprep.mubr.f32.mxu1 %v7093_v10  ;;  %8967 = vmatpush1.bf16.msra.mxu1 %v14308_v50  ;;  %v7263_v10 = vld [vmem:[%s14890_s7 + $0x358] sm:$0xff] }
 0x83f   : > { %6989 = vrot.lane.b32.xlu0 %v6503_v22, %s15170_s19  ;;  %v14338_v19 = vpop.permute.xlu1 %9871  ;;  %8959 = vmatprep.subr.bf16.mxu1 %v15065_v4  ;;  %v7095_v24 = vsel %vm7090_vm8, %v7078_v32, %v9863_v40  ;;  %v7096_v46 = vsel %vm7090_vm8, %v7079_v14, %v9864_v55  ;;  %v14444_v32 = vpack.c.bf16 %v7265_v17, %v7264_v54 }
 0x840   : > { %9996 = vrot.lane.b32.xlu1 %v13828_v63, %s10096_s17  ;;  %v14348_v33 = vpop.permute.xlu0 %9866  ;;  %v7060_v63 = vsel %vm7057_vm10, %v9758_v15, %v9838_v31  ;;  %v7260_v31 = vld [vmem:[%s14890_s7 + $0x340] sm:$0xff] }
 0x841   : > { %7531 = vmatmul.mubr.f32.gmra.mrb[104].mxu1 %v7060_v63  ;;  %v14385_v21 = vpack.c.bf16 %v7261_v5, %v7260_v31  ;;  %v9868_v59 = vunpack.i.l.bf16 %v14348_v33 }
 0x842   : > { %7535 = vmatprep.mubr.f32.mxu1 %v7094_v45  ;;  %8968 = vmatpush1.bf16.msra.mxu1 %v14333_v6  ;;  %v9874_v45 = vunpack.i.h.bf16 %v14338_v19 }
 0x843   : > { %10001 = vrot.lane.b32.xlu0 %v14224_v13, %s15154_s30  ;;  %v6326_v15 = vpop.permute.xlu1 %6325  ;;  %v7061_v13 = vsel %vm7057_vm10, %v9759_v56, %v9839_v11  ;;  %8960 = vmatprep.subr.bf16.mxu1 %v15065_v4  ;;  %v9873_v56 = vunpack.i.l.bf16 %v14338_v19  ;;  %v7062_v11 = vsel %vm7057_vm10, %v9768_v27, %v9853_v9  ;;  %v6506_v27 = vld [vmem:[#allocation2 + $0xe2] sm:$0xff] }
 0x844   : > { %6991 = vrot.lane.b32.xlu1 %v6504_v26, %s15170_s19  ;;  %6367 = vst.msk [vmem:[#allocation2 + $0x129] sm:$0xff] %vm6347_vm11, %v6326_v15  ;;  %v14373_v44 = vpop.permute.xlu0 %9876  ;;  %v6479_v39 = vld [vmem:[#allocation2 + $0x120] sm:$0xff]  ;;  %v9869_v26 = vunpack.i.h.bf16 %v14348_v33  ;;  %vm7123_vm11 = vcmask 490496  }
 0x845   : > { %7536 = vmatmul.mubr.f32.gmra.mrb[106].mxu1 %v7061_v13  ;;  %v9878_v22 = vunpack.i.l.bf16 %v14373_v44  ;;  %v7080_v31 = vsel %vm1745_vm7, %v9868_v59, %v9873_v56  ;;  %v9879_v53 = vunpack.i.h.bf16 %v14373_v44  ;;  %v6495_v33 = vld [vmem:[#allocation2 + $0x121] sm:$0xff]  ;;  %v7064_v13 = vsel %vm7057_vm10, %v9778_v23, %v9868_v59 }
 0x846   : > { %7540 = vmatprep.mubr.f32.mxu1 %v7095_v24  ;;  %8969 = vmatpush1.bf16.msra.mxu1 %v14359_v62  ;;  %v7266_v24 = vld [vmem:[%s14890_s7 + $0x370] sm:$0xff]  ;;  %v7081_v59 = vsel %vm1745_vm7, %v9869_v26, %v9874_v45 }
 0x847   : > { %6993 = vrot.lane.b32.xlu0 %v6505_v61, %s15170_s19  ;;  %v14390_v37 = vpop.permute.xlu1 %9886  ;;  %8961 = vmatprep.subr.bf16.mxu1 %v15065_v4  ;;  %v7097_v19 = vsel %vm7090_vm8, %v7080_v31, %v9878_v22  ;;  %v7267_v61 = vld [vmem:[%s14890_s7 + $0x378] sm:$0xff] }
 0x848   : > { %10006 = vrot.lane.b32.xlu1 %v14222_v1, %s10096_s17  ;;  %v14394_v47 = vpop.permute.xlu0 %9881  ;;  %v7262_v1 = vld [vmem:[%s14890_s7 + $0x350] sm:$0xff]  ;;  %v9888_v56 = vunpack.i.l.bf16 %v14390_v37  ;;  %v9889_v45 = vunpack.i.h.bf16 %v14390_v37  ;;  %v7065_v37 = vsel %vm7057_vm10, %v9779_v35, %v9869_v26  ;;  %v6508_v35 = vld [vmem:[#allocation2 + $0xfa] sm:$0xff] }
 0x849   : > { %7541 = vmatmul.mubr.f32.gmra.mrb[108].mxu1 %v7062_v11  ;;  %v14418_v63 = vpack.c.bf16 %v7263_v10, %v7262_v1  ;;  %v9883_v11 = vunpack.i.l.bf16 %v14394_v47  ;;  %v9884_v31 = vunpack.i.h.bf16 %v14394_v47  ;;  %v6497_v26 = vld [vmem:[#allocation2 + $0x7a] sm:$0xff] }
 0x84a   : > { %7545 = vmatprep.mubr.f32.mxu1 %v7096_v46  ;;  %8970 = vmatpush1.bf16.msra.mxu1 %v14385_v21 }
 0x84b   : > { %v14413_v2 = vpop.permute.xlu1 %9896  ;;  %v6480_v9 = vld [vmem:[#allocation2 + $0x128] sm:$0xff]  ;;  %8962 = vmatprep.subr.bf16.mxu1 %v15065_v4 }
 0x84c   : > { %6995 = vrot.lane.b32.xlu1 %v6506_v27, %s15170_s19  ;;  %v14422_v15 = vpop.permute.xlu0 %9891  ;;  %v10010_v5 = vpack.i.bf16 %v6480_v9, %v6479_v39  ;;  %v9898_v14 = vunpack.i.l.bf16 %v14413_v2  ;;  %v7098_v27 = vsel %vm7090_vm8, %v7081_v59, %v9879_v53  ;;  %v6496_v39 = vld [vmem:[#allocation2 + $0x129] sm:$0xff]  ;;  %v14466_v9 = vpack.c.bf16 %v7267_v61, %v7266_v24 }
 0x84d   : > { %7546 = vmatmul.mubr.f32.gmra.mrb[110].mxu1 %v7063_v3  ;;  %v9893_v1 = vunpack.i.l.bf16 %v14422_v15  ;;  %v6507_v3 = vld [vmem:[#allocation2 + $0xf2] sm:$0xff]  ;;  %v7066_v61 = vsel %vm7057_vm10, %v9788_v60, %v9883_v11 }
 0x84e   : > { %7550 = vmatprep.mubr.f32.mxu1 %v7097_v19  ;;  %10011 = vrot.lane.b32.xlu0 %v10010_v5, %s15154_s30  ;;  %v9899_v5 = vunpack.i.h.bf16 %v14413_v2  ;;  %v9894_v19 = vunpack.i.h.bf16 %v14422_v15  ;;  %v7107_v47 = vsel %vm3642_vm3, %v9828_v38, %v9898_v14  ;;  %v7082_v2 = vsel %vm1745_vm7, %v9883_v11, %v9888_v56 }
 0x84f   : > { %v14438_v58 = vpop.permute.xlu1 %9906  ;;  %8971 = vmatpush1.bf16.msra.mxu1 %v14418_v63  ;;  %v7083_v56 = vsel %vm1745_vm7, %v9884_v31, %v9889_v45 }
 0x850   : > { %6941 = vrot.lane.b32.xlu1 %v6495_v33, %s10096_s17  ;;  %v14455_v23 = vpop.permute.xlu0 %9901  ;;  %8963 = vmatprep.subr.bf16.mxu1 %v15065_v4 }
 0x851   : > { %v9904_v10 = vunpack.i.h.bf16 %v14455_v23  ;;  %v9903_v46 = vunpack.i.l.bf16 %v14455_v23  ;;  %7551 = vmatmul.mubr.f32.gmra.mrb[112].mxu1 %v7064_v13  ;;  %v7099_v13 = vsel %vm7090_vm8, %v7082_v2, %v9893_v1 }
 0x852   : > { %7555 = vmatprep.mubr.f32.mxu1 %v7098_v27  ;;  %6997 = vrot.lane.b32.xlu0 %v6507_v3, %s15170_s19  ;;  %v7108_v3 = vsel %vm3642_vm3, %v9829_v34, %v9899_v5 }
 0x853   : > { %v14472_v54 = vpop.permute.xlu1 %9916  ;;  %v7124_v17 = vsel %vm7123_vm11, %v9898_v14, %v9903_v46  ;;  %8972 = vmatpush1.bf16.msra.mxu1 %v14444_v32  ;;  %v7125_v57 = vsel %vm7123_vm11, %v9899_v5, %v9904_v10  ;;  %v9908_v14 = vunpack.i.l.bf16 %v14438_v58 }
 0x854   : > { %6943 = vrot.lane.b32.xlu1 %v6496_v39, %s10096_s17  ;;  %v9912_v33 = vpop.permute.xlu0 %9911  ;;  %7665 = vmatprep.mubr.f32.mxu0 %v7124_v17  ;;  %v7100_v39 = vsel %vm7090_vm8, %v7083_v56, %v9894_v19  ;;  %v9918_v60 = vunpack.i.l.bf16 %v14472_v54  ;;  %v9919_v2 = vunpack.i.h.bf16 %v14472_v54 }
 0x855   : > { %8964 = vmatprep.subr.bf16.mxu1 %v15065_v4  ;;  %7556 = vmatmul.mubr.f32.gmra.mrb[114].mxu1 %v7065_v37  ;;  %v9913_v24 = vunpack.i.l.bf16 %v9912_v33  ;;  %v9914_v37 = vunpack.i.h.bf16 %v9912_v33 }
 0x856   : > { %7666 = vmatmul.mubr.f32.vlgmr.msra.gmra.mrb[92].mxu0 %v7107_v47  ;;  %7560 = vmatprep.mubr.f32.mxu1 %v7099_v13  ;;  %v9909_v47 = vunpack.i.h.bf16 %v14438_v58 }
 0x857   : > { %7670 = vmatprep.mubr.f32.mxu0 %v7125_v57  ;;  %6999 = vrot.lane.b32.xlu0 %v6508_v35, %s15170_s19  ;;  %v14495_v38 = vpop.permute.xlu1 %9926  ;;  %v7084_v34 = vsel %vm1745_vm7, %v9908_v14, %v9913_v24  ;;  %v7068_v35 = vsel %vm7057_vm10, %v9798_v8, %v9908_v14 }
 0x858   : > { %6977 = vrot.lane.b32.xlu1 %v6497_v26, %s15170_s19  ;;  %v9928_v59 = vunpack.i.l.bf16 %v14495_v38  ;;  %v9922_v27 = vpop.permute.xlu0 %9921  ;;  %8935 = vmatpush1.bf16.msra.mxu0 %v14281_v25  ;;  %v9929_v11 = vunpack.i.h.bf16 %v14495_v38 }
 0x859   : > { %8973 = vmatpush1.bf16.msra.mxu1 %v14466_v9  ;;  %v9924_v45 = vunpack.i.h.bf16 %v9922_v27  ;;  %v9923_v17 = vunpack.i.l.bf16 %v9922_v27  ;;  %8936 = vmatprep.subr.bf16.mxu0 %v15065_v4 }
 0x85a   : > { %7561 = vmatmul.mubr.f32.gmra.mrb[116].mxu1 %v7066_v61  ;;  %7671 = vmatmul.mubr.f32.gmra.mrb[94].mxu0 %v7108_v3  ;;  %v15171_v61 = vmov 0.0   ;;  %v6511_v3 = vld [vmem:[#allocation2 + $0x122] sm:$0xff] }
 0x85b   : > { %7565 = vmatprep.mubr.f32.mxu1 %v7100_v39  ;;  %7001 = vrot.lane.b32.xlu0 %v14226_v29, %s15170_s19  ;;  %v14518_v25 = vpop.permute.xlu1 %9931  ;;  %v7126_v5 = vsel %vm7123_vm11, %v9923_v17, %v9928_v59  ;;  %v7109_v33 = vsel %vm3642_vm3, %v9848_v52, %v9923_v17  ;;  %v7067_v29 = vsel %vm7057_vm10, %v9789_v20, %v9884_v31  ;;  %v6500_v39 = vld [vmem:[#allocation2 + $0x9a] sm:$0xff] }
 0x85c   : > { %6979 = vrot.lane.b32.xlu1 %v6498_v30, %s15170_s19  ;;  %v14528_v13 = vpop.permute.xlu0 %9936  ;;  %7675 = vmatprep.mubr.f32.mxu0 %v7126_v5  ;;  %v9933_v57 = vunpack.i.l.bf16 %v14518_v25  ;;  %v7101_v52 = vsel %vm7090_vm8, %v7084_v34, %v9918_v60  ;;  %v7127_v58 = vsel %vm7123_vm11, %v9924_v45, %v9929_v11  ;;  %v7085_v20 = vsel %vm1745_vm7, %v9909_v47, %v9914_v37 }
 0x85d   : > { %8938 = vmatpush1.bf16.msra.mxu0 %v14308_v50  ;;  %v9938_v24 = vunpack.i.l.bf16 %v14528_v13  ;;  %v7110_v26 = vsel %vm3642_vm3, %v9849_v41, %v9924_v45  ;;  %8965 = vmatprep.subr.mxu1 %v15171_v61  ;;  %v9934_v56 = vunpack.i.h.bf16 %v14518_v25  ;;  %v7102_v27 = vsel %vm7090_vm8, %v7085_v20, %v9919_v2 }
 0x85e   : > { %7566 = vmatmul.mubr.f32.gmra.mrb[118].mxu1 %v7067_v29  ;;  %7676 = vmatmul.mubr.f32.gmra.mrb[96].mxu0 %v7109_v33  ;;  %v7069_v30 = vsel %vm7057_vm10, %v9799_v51, %v9909_v47  ;;  %v7111_v34 = vsel %vm3642_vm3, %v9863_v40, %v9933_v57  ;;  %v6512_v51 = vld [vmem:[#allocation2 + $0x12a] sm:$0xff] }
 0x85f   : > { %7570 = vmatprep.mubr.f32.mxu1 %v7101_v52  ;;  %7680 = vmatprep.mubr.f32.mxu0 %v7127_v58  ;;  %v9947_v50 = vpop.permute.xlu1 %9946  ;;  %v7128_v8 = vsel %vm7123_vm11, %v9933_v57, %v9938_v24  ;;  %v7112_v47 = vsel %vm3642_vm3, %v9864_v55, %v9934_v56 }
 0x860   : > { %7003 = vrot.lane.b32.xlu0 %v14228_v43, %s15170_s19  ;;  %6981 = vrot.lane.b32.xlu1 %v6499_v36, %s15170_s19  ;;  %v9942_v31 = vpop.permute.xlu0 %9941  ;;  %v9939_v43 = vunpack.i.h.bf16 %v14528_v13  ;;  %v9948_v41 = vunpack.i.l.bf16 %v9947_v50  ;;  %v9949_v45 = vunpack.i.h.bf16 %v9947_v50 }
 0x861   : > { %8939 = vmatprep.subr.bf16.mxu0 %v15065_v4  ;;  %v9943_v14 = vunpack.i.l.bf16 %v9942_v31  ;;  %v9944_v17 = vunpack.i.h.bf16 %v9942_v31  ;;  %8974 = vmatpush1.msk.msra.mxu1 %vm15172_vm12, %v7268_v18 }
 0x862   : > { %7571 = vmatmul.mubr.f32.gmra.mrb[120].mxu1 %v7068_v35  ;;  %7681 = vmatmul.mubr.f32.gmra.mrb[98].mxu0 %v7110_v26  ;;  %v7129_v12 = vsel %vm7123_vm11, %v9934_v56, %v9939_v43 }
 0x863   : > { %7575 = vmatprep.mubr.f32.mxu1 %v7102_v27  ;;  %7685 = vmatprep.mubr.f32.mxu0 %v7128_v8  ;;  %v7086_v33 = vsel %vm1745_vm7, %v9943_v14, %v9948_v41  ;;  %v7070_v40 = vsel %vm7057_vm10, %v9813_v48, %v9943_v14  ;;  %v7087_v29 = vsel %vm1745_vm7, %v9944_v17, %v9949_v45 }
 0x864   : > { %7005 = vrot.lane.b32.xlu0 %v6511_v3, %s15170_s19  ;;  %6983 = vrot.lane.b32.xlu1 %v6500_v39, %s15170_s19  ;;  %v14567_v37 = vpop.permute.xlu0 %9951  ;;  %v7071_v48 = vsel %vm7057_vm10, %v9814_v7, %v9944_v17 }
 0x865   : > { %8941 = vmatpush1.bf16.msra.mxu0 %v14333_v6  ;;  %v9954_v25 = vunpack.i.h.bf16 %v14567_v37  ;;  %v9953_v5 = vunpack.i.l.bf16 %v14567_v37 }
 0x866   : > { %7576 = vmatmul.mubr.f32.gmra.mrb[122].mxu1 %v7069_v30  ;;  %7686 = vmatmul.mubr.f32.gmra.mrb[100].mxu0 %v7111_v34 }
 0x867   : > { %7690 = vmatprep.mubr.f32.mxu0 %v7129_v12  ;;  %8942 = vmatprep.subr.bf16.mxu0 %v15065_v4  ;;  %v7103_v6 = vsel %vm7090_vm8, %v7086_v33, %v9953_v5  ;;  %v7104_v57 = vsel %vm7090_vm8, %v7087_v29, %v9954_v25 }
 0x868   : > { %7007 = vrot.lane.b32.xlu0 %v6512_v51, %s15170_s19  ;;  %7580 = vmatprep.mubr.f32.mxu1 %v7103_v6 }
 0x869   : > { %8944 = vmatpush1.bf16.msra.mxu0 %v14359_v62 }
 0x86a   : > { %7581 = vmatmul.mubr.f32.gmra.mrb[124].mxu1 %v7070_v40  ;;  %7691 = vmatmul.mubr.f32.gmra.mrb[102].mxu0 %v7112_v47 }
 0x86b   : > { %7585 = vmatprep.mubr.f32.mxu1 %v7104_v57  ;;  %8945 = vmatprep.subr.bf16.mxu0 %v15065_v4 }
 0x86d   : > { %8947 = vmatpush1.bf16.msra.mxu0 %v14385_v21 }
 0x86e   : > { %7586 = vmatmul.mubr.f32.gmra.mrb[126].mxu1 %v7071_v48  ;;  %8948 = vmatprep.subr.bf16.mxu0 %v15065_v4 }
 0x871   : > { %8950 = vmatpush1.bf16.msra.mxu0 %v14418_v63 }
 0x872   : > { %8951 = vmatprep.subr.bf16.mxu0 %v15065_v4 }
 0x875   : > { %8953 = vmatpush1.bf16.msra.mxu0 %v14444_v32 }
 0x876   : > { %8954 = vmatprep.subr.bf16.mxu0 %v15065_v4 }
 0x879   : > { %8956 = vmatpush1.bf16.msra.mxu0 %v14466_v9 }
 0x87a   : > { %7778 = vmatprep.subr.mxu0 %v15171_v61 }
 0x87d   : > { %8125 = vmatpush1.msk.msra.mxu0 %vm15173_vm13, %v7268_v18 }
 0x89d   : > { %v9962_v7 = vpop.permute.xlu0 %9961 }
 0x89e   : > { %v9957_v49 = vpop.permute.xlu1 %9956  ;;  %v9963_v62 = vunpack.i.l.bf16 %v9962_v7  ;;  %v9964_v21 = vunpack.i.h.bf16 %v9962_v7 }
 0x89f   : > { %v9958_v0 = vunpack.i.l.bf16 %v9957_v49  ;;  %v9959_v55 = vunpack.i.h.bf16 %v9957_v49 }
 0x8a1   : > { %v9967_v63 = vpop.permute.xlu0 %9966  ;;  %v7088_v4 = vsel %vm1745_vm7, %v9958_v0, %v9963_v62  ;;  %v7072_v31 = vsel %vm7057_vm10, %v9833_v28, %v9958_v0  ;;  %v7089_v35 = vsel %vm1745_vm7, %v9959_v55, %v9964_v21  ;;  %v7073_v28 = vsel %vm7057_vm10, %v9834_v16, %v9959_v55 }
 0x8a2   : > { %v14612_v52 = vpop.permute.xlu1 %9971  ;;  %v9968_v36 = vunpack.i.l.bf16 %v9967_v63  ;;  %v9969_v27 = vunpack.i.h.bf16 %v9967_v63  ;;  %vm15174_vm7 = vcmask 261120  }
 0x8a3   : > { %v9974_v58 = vunpack.i.h.bf16 %v14612_v52  ;;  %v9973_v32 = vunpack.i.l.bf16 %v14612_v52  ;;  %vm15175_vm1 = vmmov %vm15174_vm7 }
 0x8a4   : > { %v7113_v14 = vsel %vm3642_vm3, %v9878_v22, %v9968_v36  ;;  %v7114_v22 = vsel %vm3642_vm3, %v9879_v53, %v9969_v27  ;;  %vm15176_vm6 = vmmov %vm15175_vm1 }
 0x8a5   : > { %v7105_v9 = vsel %vm7090_vm8, %v7088_v4, %v9973_v32  ;;  %v9982_v50 = vpop.permute.xlu0 %9981  ;;  %v7106_v56 = vsel %vm7090_vm8, %v7089_v35, %v9974_v58  ;;  %vm15177_vm5 = vmmov %vm15175_vm1 }
 0x8a6   : > { %v9977_v20 = vpop.permute.xlu1 %9976  ;;  %7590 = vmatprep.mubr.f32.mxu1 %v7105_v9  ;;  %v9983_v45 = vunpack.i.l.bf16 %v9982_v50  ;;  %v9984_v12 = vunpack.i.h.bf16 %v9982_v50  ;;  %vm15178_vm15 = vmmov %vm15175_vm1 }
 0x8a7   : > { %v9979_v26 = vunpack.i.h.bf16 %v9977_v20  ;;  %v9978_v61 = vunpack.i.l.bf16 %v9977_v20  ;;  %7591 = vmatmul.mubr.f32.gmra.mrb[128].mxu1 %v7072_v31  ;;  %vm15179_vm9 = vmmov %vm15175_vm1 }
 0x8a8   : > { %7595 = vmatprep.mubr.f32.mxu1 %v7106_v56  ;;  %vm15180_vm14 = vmmov %vm15175_vm1 }
 0x8a9   : > { %v7130_v8 = vsel %vm7123_vm11, %v9968_v36, %v9978_v61  ;;  %v6986_v41 = vpop.permute.xlu0 %6985  ;;  %v7131_v39 = vsel %vm7123_vm11, %v9969_v27, %v9979_v26  ;;  %vm15181_vm0 = vmmov %vm15175_vm1 }
 0x8aa   : > { %v14628_v18 = vpop.permute.xlu1 %9986  ;;  %7695 = vmatprep.mubr.f32.mxu0 %v7130_v8  ;;  %v7144_v42 = vsel %vm15174_vm7, %v9938_v24, %v6986_v41  ;;  %v7115_v24 = vsel %vm3642_vm3, %v9893_v1, %v9983_v45  ;;  %v7116_v1 = vsel %vm3642_vm3, %v9894_v19, %v9984_v12  ;;  %vm15182_vm8 = vmmov %vm15181_vm0 }
 0x8ab   : > { %v9988_v3 = vunpack.i.l.bf16 %v14628_v18  ;;  %7596 = vmatmul.mubr.f32.gmra.mrb[130].mxu1 %v7073_v28  ;;  %7696 = vmatmul.mubr.f32.gmra.mrb[104].mxu0 %v7113_v14  ;;  %v9989_v30 = vunpack.i.h.bf16 %v14628_v18  ;;  %vm15183_vm4 = vmmov %vm15181_vm0 }
 0x8ac   : > { %7700 = vmatprep.mubr.f32.mxu0 %v7131_v39  ;;  %8130 = vmatprep.mubr.msk.f32.mxu1 %vm459_vm2, %v6986_v41  ;;  %vm15185_vm10 = vmmov %vm15181_vm0 }
 0x8ad   : > { %v9992_v16 = vpop.permute.xlu0 %9991  ;;  %v7132_v34 = vsel %vm7123_vm11, %v9983_v45, %v9988_v3  ;;  %v7133_v6 = vsel %vm7123_vm11, %v9984_v12, %v9989_v30  ;;  %vm15187_vm12 = vmmov %vm15181_vm0 }
 0x8ae   : > { %v6988_v17 = vpop.permute.xlu1 %6987  ;;  %v9993_v40 = vunpack.i.l.bf16 %v9992_v16  ;;  %v9994_v48 = vunpack.i.h.bf16 %v9992_v16  ;;  %vm15188_vm13 = vmmov %vm15181_vm0 }
 0x8af   : > { %7701 = vmatmul.mubr.f32.gmra.mrb[106].mxu0 %v7114_v22  ;;  %7831 = vmatmul.mubr.f32.vlgmr.msra.gmra.mrb[132].mxu1 %v7144_v42  ;;  %v7145_v44 = vsel %vm15175_vm1, %v9939_v43, %v6988_v17  ;;  %vm15189_vm7 = vmmov %vm15181_vm0 }
 0x8b0   : > { %7705 = vmatprep.mubr.f32.mxu0 %v7132_v34  ;;  %8131 = vmatprep.mubr.msk.f32.mxu1 %vm459_vm2, %v6988_v17  ;;  %v7117_v15 = vsel %vm3642_vm3, %v9918_v60, %v9993_v40  ;;  %v7118_v63 = vsel %vm3642_vm3, %v9919_v2, %v9994_v48 }
 0x8b1   : > { %v6990_v33 = vpop.permute.xlu0 %6989 }
 0x8b2   : > { %v14648_v51 = vpop.permute.xlu1 %9996  ;;  %v7146_v13 = vsel %vm15176_vm6, %v9978_v61, %v6990_v33 }
 0x8b3   : > { %v9998_v53 = vunpack.i.l.bf16 %v14648_v51  ;;  %7706 = vmatmul.mubr.f32.gmra.mrb[108].mxu0 %v7115_v24  ;;  %7836 = vmatmul.mubr.f32.gmra.mrb[134].mxu1 %v7145_v44  ;;  %v9999_v43 = vunpack.i.h.bf16 %v14648_v51 }
 0x8b4   : > { %7710 = vmatprep.mubr.f32.mxu0 %v7133_v6  ;;  %8132 = vmatprep.mubr.msk.f32.mxu1 %vm459_vm2, %v6990_v33 }
 0x8b5   : > { %v10002_v29 = vpop.permute.xlu0 %10001  ;;  %v7134_v57 = vsel %vm7123_vm11, %v9993_v40, %v9998_v53  ;;  %v7135_v62 = vsel %vm7123_vm11, %v9994_v48, %v9999_v43 }
 0x8b6   : > { %v6992_v47 = vpop.permute.xlu1 %6991  ;;  %v10003_v55 = vunpack.i.l.bf16 %v10002_v29  ;;  %v10004_v36 = vunpack.i.h.bf16 %v10002_v29 }
 0x8b7   : > { %7711 = vmatmul.mubr.f32.gmra.mrb[110].mxu0 %v7116_v1  ;;  %7841 = vmatmul.mubr.f32.gmra.mrb[136].mxu1 %v7146_v13  ;;  %v7147_v19 = vsel %vm15177_vm5, %v9979_v26, %v6992_v47 }
 0x8b8   : > { %7715 = vmatprep.mubr.f32.mxu0 %v7134_v57  ;;  %8133 = vmatprep.mubr.msk.f32.mxu1 %vm459_vm2, %v6992_v47  ;;  %v7119_v54 = vsel %vm3642_vm3, %v9953_v5, %v10003_v55  ;;  %v7120_v56 = vsel %vm3642_vm3, %v9954_v25, %v10004_v36 }
 0x8b9   : > { %v6994_v7 = vpop.permute.xlu0 %6993 }
 0x8ba   : > { %v14666_v49 = vpop.permute.xlu1 %10006  ;;  %v7148_v4 = vsel %vm15178_vm15, %v9988_v3, %v6994_v7 }
 0x8bb   : > { %v10008_v0 = vunpack.i.l.bf16 %v14666_v49  ;;  %7716 = vmatmul.mubr.f32.gmra.mrb[112].mxu0 %v7117_v15  ;;  %7846 = vmatmul.mubr.f32.gmra.mrb[138].mxu1 %v7147_v19  ;;  %v10009_v60 = vunpack.i.h.bf16 %v14666_v49 }
 0x8bc   : > { %7720 = vmatprep.mubr.f32.mxu0 %v7135_v62  ;;  %8134 = vmatprep.mubr.msk.f32.mxu1 %vm459_vm2, %v6994_v7 }
 0x8bd   : > { %v7136_v9 = vsel %vm7123_vm11, %v10003_v55, %v10008_v0  ;;  %v7137_v35 = vsel %vm7123_vm11, %v10004_v36, %v10009_v60 }
 0x8be   : > { %v6996_v21 = vpop.permute.xlu1 %6995 }
 0x8bf   : > { %7721 = vmatmul.mubr.f32.gmra.mrb[114].mxu0 %v7118_v63  ;;  %7851 = vmatmul.mubr.f32.gmra.mrb[140].mxu1 %v7148_v4  ;;  %v7149_v2 = vsel %vm15179_vm9, %v9989_v30, %v6996_v21 }
 0x8c0   : > { %7725 = vmatprep.mubr.f32.mxu0 %v7136_v9  ;;  %8135 = vmatprep.mubr.msk.f32.mxu1 %vm459_vm2, %v6996_v21  ;;  %v10012_v20 = vpop.permute.xlu0 %10011 }
 0x8c1   : > { %v10013_v31 = vunpack.i.l.bf16 %v10012_v20  ;;  %v10014_v8 = vunpack.i.h.bf16 %v10012_v20 }
 0x8c2   : > { %v6942_v50 = vpop.permute.xlu1 %6941 }
 0x8c3   : > { %7726 = vmatmul.mubr.f32.gmra.mrb[116].mxu0 %v7119_v54  ;;  %7856 = vmatmul.mubr.f32.gmra.mrb[142].mxu1 %v7149_v2  ;;  %v7138_v5 = vsel %vm7123_vm11, %v10013_v31, %v6942_v50  ;;  %v7121_v28 = vsel %vm3642_vm3, %v9973_v32, %v10013_v31  ;;  %v7122_v42 = vsel %vm3642_vm3, %v9974_v58, %v10014_v8  ;;  %vm15184_vm3 = vmmov %vm15181_vm0 }
 0x8c4   : > { %7730 = vmatprep.mubr.f32.mxu0 %v7137_v35  ;;  %v6998_v26 = vpop.permute.xlu0 %6997 }
 0x8c5   : > { %8136 = vmatprep.mubr.msk.f32.mxu1 %vm459_vm2, %v6998_v26  ;;  %v7150_v27 = vsel %vm15180_vm14, %v9998_v53, %v6998_v26 }
 0x8c6   : > { %v6944_v61 = vpop.permute.xlu1 %6943 }
 0x8c7   : > { %7731 = vmatmul.mubr.f32.gmra.mrb[118].mxu0 %v7120_v56  ;;  %7861 = vmatmul.mubr.f32.gmra.mrb[144].mxu1 %v7150_v27  ;;  %v7139_v37 = vsel %vm7123_vm11, %v10014_v8, %v6944_v61  ;;  %vm15186_vm11 = vmmov %vm15181_vm0 }
 0x8c8   : > { %7735 = vmatprep.mubr.f32.mxu0 %v7138_v5 }
 0x8c9   : > { %v7000_v41 = vpop.permute.xlu0 %6999 }
 0x8ca   : > { %v6978_v18 = vpop.permute.xlu1 %6977  ;;  %8137 = vmatprep.mubr.msk.f32.mxu1 %vm459_vm2, %v7000_v41  ;;  %v7151_v25 = vsel %vm15181_vm0, %v9999_v43, %v7000_v41 }
 0x8cb   : > { %7736 = vmatmul.mubr.f32.gmra.mrb[120].mxu0 %v7121_v28  ;;  %7866 = vmatmul.mubr.f32.gmra.mrb[146].mxu1 %v7151_v25  ;;  %v7140_v30 = vsel %vm15183_vm4, %v9903_v46, %v6978_v18 }
 0x8cc   : > { %7740 = vmatprep.mubr.f32.mxu0 %v7139_v37  ;;  %v8275_v14 = vpop.f32.mrb[68].mxu1 }
 0x8cd   : > { %v8276_v3 = vpop.f32.mrb[69].mxu1  ;;  %v7002_v39 = vpop.permute.xlu0 %7001 }
 0x8ce   : > { %v14699_v45 = vadd.f32 %v8276_v3, %v8275_v14  ;;  %v6980_v17 = vpop.permute.xlu1 %6979  ;;  %8138 = vmatprep.mubr.msk.f32.mxu1 %vm459_vm2, %v7002_v39  ;;  %v7152_v32 = vsel %vm15182_vm8, %v10008_v0, %v7002_v39  ;;  %v14755_v14 = vld [vmem:[%s14891_s8] ss:$0 sm:$0xff] }
 0x8cf   : > { %7741 = vmatmul.mubr.f32.gmra.mrb[122].mxu0 %v7122_v42  ;;  %7871 = vmatmul.mubr.f32.gmra.mrb[148].mxu1 %v7152_v32  ;;  %v7141_v46 = vsel %vm15185_vm10, %v9904_v10, %v6980_v17 }
 0x8d0   : > { %8126 = vmatprep.mubr.msk.f32.mxu0 %vm459_vm2, %v6978_v18  ;;  %v8278_v16 = vpop.f32.mrb[70].mxu1  ;;  %v7378_v42 = vadd.f32 %v14699_v45, %v14755_v14 }
 0x8d1   : > { %v8279_v22 = vpop.f32.mrb[71].mxu1 }
 0x8d2   : > { %v7004_v34 = vpop.permute.xlu0 %7003  ;;  %v14710_v12 = vadd.f32 %v8279_v22, %v8278_v16  ;;  %v6982_v51 = vpop.permute.xlu1 %6981 }
 0x8d3   : > { %7811 = vmatmul.mubr.f32.vlgmr.msra.gmra.mrb[124].mxu0 %v7140_v30  ;;  %8139 = vmatprep.mubr.msk.f32.mxu1 %vm459_vm2, %v7004_v34  ;;  %v7153_v52 = vsel %vm15184_vm3, %v10009_v60, %v7004_v34  ;;  %v7142_v1 = vsel %vm15187_vm12, %v9928_v59, %v6982_v51 }
 0x8d4   : > { %8127 = vmatprep.mubr.msk.f32.mxu0 %vm459_vm2, %v6980_v17  ;;  %7876 = vmatmul.mubr.f32.gmra.mrb[150].mxu1 %v7153_v52  ;;  %v8281_v58 = vpop.f32.mrb[72].mxu1  ;;  %v7383_v30 = vadd.f32 %v14710_v12, %v14755_v14 }
 0x8d5   : > { %v8282_v33 = vpop.f32.mrb[73].mxu1 }
 0x8d6   : > { %v7006_v24 = vpop.permute.xlu0 %7005  ;;  %v14715_v44 = vadd.f32 %v8282_v33, %v8281_v58  ;;  %v6984_v23 = vpop.permute.xlu1 %6983 }
 0x8d7   : > { %7816 = vmatmul.mubr.f32.gmra.mrb[126].mxu0 %v7141_v46  ;;  %8140 = vmatprep.mubr.msk.f32.mxu1 %vm459_vm2, %v7006_v24  ;;  %v7154_v53 = vsel %vm15186_vm11, %v6942_v50, %v7006_v24  ;;  %v7143_v48 = vsel %vm15189_vm7, %v9929_v11, %v6984_v23 }
 0x8d8   : > { %8128 = vmatprep.mubr.msk.f32.mxu0 %vm459_vm2, %v6982_v51  ;;  %7881 = vmatmul.mubr.f32.gmra.mrb[152].mxu1 %v7154_v53  ;;  %v8284_v6 = vpop.f32.mrb[74].mxu1  ;;  %v7388_v33 = vadd.f32 %v14715_v44, %v14755_v14 }
 0x8d9   : > { %v8285_v40 = vpop.f32.mrb[75].mxu1 }
 0x8da   : > { %v7008_v47 = vpop.permute.xlu0 %7007  ;;  %v14723_v29 = vadd.f32 %v8285_v40, %v8284_v6 }
 0x8db   : > { %7821 = vmatmul.mubr.f32.gmra.mrb[128].mxu0 %v7142_v1  ;;  %8141 = vmatprep.mubr.msk.f32.mxu1 %vm459_vm2, %v7008_v47  ;;  %v7155_v10 = vsel %vm15188_vm13, %v6944_v61, %v7008_v47 }
 0x8dc   : > { %8129 = vmatprep.mubr.msk.f32.mxu0 %vm459_vm2, %v6984_v23  ;;  %7886 = vmatmul.mubr.f32.gmra.mrb[154].mxu1 %v7155_v10  ;;  %v8287_v13 = vpop.f32.mrb[76].mxu1  ;;  %v7393_v45 = vadd.f32 %v14723_v29, %v14755_v14 }
 0x8dd   : > { %v8288_v43 = vpop.f32.mrb[77].mxu1 }
 0x8de   : > { %v8289_v57 = vadd.f32 %v8288_v43, %v8287_v13 }
 0x8df   : > { %7826 = vmatmul.mubr.f32.gmra.mrb[130].mxu0 %v7143_v48 }
 0x8e0   : > { %v8290_v49 = vpop.f32.mrb[78].mxu1  ;;  %v7398_v12 = vadd.f32 %v8289_v57, %v14755_v14 }
 0x8e1   : > { %v8291_v7 = vpop.f32.mrb[79].mxu1 }
 0x8e2   : > { %v8292_v59 = vadd.f32 %v8291_v7, %v8290_v49 }
 0x8e4   : > { %v8293_v15 = vpop.f32.mrb[80].mxu1  ;;  %v7403_v49 = vadd.f32 %v8292_v59, %v14755_v14 }
 0x8e5   : > { %v8294_v19 = vpop.f32.mrb[81].mxu1 }
 0x8e6   : > { %v8295_v0 = vadd.f32 %v8294_v19, %v8293_v15 }
 0x8e8   : > { %v8296_v62 = vpop.f32.mrb[82].mxu1 }
 0x8e9   : > { %v8297_v55 = vpop.f32.mrb[83].mxu1 }
 0x8ea   : > { %v14734_v21 = vadd.f32 %v8297_v55, %v8296_v62  ;;  %v7408_v62 = vadd.f32 %v8295_v0, %v14755_v14 }
 0x8ec   : > { %v8299_v63 = vpop.f32.mrb[84].mxu1  ;;  %v7413_v57 = vadd.f32 %v14734_v21, %v14755_v14 }
 0x8ed   : > { %v8300_v4 = vpop.f32.mrb[85].mxu1 }
 0x8ee   : > { %v14736_v60 = vadd.f32 %v8300_v4, %v8299_v63 }
 0x8f0   : > { %v8302_v9 = vpop.f32.mrb[86].mxu1 }
 0x8f1   : > { %v8303_v36 = vpop.f32.mrb[87].mxu1 }
 0x8f2   : > { %v14738_v38 = vadd.f32 %v8303_v36, %v8302_v9 }
 0x8f4   : > { %v8305_v11 = vpop.f32.mrb[88].mxu1 }
 0x8f5   : > { %v8306_v20 = vpop.f32.mrb[89].mxu1 }
 0x8f6   : > { %v14740_v50 = vadd.f32 %v8306_v20, %v8305_v11 }
 0x8f8   : > { %v8308_v54 = vpop.f32.mrb[90].mxu1 }
 0x8f9   : > { %v8309_v2 = vpop.f32.mrb[91].mxu1 }
 0x8fa   : > { %v14742_v31 = vadd.f32 %v8309_v2, %v8308_v54 }
 0x8fc   : > { %v8311_v35 = vpop.f32.mrb[92].mxu1 }
 0x8fd   : > { %v8312_v26 = vpop.f32.mrb[93].mxu1 }
 0x8fe   : > { %v14744_v61 = vadd.f32 %v8312_v26, %v8311_v35 }
 0x900   : > { %v8314_v56 = vpop.f32.mrb[94].mxu1 }
 0x901   : > { %v8315_v27 = vpop.f32.mrb[95].mxu1 }
 0x902   : > { %v14746_v5 = vadd.f32 %v8315_v27, %v8314_v56  ;;  %v7418_v56 = vadd.f32 %v14736_v60, %v14755_v14 }
 0x904   : > { %v8317_v8 = vpop.f32.mrb[96].mxu1 }
 0x905   : > { %v8318_v18 = vpop.f32.mrb[97].mxu1 }
 0x906   : > { %v14748_v41 = vadd.f32 %v8318_v18, %v8317_v8 }
 0x908   : > { %v8320_v28 = vpop.f32.mrb[98].mxu1 }
 0x909   : > { %v8321_v37 = vpop.f32.mrb[99].mxu1 }
 0x90a   : > { %v14750_v25 = vadd.f32 %v8321_v37, %v8320_v28 }
 0x90c   : > { %v8355_v3 = vpop.f32.mrb[100].mxu1 }
 0x90d   : > { %v8356_v39 = vpop.f32.mrb[101].mxu1 }
 0x90e   : > { %v8357_v17 = vadd.f32 %v8356_v39, %v8355_v3 }
 0x910   : > { %v7523_v32 = vadd.f32 %v8357_v17, %v7378_v42  ;;  %v8358_v16 = vpop.f32.mrb[102].mxu1  ;;  %v7423_v42 = vadd.f32 %v14738_v38, %v14755_v14 }
 0x911   : > { %v8359_v22 = vpop.f32.mrb[103].mxu1 }
 0x912   : > { %v8360_v34 = vadd.f32 %v8359_v22, %v8358_v16 }
 0x914   : > { %v7528_v52 = vadd.f32 %v8360_v34, %v7383_v30  ;;  %v8361_v58 = vpop.f32.mrb[104].mxu1 }
 0x915   : > { %v8362_v51 = vpop.f32.mrb[105].mxu1 }
 0x916   : > { %v8363_v24 = vadd.f32 %v8362_v51, %v8361_v58  ;;  %v7428_v51 = vadd.f32 %v14740_v50, %v14755_v14 }
 0x918   : > { %v7533_v46 = vadd.f32 %v8363_v24, %v7388_v33  ;;  %v8364_v53 = vpop.f32.mrb[106].mxu1 }
 0x919   : > { %v8365_v6 = vpop.f32.mrb[107].mxu1 }
 0x91a   : > { %v8366_v40 = vadd.f32 %v8365_v6, %v8364_v53 }
 0x91c   : > { %v7538_v47 = vadd.f32 %v8366_v40, %v7393_v45  ;;  %v8367_v1 = vpop.f32.mrb[108].mxu1 }
 0x91d   : > { %v8368_v23 = vpop.f32.mrb[109].mxu1 }
 0x91e   : > { %v8369_v10 = vadd.f32 %v8368_v23, %v8367_v1  ;;  %v7433_v1 = vadd.f32 %v14742_v31, %v14755_v14 }
 0x920   : > { %v7543_v13 = vadd.f32 %v8369_v10, %v7398_v12  ;;  %v8370_v43 = vpop.f32.mrb[110].mxu1 }
 0x921   : > { %v8371_v48 = vpop.f32.mrb[111].mxu1 }
 0x922   : > { %v8372_v44 = vadd.f32 %v8371_v48, %v8370_v43 }
 0x924   : > { %v7548_v7 = vadd.f32 %v8372_v44, %v7403_v49  ;;  %v8373_v15 = vpop.f32.mrb[112].mxu1 }
 0x925   : > { %v8374_v19 = vpop.f32.mrb[113].mxu1 }
 0x926   : > { %v8375_v55 = vadd.f32 %v8374_v19, %v8373_v15 }
 0x928   : > { %v14768_v29 = vadd.f32 %v8375_v55, %v7408_v62  ;;  %v8376_v63 = vpop.f32.mrb[114].mxu1 }
 0x929   : > { %v8435_v4 = vpop.f32.mrb[92].mxu0  ;;  %v8377_v9 = vpop.f32.mrb[115].mxu1 }
 0x92a   : > { %v8436_v36 = vpop.f32.mrb[93].mxu0  ;;  %v8378_v11 = vadd.f32 %v8377_v9, %v8376_v63  ;;  %v7443_v63 = vadd.f32 %v14746_v5, %v14755_v14  ;;  %v7453_v5 = vadd.f32 %v14750_v25, %v14755_v14 }
 0x92b   : > { %v8437_v20 = vadd.f32 %v8436_v36, %v8435_v4 }
 0x92c   : > { %v14772_v54 = vadd.f32 %v8378_v11, %v7413_v57 }
 0x92d   : > { %v8379_v59 = vpop.f32.mrb[116].mxu1  ;;  %v8438_v2 = vpop.f32.mrb[94].mxu0  ;;  %v14774_v35 = vadd.f32 %v8437_v20, %v7523_v32 }
 0x92e   : > { %v8380_v26 = vpop.f32.mrb[117].mxu1  ;;  %v8439_v0 = vpop.f32.mrb[95].mxu0 }
 0x92f   : > { %v8381_v27 = vadd.f32 %v8380_v26, %v8379_v59  ;;  %v8440_v8 = vadd.f32 %v8439_v0, %v8438_v2 }
 0x931   : > { %v14778_v18 = vadd.f32 %v8381_v27, %v7418_v56  ;;  %v8382_v28 = vpop.f32.mrb[118].mxu1  ;;  %v8441_v37 = vpop.f32.mrb[96].mxu0  ;;  %v14780_v21 = vadd.f32 %v8440_v8, %v7528_v52 }
 0x932   : > { %v8383_v3 = vpop.f32.mrb[119].mxu1  ;;  %v8442_v39 = vpop.f32.mrb[97].mxu0 }
 0x933   : > { %v8384_v17 = vadd.f32 %v8383_v3, %v8382_v28  ;;  %v8443_v32 = vadd.f32 %v8442_v39, %v8441_v37 }
 0x935   : > { %v14784_v16 = vadd.f32 %v8384_v17, %v7423_v42  ;;  %v8385_v22 = vpop.f32.mrb[120].mxu1  ;;  %v8444_v30 = vpop.f32.mrb[98].mxu0  ;;  %v14786_v60 = vadd.f32 %v8443_v32, %v7533_v46  ;;  %v10017_v32 = vld [vmem:[#allocation2 + $0x91] sm:$0xff] }
 0x936   : > { %v8386_v34 = vpop.f32.mrb[121].mxu1  ;;  %v8445_v58 = vpop.f32.mrb[99].mxu0 }
 0x937   : > { %v8387_v52 = vadd.f32 %v8386_v34, %v8385_v22  ;;  %v8446_v33 = vadd.f32 %v8445_v58, %v8444_v30 }
 0x939   : > { %v14790_v24 = vadd.f32 %v8387_v52, %v7428_v51  ;;  %v8388_v53 = vpop.f32.mrb[122].mxu1  ;;  %v8447_v6 = vpop.f32.mrb[100].mxu0  ;;  %v14792_v38 = vadd.f32 %v8446_v33, %v7538_v47  ;;  %v7438_v47 = vadd.f32 %v14744_v61, %v14755_v14  ;;  %v7448_v61 = vadd.f32 %v14748_v41, %v14755_v14 }
 0x93a   : > { %v8389_v45 = vpop.f32.mrb[123].mxu1  ;;  %v8448_v40 = vpop.f32.mrb[101].mxu0 }
 0x93b   : > { %v8390_v46 = vadd.f32 %v8389_v45, %v8388_v53  ;;  %v8449_v23 = vadd.f32 %v8448_v40, %v8447_v6  ;;  %v10018_v6 = vld [vmem:[#allocation2 + $0x99] sm:$0xff] }
 0x93d   : > { %v14796_v12 = vadd.f32 %v8390_v46, %v7433_v1  ;;  %v8391_v10 = vpop.f32.mrb[124].mxu1  ;;  %v8450_v50 = vpop.f32.mrb[102].mxu0  ;;  %v7688_v43 = vadd.f32 %v8449_v23, %v7543_v13 }
 0x93e   : > { %v8392_v48 = vpop.f32.mrb[125].mxu1  ;;  %v8451_v49 = vpop.f32.mrb[103].mxu0 }
 0x93f   : > { %v8393_v44 = vadd.f32 %v8392_v48, %v8391_v10  ;;  %v8452_v15 = vadd.f32 %v8451_v49, %v8450_v50  ;;  %v10019_v48 = vld [vmem:[#allocation2 + $0xa9] sm:$0xff] }
 0x941   : > { %v14800_v19 = vadd.f32 %v8393_v44, %v7438_v47  ;;  %v8394_v31 = vpop.f32.mrb[126].mxu1  ;;  %v7693_v62 = vadd.f32 %v8452_v15, %v7548_v7 }
 0x942   : > { %v8395_v55 = vpop.f32.mrb[127].mxu1 }
 0x943   : > { %v8396_v4 = vadd.f32 %v8395_v55, %v8394_v31 }
 0x945   : > { %v14804_v9 = vadd.f32 %v8396_v4, %v7443_v63  ;;  %v10020_v4 = vld [vmem:[#allocation2 + $0xb1] sm:$0xff] }
 0x97a   : > { %v8397_v13 = vpop.f32.mrb[128].mxu1 }
 0x97b   : > { %v8398_v36 = vpop.f32.mrb[129].mxu1 }
 0x97c   : > { %v8399_v57 = vadd.f32 %v8398_v36, %v8397_v13 }
 0x97e   : > { %v14811_v11 = vadd.f32 %v8399_v57, %v7448_v61  ;;  %v8400_v7 = vpop.f32.mrb[130].mxu1  ;;  %v8453_v20 = vpop.f32.mrb[104].mxu0 }
 0x97f   : > { %v8401_v59 = vpop.f32.mrb[131].mxu1  ;;  %v8454_v2 = vpop.f32.mrb[105].mxu0 }
 0x980   : > { %v8402_v26 = vadd.f32 %v8401_v59, %v8400_v7  ;;  %v8455_v0 = vadd.f32 %v8454_v2, %v8453_v20 }
 0x982   : > { %v14815_v56 = vadd.f32 %v8402_v26, %v7453_v5  ;;  %v8456_v27 = vpop.f32.mrb[106].mxu0  ;;  %v7832_v8 = vpop.f32.mrb[132].mxu1  ;;  %v7698_v41 = vadd.f32 %v8455_v0, %v14768_v29  ;;  %v10021_v5 = vld [vmem:[#allocation2 + $0xc1] sm:$0xff] }
 0x983   : > { %v7833_v28 = vadd.f32 %v7832_v8, %v7688_v43  ;;  %v8457_v37 = vpop.f32.mrb[107].mxu0  ;;  %v7834_v3 = vpop.f32.mrb[133].mxu1 }
 0x984   : > { %v8458_v39 = vadd.f32 %v8457_v37, %v8456_v27 }
 0x985   : > { %v7895_v42 = vmul.f32 0.2, %v7833_v28 }
 0x986   : > { %v8459_v25 = vpop.f32.mrb[108].mxu0  ;;  %v7837_v14 = vpop.f32.mrb[134].mxu1  ;;  %v7703_v17 = vadd.f32 %v8458_v39, %v14772_v54  ;;  %v10022_v39 = vld [vmem:[#allocation2 + $0xc9] sm:$0xff] }
 0x987   : > { %v7911_v22 = vadd.f32 %v10017_v32, %v7895_v42  ;;  %v7838_v29 = vadd.f32 %v7837_v14, %v7693_v62  ;;  %v8460_v30 = vpop.f32.mrb[109].mxu0  ;;  %v7839_v34 = vpop.f32.mrb[135].mxu1 }
 0x988   : > { %v8461_v58 = vadd.f32 %v8460_v30, %v8459_v25  ;;  %v10023_v30 = vld [vmem:[#allocation2 + $0xd9] sm:$0xff] }
 0x989   : > { %7927 = vst.msk [vmem:[%s14821_s24 + $0x20] sm:$0xff] %vm459_vm2, %v7911_v22  ;;  %v7896_v51 = vmul.f32 0.2, %v7838_v29 }
 0x98a   : > { %v8462_v52 = vpop.f32.mrb[110].mxu0  ;;  %v7842_v33 = vpop.f32.mrb[136].mxu1  ;;  %v7708_v53 = vadd.f32 %v8461_v58, %v14778_v18 }
 0x98b   : > { %v7912_v45 = vadd.f32 %v10018_v6, %v7896_v51  ;;  %v7843_v40 = vadd.f32 %v7842_v33, %v7698_v41  ;;  %v8463_v1 = vpop.f32.mrb[111].mxu0  ;;  %v7844_v54 = vpop.f32.mrb[137].mxu1 }
 0x98c   : > { %v8464_v46 = vadd.f32 %v8463_v1, %v8462_v52  ;;  %v10024_v54 = vld [vmem:[#allocation2 + $0xe1] sm:$0xff] }
 0x98d   : > { %7928 = vst.msk [vmem:[%s14821_s24 + $0x28] sm:$0xff] %vm459_vm2, %v7912_v45  ;;  %v7897_v23 = vmul.f32 0.2, %v7843_v40 }
 0x98e   : > { %v8465_v10 = vpop.f32.mrb[112].mxu0  ;;  %v7847_v50 = vpop.f32.mrb[138].mxu1  ;;  %v7713_v43 = vadd.f32 %v8464_v46, %v14784_v16 }
 0x98f   : > { %v7913_v49 = vadd.f32 %v10019_v48, %v7897_v23  ;;  %v7848_v47 = vadd.f32 %v7847_v50, %v7703_v17  ;;  %v8466_v44 = vpop.f32.mrb[113].mxu0  ;;  %v7849_v18 = vpop.f32.mrb[139].mxu1 }
 0x990   : > { %v8467_v15 = vadd.f32 %v8466_v44, %v8465_v10  ;;  %v10025_v18 = vld [vmem:[#allocation2 + $0xf1] sm:$0xff] }
 0x991   : > { %7929 = vst.msk [vmem:[%s14821_s24 + $0x30] sm:$0xff] %vm459_vm2, %v7913_v49  ;;  %v7898_v31 = vmul.f32 0.2, %v7848_v47 }
 0x992   : > { %v8468_v62 = vpop.f32.mrb[114].mxu0  ;;  %v7852_v55 = vpop.f32.mrb[140].mxu1  ;;  %v7718_v63 = vadd.f32 %v8467_v15, %v14790_v24 }
 0x993   : > { %v7914_v13 = vadd.f32 %v10020_v4, %v7898_v31  ;;  %v7853_v36 = vadd.f32 %v7852_v55, %v7708_v53  ;;  %v8469_v61 = vpop.f32.mrb[115].mxu0  ;;  %v7854_v16 = vpop.f32.mrb[141].mxu1  ;;  %v10026_v4 = vld [vmem:[#allocation2 + $0x61] sm:$0xff] }
 0x994   : > { %v8470_v57 = vadd.f32 %v8469_v61, %v8468_v62 }
 0x995   : > { %7930 = vst.msk [vmem:[%s14821_s24 + $0x38] sm:$0xff] %vm459_vm2, %v7914_v13  ;;  %v7899_v7 = vmul.f32 0.2, %v7853_v36 }
 0x996   : > { %v8471_v20 = vpop.f32.mrb[116].mxu0  ;;  %v7857_v59 = vpop.f32.mrb[142].mxu1  ;;  %v7723_v2 = vadd.f32 %v8470_v57, %v14796_v12 }
 0x997   : > { %v7915_v26 = vadd.f32 %v10021_v5, %v7899_v7  ;;  %v7858_v0 = vadd.f32 %v7857_v59, %v7713_v43  ;;  %v8472_v27 = vpop.f32.mrb[117].mxu0  ;;  %v7859_v24 = vpop.f32.mrb[143].mxu1  ;;  %v10028_v5 = vld [vmem:[#allocation2 + $0x69] sm:$0xff] }
 0x998   : > { %v8473_v8 = vadd.f32 %v8472_v27, %v8471_v20  ;;  %v10029_v24 = vld [vmem:[#allocation2 + $0x109] sm:$0xff] }
 0x999   : > { %7931 = vst.msk [vmem:[%s14821_s24 + $0x40] sm:$0xff] %vm459_vm2, %v7915_v26  ;;  %v7900_v41 = vmul.f32 0.2, %v7858_v0 }
 0x99a   : > { %v8474_v28 = vpop.f32.mrb[118].mxu0  ;;  %v7862_v37 = vpop.f32.mrb[144].mxu1  ;;  %v7728_v3 = vadd.f32 %v8473_v8, %v14800_v19 }
 0x99b   : > { %v7916_v42 = vadd.f32 %v10022_v39, %v7900_v41  ;;  %v8475_v25 = vpop.f32.mrb[119].mxu0  ;;  %v7863_v14 = vadd.f32 %v7862_v37, %v7718_v63  ;;  %v7864_v12 = vpop.f32.mrb[145].mxu1 }
 0x99c   : > { %v8476_v17 = vadd.f32 %v8475_v25, %v8474_v28  ;;  %v10031_v12 = vld [vmem:[#allocation2 + $0x111] sm:$0xff] }
 0x99d   : > { %7932 = vst.msk [vmem:[%s14821_s24 + $0x48] sm:$0xff] %vm459_vm2, %v7916_v42  ;;  %v7901_v32 = vmul.f32 0.2, %v7863_v14  ;;  %v10030_v42 = vld [vmem:[#allocation2 + $0x79] sm:$0xff] }
 0x99e   : > { %v8477_v22 = vpop.f32.mrb[120].mxu0  ;;  %v7733_v29 = vadd.f32 %v8476_v17, %v14804_v9  ;;  %v7867_v51 = vpop.f32.mrb[146].mxu1 }
 0x99f   : > { %v7917_v34 = vadd.f32 %v10023_v30, %v7901_v32  ;;  %v8478_v58 = vpop.f32.mrb[121].mxu0  ;;  %v7868_v19 = vadd.f32 %v7867_v51, %v7723_v2  ;;  %v7869_v33 = vpop.f32.mrb[147].mxu1 }
 0x9a0   : > { %v8479_v52 = vadd.f32 %v8478_v58, %v8477_v22  ;;  %v10032_v22 = vld [vmem:[#allocation2 + $0x81] sm:$0xff] }
 0x9a1   : > { %7933 = vst.msk [vmem:[%s14821_s24 + $0x50] sm:$0xff] %vm459_vm2, %v7917_v34  ;;  %v7902_v53 = vmul.f32 0.2, %v7868_v19 }
 0x9a2   : > { %v8480_v6 = vpop.f32.mrb[122].mxu0  ;;  %v7738_v45 = vadd.f32 %v8479_v52, %v14811_v11  ;;  %v7872_v1 = vpop.f32.mrb[148].mxu1 }
 0x9a3   : > { %v8481_v40 = vpop.f32.mrb[123].mxu0  ;;  %v7918_v46 = vadd.f32 %v10024_v54, %v7902_v53  ;;  %v7873_v23 = vadd.f32 %v7872_v1, %v7728_v3  ;;  %v7874_v10 = vpop.f32.mrb[149].mxu1 }
 0x9a4   : > { %v8482_v9 = vadd.f32 %v8481_v40, %v8480_v6 }
 0x9a5   : > { %7934 = vst.msk [vmem:[%s14821_s24 + $0x58] sm:$0xff] %vm459_vm2, %v7918_v46  ;;  %v7903_v50 = vmul.f32 0.2, %v7873_v23 }
 0x9a6   : > { %v7812_v43 = vpop.f32.mrb[124].mxu0  ;;  %v7743_v48 = vadd.f32 %v8482_v9, %v14815_v56 }
 0x9a7   : > { %v7813_v49 = vadd.f32 %v7812_v43, %v14774_v35  ;;  %v7814_v47 = vpop.f32.mrb[125].mxu0  ;;  %v7877_v44 = vpop.f32.mrb[150].mxu1  ;;  %v7919_v11 = vadd.f32 %v10025_v18, %v7903_v50  ;;  %v10027_v35 = vld [vmem:[#allocation2 + $0xf9] sm:$0xff] }
 0x9a8   : > { %v7878_v15 = vadd.f32 %v7877_v44, %v7733_v29  ;;  %v7879_v31 = vpop.f32.mrb[151].mxu1 }
 0x9a9   : > { %v7891_v62 = vmul.f32 0.2, %v7813_v49  ;;  %7935 = vst.msk [vmem:[%s14821_s24 + $0x60] sm:$0xff] %vm459_vm2, %v7919_v11 }
 0x9aa   : > { %v7904_v55 = vmul.f32 0.2, %v7878_v15  ;;  %v7817_v63 = vpop.f32.mrb[126].mxu0 }
 0x9ab   : > { %v7907_v13 = vadd.f32 %v10026_v4, %v7891_v62  ;;  %v7818_v36 = vadd.f32 %v7817_v63, %v14780_v21  ;;  %v7819_v56 = vpop.f32.mrb[127].mxu0  ;;  %v7882_v61 = vpop.f32.mrb[152].mxu1 }
 0x9ac   : > { %v7920_v16 = vadd.f32 %v10027_v35, %v7904_v55  ;;  %v7883_v57 = vadd.f32 %v7882_v61, %v7738_v45  ;;  %v7884_v7 = vpop.f32.mrb[153].mxu1 }
 0x9ad   : > { %7923 = vst.msk [vmem:[%s14821_s24] sm:$0xff] %vm459_vm2, %v7907_v13  ;;  %v7892_v20 = vmul.f32 0.2, %v7818_v36 }
 0x9ae   : > { %7936 = vst.msk [vmem:[%s14821_s24 + $0x68] sm:$0xff] %vm459_vm2, %v7920_v16  ;;  %v7905_v59 = vmul.f32 0.2, %v7883_v57  ;;  %v7822_v2 = vpop.f32.mrb[128].mxu0 }
 0x9af   : > { %v7908_v26 = vadd.f32 %v10028_v5, %v7892_v20  ;;  %v7823_v0 = vadd.f32 %v7822_v2, %v14786_v60  ;;  %v7824_v21 = vpop.f32.mrb[129].mxu0  ;;  %v7887_v27 = vpop.f32.mrb[154].mxu1 }
 0x9b0   : > { %v7921_v8 = vadd.f32 %v10029_v24, %v7905_v59  ;;  %v7888_v41 = vadd.f32 %v7887_v27, %v7743_v48  ;;  %v7889_v28 = vpop.f32.mrb[155].mxu1 }
 0x9b1   : > { %7924 = vst.msk [vmem:[%s14821_s24 + $0x8] sm:$0xff] %vm459_vm2, %v7908_v26  ;;  %v7893_v37 = vmul.f32 0.2, %v7823_v0 }
 0x9b2   : > { %7937 = vst.msk [vmem:[%s14821_s24 + $0x70] sm:$0xff] %vm459_vm2, %v7921_v8  ;;  %v7906_v3 = vmul.f32 0.2, %v7888_v41  ;;  %v7827_v39 = vpop.f32.mrb[130].mxu0 }
 0x9b3   : > { %v7909_v25 = vadd.f32 %v10030_v42, %v7893_v37  ;;  %v7828_v60 = vadd.f32 %v7827_v39, %v14792_v38  ;;  %v7829_v14 = vpop.f32.mrb[131].mxu0 }
 0x9b4   : > { %v7922_v17 = vadd.f32 %v10031_v12, %v7906_v3 }
 0x9b5   : > { %7925 = vst.msk [vmem:[%s14821_s24 + $0x10] sm:$0xff] %vm459_vm2, %v7909_v25  ;;  %v7894_v32 = vmul.f32 0.2, %v7828_v60 }
 0x9b6   : > { %7938 = vst.msk [vmem:[%s14821_s24 + $0x78] sm:$0xff] %vm459_vm2, %v7922_v17 }
 0x9b7   : > { %v7910_v29 = vadd.f32 %v10032_v22, %v7894_v32 }
 0x9b9   : > { %7926 = vst.msk [vmem:[%s14821_s24 + $0x18] sm:$0xff] %vm459_vm2, %v7910_v29 }
 0x9ba PF: > { %s19_s13 = sadd.s32 1, %s10071_s13   ;;  %s15190_s30 = smov %s10063_s11 }
 0x9bb   : > { %p16_p7 = scmp.ge.s32.totalorder %s19_s13, 6   ;;  %s15191_s10 = smov %s10067_s12 }
 0x9bc   : > { %s15192_s11 = smov %s15195_s14  ;;  %s15193_s12 = smov %s15199_s15 }
 0x9bd   :  { %18 = sbr.rel (!%p16_p7) target bundleno = 3 (0x3), region = 92 }

</bundles_post_ra>
